<compile_context>
chip_gen: v6e
topology: v6e:2x2x1
jax: 0.10.0
libtpu: 0.0.40
codegen_flags: <defaults>
</compile_context>

<pallas_src>
import numpy as np
import jax
import jax.numpy as jnp
from jax import lax
from jax.experimental import pallas as pl
from jax.experimental.pallas import tpu as pltpu

INPUT_SIZE = 1
HIDDEN1 = 128
HIDDEN2 = 64
NUM_LAYERS = 3
OUTPUT_SIZE = 3
OUT_PAD = 128            # lane-dense padded output width
# dropout_prob = 0 -> dropout is identity in forward; nothing to implement.


def lstm_mlp_kernel(x_ref, w_ih0_ref, w_ih_ref, w_hh_ref, b_ref,
                    wfc1_ref, bfc1_ref, wfc2_ref, bfc2_ref,
                    out_ref, pg_a_ref, pg_b_ref):
    """3-layer LSTM over time + two FC layers in one invocation.

    x_ref     : (T, Bp, 1)  f32   time-major input (INPUT_SIZE=1, not lane-padded)
    w_ih0_ref : (1, 4H)     f32   layer-0 input->gates weights (transposed row)
    w_ih_ref  : (NL-1, H, 4H) bf16  layers 1.. input->gates weights (transposed)
    w_hh_ref  : (NL, H, 4H)   bf16  hidden->gates weights (transposed)
    b_ref     : (NL, 1, 4H)   f32   b_ih + b_hh
    wfc1_ref  : (H, H2) bf16, bfc1_ref: (1, H2) f32
    wfc2_ref  : (H2, OUT_PAD) bf16 (zero-padded cols), bfc2_ref: (1, OUT_PAD) f32
    out_ref   : (Bp, OUT_PAD) f32
    pg_a_ref, pg_b_ref : (T, Bp, 4H) f32  ping-pong pre-gate buffers

    Gate columns are pre-permuted to [i, f, o, g].
    """
    T, Bp, _ = x_ref.shape
    H = HIDDEN1
    pg_bufs = (pg_a_ref, pg_b_ref)

    def apply_gates(gates, c):
        # gates columns are [i, f, o, g]; sigmoid(x) == 0.5*tanh(0.5*x)+0.5
        sg = 0.5 * jnp.tanh(0.5 * gates[:, 0:3 * H]) + 0.5   # one contiguous EUP slab
        i_g = sg[:, 0:H]
        f_g = sg[:, H:2 * H]
        o_g = sg[:, 2 * H:3 * H]
        g_g = jnp.tanh(gates[:, 3 * H:4 * H])
        c_new = f_g * c + i_g * g_g
        h_new = o_g * jnp.tanh(c_new)
        return h_new, c_new

    # ---- Layer-0 input projection (+bias) for ALL timesteps.
    # INPUT_SIZE == 1 -> VPU broadcast-multiply (outer product), stays f32.
    pg_bufs[0][...] = x_ref[...] * w_ih0_ref[...] + b_ref[0]

    h_last = None
    for l in range(NUM_LAYERS):              # static Python loop over layers
        pg_cur = pg_bufs[l % 2]
        pg_next = pg_bufs[(l + 1) % 2]
        feeds_next = l < NUM_LAYERS - 1

        if feeds_next:
            # Interleaved projection: layer l+1's pre-gates for timestep t are
            # computed right after layer l produces h(t) -> independent MXU work
            # to hide under this step's EUP sigmoid/tanh, and no monolithic
            # post-layer matmul.
            def project_next(t, h_new, _w=w_ih_ref, _b=b_ref, _pg=pg_next, _l=l):
                _pg[t] = jnp.dot(h_new.astype(jnp.bfloat16), _w[_l],
                                 preferred_element_type=jnp.float32) + _b[_l + 1]
        else:
            project_next = None

        # ---- t = 0 peeled: h0 == 0 -> gates = pre_gates[0] (dead h@W_hh skipped).
        c0 = jnp.zeros((Bp, H), jnp.float32)
        h, c = apply_gates(pg_cur[0], c0)
        if project_next is not None:
            project_next(0, h)

        # ---- Serial recurrence: only h @ W_hh (bf16 operands, f32 accum) remains
        # on the critical path; gate math stays f32.
        def step(t, carry, _l=l):
            h, c = carry
            gates = pg_cur[t] + jnp.dot(h.astype(jnp.bfloat16), w_hh_ref[_l],
                                        preferred_element_type=jnp.float32)
            h_new, c_new = apply_gates(gates, c)
            if project_next is not None:
                project_next(t, h_new)
            return h_new, c_new

        # T is static and small -> fully unroll so the LLO scheduler can overlap
        # the next step's MXU push with this step's EUP work.
        h_last, _ = lax.fori_loop(1, T, step, (h, c), unroll=True)

    # out[:, -1, :] of the last LSTM layer == h_last; then fc1, fc2 (no activation).
    y = jnp.dot(h_last.astype(jnp.bfloat16), wfc1_ref[...],
                preferred_element_type=jnp.float32) + bfc1_ref[...]
    y = jnp.dot(y.astype(jnp.bfloat16), wfc2_ref[...],
                preferred_element_type=jnp.float32) + bfc2_ref[...]
    out_ref[...] = y                           # (Bp, 128) lane-dense store


def init_params(key):
    """Deterministic init matching the PyTorch module's parameter shapes."""
    ks = iter(jax.random.split(key, 4 * NUM_LAYERS + 4))

    def u(k, shape, bound):
        return jax.random.uniform(k, shape, jnp.float32, -bound, bound)

    bound_lstm = 1.0 / np.sqrt(HIDDEN1)
    w_ih, w_hh, b_ih, b_hh = [], [], [], []
    for l in range(NUM_LAYERS):
        in_l = INPUT_SIZE if l == 0 else HIDDEN1
        w_ih.append(u(next(ks), (4 * HIDDEN1, in_l), bound_lstm))
        w_hh.append(u(next(ks), (4 * HIDDEN1, HIDDEN1), bound_lstm))
        b_ih.append(u(next(ks), (4 * HIDDEN1,), bound_lstm))
        b_hh.append(u(next(ks), (4 * HIDDEN1,), bound_lstm))

    wfc1 = u(next(ks), (HIDDEN2, HIDDEN1), 1.0 / np.sqrt(HIDDEN1))
    bfc1 = u(next(ks), (HIDDEN2,), 1.0 / np.sqrt(HIDDEN1))
    wfc2 = u(next(ks), (OUTPUT_SIZE, HIDDEN2), 1.0 / np.sqrt(HIDDEN2))
    bfc2 = u(next(ks), (OUTPUT_SIZE,), 1.0 / np.sqrt(HIDDEN2))
    return dict(w_ih=w_ih, w_hh=w_hh, b_ih=b_ih, b_hh=b_hh,
                wfc1=wfc1, bfc1=bfc1, wfc2=wfc2, bfc2=bfc2)


def pack_params_for_kernel(p):
    """Permute gates to [i,f,o,g], transpose, cast MXU operands to bf16, pad fc2."""
    H = HIDDEN1
    perm = np.concatenate([np.arange(0, H), np.arange(H, 2 * H),
                           np.arange(3 * H, 4 * H), np.arange(2 * H, 3 * H)])
    w_ih = [w[perm, :] for w in p['w_ih']]
    w_hh = [w[perm, :] for w in p['w_hh']]
    b = [(bi + bh)[perm] for bi, bh in zip(p['b_ih'], p['b_hh'])]

    w_ih0_T = w_ih[0].T                                            # (1, 4H) f32 (VPU)
    w_ih_T = jnp.stack([w.T for w in w_ih[1:]]).astype(jnp.bfloat16)   # (NL-1, H, 4H)
    w_hh_T = jnp.stack([w.T for w in w_hh]).astype(jnp.bfloat16)       # (NL, H, 4H)
    b_all = jnp.stack([bb[None, :] for bb in b])                   # (NL, 1, 4H) f32

    wfc1_T = p['wfc1'].T.astype(jnp.bfloat16)                      # (H, H2)
    bfc1 = p['bfc1'][None, :]                                      # (1, H2) f32
    wfc2_T = jnp.zeros((HIDDEN2, OUT_PAD), jnp.float32)
    wfc2_T = wfc2_T.at[:, :OUTPUT_SIZE].set(p['wfc2'].T).astype(jnp.bfloat16)
    bfc2 = jnp.zeros((1, OUT_PAD), jnp.float32).at[0, :OUTPUT_SIZE].set(p['bfc2'])
    return w_ih0_T, w_ih_T, w_hh_T, b_all, wfc1_T, bfc1, wfc2_T, bfc2


@jax.jit
def custom_lstm_forward(x, w_ih0_T, w_ih_T, w_hh_T, b, wfc1_T, bfc1, wfc2_T, bfc2):
    """x: (B, T, INPUT_SIZE) float32, batch_first like PyTorch. Returns (B, 3)."""
    B, T, _ = x.shape
    Bp = max(16, ((B + 15) // 16) * 16)       # pad batch to 16 sublanes (bf16 tile)
    x_tm = jnp.transpose(x, (1, 0, 2))                          # (T, B, 1)
    x_tm = jnp.pad(x_tm, ((0, 0), (0, Bp - B), (0, 0)))         # (T, Bp, 1)

    out = pl.pallas_call(
        lstm_mlp_kernel,
        out_shape=jax.ShapeDtypeStruct((Bp, OUT_PAD), jnp.float32),
        in_specs=[pl.BlockSpec(memory_space=pltpu.MemorySpace.VMEM)] * 9,
        out_specs=pl.BlockSpec(memory_space=pltpu.MemorySpace.VMEM),
        scratch_shapes=[
            pltpu.VMEM((T, Bp, 4 * HIDDEN1), jnp.float32),   # pre-gates (ping)
            pltpu.VMEM((T, Bp, 4 * HIDDEN1), jnp.float32),   # pre-gates (pong)
        ],
    )(x_tm, w_ih0_T, w_ih_T, w_hh_T, b, wfc1_T, bfc1, wfc2_T, bfc2)
    return out[:B, :OUTPUT_SIZE]


def reference_forward(x, p):
    """Pure-JAX reference with exact PyTorch LSTM semantics (zero init state)."""
    B, T, _ = x.shape
    H = HIDDEN1
    layer_in = x
    for l in range(NUM_LAYERS):
        h = jnp.zeros((B, H), jnp.float32)
        c = jnp.zeros((B, H), jnp.float32)
        outs = []
        for t in range(T):
            xt = layer_in[:, t, :]
            gates = (xt @ p['w_ih'][l].T + h @ p['w_hh'][l].T
                     + p['b_ih'][l] + p['b_hh'][l])
            i = jax.nn.sigmoid(gates[:, 0:H])
            f = jax.nn.sigmoid(gates[:, H:2 * H])
            g = jnp.tanh(gates[:, 2 * H:3 * H])
            o = jax.nn.sigmoid(gates[:, 3 * H:4 * H])
            c = f * c + i * g
            h = o * jnp.tanh(c)
            outs.append(h)
        layer_in = jnp.stack(outs, axis=1)
    last = layer_in[:, -1, :]
    y = last @ p['wfc1'].T + p['bfc1']
    y = y @ p['wfc2'].T + p['bfc2']
    return y


if __name__ == "__main__":
    key = jax.random.PRNGKey(0)
    kp, kx = jax.random.split(key)

    B, T = 2, 8
    x = jax.random.normal(kx, (B, T, INPUT_SIZE), jnp.float32)

    params = init_params(kp)
    packed = pack_params_for_kernel(params)

    out = custom_lstm_forward(x, *packed)
    out = jax.block_until_ready(out)

    ref = reference_forward(x, params)
    err = float(jnp.max(jnp.abs(out - ref)))
    assert out.shape == (B, OUTPUT_SIZE), out.shape
    assert err < 1e-2, f"max abs err {err}"
    print("KERNEL_OK")
</pallas_src>

<mosaic_0001>
module attributes {stable_mosaic.version = 11 : i64} {
  func.func @lstm_mlp_kernel(%arg0: memref<8x16x1xf32, #tpu.memory_space<vmem>>, %arg1: memref<1x512xf32, #tpu.memory_space<vmem>>, %arg2: memref<2x128x512xbf16, #tpu.memory_space<vmem>>, %arg3: memref<3x128x512xbf16, #tpu.memory_space<vmem>>, %arg4: memref<3x1x512xf32, #tpu.memory_space<vmem>>, %arg5: memref<128x64xbf16, #tpu.memory_space<vmem>>, %arg6: memref<1x64xf32, #tpu.memory_space<vmem>>, %arg7: memref<64x128xbf16, #tpu.memory_space<vmem>>, %arg8: memref<1x128xf32, #tpu.memory_space<vmem>>, %arg9: memref<16x128xf32, #tpu.memory_space<vmem>>, %arg10: memref<8x16x512xf32, #tpu.memory_space<vmem>>, %arg11: memref<8x16x512xf32, #tpu.memory_space<vmem>>) attributes {dimension_semantics = [], scalar_prefetch = 0 : i64, scratch_operands = 2 : i64, tpu.core_type = #tpu.core_type<tc>} {
    %c0 = arith.constant 0 : index
    %c0_0 = arith.constant 0 : index
    %c0_1 = arith.constant 0 : index
    %0 = vector.load %arg0[%c0, %c0_0, %c0_1] : memref<8x16x1xf32, #tpu.memory_space<vmem>>, vector<8x16x1xf32>
    %c0_2 = arith.constant 0 : index
    %c0_3 = arith.constant 0 : index
    %1 = vector.load %arg1[%c0_2, %c0_3] : memref<1x512xf32, #tpu.memory_space<vmem>>, vector<1x512xf32>
    %2 = vector.shape_cast %1 : vector<1x512xf32> to vector<1x1x512xf32>
    %3 = vector.broadcast %0 : vector<8x16x1xf32> to vector<8x16x512xf32>
    %4 = vector.broadcast %2 : vector<1x1x512xf32> to vector<8x16x512xf32>
    %5 = arith.mulf %3, %4 : vector<8x16x512xf32>
    %c0_4 = arith.constant 0 : index
    %c0_5 = arith.constant 0 : index
    %c0_6 = arith.constant 0 : index
    %6 = vector.load %arg4[%c0_4, %c0_5, %c0_6] : memref<3x1x512xf32, #tpu.memory_space<vmem>>, vector<1x1x512xf32>
    %7 = vector.shape_cast %6 : vector<1x1x512xf32> to vector<1x512xf32>
    %8 = vector.shape_cast %7 : vector<1x512xf32> to vector<1x1x512xf32>
    %9 = vector.broadcast %8 : vector<1x1x512xf32> to vector<8x16x512xf32>
    %10 = arith.addf %5, %9 : vector<8x16x512xf32>
    %c0_7 = arith.constant 0 : index
    %c0_8 = arith.constant 0 : index
    %c0_9 = arith.constant 0 : index
    %11 = vector.load %arg10[%c0_7, %c0_8, %c0_9] : memref<8x16x512xf32, #tpu.memory_space<vmem>>, vector<8x16x512xf32>
    tpu.vector_store %arg10[%c0_7, %c0_8, %c0_9], %10 {strides = array<i32>} : memref<8x16x512xf32, #tpu.memory_space<vmem>>, vector<8x16x512xf32>,
    %cst = arith.constant 0.000000e+00 : f32
    %12 = vector.broadcast %cst : f32 to vector<16x128xf32>
    %c0_10 = arith.constant 0 : index
    %c0_11 = arith.constant 0 : index
    %c0_12 = arith.constant 0 : index
    %13 = vector.load %arg10[%c0_10, %c0_11, %c0_12] : memref<8x16x512xf32, #tpu.memory_space<vmem>>, vector<1x16x512xf32>
    %14 = vector.shape_cast %13 : vector<1x16x512xf32> to vector<16x512xf32>
    %15 = vector.extract_strided_slice %14 {offsets = [0, 0], sizes = [16, 384], strides = [1, 1]} : vector<16x512xf32> to vector<16x384xf32>
    %cst_13 = arith.constant 5.000000e-01 : f32
    %16 = vector.broadcast %cst_13 : f32 to vector<16x384xf32>
    %17 = arith.mulf %16, %15 : vector<16x384xf32>
    %18 = math.tanh %17 : vector<16x384xf32>
    %cst_14 = arith.constant 5.000000e-01 : f32
    %19 = vector.broadcast %cst_14 : f32 to vector<16x384xf32>
    %20 = arith.mulf %19, %18 : vector<16x384xf32>
    %cst_15 = arith.constant 5.000000e-01 : f32
    %21 = vector.broadcast %cst_15 : f32 to vector<16x384xf32>
    %22 = arith.addf %20, %21 : vector<16x384xf32>
    %23 = vector.extract_strided_slice %22 {offsets = [0, 0], sizes = [16, 128], strides = [1, 1]} : vector<16x384xf32> to vector<16x128xf32>
    %24 = vector.extract_strided_slice %22 {offsets = [0, 128], sizes = [16, 128], strides = [1, 1]} : vector<16x384xf32> to vector<16x128xf32>
    %25 = vector.extract_strided_slice %22 {offsets = [0, 256], sizes = [16, 128], strides = [1, 1]} : vector<16x384xf32> to vector<16x128xf32>
    %26 = vector.extract_strided_slice %14 {offsets = [0, 384], sizes = [16, 128], strides = [1, 1]} : vector<16x512xf32> to vector<16x128xf32>
    %27 = math.tanh %26 : vector<16x128xf32>
    %28 = arith.mulf %24, %12 : vector<16x128xf32>
    %29 = arith.mulf %23, %27 : vector<16x128xf32>
    %30 = arith.addf %28, %29 : vector<16x128xf32>
    %31 = math.tanh %30 : vector<16x128xf32>
    %32 = arith.mulf %25, %31 : vector<16x128xf32>
    %33 = arith.truncf %32 : vector<16x128xf32> to vector<16x128xbf16>
    %c0_16 = arith.constant 0 : index
    %c0_17 = arith.constant 0 : index
    %c0_18 = arith.constant 0 : index
    %34 = vector.load %arg2[%c0_16, %c0_17, %c0_18] : memref<2x128x512xbf16, #tpu.memory_space<vmem>>, vector<1x128x512xbf16>
    %35 = vector.shape_cast %34 : vector<1x128x512xbf16> to vector<128x512xbf16>
    %cst_19 = arith.constant dense<0.000000e+00> : vector<16x512xf32>
    %36 = tpu.matmul %33, %35, %cst_19 {dimension_numbers = #tpu.dot_dimension_numbers<[1], [0], [0], [1], [0, 0, 1, 1], [], []>} : vector<16x128xbf16>, vector<128x512xbf16>, vector<16x512xf32> -> vector<16x512xf32>
    %c1 = arith.constant 1 : index
    %c0_20 = arith.constant 0 : index
    %c0_21 = arith.constant 0 : index
    %37 = vector.load %arg4[%c1, %c0_20, %c0_21] : memref<3x1x512xf32, #tpu.memory_space<vmem>>, vector<1x1x512xf32>
    %38 = vector.shape_cast %37 : vector<1x1x512xf32> to vector<1x512xf32>
    %39 = vector.broadcast %38 : vector<1x512xf32> to vector<16x512xf32>
    %40 = arith.addf %36, %39 : vector<16x512xf32>
    %c0_22 = arith.constant 0 : index
    %c0_23 = arith.constant 0 : index
    %c0_24 = arith.constant 0 : index
    %41 = vector.load %arg11[%c0_22, %c0_23, %c0_24] : memref<8x16x512xf32, #tpu.memory_space<vmem>>, vector<1x16x512xf32>
    %42 = vector.shape_cast %41 : vector<1x16x512xf32> to vector<16x512xf32>
    %43 = vector.shape_cast %40 : vector<16x512xf32> to vector<1x16x512xf32>
    tpu.vector_store %arg11[%c0_22, %c0_23, %c0_24], %43 {strides = array<i32>} : memref<8x16x512xf32, #tpu.memory_space<vmem>>, vector<1x16x512xf32>,
    %c1_i32 = arith.constant 1 : i32
    %44 = arith.index_cast %c1_i32 : i32 to index
    %c0_25 = arith.constant 0 : index
    %c0_26 = arith.constant 0 : index
    %45 = vector.load %arg10[%44, %c0_25, %c0_26] : memref<8x16x512xf32, #tpu.memory_space<vmem>>, vector<1x16x512xf32>
    %46 = vector.shape_cast %45 : vector<1x16x512xf32> to vector<16x512xf32>
    %47 = arith.truncf %32 : vector<16x128xf32> to vector<16x128xbf16>
    %c0_27 = arith.constant 0 : index
    %c0_28 = arith.constant 0 : index
    %c0_29 = arith.constant 0 : index
    %48 = vector.load %arg3[%c0_27, %c0_28, %c0_29] : memref<3x128x512xbf16, #tpu.memory_space<vmem>>, vector<1x128x512xbf16>
    %49 = vector.shape_cast %48 : vector<1x128x512xbf16> to vector<128x512xbf16>
    %cst_30 = arith.constant dense<0.000000e+00> : vector<16x512xf32>
    %50 = tpu.matmul %47, %49, %cst_30 {dimension_numbers = #tpu.dot_dimension_numbers<[1], [0], [0], [1], [0, 0, 1, 1], [], []>} : vector<16x128xbf16>, vector<128x512xbf16>, vector<16x512xf32> -> vector<16x512xf32>
    %51 = arith.addf %46, %50 : vector<16x512xf32>
    %52 = vector.extract_strided_slice %51 {offsets = [0, 0], sizes = [16, 384], strides = [1, 1]} : vector<16x512xf32> to vector<16x384xf32>
    %cst_31 = arith.constant 5.000000e-01 : f32
    %53 = vector.broadcast %cst_31 : f32 to vector<16x384xf32>
    %54 = arith.mulf %53, %52 : vector<16x384xf32>
    %55 = math.tanh %54 : vector<16x384xf32>
    %cst_32 = arith.constant 5.000000e-01 : f32
    %56 = vector.broadcast %cst_32 : f32 to vector<16x384xf32>
    %57 = arith.mulf %56, %55 : vector<16x384xf32>
    %cst_33 = arith.constant 5.000000e-01 : f32
    %58 = vector.broadcast %cst_33 : f32 to vector<16x384xf32>
    %59 = arith.addf %57, %58 : vector<16x384xf32>
    %60 = vector.extract_strided_slice %59 {offsets = [0, 0], sizes = [16, 128], strides = [1, 1]} : vector<16x384xf32> to vector<16x128xf32>
    %61 = vector.extract_strided_slice %59 {offsets = [0, 128], sizes = [16, 128], strides = [1, 1]} : vector<16x384xf32> to vector<16x128xf32>
    %62 = vector.extract_strided_slice %59 {offsets = [0, 256], sizes = [16, 128], strides = [1, 1]} : vector<16x384xf32> to vector<16x128xf32>
    %63 = vector.extract_strided_slice %51 {offsets = [0, 384], sizes = [16, 128], strides = [1, 1]} : vector<16x512xf32> to vector<16x128xf32>
    %64 = math.tanh %63 : vector<16x128xf32>
    %65 = arith.mulf %61, %30 : vector<16x128xf32>
    %66 = arith.mulf %60, %64 : vector<16x128xf32>
    %67 = arith.addf %65, %66 : vector<16x128xf32>
    %68 = math.tanh %67 : vector<16x128xf32>
    %69 = arith.mulf %62, %68 : vector<16x128xf32>
    %70 = arith.truncf %69 : vector<16x128xf32> to vector<16x128xbf16>
    %c0_34 = arith.constant 0 : index
    %c0_35 = arith.constant 0 : index
    %c0_36 = arith.constant 0 : index
    %71 = vector.load %arg2[%c0_34, %c0_35, %c0_36] : memref<2x128x512xbf16, #tpu.memory_space<vmem>>, vector<1x128x512xbf16>
    %72 = vector.shape_cast %71 : vector<1x128x512xbf16> to vector<128x512xbf16>
    %cst_37 = arith.constant dense<0.000000e+00> : vector<16x512xf32>
    %73 = tpu.matmul %70, %72, %cst_37 {dimension_numbers = #tpu.dot_dimension_numbers<[1], [0], [0], [1], [0, 0, 1, 1], [], []>} : vector<16x128xbf16>, vector<128x512xbf16>, vector<16x512xf32> -> vector<16x512xf32>
    %c1_38 = arith.constant 1 : index
    %c0_39 = arith.constant 0 : index
    %c0_40 = arith.constant 0 : index
    %74 = vector.load %arg4[%c1_38, %c0_39, %c0_40] : memref<3x1x512xf32, #tpu.memory_space<vmem>>, vector<1x1x512xf32>
    %75 = vector.shape_cast %74 : vector<1x1x512xf32> to vector<1x512xf32>
    %76 = vector.broadcast %75 : vector<1x512xf32> to vector<16x512xf32>
    %77 = arith.addf %73, %76 : vector<16x512xf32>
    %78 = arith.index_cast %c1_i32 : i32 to index
    %c0_41 = arith.constant 0 : index
    %c0_42 = arith.constant 0 : index
    %79 = vector.load %arg11[%78, %c0_41, %c0_42] : memref<8x16x512xf32, #tpu.memory_space<vmem>>, vector<1x16x512xf32>
    %80 = vector.shape_cast %79 : vector<1x16x512xf32> to vector<16x512xf32>
    %81 = vector.shape_cast %77 : vector<16x512xf32> to vector<1x16x512xf32>
    tpu.vector_store %arg11[%78, %c0_41, %c0_42], %81 {strides = array<i32>} : memref<8x16x512xf32, #tpu.memory_space<vmem>>, vector<1x16x512xf32>,
    %c2_i32 = arith.constant 2 : i32
    %82 = arith.index_cast %c2_i32 : i32 to index
    %c0_43 = arith.constant 0 : index
    %c0_44 = arith.constant 0 : index
    %83 = vector.load %arg10[%82, %c0_43, %c0_44] : memref<8x16x512xf32, #tpu.memory_space<vmem>>, vector<1x16x512xf32>
    %84 = vector.shape_cast %83 : vector<1x16x512xf32> to vector<16x512xf32>
    %85 = arith.truncf %69 : vector<16x128xf32> to vector<16x128xbf16>
    %c0_45 = arith.constant 0 : index
    %c0_46 = arith.constant 0 : index
    %c0_47 = arith.constant 0 : index
    %86 = vector.load %arg3[%c0_45, %c0_46, %c0_47] : memref<3x128x512xbf16, #tpu.memory_space<vmem>>, vector<1x128x512xbf16>
    %87 = vector.shape_cast %86 : vector<1x128x512xbf16> to vector<128x512xbf16>
    %cst_48 = arith.constant dense<0.000000e+00> : vector<16x512xf32>
    %88 = tpu.matmul %85, %87, %cst_48 {dimension_numbers = #tpu.dot_dimension_numbers<[1], [0], [0], [1], [0, 0, 1, 1], [], []>} : vector<16x128xbf16>, vector<128x512xbf16>, vector<16x512xf32> -> vector<16x512xf32>
    %89 = arith.addf %84, %88 : vector<16x512xf32>
    %90 = vector.extract_strided_slice %89 {offsets = [0, 0], sizes = [16, 384], strides = [1, 1]} : vector<16x512xf32> to vector<16x384xf32>
    %cst_49 = arith.constant 5.000000e-01 : f32
    %91 = vector.broadcast %cst_49 : f32 to vector<16x384xf32>
    %92 = arith.mulf %91, %90 : vector<16x384xf32>
    %93 = math.tanh %92 : vector<16x384xf32>
    %cst_50 = arith.constant 5.000000e-01 : f32
    %94 = vector.broadcast %cst_50 : f32 to vector<16x384xf32>
    %95 = arith.mulf %94, %93 : vector<16x384xf32>
    %cst_51 = arith.constant 5.000000e-01 : f32
    %96 = vector.broadcast %cst_51 : f32 to vector<16x384xf32>
    %97 = arith.addf %95, %96 : vector<16x384xf32>
    %98 = vector.extract_strided_slice %97 {offsets = [0, 0], sizes = [16, 128], strides = [1, 1]} : vector<16x384xf32> to vector<16x128xf32>
    %99 = vector.extract_strided_slice %97 {offsets = [0, 128], sizes = [16, 128], strides = [1, 1]} : vector<16x384xf32> to vector<16x128xf32>
    %100 = vector.extract_strided_slice %97 {offsets = [0, 256], sizes = [16, 128], strides = [1, 1]} : vector<16x384xf32> to vector<16x128xf32>
    %101 = vector.extract_strided_slice %89 {offsets = [0, 384], sizes = [16, 128], strides = [1, 1]} : vector<16x512xf32> to vector<16x128xf32>
    %102 = math.tanh %101 : vector<16x128xf32>
    %103 = arith.mulf %99, %67 : vector<16x128xf32>
    %104 = arith.mulf %98, %102 : vector<16x128xf32>
    %105 = arith.addf %103, %104 : vector<16x128xf32>
    %106 = math.tanh %105 : vector<16x128xf32>
    %107 = arith.mulf %100, %106 : vector<16x128xf32>
    %108 = arith.truncf %107 : vector<16x128xf32> to vector<16x128xbf16>
    %c0_52 = arith.constant 0 : index
    %c0_53 = arith.constant 0 : index
    %c0_54 = arith.constant 0 : index
    %109 = vector.load %arg2[%c0_52, %c0_53, %c0_54] : memref<2x128x512xbf16, #tpu.memory_space<vmem>>, vector<1x128x512xbf16>
    %110 = vector.shape_cast %109 : vector<1x128x512xbf16> to vector<128x512xbf16>
    %cst_55 = arith.constant dense<0.000000e+00> : vector<16x512xf32>
    %111 = tpu.matmul %108, %110, %cst_55 {dimension_numbers = #tpu.dot_dimension_numbers<[1], [0], [0], [1], [0, 0, 1, 1], [], []>} : vector<16x128xbf16>, vector<128x512xbf16>, vector<16x512xf32> -> vector<16x512xf32>
    %c1_56 = arith.constant 1 : index
    %c0_57 = arith.constant 0 : index
    %c0_58 = arith.constant 0 : index
    %112 = vector.load %arg4[%c1_56, %c0_57, %c0_58] : memref<3x1x512xf32, #tpu.memory_space<vmem>>, vector<1x1x512xf32>
    %113 = vector.shape_cast %112 : vector<1x1x512xf32> to vector<1x512xf32>
    %114 = vector.broadcast %113 : vector<1x512xf32> to vector<16x512xf32>
    %115 = arith.addf %111, %114 : vector<16x512xf32>
    %116 = arith.index_cast %c2_i32 : i32 to index
    %c0_59 = arith.constant 0 : index
    %c0_60 = arith.constant 0 : index
    %117 = vector.load %arg11[%116, %c0_59, %c0_60] : memref<8x16x512xf32, #tpu.memory_space<vmem>>, vector<1x16x512xf32>
    %118 = vector.shape_cast %117 : vector<1x16x512xf32> to vector<16x512xf32>
    %119 = vector.shape_cast %115 : vector<16x512xf32> to vector<1x16x512xf32>
    tpu.vector_store %arg11[%116, %c0_59, %c0_60], %119 {strides = array<i32>} : memref<8x16x512xf32, #tpu.memory_space<vmem>>, vector<1x16x512xf32>,
    %c3_i32 = arith.constant 3 : i32
    %120 = arith.index_cast %c3_i32 : i32 to index
    %c0_61 = arith.constant 0 : index
    %c0_62 = arith.constant 0 : index
    %121 = vector.load %arg10[%120, %c0_61, %c0_62] : memref<8x16x512xf32, #tpu.memory_space<vmem>>, vector<1x16x512xf32>
    %122 = vector.shape_cast %121 : vector<1x16x512xf32> to vector<16x512xf32>
    %123 = arith.truncf %107 : vector<16x128xf32> to vector<16x128xbf16>
    %c0_63 = arith.constant 0 : index
    %c0_64 = arith.constant 0 : index
    %c0_65 = arith.constant 0 : index
    %124 = vector.load %arg3[%c0_63, %c0_64, %c0_65] : memref<3x128x512xbf16, #tpu.memory_space<vmem>>, vector<1x128x512xbf16>
    %125 = vector.shape_cast %124 : vector<1x128x512xbf16> to vector<128x512xbf16>
    %cst_66 = arith.constant dense<0.000000e+00> : vector<16x512xf32>
    %126 = tpu.matmul %123, %125, %cst_66 {dimension_numbers = #tpu.dot_dimension_numbers<[1], [0], [0], [1], [0, 0, 1, 1], [], []>} : vector<16x128xbf16>, vector<128x512xbf16>, vector<16x512xf32> -> vector<16x512xf32>
    %127 = arith.addf %122, %126 : vector<16x512xf32>
    %128 = vector.extract_strided_slice %127 {offsets = [0, 0], sizes = [16, 384], strides = [1, 1]} : vector<16x512xf32> to vector<16x384xf32>
    %cst_67 = arith.constant 5.000000e-01 : f32
    %129 = vector.broadcast %cst_67 : f32 to vector<16x384xf32>
    %130 = arith.mulf %129, %128 : vector<16x384xf32>
    %131 = math.tanh %130 : vector<16x384xf32>
    %cst_68 = arith.constant 5.000000e-01 : f32
    %132 = vector.broadcast %cst_68 : f32 to vector<16x384xf32>
    %133 = arith.mulf %132, %131 : vector<16x384xf32>
    %cst_69 = arith.constant 5.000000e-01 : f32
    %134 = vector.broadcast %cst_69 : f32 to vector<16x384xf32>
    %135 = arith.addf %133, %134 : vector<16x384xf32>
    %136 = vector.extract_strided_slice %135 {offsets = [0, 0], sizes = [16, 128], strides = [1, 1]} : vector<16x384xf32> to vector<16x128xf32>
    %137 = vector.extract_strided_slice %135 {offsets = [0, 128], sizes = [16, 128], strides = [1, 1]} : vector<16x384xf32> to vector<16x128xf32>
    %138 = vector.extract_strided_slice %135 {offsets = [0, 256], sizes = [16, 128], strides = [1, 1]} : vector<16x384xf32> to vector<16x128xf32>
    %139 = vector.extract_strided_slice %127 {offsets = [0, 384], sizes = [16, 128], strides = [1, 1]} : vector<16x512xf32> to vector<16x128xf32>
    %140 = math.tanh %139 : vector<16x128xf32>
    %141 = arith.mulf %137, %105 : vector<16x128xf32>
    %142 = arith.mulf %136, %140 : vector<16x128xf32>
    %143 = arith.addf %141, %142 : vector<16x128xf32>
    %144 = math.tanh %143 : vector<16x128xf32>
    %145 = arith.mulf %138, %144 : vector<16x128xf32>
    %146 = arith.truncf %145 : vector<16x128xf32> to vector<16x128xbf16>
    %c0_70 = arith.constant 0 : index
    %c0_71 = arith.constant 0 : index
    %c0_72 = arith.constant 0 : index
    %147 = vector.load %arg2[%c0_70, %c0_71, %c0_72] : memref<2x128x512xbf16, #tpu.memory_space<vmem>>, vector<1x128x512xbf16>
    %148 = vector.shape_cast %147 : vector<1x128x512xbf16> to vector<128x512xbf16>
    %cst_73 = arith.constant dense<0.000000e+00> : vector<16x512xf32>
    %149 = tpu.matmul %146, %148, %cst_73 {dimension_numbers = #tpu.dot_dimension_numbers<[1], [0], [0], [1], [0, 0, 1, 1], [], []>} : vector<16x128xbf16>, vector<128x512xbf16>, vector<16x512xf32> -> vector<16x512xf32>
    %c1_74 = arith.constant 1 : index
    %c0_75 = arith.constant 0 : index
    %c0_76 = arith.constant 0 : index
    %150 = vector.load %arg4[%c1_74, %c0_75, %c0_76] : memref<3x1x512xf32, #tpu.memory_space<vmem>>, vector<1x1x512xf32>
    %151 = vector.shape_cast %150 : vector<1x1x512xf32> to vector<1x512xf32>
    %152 = vector.broadcast %151 : vector<1x512xf32> to vector<16x512xf32>
    %153 = arith.addf %149, %152 : vector<16x512xf32>
    %154 = arith.index_cast %c3_i32 : i32 to index
    %c0_77 = arith.constant 0 : index
    %c0_78 = arith.constant 0 : index
    %155 = vector.load %arg11[%154, %c0_77, %c0_78] : memref<8x16x512xf32, #tpu.memory_space<vmem>>, vector<1x16x512xf32>
    %156 = vector.shape_cast %155 : vector<1x16x512xf32> to vector<16x512xf32>
    %157 = vector.shape_cast %153 : vector<16x512xf32> to vector<1x16x512xf32>
    tpu.vector_store %arg11[%154, %c0_77, %c0_78], %157 {strides = array<i32>} : memref<8x16x512xf32, #tpu.memory_space<vmem>>, vector<1x16x512xf32>,
    %c4_i32 = arith.constant 4 : i32
    %158 = arith.index_cast %c4_i32 : i32 to index
    %c0_79 = arith.constant 0 : index
    %c0_80 = arith.constant 0 : index
    %159 = vector.load %arg10[%158, %c0_79, %c0_80] : memref<8x16x512xf32, #tpu.memory_space<vmem>>, vector<1x16x512xf32>
    %160 = vector.shape_cast %159 : vector<1x16x512xf32> to vector<16x512xf32>
    %161 = arith.truncf %145 : vector<16x128xf32> to vector<16x128xbf16>
    %c0_81 = arith.constant 0 : index
    %c0_82 = arith.constant 0 : index
    %c0_83 = arith.constant 0 : index
    %162 = vector.load %arg3[%c0_81, %c0_82, %c0_83] : memref<3x128x512xbf16, #tpu.memory_space<vmem>>, vector<1x128x512xbf16>
    %163 = vector.shape_cast %162 : vector<1x128x512xbf16> to vector<128x512xbf16>
    %cst_84 = arith.constant dense<0.000000e+00> : vector<16x512xf32>
    %164 = tpu.matmul %161, %163, %cst_84 {dimension_numbers = #tpu.dot_dimension_numbers<[1], [0], [0], [1], [0, 0, 1, 1], [], []>} : vector<16x128xbf16>, vector<128x512xbf16>, vector<16x512xf32> -> vector<16x512xf32>
    %165 = arith.addf %160, %164 : vector<16x512xf32>
    %166 = vector.extract_strided_slice %165 {offsets = [0, 0], sizes = [16, 384], strides = [1, 1]} : vector<16x512xf32> to vector<16x384xf32>
    %cst_85 = arith.constant 5.000000e-01 : f32
    %167 = vector.broadcast %cst_85 : f32 to vector<16x384xf32>
    %168 = arith.mulf %167, %166 : vector<16x384xf32>
    %169 = math.tanh %168 : vector<16x384xf32>
    %cst_86 = arith.constant 5.000000e-01 : f32
    %170 = vector.broadcast %cst_86 : f32 to vector<16x384xf32>
    %171 = arith.mulf %170, %169 : vector<16x384xf32>
    %cst_87 = arith.constant 5.000000e-01 : f32
    %172 = vector.broadcast %cst_87 : f32 to vector<16x384xf32>
    %173 = arith.addf %171, %172 : vector<16x384xf32>
    %174 = vector.extract_strided_slice %173 {offsets = [0, 0], sizes = [16, 128], strides = [1, 1]} : vector<16x384xf32> to vector<16x128xf32>
    %175 = vector.extract_strided_slice %173 {offsets = [0, 128], sizes = [16, 128], strides = [1, 1]} : vector<16x384xf32> to vector<16x128xf32>
    %176 = vector.extract_strided_slice %173 {offsets = [0, 256], sizes = [16, 128], strides = [1, 1]} : vector<16x384xf32> to vector<16x128xf32>
    %177 = vector.extract_strided_slice %165 {offsets = [0, 384], sizes = [16, 128], strides = [1, 1]} : vector<16x512xf32> to vector<16x128xf32>
    %178 = math.tanh %177 : vector<16x128xf32>
    %179 = arith.mulf %175, %143 : vector<16x128xf32>
    %180 = arith.mulf %174, %178 : vector<16x128xf32>
    %181 = arith.addf %179, %180 : vector<16x128xf32>
    %182 = math.tanh %181 : vector<16x128xf32>
    %183 = arith.mulf %176, %182 : vector<16x128xf32>
    %184 = arith.truncf %183 : vector<16x128xf32> to vector<16x128xbf16>
    %c0_88 = arith.constant 0 : index
    %c0_89 = arith.constant 0 : index
    %c0_90 = arith.constant 0 : index
    %185 = vector.load %arg2[%c0_88, %c0_89, %c0_90] : memref<2x128x512xbf16, #tpu.memory_space<vmem>>, vector<1x128x512xbf16>
    %186 = vector.shape_cast %185 : vector<1x128x512xbf16> to vector<128x512xbf16>
    %cst_91 = arith.constant dense<0.000000e+00> : vector<16x512xf32>
    %187 = tpu.matmul %184, %186, %cst_91 {dimension_numbers = #tpu.dot_dimension_numbers<[1], [0], [0], [1], [0, 0, 1, 1], [], []>} : vector<16x128xbf16>, vector<128x512xbf16>, vector<16x512xf32> -> vector<16x512xf32>
    %c1_92 = arith.constant 1 : index
    %c0_93 = arith.constant 0 : index
    %c0_94 = arith.constant 0 : index
    %188 = vector.load %arg4[%c1_92, %c0_93, %c0_94] : memref<3x1x512xf32, #tpu.memory_space<vmem>>, vector<1x1x512xf32>
    %189 = vector.shape_cast %188 : vector<1x1x512xf32> to vector<1x512xf32>
    %190 = vector.broadcast %189 : vector<1x512xf32> to vector<16x512xf32>
    %191 = arith.addf %187, %190 : vector<16x512xf32>
    %192 = arith.index_cast %c4_i32 : i32 to index
    %c0_95 = arith.constant 0 : index
    %c0_96 = arith.constant 0 : index
    %193 = vector.load %arg11[%192, %c0_95, %c0_96] : memref<8x16x512xf32, #tpu.memory_space<vmem>>, vector<1x16x512xf32>
    %194 = vector.shape_cast %193 : vector<1x16x512xf32> to vector<16x512xf32>
    %195 = vector.shape_cast %191 : vector<16x512xf32> to vector<1x16x512xf32>
    tpu.vector_store %arg11[%192, %c0_95, %c0_96], %195 {strides = array<i32>} : memref<8x16x512xf32, #tpu.memory_space<vmem>>, vector<1x16x512xf32>,
    %c5_i32 = arith.constant 5 : i32
    %196 = arith.index_cast %c5_i32 : i32 to index
    %c0_97 = arith.constant 0 : index
    %c0_98 = arith.constant 0 : index
    %197 = vector.load %arg10[%196, %c0_97, %c0_98] : memref<8x16x512xf32, #tpu.memory_space<vmem>>, vector<1x16x512xf32>
    %198 = vector.shape_cast %197 : vector<1x16x512xf32> to vector<16x512xf32>
    %199 = arith.truncf %183 : vector<16x128xf32> to vector<16x128xbf16>
    %c0_99 = arith.constant 0 : index
    %c0_100 = arith.constant 0 : index
    %c0_101 = arith.constant 0 : index
    %200 = vector.load %arg3[%c0_99, %c0_100, %c0_101] : memref<3x128x512xbf16, #tpu.memory_space<vmem>>, vector<1x128x512xbf16>
    %201 = vector.shape_cast %200 : vector<1x128x512xbf16> to vector<128x512xbf16>
    %cst_102 = arith.constant dense<0.000000e+00> : vector<16x512xf32>
    %202 = tpu.matmul %199, %201, %cst_102 {dimension_numbers = #tpu.dot_dimension_numbers<[1], [0], [0], [1], [0, 0, 1, 1], [], []>} : vector<16x128xbf16>, vector<128x512xbf16>, vector<16x512xf32> -> vector<16x512xf32>
    %203 = arith.addf %198, %202 : vector<16x512xf32>
    %204 = vector.extract_strided_slice %203 {offsets = [0, 0], sizes = [16, 384], strides = [1, 1]} : vector<16x512xf32> to vector<16x384xf32>
    %cst_103 = arith.constant 5.000000e-01 : f32
    %205 = vector.broadcast %cst_103 : f32 to vector<16x384xf32>
    %206 = arith.mulf %205, %204 : vector<16x384xf32>
    %207 = math.tanh %206 : vector<16x384xf32>
    %cst_104 = arith.constant 5.000000e-01 : f32
    %208 = vector.broadcast %cst_104 : f32 to vector<16x384xf32>
    %209 = arith.mulf %208, %207 : vector<16x384xf32>
    %cst_105 = arith.constant 5.000000e-01 : f32
    %210 = vector.broadcast %cst_105 : f32 to vector<16x384xf32>
    %211 = arith.addf %209, %210 : vector<16x384xf32>
    %212 = vector.extract_strided_slice %211 {offsets = [0, 0], sizes = [16, 128], strides = [1, 1]} : vector<16x384xf32> to vector<16x128xf32>
    %213 = vector.extract_strided_slice %211 {offsets = [0, 128], sizes = [16, 128], strides = [1, 1]} : vector<16x384xf32> to vector<16x128xf32>
    %214 = vector.extract_strided_slice %211 {offsets = [0, 256], sizes = [16, 128], strides = [1, 1]} : vector<16x384xf32> to vector<16x128xf32>
    %215 = vector.extract_strided_slice %203 {offsets = [0, 384], sizes = [16, 128], strides = [1, 1]} : vector<16x512xf32> to vector<16x128xf32>
    %216 = math.tanh %215 : vector<16x128xf32>
    %217 = arith.mulf %213, %181 : vector<16x128xf32>
    %218 = arith.mulf %212, %216 : vector<16x128xf32>
    %219 = arith.addf %217, %218 : vector<16x128xf32>
    %220 = math.tanh %219 : vector<16x128xf32>
    %221 = arith.mulf %214, %220 : vector<16x128xf32>
    %222 = arith.truncf %221 : vector<16x128xf32> to vector<16x128xbf16>
    %c0_106 = arith.constant 0 : index
    %c0_107 = arith.constant 0 : index
    %c0_108 = arith.constant 0 : index
    %223 = vector.load %arg2[%c0_106, %c0_107, %c0_108] : memref<2x128x512xbf16, #tpu.memory_space<vmem>>, vector<1x128x512xbf16>
    %224 = vector.shape_cast %223 : vector<1x128x512xbf16> to vector<128x512xbf16>
    %cst_109 = arith.constant dense<0.000000e+00> : vector<16x512xf32>
    %225 = tpu.matmul %222, %224, %cst_109 {dimension_numbers = #tpu.dot_dimension_numbers<[1], [0], [0], [1], [0, 0, 1, 1], [], []>} : vector<16x128xbf16>, vector<128x512xbf16>, vector<16x512xf32> -> vector<16x512xf32>
    %c1_110 = arith.constant 1 : index
    %c0_111 = arith.constant 0 : index
    %c0_112 = arith.constant 0 : index
    %226 = vector.load %arg4[%c1_110, %c0_111, %c0_112] : memref<3x1x512xf32, #tpu.memory_space<vmem>>, vector<1x1x512xf32>
    %227 = vector.shape_cast %226 : vector<1x1x512xf32> to vector<1x512xf32>
    %228 = vector.broadcast %227 : vector<1x512xf32> to vector<16x512xf32>
    %229 = arith.addf %225, %228 : vector<16x512xf32>
    %230 = arith.index_cast %c5_i32 : i32 to index
    %c0_113 = arith.constant 0 : index
    %c0_114 = arith.constant 0 : index
    %231 = vector.load %arg11[%230, %c0_113, %c0_114] : memref<8x16x512xf32, #tpu.memory_space<vmem>>, vector<1x16x512xf32>
    %232 = vector.shape_cast %231 : vector<1x16x512xf32> to vector<16x512xf32>
    %233 = vector.shape_cast %229 : vector<16x512xf32> to vector<1x16x512xf32>
    tpu.vector_store %arg11[%230, %c0_113, %c0_114], %233 {strides = array<i32>} : memref<8x16x512xf32, #tpu.memory_space<vmem>>, vector<1x16x512xf32>,
    %c6_i32 = arith.constant 6 : i32
    %234 = arith.index_cast %c6_i32 : i32 to index
    %c0_115 = arith.constant 0 : index
    %c0_116 = arith.constant 0 : index
    %235 = vector.load %arg10[%234, %c0_115, %c0_116] : memref<8x16x512xf32, #tpu.memory_space<vmem>>, vector<1x16x512xf32>
    %236 = vector.shape_cast %235 : vector<1x16x512xf32> to vector<16x512xf32>
    %237 = arith.truncf %221 : vector<16x128xf32> to vector<16x128xbf16>
    %c0_117 = arith.constant 0 : index
    %c0_118 = arith.constant 0 : index
    %c0_119 = arith.constant 0 : index
    %238 = vector.load %arg3[%c0_117, %c0_118, %c0_119] : memref<3x128x512xbf16, #tpu.memory_space<vmem>>, vector<1x128x512xbf16>
    %239 = vector.shape_cast %238 : vector<1x128x512xbf16> to vector<128x512xbf16>
    %cst_120 = arith.constant dense<0.000000e+00> : vector<16x512xf32>
    %240 = tpu.matmul %237, %239, %cst_120 {dimension_numbers = #tpu.dot_dimension_numbers<[1], [0], [0], [1], [0, 0, 1, 1], [], []>} : vector<16x128xbf16>, vector<128x512xbf16>, vector<16x512xf32> -> vector<16x512xf32>
    %241 = arith.addf %236, %240 : vector<16x512xf32>
    %242 = vector.extract_strided_slice %241 {offsets = [0, 0], sizes = [16, 384], strides = [1, 1]} : vector<16x512xf32> to vector<16x384xf32>
    %cst_121 = arith.constant 5.000000e-01 : f32
    %243 = vector.broadcast %cst_121 : f32 to vector<16x384xf32>
    %244 = arith.mulf %243, %242 : vector<16x384xf32>
    %245 = math.tanh %244 : vector<16x384xf32>
    %cst_122 = arith.constant 5.000000e-01 : f32
    %246 = vector.broadcast %cst_122 : f32 to vector<16x384xf32>
    %247 = arith.mulf %246, %245 : vector<16x384xf32>
    %cst_123 = arith.constant 5.000000e-01 : f32
    %248 = vector.broadcast %cst_123 : f32 to vector<16x384xf32>
    %249 = arith.addf %247, %248 : vector<16x384xf32>
    %250 = vector.extract_strided_slice %249 {offsets = [0, 0], sizes = [16, 128], strides = [1, 1]} : vector<16x384xf32> to vector<16x128xf32>
    %251 = vector.extract_strided_slice %249 {offsets = [0, 128], sizes = [16, 128], strides = [1, 1]} : vector<16x384xf32> to vector<16x128xf32>
    %252 = vector.extract_strided_slice %249 {offsets = [0, 256], sizes = [16, 128], strides = [1, 1]} : vector<16x384xf32> to vector<16x128xf32>
    %253 = vector.extract_strided_slice %241 {offsets = [0, 384], sizes = [16, 128], strides = [1, 1]} : vector<16x512xf32> to vector<16x128xf32>
    %254 = math.tanh %253 : vector<16x128xf32>
    %255 = arith.mulf %251, %219 : vector<16x128xf32>
    %256 = arith.mulf %250, %254 : vector<16x128xf32>
    %257 = arith.addf %255, %256 : vector<16x128xf32>
    %258 = math.tanh %257 : vector<16x128xf32>
    %259 = arith.mulf %252, %258 : vector<16x128xf32>
    %260 = arith.truncf %259 : vector<16x128xf32> to vector<16x128xbf16>
    %c0_124 = arith.constant 0 : index
    %c0_125 = arith.constant 0 : index
    %c0_126 = arith.constant 0 : index
    %261 = vector.load %arg2[%c0_124, %c0_125, %c0_126] : memref<2x128x512xbf16, #tpu.memory_space<vmem>>, vector<1x128x512xbf16>
    %262 = vector.shape_cast %261 : vector<1x128x512xbf16> to vector<128x512xbf16>
    %cst_127 = arith.constant dense<0.000000e+00> : vector<16x512xf32>
    %263 = tpu.matmul %260, %262, %cst_127 {dimension_numbers = #tpu.dot_dimension_numbers<[1], [0], [0], [1], [0, 0, 1, 1], [], []>} : vector<16x128xbf16>, vector<128x512xbf16>, vector<16x512xf32> -> vector<16x512xf32>
    %c1_128 = arith.constant 1 : index
    %c0_129 = arith.constant 0 : index
    %c0_130 = arith.constant 0 : index
    %264 = vector.load %arg4[%c1_128, %c0_129, %c0_130] : memref<3x1x512xf32, #tpu.memory_space<vmem>>, vector<1x1x512xf32>
    %265 = vector.shape_cast %264 : vector<1x1x512xf32> to vector<1x512xf32>
    %266 = vector.broadcast %265 : vector<1x512xf32> to vector<16x512xf32>
    %267 = arith.addf %263, %266 : vector<16x512xf32>
    %268 = arith.index_cast %c6_i32 : i32 to index
    %c0_131 = arith.constant 0 : index
    %c0_132 = arith.constant 0 : index
    %269 = vector.load %arg11[%268, %c0_131, %c0_132] : memref<8x16x512xf32, #tpu.memory_space<vmem>>, vector<1x16x512xf32>
    %270 = vector.shape_cast %269 : vector<1x16x512xf32> to vector<16x512xf32>
    %271 = vector.shape_cast %267 : vector<16x512xf32> to vector<1x16x512xf32>
    tpu.vector_store %arg11[%268, %c0_131, %c0_132], %271 {strides = array<i32>} : memref<8x16x512xf32, #tpu.memory_space<vmem>>, vector<1x16x512xf32>,
    %c7_i32 = arith.constant 7 : i32
    %272 = arith.index_cast %c7_i32 : i32 to index
    %c0_133 = arith.constant 0 : index
    %c0_134 = arith.constant 0 : index
    %273 = vector.load %arg10[%272, %c0_133, %c0_134] : memref<8x16x512xf32, #tpu.memory_space<vmem>>, vector<1x16x512xf32>
    %274 = vector.shape_cast %273 : vector<1x16x512xf32> to vector<16x512xf32>
    %275 = arith.truncf %259 : vector<16x128xf32> to vector<16x128xbf16>
    %c0_135 = arith.constant 0 : index
    %c0_136 = arith.constant 0 : index
    %c0_137 = arith.constant 0 : index
    %276 = vector.load %arg3[%c0_135, %c0_136, %c0_137] : memref<3x128x512xbf16, #tpu.memory_space<vmem>>, vector<1x128x512xbf16>
    %277 = vector.shape_cast %276 : vector<1x128x512xbf16> to vector<128x512xbf16>
    %cst_138 = arith.constant dense<0.000000e+00> : vector<16x512xf32>
    %278 = tpu.matmul %275, %277, %cst_138 {dimension_numbers = #tpu.dot_dimension_numbers<[1], [0], [0], [1], [0, 0, 1, 1], [], []>} : vector<16x128xbf16>, vector<128x512xbf16>, vector<16x512xf32> -> vector<16x512xf32>
    %279 = arith.addf %274, %278 : vector<16x512xf32>
    %280 = vector.extract_strided_slice %279 {offsets = [0, 0], sizes = [16, 384], strides = [1, 1]} : vector<16x512xf32> to vector<16x384xf32>
    %cst_139 = arith.constant 5.000000e-01 : f32
    %281 = vector.broadcast %cst_139 : f32 to vector<16x384xf32>
    %282 = arith.mulf %281, %280 : vector<16x384xf32>
    %283 = math.tanh %282 : vector<16x384xf32>
    %cst_140 = arith.constant 5.000000e-01 : f32
    %284 = vector.broadcast %cst_140 : f32 to vector<16x384xf32>
    %285 = arith.mulf %284, %283 : vector<16x384xf32>
    %cst_141 = arith.constant 5.000000e-01 : f32
    %286 = vector.broadcast %cst_141 : f32 to vector<16x384xf32>
    %287 = arith.addf %285, %286 : vector<16x384xf32>
    %288 = vector.extract_strided_slice %287 {offsets = [0, 0], sizes = [16, 128], strides = [1, 1]} : vector<16x384xf32> to vector<16x128xf32>
    %289 = vector.extract_strided_slice %287 {offsets = [0, 128], sizes = [16, 128], strides = [1, 1]} : vector<16x384xf32> to vector<16x128xf32>
    %290 = vector.extract_strided_slice %287 {offsets = [0, 256], sizes = [16, 128], strides = [1, 1]} : vector<16x384xf32> to vector<16x128xf32>
    %291 = vector.extract_strided_slice %279 {offsets = [0, 384], sizes = [16, 128], strides = [1, 1]} : vector<16x512xf32> to vector<16x128xf32>
    %292 = math.tanh %291 : vector<16x128xf32>
    %293 = arith.mulf %289, %257 : vector<16x128xf32>
    %294 = arith.mulf %288, %292 : vector<16x128xf32>
    %295 = arith.addf %293, %294 : vector<16x128xf32>
    %296 = math.tanh %295 : vector<16x128xf32>
    %297 = arith.mulf %290, %296 : vector<16x128xf32>
    %298 = arith.truncf %297 : vector<16x128xf32> to vector<16x128xbf16>
    %c0_142 = arith.constant 0 : index
    %c0_143 = arith.constant 0 : index
    %c0_144 = arith.constant 0 : index
    %299 = vector.load %arg2[%c0_142, %c0_143, %c0_144] : memref<2x128x512xbf16, #tpu.memory_space<vmem>>, vector<1x128x512xbf16>
    %300 = vector.shape_cast %299 : vector<1x128x512xbf16> to vector<128x512xbf16>
    %cst_145 = arith.constant dense<0.000000e+00> : vector<16x512xf32>
    %301 = tpu.matmul %298, %300, %cst_145 {dimension_numbers = #tpu.dot_dimension_numbers<[1], [0], [0], [1], [0, 0, 1, 1], [], []>} : vector<16x128xbf16>, vector<128x512xbf16>, vector<16x512xf32> -> vector<16x512xf32>
    %c1_146 = arith.constant 1 : index
    %c0_147 = arith.constant 0 : index
    %c0_148 = arith.constant 0 : index
    %302 = vector.load %arg4[%c1_146, %c0_147, %c0_148] : memref<3x1x512xf32, #tpu.memory_space<vmem>>, vector<1x1x512xf32>
    %303 = vector.shape_cast %302 : vector<1x1x512xf32> to vector<1x512xf32>
    %304 = vector.broadcast %303 : vector<1x512xf32> to vector<16x512xf32>
    %305 = arith.addf %301, %304 : vector<16x512xf32>
    %306 = arith.index_cast %c7_i32 : i32 to index
    %c0_149 = arith.constant 0 : index
    %c0_150 = arith.constant 0 : index
    %307 = vector.load %arg11[%306, %c0_149, %c0_150] : memref<8x16x512xf32, #tpu.memory_space<vmem>>, vector<1x16x512xf32>
    %308 = vector.shape_cast %307 : vector<1x16x512xf32> to vector<16x512xf32>
    %309 = vector.shape_cast %305 : vector<16x512xf32> to vector<1x16x512xf32>
    tpu.vector_store %arg11[%306, %c0_149, %c0_150], %309 {strides = array<i32>} : memref<8x16x512xf32, #tpu.memory_space<vmem>>, vector<1x16x512xf32>,
    %c7_i32_151 = arith.constant 7 : i32
    %cst_152 = arith.constant 0.000000e+00 : f32
    %310 = vector.broadcast %cst_152 : f32 to vector<16x128xf32>
    %c0_153 = arith.constant 0 : index
    %c0_154 = arith.constant 0 : index
    %c0_155 = arith.constant 0 : index
    %311 = vector.load %arg11[%c0_153, %c0_154, %c0_155] : memref<8x16x512xf32, #tpu.memory_space<vmem>>, vector<1x16x512xf32>
    %312 = vector.shape_cast %311 : vector<1x16x512xf32> to vector<16x512xf32>
    %313 = vector.extract_strided_slice %312 {offsets = [0, 0], sizes = [16, 384], strides = [1, 1]} : vector<16x512xf32> to vector<16x384xf32>
    %cst_156 = arith.constant 5.000000e-01 : f32
    %314 = vector.broadcast %cst_156 : f32 to vector<16x384xf32>
    %315 = arith.mulf %314, %313 : vector<16x384xf32>
    %316 = math.tanh %315 : vector<16x384xf32>
    %cst_157 = arith.constant 5.000000e-01 : f32
    %317 = vector.broadcast %cst_157 : f32 to vector<16x384xf32>
    %318 = arith.mulf %317, %316 : vector<16x384xf32>
    %cst_158 = arith.constant 5.000000e-01 : f32
    %319 = vector.broadcast %cst_158 : f32 to vector<16x384xf32>
    %320 = arith.addf %318, %319 : vector<16x384xf32>
    %321 = vector.extract_strided_slice %320 {offsets = [0, 0], sizes = [16, 128], strides = [1, 1]} : vector<16x384xf32> to vector<16x128xf32>
    %322 = vector.extract_strided_slice %320 {offsets = [0, 128], sizes = [16, 128], strides = [1, 1]} : vector<16x384xf32> to vector<16x128xf32>
    %323 = vector.extract_strided_slice %320 {offsets = [0, 256], sizes = [16, 128], strides = [1, 1]} : vector<16x384xf32> to vector<16x128xf32>
    %324 = vector.extract_strided_slice %312 {offsets = [0, 384], sizes = [16, 128], strides = [1, 1]} : vector<16x512xf32> to vector<16x128xf32>
    %325 = math.tanh %324 : vector<16x128xf32>
    %326 = arith.mulf %322, %310 : vector<16x128xf32>
    %327 = arith.mulf %321, %325 : vector<16x128xf32>
    %328 = arith.addf %326, %327 : vector<16x128xf32>
    %329 = math.tanh %328 : vector<16x128xf32>
    %330 = arith.mulf %323, %329 : vector<16x128xf32>
    %331 = arith.truncf %330 : vector<16x128xf32> to vector<16x128xbf16>
    %c1_159 = arith.constant 1 : index
    %c0_160 = arith.constant 0 : index
    %c0_161 = arith.constant 0 : index
    %332 = vector.load %arg2[%c1_159, %c0_160, %c0_161] : memref<2x128x512xbf16, #tpu.memory_space<vmem>>, vector<1x128x512xbf16>
    %333 = vector.shape_cast %332 : vector<1x128x512xbf16> to vector<128x512xbf16>
    %cst_162 = arith.constant dense<0.000000e+00> : vector<16x512xf32>
    %334 = tpu.matmul %331, %333, %cst_162 {dimension_numbers = #tpu.dot_dimension_numbers<[1], [0], [0], [1], [0, 0, 1, 1], [], []>} : vector<16x128xbf16>, vector<128x512xbf16>, vector<16x512xf32> -> vector<16x512xf32>
    %c2 = arith.constant 2 : index
    %c0_163 = arith.constant 0 : index
    %c0_164 = arith.constant 0 : index
    %335 = vector.load %arg4[%c2, %c0_163, %c0_164] : memref<3x1x512xf32, #tpu.memory_space<vmem>>, vector<1x1x512xf32>
    %336 = vector.shape_cast %335 : vector<1x1x512xf32> to vector<1x512xf32>
    %337 = vector.broadcast %336 : vector<1x512xf32> to vector<16x512xf32>
    %338 = arith.addf %334, %337 : vector<16x512xf32>
    %c0_165 = arith.constant 0 : index
    %c0_166 = arith.constant 0 : index
    %c0_167 = arith.constant 0 : index
    %339 = vector.load %arg10[%c0_165, %c0_166, %c0_167] : memref<8x16x512xf32, #tpu.memory_space<vmem>>, vector<1x16x512xf32>
    %340 = vector.shape_cast %339 : vector<1x16x512xf32> to vector<16x512xf32>
    %341 = vector.shape_cast %338 : vector<16x512xf32> to vector<1x16x512xf32>
    tpu.vector_store %arg10[%c0_165, %c0_166, %c0_167], %341 {strides = array<i32>} : memref<8x16x512xf32, #tpu.memory_space<vmem>>, vector<1x16x512xf32>,
    %c1_i32_168 = arith.constant 1 : i32
    %342 = arith.index_cast %c1_i32_168 : i32 to index
    %c0_169 = arith.constant 0 : index
    %c0_170 = arith.constant 0 : index
    %343 = vector.load %arg11[%342, %c0_169, %c0_170] : memref<8x16x512xf32, #tpu.memory_space<vmem>>, vector<1x16x512xf32>
    %344 = vector.shape_cast %343 : vector<1x16x512xf32> to vector<16x512xf32>
    %345 = arith.truncf %330 : vector<16x128xf32> to vector<16x128xbf16>
    %c1_171 = arith.constant 1 : index
    %c0_172 = arith.constant 0 : index
    %c0_173 = arith.constant 0 : index
    %346 = vector.load %arg3[%c1_171, %c0_172, %c0_173] : memref<3x128x512xbf16, #tpu.memory_space<vmem>>, vector<1x128x512xbf16>
    %347 = vector.shape_cast %346 : vector<1x128x512xbf16> to vector<128x512xbf16>
    %cst_174 = arith.constant dense<0.000000e+00> : vector<16x512xf32>
    %348 = tpu.matmul %345, %347, %cst_174 {dimension_numbers = #tpu.dot_dimension_numbers<[1], [0], [0], [1], [0, 0, 1, 1], [], []>} : vector<16x128xbf16>, vector<128x512xbf16>, vector<16x512xf32> -> vector<16x512xf32>
    %349 = arith.addf %344, %348 : vector<16x512xf32>
    %350 = vector.extract_strided_slice %349 {offsets = [0, 0], sizes = [16, 384], strides = [1, 1]} : vector<16x512xf32> to vector<16x384xf32>
    %cst_175 = arith.constant 5.000000e-01 : f32
    %351 = vector.broadcast %cst_175 : f32 to vector<16x384xf32>
    %352 = arith.mulf %351, %350 : vector<16x384xf32>
    %353 = math.tanh %352 : vector<16x384xf32>
    %cst_176 = arith.constant 5.000000e-01 : f32
    %354 = vector.broadcast %cst_176 : f32 to vector<16x384xf32>
    %355 = arith.mulf %354, %353 : vector<16x384xf32>
    %cst_177 = arith.constant 5.000000e-01 : f32
    %356 = vector.broadcast %cst_177 : f32 to vector<16x384xf32>
    %357 = arith.addf %355, %356 : vector<16x384xf32>
    %358 = vector.extract_strided_slice %357 {offsets = [0, 0], sizes = [16, 128], strides = [1, 1]} : vector<16x384xf32> to vector<16x128xf32>
    %359 = vector.extract_strided_slice %357 {offsets = [0, 128], sizes = [16, 128], strides = [1, 1]} : vector<16x384xf32> to vector<16x128xf32>
    %360 = vector.extract_strided_slice %357 {offsets = [0, 256], sizes = [16, 128], strides = [1, 1]} : vector<16x384xf32> to vector<16x128xf32>
    %361 = vector.extract_strided_slice %349 {offsets = [0, 384], sizes = [16, 128], strides = [1, 1]} : vector<16x512xf32> to vector<16x128xf32>
    %362 = math.tanh %361 : vector<16x128xf32>
    %363 = arith.mulf %359, %328 : vector<16x128xf32>
    %364 = arith.mulf %358, %362 : vector<16x128xf32>
    %365 = arith.addf %363, %364 : vector<16x128xf32>
    %366 = math.tanh %365 : vector<16x128xf32>
    %367 = arith.mulf %360, %366 : vector<16x128xf32>
    %368 = arith.truncf %367 : vector<16x128xf32> to vector<16x128xbf16>
    %c1_178 = arith.constant 1 : index
    %c0_179 = arith.constant 0 : index
    %c0_180 = arith.constant 0 : index
    %369 = vector.load %arg2[%c1_178, %c0_179, %c0_180] : memref<2x128x512xbf16, #tpu.memory_space<vmem>>, vector<1x128x512xbf16>
    %370 = vector.shape_cast %369 : vector<1x128x512xbf16> to vector<128x512xbf16>
    %cst_181 = arith.constant dense<0.000000e+00> : vector<16x512xf32>
    %371 = tpu.matmul %368, %370, %cst_181 {dimension_numbers = #tpu.dot_dimension_numbers<[1], [0], [0], [1], [0, 0, 1, 1], [], []>} : vector<16x128xbf16>, vector<128x512xbf16>, vector<16x512xf32> -> vector<16x512xf32>
    %c2_182 = arith.constant 2 : index
    %c0_183 = arith.constant 0 : index
    %c0_184 = arith.constant 0 : index
    %372 = vector.load %arg4[%c2_182, %c0_183, %c0_184] : memref<3x1x512xf32, #tpu.memory_space<vmem>>, vector<1x1x512xf32>
    %373 = vector.shape_cast %372 : vector<1x1x512xf32> to vector<1x512xf32>
    %374 = vector.broadcast %373 : vector<1x512xf32> to vector<16x512xf32>
    %375 = arith.addf %371, %374 : vector<16x512xf32>
    %376 = arith.index_cast %c1_i32_168 : i32 to index
    %c0_185 = arith.constant 0 : index
    %c0_186 = arith.constant 0 : index
    %377 = vector.load %arg10[%376, %c0_185, %c0_186] : memref<8x16x512xf32, #tpu.memory_space<vmem>>, vector<1x16x512xf32>
    %378 = vector.shape_cast %377 : vector<1x16x512xf32> to vector<16x512xf32>
    %379 = vector.shape_cast %375 : vector<16x512xf32> to vector<1x16x512xf32>
    tpu.vector_store %arg10[%376, %c0_185, %c0_186], %379 {strides = array<i32>} : memref<8x16x512xf32, #tpu.memory_space<vmem>>, vector<1x16x512xf32>,
    %c2_i32_187 = arith.constant 2 : i32
    %380 = arith.index_cast %c2_i32_187 : i32 to index
    %c0_188 = arith.constant 0 : index
    %c0_189 = arith.constant 0 : index
    %381 = vector.load %arg11[%380, %c0_188, %c0_189] : memref<8x16x512xf32, #tpu.memory_space<vmem>>, vector<1x16x512xf32>
    %382 = vector.shape_cast %381 : vector<1x16x512xf32> to vector<16x512xf32>
    %383 = arith.truncf %367 : vector<16x128xf32> to vector<16x128xbf16>
    %c1_190 = arith.constant 1 : index
    %c0_191 = arith.constant 0 : index
    %c0_192 = arith.constant 0 : index
    %384 = vector.load %arg3[%c1_190, %c0_191, %c0_192] : memref<3x128x512xbf16, #tpu.memory_space<vmem>>, vector<1x128x512xbf16>
    %385 = vector.shape_cast %384 : vector<1x128x512xbf16> to vector<128x512xbf16>
    %cst_193 = arith.constant dense<0.000000e+00> : vector<16x512xf32>
    %386 = tpu.matmul %383, %385, %cst_193 {dimension_numbers = #tpu.dot_dimension_numbers<[1], [0], [0], [1], [0, 0, 1, 1], [], []>} : vector<16x128xbf16>, vector<128x512xbf16>, vector<16x512xf32> -> vector<16x512xf32>
    %387 = arith.addf %382, %386 : vector<16x512xf32>
    %388 = vector.extract_strided_slice %387 {offsets = [0, 0], sizes = [16, 384], strides = [1, 1]} : vector<16x512xf32> to vector<16x384xf32>
    %cst_194 = arith.constant 5.000000e-01 : f32
    %389 = vector.broadcast %cst_194 : f32 to vector<16x384xf32>
    %390 = arith.mulf %389, %388 : vector<16x384xf32>
    %391 = math.tanh %390 : vector<16x384xf32>
    %cst_195 = arith.constant 5.000000e-01 : f32
    %392 = vector.broadcast %cst_195 : f32 to vector<16x384xf32>
    %393 = arith.mulf %392, %391 : vector<16x384xf32>
    %cst_196 = arith.constant 5.000000e-01 : f32
    %394 = vector.broadcast %cst_196 : f32 to vector<16x384xf32>
    %395 = arith.addf %393, %394 : vector<16x384xf32>
    %396 = vector.extract_strided_slice %395 {offsets = [0, 0], sizes = [16, 128], strides = [1, 1]} : vector<16x384xf32> to vector<16x128xf32>
    %397 = vector.extract_strided_slice %395 {offsets = [0, 128], sizes = [16, 128], strides = [1, 1]} : vector<16x384xf32> to vector<16x128xf32>
    %398 = vector.extract_strided_slice %395 {offsets = [0, 256], sizes = [16, 128], strides = [1, 1]} : vector<16x384xf32> to vector<16x128xf32>
    %399 = vector.extract_strided_slice %387 {offsets = [0, 384], sizes = [16, 128], strides = [1, 1]} : vector<16x512xf32> to vector<16x128xf32>
    %400 = math.tanh %399 : vector<16x128xf32>
    %401 = arith.mulf %397, %365 : vector<16x128xf32>
    %402 = arith.mulf %396, %400 : vector<16x128xf32>
    %403 = arith.addf %401, %402 : vector<16x128xf32>
    %404 = math.tanh %403 : vector<16x128xf32>
    %405 = arith.mulf %398, %404 : vector<16x128xf32>
    %406 = arith.truncf %405 : vector<16x128xf32> to vector<16x128xbf16>
    %c1_197 = arith.constant 1 : index
    %c0_198 = arith.constant 0 : index
    %c0_199 = arith.constant 0 : index
    %407 = vector.load %arg2[%c1_197, %c0_198, %c0_199] : memref<2x128x512xbf16, #tpu.memory_space<vmem>>, vector<1x128x512xbf16>
    %408 = vector.shape_cast %407 : vector<1x128x512xbf16> to vector<128x512xbf16>
    %cst_200 = arith.constant dense<0.000000e+00> : vector<16x512xf32>
    %409 = tpu.matmul %406, %408, %cst_200 {dimension_numbers = #tpu.dot_dimension_numbers<[1], [0], [0], [1], [0, 0, 1, 1], [], []>} : vector<16x128xbf16>, vector<128x512xbf16>, vector<16x512xf32> -> vector<16x512xf32>
    %c2_201 = arith.constant 2 : index
    %c0_202 = arith.constant 0 : index
    %c0_203 = arith.constant 0 : index
    %410 = vector.load %arg4[%c2_201, %c0_202, %c0_203] : memref<3x1x512xf32, #tpu.memory_space<vmem>>, vector<1x1x512xf32>
    %411 = vector.shape_cast %410 : vector<1x1x512xf32> to vector<1x512xf32>
    %412 = vector.broadcast %411 : vector<1x512xf32> to vector<16x512xf32>
    %413 = arith.addf %409, %412 : vector<16x512xf32>
    %414 = arith.index_cast %c2_i32_187 : i32 to index
    %c0_204 = arith.constant 0 : index
    %c0_205 = arith.constant 0 : index
    %415 = vector.load %arg10[%414, %c0_204, %c0_205] : memref<8x16x512xf32, #tpu.memory_space<vmem>>, vector<1x16x512xf32>
    %416 = vector.shape_cast %415 : vector<1x16x512xf32> to vector<16x512xf32>
    %417 = vector.shape_cast %413 : vector<16x512xf32> to vector<1x16x512xf32>
    tpu.vector_store %arg10[%414, %c0_204, %c0_205], %417 {strides = array<i32>} : memref<8x16x512xf32, #tpu.memory_space<vmem>>, vector<1x16x512xf32>,
    %c3_i32_206 = arith.constant 3 : i32
    %418 = arith.index_cast %c3_i32_206 : i32 to index
    %c0_207 = arith.constant 0 : index
    %c0_208 = arith.constant 0 : index
    %419 = vector.load %arg11[%418, %c0_207, %c0_208] : memref<8x16x512xf32, #tpu.memory_space<vmem>>, vector<1x16x512xf32>
    %420 = vector.shape_cast %419 : vector<1x16x512xf32> to vector<16x512xf32>
    %421 = arith.truncf %405 : vector<16x128xf32> to vector<16x128xbf16>
    %c1_209 = arith.constant 1 : index
    %c0_210 = arith.constant 0 : index
    %c0_211 = arith.constant 0 : index
    %422 = vector.load %arg3[%c1_209, %c0_210, %c0_211] : memref<3x128x512xbf16, #tpu.memory_space<vmem>>, vector<1x128x512xbf16>
    %423 = vector.shape_cast %422 : vector<1x128x512xbf16> to vector<128x512xbf16>
    %cst_212 = arith.constant dense<0.000000e+00> : vector<16x512xf32>
    %424 = tpu.matmul %421, %423, %cst_212 {dimension_numbers = #tpu.dot_dimension_numbers<[1], [0], [0], [1], [0, 0, 1, 1], [], []>} : vector<16x128xbf16>, vector<128x512xbf16>, vector<16x512xf32> -> vector<16x512xf32>
    %425 = arith.addf %420, %424 : vector<16x512xf32>
    %426 = vector.extract_strided_slice %425 {offsets = [0, 0], sizes = [16, 384], strides = [1, 1]} : vector<16x512xf32> to vector<16x384xf32>
    %cst_213 = arith.constant 5.000000e-01 : f32
    %427 = vector.broadcast %cst_213 : f32 to vector<16x384xf32>
    %428 = arith.mulf %427, %426 : vector<16x384xf32>
    %429 = math.tanh %428 : vector<16x384xf32>
    %cst_214 = arith.constant 5.000000e-01 : f32
    %430 = vector.broadcast %cst_214 : f32 to vector<16x384xf32>
    %431 = arith.mulf %430, %429 : vector<16x384xf32>
    %cst_215 = arith.constant 5.000000e-01 : f32
    %432 = vector.broadcast %cst_215 : f32 to vector<16x384xf32>
    %433 = arith.addf %431, %432 : vector<16x384xf32>
    %434 = vector.extract_strided_slice %433 {offsets = [0, 0], sizes = [16, 128], strides = [1, 1]} : vector<16x384xf32> to vector<16x128xf32>
    %435 = vector.extract_strided_slice %433 {offsets = [0, 128], sizes = [16, 128], strides = [1, 1]} : vector<16x384xf32> to vector<16x128xf32>
    %436 = vector.extract_strided_slice %433 {offsets = [0, 256], sizes = [16, 128], strides = [1, 1]} : vector<16x384xf32> to vector<16x128xf32>
    %437 = vector.extract_strided_slice %425 {offsets = [0, 384], sizes = [16, 128], strides = [1, 1]} : vector<16x512xf32> to vector<16x128xf32>
    %438 = math.tanh %437 : vector<16x128xf32>
    %439 = arith.mulf %435, %403 : vector<16x128xf32>
    %440 = arith.mulf %434, %438 : vector<16x128xf32>
    %441 = arith.addf %439, %440 : vector<16x128xf32>
    %442 = math.tanh %441 : vector<16x128xf32>
    %443 = arith.mulf %436, %442 : vector<16x128xf32>
    %444 = arith.truncf %443 : vector<16x128xf32> to vector<16x128xbf16>
    %c1_216 = arith.constant 1 : index
    %c0_217 = arith.constant 0 : index
    %c0_218 = arith.constant 0 : index
    %445 = vector.load %arg2[%c1_216, %c0_217, %c0_218] : memref<2x128x512xbf16, #tpu.memory_space<vmem>>, vector<1x128x512xbf16>
    %446 = vector.shape_cast %445 : vector<1x128x512xbf16> to vector<128x512xbf16>
    %cst_219 = arith.constant dense<0.000000e+00> : vector<16x512xf32>
    %447 = tpu.matmul %444, %446, %cst_219 {dimension_numbers = #tpu.dot_dimension_numbers<[1], [0], [0], [1], [0, 0, 1, 1], [], []>} : vector<16x128xbf16>, vector<128x512xbf16>, vector<16x512xf32> -> vector<16x512xf32>
    %c2_220 = arith.constant 2 : index
    %c0_221 = arith.constant 0 : index
    %c0_222 = arith.constant 0 : index
    %448 = vector.load %arg4[%c2_220, %c0_221, %c0_222] : memref<3x1x512xf32, #tpu.memory_space<vmem>>, vector<1x1x512xf32>
    %449 = vector.shape_cast %448 : vector<1x1x512xf32> to vector<1x512xf32>
    %450 = vector.broadcast %449 : vector<1x512xf32> to vector<16x512xf32>
    %451 = arith.addf %447, %450 : vector<16x512xf32>
    %452 = arith.index_cast %c3_i32_206 : i32 to index
    %c0_223 = arith.constant 0 : index
    %c0_224 = arith.constant 0 : index
    %453 = vector.load %arg10[%452, %c0_223, %c0_224] : memref<8x16x512xf32, #tpu.memory_space<vmem>>, vector<1x16x512xf32>
    %454 = vector.shape_cast %453 : vector<1x16x512xf32> to vector<16x512xf32>
    %455 = vector.shape_cast %451 : vector<16x512xf32> to vector<1x16x512xf32>
    tpu.vector_store %arg10[%452, %c0_223, %c0_224], %455 {strides = array<i32>} : memref<8x16x512xf32, #tpu.memory_space<vmem>>, vector<1x16x512xf32>,
    %c4_i32_225 = arith.constant 4 : i32
    %456 = arith.index_cast %c4_i32_225 : i32 to index
    %c0_226 = arith.constant 0 : index
    %c0_227 = arith.constant 0 : index
    %457 = vector.load %arg11[%456, %c0_226, %c0_227] : memref<8x16x512xf32, #tpu.memory_space<vmem>>, vector<1x16x512xf32>
    %458 = vector.shape_cast %457 : vector<1x16x512xf32> to vector<16x512xf32>
    %459 = arith.truncf %443 : vector<16x128xf32> to vector<16x128xbf16>
    %c1_228 = arith.constant 1 : index
    %c0_229 = arith.constant 0 : index
    %c0_230 = arith.constant 0 : index
    %460 = vector.load %arg3[%c1_228, %c0_229, %c0_230] : memref<3x128x512xbf16, #tpu.memory_space<vmem>>, vector<1x128x512xbf16>
    %461 = vector.shape_cast %460 : vector<1x128x512xbf16> to vector<128x512xbf16>
    %cst_231 = arith.constant dense<0.000000e+00> : vector<16x512xf32>
    %462 = tpu.matmul %459, %461, %cst_231 {dimension_numbers = #tpu.dot_dimension_numbers<[1], [0], [0], [1], [0, 0, 1, 1], [], []>} : vector<16x128xbf16>, vector<128x512xbf16>, vector<16x512xf32> -> vector<16x512xf32>
    %463 = arith.addf %458, %462 : vector<16x512xf32>
    %464 = vector.extract_strided_slice %463 {offsets = [0, 0], sizes = [16, 384], strides = [1, 1]} : vector<16x512xf32> to vector<16x384xf32>
    %cst_232 = arith.constant 5.000000e-01 : f32
    %465 = vector.broadcast %cst_232 : f32 to vector<16x384xf32>
    %466 = arith.mulf %465, %464 : vector<16x384xf32>
    %467 = math.tanh %466 : vector<16x384xf32>
    %cst_233 = arith.constant 5.000000e-01 : f32
    %468 = vector.broadcast %cst_233 : f32 to vector<16x384xf32>
    %469 = arith.mulf %468, %467 : vector<16x384xf32>
    %cst_234 = arith.constant 5.000000e-01 : f32
    %470 = vector.broadcast %cst_234 : f32 to vector<16x384xf32>
    %471 = arith.addf %469, %470 : vector<16x384xf32>
    %472 = vector.extract_strided_slice %471 {offsets = [0, 0], sizes = [16, 128], strides = [1, 1]} : vector<16x384xf32> to vector<16x128xf32>
    %473 = vector.extract_strided_slice %471 {offsets = [0, 128], sizes = [16, 128], strides = [1, 1]} : vector<16x384xf32> to vector<16x128xf32>
    %474 = vector.extract_strided_slice %471 {offsets = [0, 256], sizes = [16, 128], strides = [1, 1]} : vector<16x384xf32> to vector<16x128xf32>
    %475 = vector.extract_strided_slice %463 {offsets = [0, 384], sizes = [16, 128], strides = [1, 1]} : vector<16x512xf32> to vector<16x128xf32>
    %476 = math.tanh %475 : vector<16x128xf32>
    %477 = arith.mulf %473, %441 : vector<16x128xf32>
    %478 = arith.mulf %472, %476 : vector<16x128xf32>
    %479 = arith.addf %477, %478 : vector<16x128xf32>
    %480 = math.tanh %479 : vector<16x128xf32>
    %481 = arith.mulf %474, %480 : vector<16x128xf32>
    %482 = arith.truncf %481 : vector<16x128xf32> to vector<16x128xbf16>
    %c1_235 = arith.constant 1 : index
    %c0_236 = arith.constant 0 : index
    %c0_237 = arith.constant 0 : index
    %483 = vector.load %arg2[%c1_235, %c0_236, %c0_237] : memref<2x128x512xbf16, #tpu.memory_space<vmem>>, vector<1x128x512xbf16>
    %484 = vector.shape_cast %483 : vector<1x128x512xbf16> to vector<128x512xbf16>
    %cst_238 = arith.constant dense<0.000000e+00> : vector<16x512xf32>
    %485 = tpu.matmul %482, %484, %cst_238 {dimension_numbers = #tpu.dot_dimension_numbers<[1], [0], [0], [1], [0, 0, 1, 1], [], []>} : vector<16x128xbf16>, vector<128x512xbf16>, vector<16x512xf32> -> vector<16x512xf32>
    %c2_239 = arith.constant 2 : index
    %c0_240 = arith.constant 0 : index
    %c0_241 = arith.constant 0 : index
    %486 = vector.load %arg4[%c2_239, %c0_240, %c0_241] : memref<3x1x512xf32, #tpu.memory_space<vmem>>, vector<1x1x512xf32>
    %487 = vector.shape_cast %486 : vector<1x1x512xf32> to vector<1x512xf32>
    %488 = vector.broadcast %487 : vector<1x512xf32> to vector<16x512xf32>
    %489 = arith.addf %485, %488 : vector<16x512xf32>
    %490 = arith.index_cast %c4_i32_225 : i32 to index
    %c0_242 = arith.constant 0 : index
    %c0_243 = arith.constant 0 : index
    %491 = vector.load %arg10[%490, %c0_242, %c0_243] : memref<8x16x512xf32, #tpu.memory_space<vmem>>, vector<1x16x512xf32>
    %492 = vector.shape_cast %491 : vector<1x16x512xf32> to vector<16x512xf32>
    %493 = vector.shape_cast %489 : vector<16x512xf32> to vector<1x16x512xf32>
    tpu.vector_store %arg10[%490, %c0_242, %c0_243], %493 {strides = array<i32>} : memref<8x16x512xf32, #tpu.memory_space<vmem>>, vector<1x16x512xf32>,
    %c5_i32_244 = arith.constant 5 : i32
    %494 = arith.index_cast %c5_i32_244 : i32 to index
    %c0_245 = arith.constant 0 : index
    %c0_246 = arith.constant 0 : index
    %495 = vector.load %arg11[%494, %c0_245, %c0_246] : memref<8x16x512xf32, #tpu.memory_space<vmem>>, vector<1x16x512xf32>
    %496 = vector.shape_cast %495 : vector<1x16x512xf32> to vector<16x512xf32>
    %497 = arith.truncf %481 : vector<16x128xf32> to vector<16x128xbf16>
    %c1_247 = arith.constant 1 : index
    %c0_248 = arith.constant 0 : index
    %c0_249 = arith.constant 0 : index
    %498 = vector.load %arg3[%c1_247, %c0_248, %c0_249] : memref<3x128x512xbf16, #tpu.memory_space<vmem>>, vector<1x128x512xbf16>
    %499 = vector.shape_cast %498 : vector<1x128x512xbf16> to vector<128x512xbf16>
    %cst_250 = arith.constant dense<0.000000e+00> : vector<16x512xf32>
    %500 = tpu.matmul %497, %499, %cst_250 {dimension_numbers = #tpu.dot_dimension_numbers<[1], [0], [0], [1], [0, 0, 1, 1], [], []>} : vector<16x128xbf16>, vector<128x512xbf16>, vector<16x512xf32> -> vector<16x512xf32>
    %501 = arith.addf %496, %500 : vector<16x512xf32>
    %502 = vector.extract_strided_slice %501 {offsets = [0, 0], sizes = [16, 384], strides = [1, 1]} : vector<16x512xf32> to vector<16x384xf32>
    %cst_251 = arith.constant 5.000000e-01 : f32
    %503 = vector.broadcast %cst_251 : f32 to vector<16x384xf32>
    %504 = arith.mulf %503, %502 : vector<16x384xf32>
    %505 = math.tanh %504 : vector<16x384xf32>
    %cst_252 = arith.constant 5.000000e-01 : f32
    %506 = vector.broadcast %cst_252 : f32 to vector<16x384xf32>
    %507 = arith.mulf %506, %505 : vector<16x384xf32>
    %cst_253 = arith.constant 5.000000e-01 : f32
    %508 = vector.broadcast %cst_253 : f32 to vector<16x384xf32>
    %509 = arith.addf %507, %508 : vector<16x384xf32>
    %510 = vector.extract_strided_slice %509 {offsets = [0, 0], sizes = [16, 128], strides = [1, 1]} : vector<16x384xf32> to vector<16x128xf32>
    %511 = vector.extract_strided_slice %509 {offsets = [0, 128], sizes = [16, 128], strides = [1, 1]} : vector<16x384xf32> to vector<16x128xf32>
    %512 = vector.extract_strided_slice %509 {offsets = [0, 256], sizes = [16, 128], strides = [1, 1]} : vector<16x384xf32> to vector<16x128xf32>
    %513 = vector.extract_strided_slice %501 {offsets = [0, 384], sizes = [16, 128], strides = [1, 1]} : vector<16x512xf32> to vector<16x128xf32>
    %514 = math.tanh %513 : vector<16x128xf32>
    %515 = arith.mulf %511, %479 : vector<16x128xf32>
    %516 = arith.mulf %510, %514 : vector<16x128xf32>
    %517 = arith.addf %515, %516 : vector<16x128xf32>
    %518 = math.tanh %517 : vector<16x128xf32>
    %519 = arith.mulf %512, %518 : vector<16x128xf32>
    %520 = arith.truncf %519 : vector<16x128xf32> to vector<16x128xbf16>
    %c1_254 = arith.constant 1 : index
    %c0_255 = arith.constant 0 : index
    %c0_256 = arith.constant 0 : index
    %521 = vector.load %arg2[%c1_254, %c0_255, %c0_256] : memref<2x128x512xbf16, #tpu.memory_space<vmem>>, vector<1x128x512xbf16>
    %522 = vector.shape_cast %521 : vector<1x128x512xbf16> to vector<128x512xbf16>
    %cst_257 = arith.constant dense<0.000000e+00> : vector<16x512xf32>
    %523 = tpu.matmul %520, %522, %cst_257 {dimension_numbers = #tpu.dot_dimension_numbers<[1], [0], [0], [1], [0, 0, 1, 1], [], []>} : vector<16x128xbf16>, vector<128x512xbf16>, vector<16x512xf32> -> vector<16x512xf32>
    %c2_258 = arith.constant 2 : index
    %c0_259 = arith.constant 0 : index
    %c0_260 = arith.constant 0 : index
    %524 = vector.load %arg4[%c2_258, %c0_259, %c0_260] : memref<3x1x512xf32, #tpu.memory_space<vmem>>, vector<1x1x512xf32>
    %525 = vector.shape_cast %524 : vector<1x1x512xf32> to vector<1x512xf32>
    %526 = vector.broadcast %525 : vector<1x512xf32> to vector<16x512xf32>
    %527 = arith.addf %523, %526 : vector<16x512xf32>
    %528 = arith.index_cast %c5_i32_244 : i32 to index
    %c0_261 = arith.constant 0 : index
    %c0_262 = arith.constant 0 : index
    %529 = vector.load %arg10[%528, %c0_261, %c0_262] : memref<8x16x512xf32, #tpu.memory_space<vmem>>, vector<1x16x512xf32>
    %530 = vector.shape_cast %529 : vector<1x16x512xf32> to vector<16x512xf32>
    %531 = vector.shape_cast %527 : vector<16x512xf32> to vector<1x16x512xf32>
    tpu.vector_store %arg10[%528, %c0_261, %c0_262], %531 {strides = array<i32>} : memref<8x16x512xf32, #tpu.memory_space<vmem>>, vector<1x16x512xf32>,
    %c6_i32_263 = arith.constant 6 : i32
    %532 = arith.index_cast %c6_i32_263 : i32 to index
    %c0_264 = arith.constant 0 : index
    %c0_265 = arith.constant 0 : index
    %533 = vector.load %arg11[%532, %c0_264, %c0_265] : memref<8x16x512xf32, #tpu.memory_space<vmem>>, vector<1x16x512xf32>
    %534 = vector.shape_cast %533 : vector<1x16x512xf32> to vector<16x512xf32>
    %535 = arith.truncf %519 : vector<16x128xf32> to vector<16x128xbf16>
    %c1_266 = arith.constant 1 : index
    %c0_267 = arith.constant 0 : index
    %c0_268 = arith.constant 0 : index
    %536 = vector.load %arg3[%c1_266, %c0_267, %c0_268] : memref<3x128x512xbf16, #tpu.memory_space<vmem>>, vector<1x128x512xbf16>
    %537 = vector.shape_cast %536 : vector<1x128x512xbf16> to vector<128x512xbf16>
    %cst_269 = arith.constant dense<0.000000e+00> : vector<16x512xf32>
    %538 = tpu.matmul %535, %537, %cst_269 {dimension_numbers = #tpu.dot_dimension_numbers<[1], [0], [0], [1], [0, 0, 1, 1], [], []>} : vector<16x128xbf16>, vector<128x512xbf16>, vector<16x512xf32> -> vector<16x512xf32>
    %539 = arith.addf %534, %538 : vector<16x512xf32>
    %540 = vector.extract_strided_slice %539 {offsets = [0, 0], sizes = [16, 384], strides = [1, 1]} : vector<16x512xf32> to vector<16x384xf32>
    %cst_270 = arith.constant 5.000000e-01 : f32
    %541 = vector.broadcast %cst_270 : f32 to vector<16x384xf32>
    %542 = arith.mulf %541, %540 : vector<16x384xf32>
    %543 = math.tanh %542 : vector<16x384xf32>
    %cst_271 = arith.constant 5.000000e-01 : f32
    %544 = vector.broadcast %cst_271 : f32 to vector<16x384xf32>
    %545 = arith.mulf %544, %543 : vector<16x384xf32>
    %cst_272 = arith.constant 5.000000e-01 : f32
    %546 = vector.broadcast %cst_272 : f32 to vector<16x384xf32>
    %547 = arith.addf %545, %546 : vector<16x384xf32>
    %548 = vector.extract_strided_slice %547 {offsets = [0, 0], sizes = [16, 128], strides = [1, 1]} : vector<16x384xf32> to vector<16x128xf32>
    %549 = vector.extract_strided_slice %547 {offsets = [0, 128], sizes = [16, 128], strides = [1, 1]} : vector<16x384xf32> to vector<16x128xf32>
    %550 = vector.extract_strided_slice %547 {offsets = [0, 256], sizes = [16, 128], strides = [1, 1]} : vector<16x384xf32> to vector<16x128xf32>
    %551 = vector.extract_strided_slice %539 {offsets = [0, 384], sizes = [16, 128], strides = [1, 1]} : vector<16x512xf32> to vector<16x128xf32>
    %552 = math.tanh %551 : vector<16x128xf32>
    %553 = arith.mulf %549, %517 : vector<16x128xf32>
    %554 = arith.mulf %548, %552 : vector<16x128xf32>
    %555 = arith.addf %553, %554 : vector<16x128xf32>
    %556 = math.tanh %555 : vector<16x128xf32>
    %557 = arith.mulf %550, %556 : vector<16x128xf32>
    %558 = arith.truncf %557 : vector<16x128xf32> to vector<16x128xbf16>
    %c1_273 = arith.constant 1 : index
    %c0_274 = arith.constant 0 : index
    %c0_275 = arith.constant 0 : index
    %559 = vector.load %arg2[%c1_273, %c0_274, %c0_275] : memref<2x128x512xbf16, #tpu.memory_space<vmem>>, vector<1x128x512xbf16>
    %560 = vector.shape_cast %559 : vector<1x128x512xbf16> to vector<128x512xbf16>
    %cst_276 = arith.constant dense<0.000000e+00> : vector<16x512xf32>
    %561 = tpu.matmul %558, %560, %cst_276 {dimension_numbers = #tpu.dot_dimension_numbers<[1], [0], [0], [1], [0, 0, 1, 1], [], []>} : vector<16x128xbf16>, vector<128x512xbf16>, vector<16x512xf32> -> vector<16x512xf32>
    %c2_277 = arith.constant 2 : index
    %c0_278 = arith.constant 0 : index
    %c0_279 = arith.constant 0 : index
    %562 = vector.load %arg4[%c2_277, %c0_278, %c0_279] : memref<3x1x512xf32, #tpu.memory_space<vmem>>, vector<1x1x512xf32>
    %563 = vector.shape_cast %562 : vector<1x1x512xf32> to vector<1x512xf32>
    %564 = vector.broadcast %563 : vector<1x512xf32> to vector<16x512xf32>
    %565 = arith.addf %561, %564 : vector<16x512xf32>
    %566 = arith.index_cast %c6_i32_263 : i32 to index
    %c0_280 = arith.constant 0 : index
    %c0_281 = arith.constant 0 : index
    %567 = vector.load %arg10[%566, %c0_280, %c0_281] : memref<8x16x512xf32, #tpu.memory_space<vmem>>, vector<1x16x512xf32>
    %568 = vector.shape_cast %567 : vector<1x16x512xf32> to vector<16x512xf32>
    %569 = vector.shape_cast %565 : vector<16x512xf32> to vector<1x16x512xf32>
    tpu.vector_store %arg10[%566, %c0_280, %c0_281], %569 {strides = array<i32>} : memref<8x16x512xf32, #tpu.memory_space<vmem>>, vector<1x16x512xf32>,
    %c7_i32_282 = arith.constant 7 : i32
    %570 = arith.index_cast %c7_i32_282 : i32 to index
    %c0_283 = arith.constant 0 : index
    %c0_284 = arith.constant 0 : index
    %571 = vector.load %arg11[%570, %c0_283, %c0_284] : memref<8x16x512xf32, #tpu.memory_space<vmem>>, vector<1x16x512xf32>
    %572 = vector.shape_cast %571 : vector<1x16x512xf32> to vector<16x512xf32>
    %573 = arith.truncf %557 : vector<16x128xf32> to vector<16x128xbf16>
    %c1_285 = arith.constant 1 : index
    %c0_286 = arith.constant 0 : index
    %c0_287 = arith.constant 0 : index
    %574 = vector.load %arg3[%c1_285, %c0_286, %c0_287] : memref<3x128x512xbf16, #tpu.memory_space<vmem>>, vector<1x128x512xbf16>
    %575 = vector.shape_cast %574 : vector<1x128x512xbf16> to vector<128x512xbf16>
    %cst_288 = arith.constant dense<0.000000e+00> : vector<16x512xf32>
    %576 = tpu.matmul %573, %575, %cst_288 {dimension_numbers = #tpu.dot_dimension_numbers<[1], [0], [0], [1], [0, 0, 1, 1], [], []>} : vector<16x128xbf16>, vector<128x512xbf16>, vector<16x512xf32> -> vector<16x512xf32>
    %577 = arith.addf %572, %576 : vector<16x512xf32>
    %578 = vector.extract_strided_slice %577 {offsets = [0, 0], sizes = [16, 384], strides = [1, 1]} : vector<16x512xf32> to vector<16x384xf32>
    %cst_289 = arith.constant 5.000000e-01 : f32
    %579 = vector.broadcast %cst_289 : f32 to vector<16x384xf32>
    %580 = arith.mulf %579, %578 : vector<16x384xf32>
    %581 = math.tanh %580 : vector<16x384xf32>
    %cst_290 = arith.constant 5.000000e-01 : f32
    %582 = vector.broadcast %cst_290 : f32 to vector<16x384xf32>
    %583 = arith.mulf %582, %581 : vector<16x384xf32>
    %cst_291 = arith.constant 5.000000e-01 : f32
    %584 = vector.broadcast %cst_291 : f32 to vector<16x384xf32>
    %585 = arith.addf %583, %584 : vector<16x384xf32>
    %586 = vector.extract_strided_slice %585 {offsets = [0, 0], sizes = [16, 128], strides = [1, 1]} : vector<16x384xf32> to vector<16x128xf32>
    %587 = vector.extract_strided_slice %585 {offsets = [0, 128], sizes = [16, 128], strides = [1, 1]} : vector<16x384xf32> to vector<16x128xf32>
    %588 = vector.extract_strided_slice %585 {offsets = [0, 256], sizes = [16, 128], strides = [1, 1]} : vector<16x384xf32> to vector<16x128xf32>
    %589 = vector.extract_strided_slice %577 {offsets = [0, 384], sizes = [16, 128], strides = [1, 1]} : vector<16x512xf32> to vector<16x128xf32>
    %590 = math.tanh %589 : vector<16x128xf32>
    %591 = arith.mulf %587, %555 : vector<16x128xf32>
    %592 = arith.mulf %586, %590 : vector<16x128xf32>
    %593 = arith.addf %591, %592 : vector<16x128xf32>
    %594 = math.tanh %593 : vector<16x128xf32>
    %595 = arith.mulf %588, %594 : vector<16x128xf32>
    %596 = arith.truncf %595 : vector<16x128xf32> to vector<16x128xbf16>
    %c1_292 = arith.constant 1 : index
    %c0_293 = arith.constant 0 : index
    %c0_294 = arith.constant 0 : index
    %597 = vector.load %arg2[%c1_292, %c0_293, %c0_294] : memref<2x128x512xbf16, #tpu.memory_space<vmem>>, vector<1x128x512xbf16>
    %598 = vector.shape_cast %597 : vector<1x128x512xbf16> to vector<128x512xbf16>
    %cst_295 = arith.constant dense<0.000000e+00> : vector<16x512xf32>
    %599 = tpu.matmul %596, %598, %cst_295 {dimension_numbers = #tpu.dot_dimension_numbers<[1], [0], [0], [1], [0, 0, 1, 1], [], []>} : vector<16x128xbf16>, vector<128x512xbf16>, vector<16x512xf32> -> vector<16x512xf32>
    %c2_296 = arith.constant 2 : index
    %c0_297 = arith.constant 0 : index
    %c0_298 = arith.constant 0 : index
    %600 = vector.load %arg4[%c2_296, %c0_297, %c0_298] : memref<3x1x512xf32, #tpu.memory_space<vmem>>, vector<1x1x512xf32>
    %601 = vector.shape_cast %600 : vector<1x1x512xf32> to vector<1x512xf32>
    %602 = vector.broadcast %601 : vector<1x512xf32> to vector<16x512xf32>
    %603 = arith.addf %599, %602 : vector<16x512xf32>
    %604 = arith.index_cast %c7_i32_282 : i32 to index
    %c0_299 = arith.constant 0 : index
    %c0_300 = arith.constant 0 : index
    %605 = vector.load %arg10[%604, %c0_299, %c0_300] : memref<8x16x512xf32, #tpu.memory_space<vmem>>, vector<1x16x512xf32>
    %606 = vector.shape_cast %605 : vector<1x16x512xf32> to vector<16x512xf32>
    %607 = vector.shape_cast %603 : vector<16x512xf32> to vector<1x16x512xf32>
    tpu.vector_store %arg10[%604, %c0_299, %c0_300], %607 {strides = array<i32>} : memref<8x16x512xf32, #tpu.memory_space<vmem>>, vector<1x16x512xf32>,
    %c7_i32_301 = arith.constant 7 : i32
    %cst_302 = arith.constant 0.000000e+00 : f32
    %608 = vector.broadcast %cst_302 : f32 to vector<16x128xf32>
    %c0_303 = arith.constant 0 : index
    %c0_304 = arith.constant 0 : index
    %c0_305 = arith.constant 0 : index
    %609 = vector.load %arg10[%c0_303, %c0_304, %c0_305] : memref<8x16x512xf32, #tpu.memory_space<vmem>>, vector<1x16x512xf32>
    %610 = vector.shape_cast %609 : vector<1x16x512xf32> to vector<16x512xf32>
    %611 = vector.extract_strided_slice %610 {offsets = [0, 0], sizes = [16, 384], strides = [1, 1]} : vector<16x512xf32> to vector<16x384xf32>
    %cst_306 = arith.constant 5.000000e-01 : f32
    %612 = vector.broadcast %cst_306 : f32 to vector<16x384xf32>
    %613 = arith.mulf %612, %611 : vector<16x384xf32>
    %614 = math.tanh %613 : vector<16x384xf32>
    %cst_307 = arith.constant 5.000000e-01 : f32
    %615 = vector.broadcast %cst_307 : f32 to vector<16x384xf32>
    %616 = arith.mulf %615, %614 : vector<16x384xf32>
    %cst_308 = arith.constant 5.000000e-01 : f32
    %617 = vector.broadcast %cst_308 : f32 to vector<16x384xf32>
    %618 = arith.addf %616, %617 : vector<16x384xf32>
    %619 = vector.extract_strided_slice %618 {offsets = [0, 0], sizes = [16, 128], strides = [1, 1]} : vector<16x384xf32> to vector<16x128xf32>
    %620 = vector.extract_strided_slice %618 {offsets = [0, 128], sizes = [16, 128], strides = [1, 1]} : vector<16x384xf32> to vector<16x128xf32>
    %621 = vector.extract_strided_slice %618 {offsets = [0, 256], sizes = [16, 128], strides = [1, 1]} : vector<16x384xf32> to vector<16x128xf32>
    %622 = vector.extract_strided_slice %610 {offsets = [0, 384], sizes = [16, 128], strides = [1, 1]} : vector<16x512xf32> to vector<16x128xf32>
    %623 = math.tanh %622 : vector<16x128xf32>
    %624 = arith.mulf %620, %608 : vector<16x128xf32>
    %625 = arith.mulf %619, %623 : vector<16x128xf32>
    %626 = arith.addf %624, %625 : vector<16x128xf32>
    %627 = math.tanh %626 : vector<16x128xf32>
    %628 = arith.mulf %621, %627 : vector<16x128xf32>
    %c1_i32_309 = arith.constant 1 : i32
    %629 = arith.index_cast %c1_i32_309 : i32 to index
    %c0_310 = arith.constant 0 : index
    %c0_311 = arith.constant 0 : index
    %630 = vector.load %arg10[%629, %c0_310, %c0_311] : memref<8x16x512xf32, #tpu.memory_space<vmem>>, vector<1x16x512xf32>
    %631 = vector.shape_cast %630 : vector<1x16x512xf32> to vector<16x512xf32>
    %632 = arith.truncf %628 : vector<16x128xf32> to vector<16x128xbf16>
    %c2_312 = arith.constant 2 : index
    %c0_313 = arith.constant 0 : index
    %c0_314 = arith.constant 0 : index
    %633 = vector.load %arg3[%c2_312, %c0_313, %c0_314] : memref<3x128x512xbf16, #tpu.memory_space<vmem>>, vector<1x128x512xbf16>
    %634 = vector.shape_cast %633 : vector<1x128x512xbf16> to vector<128x512xbf16>
    %cst_315 = arith.constant dense<0.000000e+00> : vector<16x512xf32>
    %635 = tpu.matmul %632, %634, %cst_315 {dimension_numbers = #tpu.dot_dimension_numbers<[1], [0], [0], [1], [0, 0, 1, 1], [], []>} : vector<16x128xbf16>, vector<128x512xbf16>, vector<16x512xf32> -> vector<16x512xf32>
    %636 = arith.addf %631, %635 : vector<16x512xf32>
    %637 = vector.extract_strided_slice %636 {offsets = [0, 0], sizes = [16, 384], strides = [1, 1]} : vector<16x512xf32> to vector<16x384xf32>
    %cst_316 = arith.constant 5.000000e-01 : f32
    %638 = vector.broadcast %cst_316 : f32 to vector<16x384xf32>
    %639 = arith.mulf %638, %637 : vector<16x384xf32>
    %640 = math.tanh %639 : vector<16x384xf32>
    %cst_317 = arith.constant 5.000000e-01 : f32
    %641 = vector.broadcast %cst_317 : f32 to vector<16x384xf32>
    %642 = arith.mulf %641, %640 : vector<16x384xf32>
    %cst_318 = arith.constant 5.000000e-01 : f32
    %643 = vector.broadcast %cst_318 : f32 to vector<16x384xf32>
    %644 = arith.addf %642, %643 : vector<16x384xf32>
    %645 = vector.extract_strided_slice %644 {offsets = [0, 0], sizes = [16, 128], strides = [1, 1]} : vector<16x384xf32> to vector<16x128xf32>
    %646 = vector.extract_strided_slice %644 {offsets = [0, 128], sizes = [16, 128], strides = [1, 1]} : vector<16x384xf32> to vector<16x128xf32>
    %647 = vector.extract_strided_slice %644 {offsets = [0, 256], sizes = [16, 128], strides = [1, 1]} : vector<16x384xf32> to vector<16x128xf32>
    %648 = vector.extract_strided_slice %636 {offsets = [0, 384], sizes = [16, 128], strides = [1, 1]} : vector<16x512xf32> to vector<16x128xf32>
    %649 = math.tanh %648 : vector<16x128xf32>
    %650 = arith.mulf %646, %626 : vector<16x128xf32>
    %651 = arith.mulf %645, %649 : vector<16x128xf32>
    %652 = arith.addf %650, %651 : vector<16x128xf32>
    %653 = math.tanh %652 : vector<16x128xf32>
    %654 = arith.mulf %647, %653 : vector<16x128xf32>
    %c2_i32_319 = arith.constant 2 : i32
    %655 = arith.index_cast %c2_i32_319 : i32 to index
    %c0_320 = arith.constant 0 : index
    %c0_321 = arith.constant 0 : index
    %656 = vector.load %arg10[%655, %c0_320, %c0_321] : memref<8x16x512xf32, #tpu.memory_space<vmem>>, vector<1x16x512xf32>
    %657 = vector.shape_cast %656 : vector<1x16x512xf32> to vector<16x512xf32>
    %658 = arith.truncf %654 : vector<16x128xf32> to vector<16x128xbf16>
    %c2_322 = arith.constant 2 : index
    %c0_323 = arith.constant 0 : index
    %c0_324 = arith.constant 0 : index
    %659 = vector.load %arg3[%c2_322, %c0_323, %c0_324] : memref<3x128x512xbf16, #tpu.memory_space<vmem>>, vector<1x128x512xbf16>
    %660 = vector.shape_cast %659 : vector<1x128x512xbf16> to vector<128x512xbf16>
    %cst_325 = arith.constant dense<0.000000e+00> : vector<16x512xf32>
    %661 = tpu.matmul %658, %660, %cst_325 {dimension_numbers = #tpu.dot_dimension_numbers<[1], [0], [0], [1], [0, 0, 1, 1], [], []>} : vector<16x128xbf16>, vector<128x512xbf16>, vector<16x512xf32> -> vector<16x512xf32>
    %662 = arith.addf %657, %661 : vector<16x512xf32>
    %663 = vector.extract_strided_slice %662 {offsets = [0, 0], sizes = [16, 384], strides = [1, 1]} : vector<16x512xf32> to vector<16x384xf32>
    %cst_326 = arith.constant 5.000000e-01 : f32
    %664 = vector.broadcast %cst_326 : f32 to vector<16x384xf32>
    %665 = arith.mulf %664, %663 : vector<16x384xf32>
    %666 = math.tanh %665 : vector<16x384xf32>
    %cst_327 = arith.constant 5.000000e-01 : f32
    %667 = vector.broadcast %cst_327 : f32 to vector<16x384xf32>
    %668 = arith.mulf %667, %666 : vector<16x384xf32>
    %cst_328 = arith.constant 5.000000e-01 : f32
    %669 = vector.broadcast %cst_328 : f32 to vector<16x384xf32>
    %670 = arith.addf %668, %669 : vector<16x384xf32>
    %671 = vector.extract_strided_slice %670 {offsets = [0, 0], sizes = [16, 128], strides = [1, 1]} : vector<16x384xf32> to vector<16x128xf32>
    %672 = vector.extract_strided_slice %670 {offsets = [0, 128], sizes = [16, 128], strides = [1, 1]} : vector<16x384xf32> to vector<16x128xf32>
    %673 = vector.extract_strided_slice %670 {offsets = [0, 256], sizes = [16, 128], strides = [1, 1]} : vector<16x384xf32> to vector<16x128xf32>
    %674 = vector.extract_strided_slice %662 {offsets = [0, 384], sizes = [16, 128], strides = [1, 1]} : vector<16x512xf32> to vector<16x128xf32>
    %675 = math.tanh %674 : vector<16x128xf32>
    %676 = arith.mulf %672, %652 : vector<16x128xf32>
    %677 = arith.mulf %671, %675 : vector<16x128xf32>
    %678 = arith.addf %676, %677 : vector<16x128xf32>
    %679 = math.tanh %678 : vector<16x128xf32>
    %680 = arith.mulf %673, %679 : vector<16x128xf32>
    %c3_i32_329 = arith.constant 3 : i32
    %681 = arith.index_cast %c3_i32_329 : i32 to index
    %c0_330 = arith.constant 0 : index
    %c0_331 = arith.constant 0 : index
    %682 = vector.load %arg10[%681, %c0_330, %c0_331] : memref<8x16x512xf32, #tpu.memory_space<vmem>>, vector<1x16x512xf32>
    %683 = vector.shape_cast %682 : vector<1x16x512xf32> to vector<16x512xf32>
    %684 = arith.truncf %680 : vector<16x128xf32> to vector<16x128xbf16>
    %c2_332 = arith.constant 2 : index
    %c0_333 = arith.constant 0 : index
    %c0_334 = arith.constant 0 : index
    %685 = vector.load %arg3[%c2_332, %c0_333, %c0_334] : memref<3x128x512xbf16, #tpu.memory_space<vmem>>, vector<1x128x512xbf16>
    %686 = vector.shape_cast %685 : vector<1x128x512xbf16> to vector<128x512xbf16>
    %cst_335 = arith.constant dense<0.000000e+00> : vector<16x512xf32>
    %687 = tpu.matmul %684, %686, %cst_335 {dimension_numbers = #tpu.dot_dimension_numbers<[1], [0], [0], [1], [0, 0, 1, 1], [], []>} : vector<16x128xbf16>, vector<128x512xbf16>, vector<16x512xf32> -> vector<16x512xf32>
    %688 = arith.addf %683, %687 : vector<16x512xf32>
    %689 = vector.extract_strided_slice %688 {offsets = [0, 0], sizes = [16, 384], strides = [1, 1]} : vector<16x512xf32> to vector<16x384xf32>
    %cst_336 = arith.constant 5.000000e-01 : f32
    %690 = vector.broadcast %cst_336 : f32 to vector<16x384xf32>
    %691 = arith.mulf %690, %689 : vector<16x384xf32>
    %692 = math.tanh %691 : vector<16x384xf32>
    %cst_337 = arith.constant 5.000000e-01 : f32
    %693 = vector.broadcast %cst_337 : f32 to vector<16x384xf32>
    %694 = arith.mulf %693, %692 : vector<16x384xf32>
    %cst_338 = arith.constant 5.000000e-01 : f32
    %695 = vector.broadcast %cst_338 : f32 to vector<16x384xf32>
    %696 = arith.addf %694, %695 : vector<16x384xf32>
    %697 = vector.extract_strided_slice %696 {offsets = [0, 0], sizes = [16, 128], strides = [1, 1]} : vector<16x384xf32> to vector<16x128xf32>
    %698 = vector.extract_strided_slice %696 {offsets = [0, 128], sizes = [16, 128], strides = [1, 1]} : vector<16x384xf32> to vector<16x128xf32>
    %699 = vector.extract_strided_slice %696 {offsets = [0, 256], sizes = [16, 128], strides = [1, 1]} : vector<16x384xf32> to vector<16x128xf32>
    %700 = vector.extract_strided_slice %688 {offsets = [0, 384], sizes = [16, 128], strides = [1, 1]} : vector<16x512xf32> to vector<16x128xf32>
    %701 = math.tanh %700 : vector<16x128xf32>
    %702 = arith.mulf %698, %678 : vector<16x128xf32>
    %703 = arith.mulf %697, %701 : vector<16x128xf32>
    %704 = arith.addf %702, %703 : vector<16x128xf32>
    %705 = math.tanh %704 : vector<16x128xf32>
    %706 = arith.mulf %699, %705 : vector<16x128xf32>
    %c4_i32_339 = arith.constant 4 : i32
    %707 = arith.index_cast %c4_i32_339 : i32 to index
    %c0_340 = arith.constant 0 : index
    %c0_341 = arith.constant 0 : index
    %708 = vector.load %arg10[%707, %c0_340, %c0_341] : memref<8x16x512xf32, #tpu.memory_space<vmem>>, vector<1x16x512xf32>
    %709 = vector.shape_cast %708 : vector<1x16x512xf32> to vector<16x512xf32>
    %710 = arith.truncf %706 : vector<16x128xf32> to vector<16x128xbf16>
    %c2_342 = arith.constant 2 : index
    %c0_343 = arith.constant 0 : index
    %c0_344 = arith.constant 0 : index
    %711 = vector.load %arg3[%c2_342, %c0_343, %c0_344] : memref<3x128x512xbf16, #tpu.memory_space<vmem>>, vector<1x128x512xbf16>
    %712 = vector.shape_cast %711 : vector<1x128x512xbf16> to vector<128x512xbf16>
    %cst_345 = arith.constant dense<0.000000e+00> : vector<16x512xf32>
    %713 = tpu.matmul %710, %712, %cst_345 {dimension_numbers = #tpu.dot_dimension_numbers<[1], [0], [0], [1], [0, 0, 1, 1], [], []>} : vector<16x128xbf16>, vector<128x512xbf16>, vector<16x512xf32> -> vector<16x512xf32>
    %714 = arith.addf %709, %713 : vector<16x512xf32>
    %715 = vector.extract_strided_slice %714 {offsets = [0, 0], sizes = [16, 384], strides = [1, 1]} : vector<16x512xf32> to vector<16x384xf32>
    %cst_346 = arith.constant 5.000000e-01 : f32
    %716 = vector.broadcast %cst_346 : f32 to vector<16x384xf32>
    %717 = arith.mulf %716, %715 : vector<16x384xf32>
    %718 = math.tanh %717 : vector<16x384xf32>
    %cst_347 = arith.constant 5.000000e-01 : f32
    %719 = vector.broadcast %cst_347 : f32 to vector<16x384xf32>
    %720 = arith.mulf %719, %718 : vector<16x384xf32>
    %cst_348 = arith.constant 5.000000e-01 : f32
    %721 = vector.broadcast %cst_348 : f32 to vector<16x384xf32>
    %722 = arith.addf %720, %721 : vector<16x384xf32>
    %723 = vector.extract_strided_slice %722 {offsets = [0, 0], sizes = [16, 128], strides = [1, 1]} : vector<16x384xf32> to vector<16x128xf32>
    %724 = vector.extract_strided_slice %722 {offsets = [0, 128], sizes = [16, 128], strides = [1, 1]} : vector<16x384xf32> to vector<16x128xf32>
    %725 = vector.extract_strided_slice %722 {offsets = [0, 256], sizes = [16, 128], strides = [1, 1]} : vector<16x384xf32> to vector<16x128xf32>
    %726 = vector.extract_strided_slice %714 {offsets = [0, 384], sizes = [16, 128], strides = [1, 1]} : vector<16x512xf32> to vector<16x128xf32>
    %727 = math.tanh %726 : vector<16x128xf32>
    %728 = arith.mulf %724, %704 : vector<16x128xf32>
    %729 = arith.mulf %723, %727 : vector<16x128xf32>
    %730 = arith.addf %728, %729 : vector<16x128xf32>
    %731 = math.tanh %730 : vector<16x128xf32>
    %732 = arith.mulf %725, %731 : vector<16x128xf32>
    %c5_i32_349 = arith.constant 5 : i32
    %733 = arith.index_cast %c5_i32_349 : i32 to index
    %c0_350 = arith.constant 0 : index
    %c0_351 = arith.constant 0 : index
    %734 = vector.load %arg10[%733, %c0_350, %c0_351] : memref<8x16x512xf32, #tpu.memory_space<vmem>>, vector<1x16x512xf32>
    %735 = vector.shape_cast %734 : vector<1x16x512xf32> to vector<16x512xf32>
    %736 = arith.truncf %732 : vector<16x128xf32> to vector<16x128xbf16>
    %c2_352 = arith.constant 2 : index
    %c0_353 = arith.constant 0 : index
    %c0_354 = arith.constant 0 : index
    %737 = vector.load %arg3[%c2_352, %c0_353, %c0_354] : memref<3x128x512xbf16, #tpu.memory_space<vmem>>, vector<1x128x512xbf16>
    %738 = vector.shape_cast %737 : vector<1x128x512xbf16> to vector<128x512xbf16>
    %cst_355 = arith.constant dense<0.000000e+00> : vector<16x512xf32>
    %739 = tpu.matmul %736, %738, %cst_355 {dimension_numbers = #tpu.dot_dimension_numbers<[1], [0], [0], [1], [0, 0, 1, 1], [], []>} : vector<16x128xbf16>, vector<128x512xbf16>, vector<16x512xf32> -> vector<16x512xf32>
    %740 = arith.addf %735, %739 : vector<16x512xf32>
    %741 = vector.extract_strided_slice %740 {offsets = [0, 0], sizes = [16, 384], strides = [1, 1]} : vector<16x512xf32> to vector<16x384xf32>
    %cst_356 = arith.constant 5.000000e-01 : f32
    %742 = vector.broadcast %cst_356 : f32 to vector<16x384xf32>
    %743 = arith.mulf %742, %741 : vector<16x384xf32>
    %744 = math.tanh %743 : vector<16x384xf32>
    %cst_357 = arith.constant 5.000000e-01 : f32
    %745 = vector.broadcast %cst_357 : f32 to vector<16x384xf32>
    %746 = arith.mulf %745, %744 : vector<16x384xf32>
    %cst_358 = arith.constant 5.000000e-01 : f32
    %747 = vector.broadcast %cst_358 : f32 to vector<16x384xf32>
    %748 = arith.addf %746, %747 : vector<16x384xf32>
    %749 = vector.extract_strided_slice %748 {offsets = [0, 0], sizes = [16, 128], strides = [1, 1]} : vector<16x384xf32> to vector<16x128xf32>
    %750 = vector.extract_strided_slice %748 {offsets = [0, 128], sizes = [16, 128], strides = [1, 1]} : vector<16x384xf32> to vector<16x128xf32>
    %751 = vector.extract_strided_slice %748 {offsets = [0, 256], sizes = [16, 128], strides = [1, 1]} : vector<16x384xf32> to vector<16x128xf32>
    %752 = vector.extract_strided_slice %740 {offsets = [0, 384], sizes = [16, 128], strides = [1, 1]} : vector<16x512xf32> to vector<16x128xf32>
    %753 = math.tanh %752 : vector<16x128xf32>
    %754 = arith.mulf %750, %730 : vector<16x128xf32>
    %755 = arith.mulf %749, %753 : vector<16x128xf32>
    %756 = arith.addf %754, %755 : vector<16x128xf32>
    %757 = math.tanh %756 : vector<16x128xf32>
    %758 = arith.mulf %751, %757 : vector<16x128xf32>
    %c6_i32_359 = arith.constant 6 : i32
    %759 = arith.index_cast %c6_i32_359 : i32 to index
    %c0_360 = arith.constant 0 : index
    %c0_361 = arith.constant 0 : index
    %760 = vector.load %arg10[%759, %c0_360, %c0_361] : memref<8x16x512xf32, #tpu.memory_space<vmem>>, vector<1x16x512xf32>
    %761 = vector.shape_cast %760 : vector<1x16x512xf32> to vector<16x512xf32>
    %762 = arith.truncf %758 : vector<16x128xf32> to vector<16x128xbf16>
    %c2_362 = arith.constant 2 : index
    %c0_363 = arith.constant 0 : index
    %c0_364 = arith.constant 0 : index
    %763 = vector.load %arg3[%c2_362, %c0_363, %c0_364] : memref<3x128x512xbf16, #tpu.memory_space<vmem>>, vector<1x128x512xbf16>
    %764 = vector.shape_cast %763 : vector<1x128x512xbf16> to vector<128x512xbf16>
    %cst_365 = arith.constant dense<0.000000e+00> : vector<16x512xf32>
    %765 = tpu.matmul %762, %764, %cst_365 {dimension_numbers = #tpu.dot_dimension_numbers<[1], [0], [0], [1], [0, 0, 1, 1], [], []>} : vector<16x128xbf16>, vector<128x512xbf16>, vector<16x512xf32> -> vector<16x512xf32>
    %766 = arith.addf %761, %765 : vector<16x512xf32>
    %767 = vector.extract_strided_slice %766 {offsets = [0, 0], sizes = [16, 384], strides = [1, 1]} : vector<16x512xf32> to vector<16x384xf32>
    %cst_366 = arith.constant 5.000000e-01 : f32
    %768 = vector.broadcast %cst_366 : f32 to vector<16x384xf32>
    %769 = arith.mulf %768, %767 : vector<16x384xf32>
    %770 = math.tanh %769 : vector<16x384xf32>
    %cst_367 = arith.constant 5.000000e-01 : f32
    %771 = vector.broadcast %cst_367 : f32 to vector<16x384xf32>
    %772 = arith.mulf %771, %770 : vector<16x384xf32>
    %cst_368 = arith.constant 5.000000e-01 : f32
    %773 = vector.broadcast %cst_368 : f32 to vector<16x384xf32>
    %774 = arith.addf %772, %773 : vector<16x384xf32>
    %775 = vector.extract_strided_slice %774 {offsets = [0, 0], sizes = [16, 128], strides = [1, 1]} : vector<16x384xf32> to vector<16x128xf32>
    %776 = vector.extract_strided_slice %774 {offsets = [0, 128], sizes = [16, 128], strides = [1, 1]} : vector<16x384xf32> to vector<16x128xf32>
    %777 = vector.extract_strided_slice %774 {offsets = [0, 256], sizes = [16, 128], strides = [1, 1]} : vector<16x384xf32> to vector<16x128xf32>
    %778 = vector.extract_strided_slice %766 {offsets = [0, 384], sizes = [16, 128], strides = [1, 1]} : vector<16x512xf32> to vector<16x128xf32>
    %779 = math.tanh %778 : vector<16x128xf32>
    %780 = arith.mulf %776, %756 : vector<16x128xf32>
    %781 = arith.mulf %775, %779 : vector<16x128xf32>
    %782 = arith.addf %780, %781 : vector<16x128xf32>
    %783 = math.tanh %782 : vector<16x128xf32>
    %784 = arith.mulf %777, %783 : vector<16x128xf32>
    %c7_i32_369 = arith.constant 7 : i32
    %785 = arith.index_cast %c7_i32_369 : i32 to index
    %c0_370 = arith.constant 0 : index
    %c0_371 = arith.constant 0 : index
    %786 = vector.load %arg10[%785, %c0_370, %c0_371] : memref<8x16x512xf32, #tpu.memory_space<vmem>>, vector<1x16x512xf32>
    %787 = vector.shape_cast %786 : vector<1x16x512xf32> to vector<16x512xf32>
    %788 = arith.truncf %784 : vector<16x128xf32> to vector<16x128xbf16>
    %c2_372 = arith.constant 2 : index
    %c0_373 = arith.constant 0 : index
    %c0_374 = arith.constant 0 : index
    %789 = vector.load %arg3[%c2_372, %c0_373, %c0_374] : memref<3x128x512xbf16, #tpu.memory_space<vmem>>, vector<1x128x512xbf16>
    %790 = vector.shape_cast %789 : vector<1x128x512xbf16> to vector<128x512xbf16>
    %cst_375 = arith.constant dense<0.000000e+00> : vector<16x512xf32>
    %791 = tpu.matmul %788, %790, %cst_375 {dimension_numbers = #tpu.dot_dimension_numbers<[1], [0], [0], [1], [0, 0, 1, 1], [], []>} : vector<16x128xbf16>, vector<128x512xbf16>, vector<16x512xf32> -> vector<16x512xf32>
    %792 = arith.addf %787, %791 : vector<16x512xf32>
    %793 = vector.extract_strided_slice %792 {offsets = [0, 0], sizes = [16, 384], strides = [1, 1]} : vector<16x512xf32> to vector<16x384xf32>
    %cst_376 = arith.constant 5.000000e-01 : f32
    %794 = vector.broadcast %cst_376 : f32 to vector<16x384xf32>
    %795 = arith.mulf %794, %793 : vector<16x384xf32>
    %796 = math.tanh %795 : vector<16x384xf32>
    %cst_377 = arith.constant 5.000000e-01 : f32
    %797 = vector.broadcast %cst_377 : f32 to vector<16x384xf32>
    %798 = arith.mulf %797, %796 : vector<16x384xf32>
    %cst_378 = arith.constant 5.000000e-01 : f32
    %799 = vector.broadcast %cst_378 : f32 to vector<16x384xf32>
    %800 = arith.addf %798, %799 : vector<16x384xf32>
    %801 = vector.extract_strided_slice %800 {offsets = [0, 0], sizes = [16, 128], strides = [1, 1]} : vector<16x384xf32> to vector<16x128xf32>
    %802 = vector.extract_strided_slice %800 {offsets = [0, 128], sizes = [16, 128], strides = [1, 1]} : vector<16x384xf32> to vector<16x128xf32>
    %803 = vector.extract_strided_slice %800 {offsets = [0, 256], sizes = [16, 128], strides = [1, 1]} : vector<16x384xf32> to vector<16x128xf32>
    %804 = vector.extract_strided_slice %792 {offsets = [0, 384], sizes = [16, 128], strides = [1, 1]} : vector<16x512xf32> to vector<16x128xf32>
    %805 = math.tanh %804 : vector<16x128xf32>
    %806 = arith.mulf %802, %782 : vector<16x128xf32>
    %807 = arith.mulf %801, %805 : vector<16x128xf32>
    %808 = arith.addf %806, %807 : vector<16x128xf32>
    %809 = math.tanh %808 : vector<16x128xf32>
    %810 = arith.mulf %803, %809 : vector<16x128xf32>
    %c7_i32_379 = arith.constant 7 : i32
    %811 = arith.truncf %810 : vector<16x128xf32> to vector<16x128xbf16>
    %c0_380 = arith.constant 0 : index
    %c0_381 = arith.constant 0 : index
    %812 = vector.load %arg5[%c0_380, %c0_381] : memref<128x64xbf16, #tpu.memory_space<vmem>>, vector<128x64xbf16>
    %cst_382 = arith.constant dense<0.000000e+00> : vector<16x64xf32>
    %813 = tpu.matmul %811, %812, %cst_382 {dimension_numbers = #tpu.dot_dimension_numbers<[1], [0], [0], [1], [0, 0, 1, 1], [], []>} : vector<16x128xbf16>, vector<128x64xbf16>, vector<16x64xf32> -> vector<16x64xf32>
    %c0_383 = arith.constant 0 : index
    %c0_384 = arith.constant 0 : index
    %814 = vector.load %arg6[%c0_383, %c0_384] : memref<1x64xf32, #tpu.memory_space<vmem>>, vector<1x64xf32>
    %815 = vector.broadcast %814 : vector<1x64xf32> to vector<16x64xf32>
    %816 = arith.addf %813, %815 : vector<16x64xf32>
    %817 = arith.truncf %816 : vector<16x64xf32> to vector<16x64xbf16>
    %c0_385 = arith.constant 0 : index
    %c0_386 = arith.constant 0 : index
    %818 = vector.load %arg7[%c0_385, %c0_386] : memref<64x128xbf16, #tpu.memory_space<vmem>>, vector<64x128xbf16>
    %cst_387 = arith.constant dense<0.000000e+00> : vector<16x128xf32>
    %819 = tpu.matmul %817, %818, %cst_387 {dimension_numbers = #tpu.dot_dimension_numbers<[1], [0], [0], [1], [0, 0, 1, 1], [], []>} : vector<16x64xbf16>, vector<64x128xbf16>, vector<16x128xf32> -> vector<16x128xf32>
    %c0_388 = arith.constant 0 : index
    %c0_389 = arith.constant 0 : index
    %820 = vector.load %arg8[%c0_388, %c0_389] : memref<1x128xf32, #tpu.memory_space<vmem>>, vector<1x128xf32>
    %821 = vector.broadcast %820 : vector<1x128xf32> to vector<16x128xf32>
    %822 = arith.addf %819, %821 : vector<16x128xf32>
    %c0_390 = arith.constant 0 : index
    %c0_391 = arith.constant 0 : index
    %823 = vector.load %arg9[%c0_390, %c0_391] : memref<16x128xf32, #tpu.memory_space<vmem>>, vector<16x128xf32>
    tpu.vector_store %arg9[%c0_390, %c0_391], %822 {strides = array<i32>} : memref<16x128xf32, #tpu.memory_space<vmem>>, vector<16x128xf32>,
    return
  }
}

</mosaic_0001>

<bundles_post_ra>
// kernel: custom_lstm_forward.1
= control target key start
LH: loop header
LB: loop body
LE: loop exit
PB: predicated region body
PF: predicated region fallthrough
CT: control target
= control target key end

     0   :  { %14 = vsyncpa [#allocation5], 0  ;;  %s17018_s0 = inlined_call_operand.vmem [shape: f32[8,16,1], index: 0, kind: input, shape index: {}]   ;;  %s17019_s1 = inlined_call_operand.vmem [shape: f32[1,512], index: 1, kind: input, shape index: {}]   ;;  %s17020_s2 = inlined_call_operand.hbm [shape: bf16[2,128,512], index: 2, kind: input, shape index: {}]   ;;  %s17021_s3 = inlined_call_operand.hbm [shape: bf16[3,128,512], index: 3, kind: input, shape index: {}]   ;;  %s17022_s4 = inlined_call_operand.vmem [shape: f32[3,1,512], index: 4, kind: input, shape index: {}]   ;;  %s17023_s5 = inlined_call_operand.vmem [shape: bf16[128,64], index: 5, kind: input, shape index: {}]   ;;  %s17024_s6 = inlined_call_operand.vmem [shape: f32[1,64], index: 6, kind: input, shape index: {}]   ;;  %s17025_s7 = inlined_call_operand.vmem [shape: bf16[64,128], index: 7, kind: input, shape index: {}]   ;;  %s17026_s8 = inlined_call_operand.vmem [shape: f32[1,128], index: 8, kind: input, shape index: {}]   ;;  %s17027_s9 = inlined_call_operand.vmem [shape: f32[16,128], index: 9, kind: output, shape index: {}]  }
   0x1   :  { %15 = vsyncpa [#allocation7], 0  ;;  %s13975_s30 = smov [#allocation4]  }
   0x2   :  { %s25_s10 = sshll.u32 %s13975_s30, 4  ;;  %s26_s10 = int_to_ptr.vmem [resolvable:$true] %s25_s10 }
   0x3   :  { %s13939_s11 = scalar_lea.vmem %s26_s10, 8192  ;;  %p13944_p1 = scmp.lt.s32.totalorder %s26_s10, %s26_s10 }
   0x4   :  { %p13940_p0 = scmp.ne.s32.totalorder %s26_s10, %s13939_s11  ;;  %p13945_p2 = scmp.lt.s32.totalorder %s13939_s11, %s13939_s11 }
   0x6   :  { %p13946_p3 = por %p13945_p2, %p13944_p1 }
   0x8   :  { %p13947_p4 = pnand %p13946_p3, %p13940_p0 }
   0xa   :  { %13950 = shalt.err (!%p13947_p4)
}
   0xb   :  { %s13976_s12 = smov 256   ;;  %s13977_s13 = smov 16  }
   0xc   :  { %31 = dma.hbm_to_vmem [thread:$0]  %s17020_s2, 8192, %s26_s10, [#allocation5], %s13976_s12, %s13976_s12, %s13977_s13  }
   0xd   :  { %s13978_s16 = smov [#allocation6]  }
   0xe   :  { %s37_s17 = sshll.u32 %s13978_s16, 4  ;;  %s38_s17 = int_to_ptr.vmem [resolvable:$true] %s37_s17 }
   0xf   :  { %s13959_s18 = scalar_lea.vmem %s38_s17, 12288  ;;  %p13964_p6 = scmp.lt.s32.totalorder %s38_s17, %s38_s17 }
  0x10   :  { %p13960_p5 = scmp.ne.s32.totalorder %s38_s17, %s13959_s18  ;;  %p13965_p7 = scmp.lt.s32.totalorder %s13959_s18, %s13959_s18 }
  0x12   :  { %p13966_p8 = por %p13965_p7, %p13964_p6 }
  0x14   :  { %p13967_p9 = pnand %p13966_p8, %p13960_p5 }
  0x16   :  { %13970 = shalt.err (!%p13967_p9)
}
  0x17   :  { %43 = dma.hbm_to_vmem [thread:$0]  %s17021_s3, 12288, %s38_s17, [#allocation7], %s13976_s12, %s13976_s12, %s13977_s13  }
  0x18   :  { %13971 = dma.done.wait [#allocation5], 8192  }
  0x19   :  { %13972 = vsyncadd [#allocation5], 4294959104 }
  0x1a   :  { %13973 = dma.done.wait [#allocation7], 12288  }
  0x1b   :  { %13974 = vsyncadd [#allocation7], 4294955008  ;;  %v17028_v0 = vmov 0   ;;  %v61_v1 = vld [vmem:[%s17018_s0] sm:$0xff]  ;;  %v62_v2 = vld [vmem:[%s17018_s0 + $0x8] sm:$0xff]  ;;  %v159_v51 = vlaneseq  ;;  %vm13981_vm0 = vmmov 0  }
  0x1c   :  { %12555 = vset.pattern.permute.xlu0 %v17028_v0  ;;  %685 = vmatprep.mubr.bf16.mxu0 %v17028_v0  ;;  %v65_v3 = vld [vmem:[%s17018_s0 + $0x20] sm:$0xff]  ;;  %v67_v4 = vld [vmem:[%s17018_s0 + $0x30] sm:$0xff]  ;;  %v12559_v7 = vld [vmem:[#allocation4 + $0xec] ss:$16 sps:$4 sm:$0xff]   ;;  %vm11426_vm1 = vcmask 523264  }
  0x1d   :  { %728 = vmatprep.mubr.bf16.mxu1 %v17028_v0  ;;  %12556 = vset.pattern.permute.xlu1 %v17028_v0  ;;  %v69_v5 = vld [vmem:[%s17018_s0 + $0x40] sm:$0xff]  ;;  %v71_v8 = vld [vmem:[%s17018_s0 + $0x50] sm:$0xff]  ;;  %v12562_v10 = vld [vmem:[#allocation4 + $0xe8] ss:$16 sps:$4 sm:$0xff]   ;;  %v160_v52 = vshrl.u32 %v159_v51, 7 }
  0x1e   :  { %80 = vperm.xlu0 %12555, %v61_v1   ;;  %v12557_v6 = vld [vmem:[#allocation4 + $0xe4] ss:$16 sps:$4 sm:$0xff]   ;;  %v12561_v9 = vld [vmem:[#allocation4 + $0xe0] ss:$16 sps:$4 sm:$0xff]   ;;  %696 = vmatprep.subr.bf16.mxu1 %v12559_v7  ;;  %v12565_v12 = vld [vmem:[#allocation4 + $0xcc] ss:$16 sps:$4 sm:$0xff]  }
  0x1f   :  { %653 = vmatprep.subr.bf16.mxu0 %v12557_v6  ;;  %697 = vmatpush1.bf16.msra.mxu1 %v12562_v10  ;;  %v12563_v11 = vld [vmem:[#allocation4 + $0xc4] ss:$16 sps:$4 sm:$0xff]   ;;  %v12567_v14 = vld [vmem:[#allocation4 + $0xc0] ss:$16 sps:$4 sm:$0xff]   ;;  %v12568_v15 = vld [vmem:[#allocation4 + $0xc8] ss:$16 sps:$4 sm:$0xff]  }
  0x20   :  { %654 = vmatpush1.bf16.msra.mxu0 %v12561_v9  ;;  %v73_v13 = vld [vmem:[%s17018_s0 + $0x60] sm:$0xff]  ;;  %698 = vmatprep.subr.bf16.mxu1 %v12565_v12  ;;  %v12571_v17 = vld [vmem:[#allocation4 + $0xac] ss:$16 sps:$4 sm:$0xff]   ;;  %v75_v18 = vld [vmem:[%s17018_s0 + $0x70] sm:$0xff]  ;;  %v14093_v54 = vsub.s32 0, %v160_v52  ;;  %v14095_v55 = vsub.s32 1, %v160_v52 }
  0x21   :  { %655 = vmatprep.subr.bf16.mxu0 %v12563_v11  ;;  %v12569_v16 = vld [vmem:[#allocation4 + $0xa4] ss:$16 sps:$4 sm:$0xff]   ;;  %v12573_v19 = vld [vmem:[#allocation4 + $0xa0] ss:$16 sps:$4 sm:$0xff]   ;;  %v12574_v20 = vld [vmem:[#allocation4 + $0xa8] ss:$16 sps:$4 sm:$0xff]  }
  0x22   :  { %85 = vperm.xlu0 %12555, %v62_v2   ;;  %v12575_v21 = vld [vmem:[#allocation4 + $0x84] ss:$16 sps:$4 sm:$0xff]   ;;  %v12577_v22 = vld [vmem:[#allocation4 + $0x8c] ss:$16 sps:$4 sm:$0xff]   ;;  %v12579_v23 = vld [vmem:[#allocation4 + $0x80] ss:$16 sps:$4 sm:$0xff]  }
  0x23   :  { %699 = vmatpush1.bf16.msra.mxu1 %v12568_v15  ;;  %v12580_v24 = vld [vmem:[#allocation4 + $0x88] ss:$16 sps:$4 sm:$0xff]   ;;  %v12581_v25 = vld [vmem:[#allocation4 + $0x64] ss:$16 sps:$4 sm:$0xff]   ;;  %v12583_v26 = vld [vmem:[#allocation4 + $0x6c] ss:$16 sps:$4 sm:$0xff]  }
  0x24   :  { %656 = vmatpush1.bf16.msra.mxu0 %v12567_v14  ;;  %700 = vmatprep.subr.bf16.mxu1 %v12571_v17  ;;  %v12585_v27 = vld [vmem:[#allocation4 + $0x60] ss:$16 sps:$4 sm:$0xff]   ;;  %v12586_v28 = vld [vmem:[#allocation4 + $0x68] ss:$16 sps:$4 sm:$0xff]   ;;  %v12587_v29 = vld [vmem:[#allocation4 + $0x44] ss:$16 sps:$4 sm:$0xff]  }
  0x25   :  { %657 = vmatprep.subr.bf16.mxu0 %v12569_v16  ;;  %v12589_v30 = vld [vmem:[#allocation4 + $0x4c] ss:$16 sps:$4 sm:$0xff]   ;;  %v12591_v31 = vld [vmem:[#allocation4 + $0x40] ss:$16 sps:$4 sm:$0xff]   ;;  %v12592_v32 = vld [vmem:[#allocation4 + $0x48] ss:$16 sps:$4 sm:$0xff]  }
  0x26   :  { %100 = vperm.xlu0 %12555, %v65_v3   ;;  %v12593_v33 = vld [vmem:[#allocation4 + $0x24] ss:$16 sps:$4 sm:$0xff]   ;;  %v12595_v34 = vld [vmem:[#allocation4 + $0x2c] ss:$16 sps:$4 sm:$0xff]   ;;  %v12597_v35 = vld [vmem:[#allocation4 + $0x20] ss:$16 sps:$4 sm:$0xff]  }
  0x27   :  { %701 = vmatpush1.bf16.msra.mxu1 %v12574_v20  ;;  %v12598_v36 = vld [vmem:[#allocation4 + $0x28] ss:$16 sps:$4 sm:$0xff]   ;;  %v12599_v37 = vld [vmem:[#allocation4 + $0x4] ss:$16 sps:$4 sm:$0xff]   ;;  %v12601_v38 = vld [vmem:[#allocation4 + $0xc] ss:$16 sps:$4 sm:$0xff]  }
  0x28   :  { %658 = vmatpush1.bf16.msra.mxu0 %v12573_v19  ;;  %702 = vmatprep.subr.bf16.mxu1 %v12577_v22  ;;  %v12603_v39 = vld [vmem:[#allocation4] ss:$16 sps:$4 sm:$0xff]   ;;  %v12604_v40 = vld [vmem:[#allocation4 + $0x8] ss:$16 sps:$4 sm:$0xff]   ;;  %v12607_v41 = vld [vmem:[#allocation6 + $0xe4] ss:$16 sps:$4 sm:$0xff]  }
  0x29   :  { %659 = vmatprep.subr.bf16.mxu0 %v12575_v21  ;;  %v12610_v42 = vld [vmem:[#allocation6 + $0xec] ss:$16 sps:$4 sm:$0xff]   ;;  %v63_v43 = vld [vmem:[%s17018_s0 + $0x10] sm:$0xff]  ;;  %v77_v53 = vld [vmem:[%s17019_s1] sm:$0xf]  ;;  %17100 = vst [vmem:[#allocation10_spill] sm:$0xff] %v14093_v54 }
  0x2a   :  { %110 = vperm.xlu0 %12555, %v67_v4   ;;  %90 = vperm.xlu1 %12556, %v63_v43   ;;  %v64_v44 = vld [vmem:[%s17018_s0 + $0x18] sm:$0xff]  ;;  %v66_v45 = vld [vmem:[%s17018_s0 + $0x28] sm:$0xff]  ;;  %17101 = vst [vmem:[#allocation11_spill] sm:$0xff] %v14095_v55  ;;  %v243_v56 = vld [vmem:[%s17022_s4] sm:$0xf]  ;;  %v14100_v57 = vsub.s32 3, %v160_v52  ;;  %v14103_v58 = vrot.slane %v77_v53, %v14093_v54  ;;  %v14106_v59 = vrot.slane %v77_v53, %v14095_v55 }
  0x2b   :  { %703 = vmatpush1.bf16.msra.mxu1 %v12580_v24  ;;  %v68_v46 = vld [vmem:[%s17018_s0 + $0x38] sm:$0xff]  ;;  %v70_v47 = vld [vmem:[%s17018_s0 + $0x48] sm:$0xff]  ;;  %v14112_v61 = vrot.slane %v243_v56, %v14093_v54  ;;  %v14115_v62 = vrot.slane %v243_v56, %v14095_v55  ;;  %v14125_v10 = vsub.s32 2, %v160_v52 }
  0x2c   :  { %660 = vmatpush1.bf16.msra.mxu0 %v12579_v23  ;;  %704 = vmatprep.subr.bf16.mxu1 %v12583_v26  ;;  %v72_v48 = vld [vmem:[%s17018_s0 + $0x58] sm:$0xff]  ;;  %v74_v49 = vld [vmem:[%s17018_s0 + $0x68] sm:$0xff]  ;;  %17102 = vst [vmem:[#allocation12_spill] sm:$0xff] %v14100_v57  ;;  %17103 = vst [vmem:[#allocation13_spill] sm:$0xff] %v14103_v58  ;;  %v14109_v60 = vrot.slane %v77_v53, %v14100_v57  ;;  %v14120_v3 = vrot.slane %v243_v56, %v14100_v57 }
  0x2d   :  { %661 = vmatprep.subr.bf16.mxu0 %v12581_v25  ;;  %v76_v50 = vld [vmem:[%s17018_s0 + $0x78] sm:$0xff]  ;;  %17104 = vst [vmem:[#allocation14_spill] sm:$0xff] %v14106_v59  ;;  %17106 = vst [vmem:[#allocation16_spill] sm:$0xff] %v14112_v61  ;;  %v14134_v17 = vrot.slane %v77_v53, %v14125_v10  ;;  %v14138_v21 = vrot.slane %v243_v56, %v14125_v10 }
  0x2e   :  { %120 = vperm.xlu0 %12555, %v69_v5   ;;  %95 = vperm.xlu1 %12556, %v64_v44   ;;  %17105 = vst [vmem:[#allocation15_spill] sm:$0xff] %v14109_v60  ;;  %17107 = vst [vmem:[#allocation17_spill] sm:$0xff] %v14125_v10 }
  0x2f   :  { %705 = vmatpush1.bf16.msra.mxu1 %v12586_v28 }
  0x30   :  { %662 = vmatpush1.bf16.msra.mxu0 %v12585_v27  ;;  %706 = vmatprep.subr.bf16.mxu1 %v12589_v30 }
  0x31   :  { %663 = vmatprep.subr.bf16.mxu0 %v12587_v29 }
  0x32   :  { %130 = vperm.xlu0 %12555, %v71_v8   ;;  %105 = vperm.xlu1 %12556, %v66_v45  }
  0x33   :  { %707 = vmatpush1.bf16.msra.mxu1 %v12592_v32 }
  0x34   :  { %664 = vmatpush1.bf16.msra.mxu0 %v12591_v31  ;;  %708 = vmatprep.subr.bf16.mxu1 %v12595_v34 }
  0x35   :  { %665 = vmatprep.subr.bf16.mxu0 %v12593_v33 }
  0x36   :  { %140 = vperm.xlu0 %12555, %v73_v13   ;;  %115 = vperm.xlu1 %12556, %v68_v46  }
  0x37   :  { %709 = vmatpush1.bf16.msra.mxu1 %v12598_v36 }
  0x38   :  { %666 = vmatpush1.bf16.msra.mxu0 %v12597_v35  ;;  %710 = vmatprep.subr.bf16.mxu1 %v12601_v38 }
  0x39   :  { %667 = vmatprep.subr.bf16.mxu0 %v12599_v37 }
  0x3a   :  { %150 = vperm.xlu0 %12555, %v75_v18   ;;  %125 = vperm.xlu1 %12556, %v70_v47  }
  0x3b   :  { %711 = vmatpush1.bf16.msra.mxu1 %v12604_v40 }
  0x3c   :  { %668 = vmatpush1.bf16.msra.mxu0 %v12603_v39  ;;  %991 = vmatprep.subr.bf16.mxu1 %v12610_v42 }
  0x3d   :  { %948 = vmatprep.subr.bf16.mxu0 %v12607_v41 }
  0x3e   :  { %135 = vperm.xlu1 %12556, %v72_v48  }
  0x42   :  { %145 = vperm.xlu1 %12556, %v74_v49  }
  0x46   :  { %155 = vperm.xlu1 %12556, %v76_v50  }
  0x99   :  { %v81_v63 = vpop.permute.xlu0 %80 }
  0x9a   :  { %v179_v1 = vmul.f32 %v14103_v58, %v81_v63  ;;  %v180_v2 = vmul.f32 %v14106_v59, %v81_v63  ;;  %v182_v4 = vmul.f32 %v14109_v60, %v81_v63  ;;  %v181_v22 = vmul.f32 %v14134_v17, %v81_v63 }
  0x9c   :  { %v265_v5 = vadd.f32 %v14112_v61, %v179_v1  ;;  %v266_v6 = vadd.f32 %v14115_v62, %v180_v2  ;;  %v268_v13 = vadd.f32 %v14120_v3, %v182_v4  ;;  %v267_v24 = vadd.f32 %v14138_v21, %v181_v22  ;;  %v14150_v1 = vld [vmem:[#allocation6 + $0xe0] ss:$16 sps:$4 sm:$0xff]   ;;  %v14152_v2 = vld [vmem:[#allocation6 + $0xe8] ss:$16 sps:$4 sm:$0xff]   ;;  %v14192_v22 = vld [vmem:[#allocation6 + $0x64] ss:$16 sps:$4 sm:$0xff]  }
  0x9d   :  { %v86_v7 = vpop.permute.xlu0 %85 }
  0x9e   :  { %v401_v8 = vmul.f32 0.5, %v265_v5  ;;  %v402_v9 = vmul.f32 0.5, %v266_v6  ;;  %v183_v11 = vmul.f32 %v14103_v58, %v86_v7  ;;  %v184_v12 = vmul.f32 %v14106_v59, %v86_v7  ;;  %v14154_v6 = vld [vmem:[#allocation6 + $0xc4] ss:$16 sps:$4 sm:$0xff]  }
  0x9f   :  { %v186_v14 = vmul.f32 %v14109_v60, %v86_v7  ;;  %v185_v23 = vmul.f32 %v14134_v17, %v86_v7  ;;  %v403_v29 = vmul.f32 0.5, %v267_v24  ;;  %v14156_v7 = vld [vmem:[#allocation6 + $0xcc] ss:$16 sps:$4 sm:$0xff]   ;;  %v14200_v24 = vld [vmem:[#allocation6 + $0x60] ss:$16 sps:$4 sm:$0xff]  }
  0xa0   :  { %13385 = vtanh.f32 %v401_v8  ;;  %v269_v15 = vadd.f32 %v14112_v61, %v183_v11  ;;  %v270_v16 = vadd.f32 %v14115_v62, %v184_v12  ;;  %v14162_v11 = vld [vmem:[#allocation6 + $0xc8] ss:$16 sps:$4 sm:$0xff]   ;;  %v14166_v12 = vld [vmem:[#allocation6 + $0xa4] ss:$16 sps:$4 sm:$0xff]  }
  0xa1   :  { %13387 = vtanh.f32 %v402_v9  ;;  %v272_v20 = vadd.f32 %v14120_v3, %v186_v14  ;;  %v271_v25 = vadd.f32 %v14138_v21, %v185_v23  ;;  %v14160_v9 = vld [vmem:[#allocation6 + $0xc0] ss:$16 sps:$4 sm:$0xff]   ;;  %v14194_v23 = vld [vmem:[#allocation6 + $0x6c] ss:$16 sps:$4 sm:$0xff]  }
  0xa2   :  { %v404_v18 = vmul.f32 0.5, %v269_v15  ;;  %v405_v19 = vmul.f32 0.5, %v270_v16  ;;  %13389 = vtanh.f32 %v268_v13  ;;  %v14168_v13 = vld [vmem:[#allocation6 + $0xac] ss:$16 sps:$4 sm:$0xff]   ;;  %v14174_v14 = vld [vmem:[#allocation6 + $0xa0] ss:$16 sps:$4 sm:$0xff]  }
  0xa3   :  { %v406_v32 = vmul.f32 0.5, %v271_v25  ;;  %v14176_v15 = vld [vmem:[#allocation6 + $0xa8] ss:$16 sps:$4 sm:$0xff]   ;;  %v14180_v16 = vld [vmem:[#allocation6 + $0x84] ss:$16 sps:$4 sm:$0xff]  }
  0xa4   :  { %13391 = vtanh.f32 %v404_v18  ;;  %v14182_v18 = vld [vmem:[#allocation6 + $0x8c] ss:$16 sps:$4 sm:$0xff]   ;;  %v14202_v25 = vld [vmem:[#allocation6 + $0x68] ss:$16 sps:$4 sm:$0xff]  }
  0xa5   :  { %13393 = vtanh.f32 %v405_v19  ;;  %v14188_v19 = vld [vmem:[#allocation6 + $0x80] ss:$16 sps:$4 sm:$0xff]  }
  0xa6   :  { %13395 = vtanh.f32 %v272_v20  ;;  %v14190_v20 = vld [vmem:[#allocation6 + $0x88] ss:$16 sps:$4 sm:$0xff]  }
  0xa7   :  { %13397 = vtanh.f32 %v403_v29  ;;  %v14214_v29 = vld [vmem:[#allocation6 + $0x48] ss:$16 sps:$4 sm:$0xff]  }
  0xa8   :  { %13399 = vtanh.f32 %v406_v32  ;;  %v14224_v32 = vld [vmem:[#allocation6 + $0x20] ss:$16 sps:$4 sm:$0xff]  }
  0xad   :  { %v13386_v26 = vpop.eup %13385 }
  0xae   :  { %v13388_v27 = vpop.eup %13387  ;;  %v413_v28 = vmul.f32 0.5, %v13386_v26  ;;  %v14204_v26 = vld [vmem:[#allocation6 + $0x44] ss:$16 sps:$4 sm:$0xff]  }
  0xaf   :  { %v414_v30 = vmul.f32 0.5, %v13388_v27  ;;  %v13390_v33 = vpop.eup %13389  ;;  %v14206_v27 = vld [vmem:[#allocation6 + $0x4c] ss:$16 sps:$4 sm:$0xff]  }
  0xb0   :  { %v419_v31 = vadd.f32 0.5, %v413_v28  ;;  %v14212_v28 = vld [vmem:[#allocation6 + $0x40] ss:$16 sps:$4 sm:$0xff]  }
  0xb1   :  { %v420_v34 = vadd.f32 0.5, %v414_v30  ;;  %v13392_v35 = vpop.eup %13391  ;;  %v14216_v30 = vld [vmem:[#allocation6 + $0x24] ss:$16 sps:$4 sm:$0xff]  }
  0xb2   :  { %v429_v36 = vmul.f32 %v13390_v33, %v419_v31  ;;  %v13394_v37 = vpop.eup %13393  ;;  %v416_v39 = vmul.f32 0.5, %v13392_v35  ;;  %v14218_v31 = vld [vmem:[#allocation6 + $0x2c] ss:$16 sps:$4 sm:$0xff]   ;;  %v14226_v33 = vld [vmem:[#allocation6 + $0x28] ss:$16 sps:$4 sm:$0xff]  }
  0xb3   :  { %v427_v38 = vmul.f32 0.0, %v420_v34  ;;  %v417_v40 = vmul.f32 0.5, %v13394_v37  ;;  %v13396_v42 = vpop.eup %13395  ;;  %v14228_v34 = vld [vmem:[#allocation6 + $0x4] ss:$16 sps:$4 sm:$0xff]   ;;  %v14230_v35 = vld [vmem:[#allocation6 + $0xc] ss:$16 sps:$4 sm:$0xff]  }
  0xb4   :  { %v422_v41 = vadd.f32 0.5, %v416_v39  ;;  %v13398_v48 = vpop.eup %13397  ;;  %v14238_v37 = vld [vmem:[#allocation6 + $0x8] ss:$16 sps:$4 sm:$0xff]   ;;  %v13866_v39 = vld [vmem:[#allocation4 + $0xec] ss:$16 sps:$4 sm:$0xff]  }
  0xb5   :  { %v14144_v43 = vadd.f32 %v429_v36, %v427_v38  ;;  %v423_v44 = vadd.f32 0.5, %v417_v40  ;;  %v13400_v49 = vpop.eup %13399  ;;  %v415_v50 = vmul.f32 0.5, %v13398_v48  ;;  %v14236_v36 = vld [vmem:[#allocation6] ss:$16 sps:$4 sm:$0xff]   ;;  %v13865_v38 = vld [vmem:[#allocation4 + $0xe4] ss:$16 sps:$4 sm:$0xff]  }
  0xb6   :  { %v430_v45 = vmul.f32 %v13396_v42, %v422_v41  ;;  %v418_v51 = vmul.f32 0.5, %v13400_v49  ;;  %v13867_v40 = vld [vmem:[#allocation4 + $0xe0] ss:$16 sps:$4 sm:$0xff]   ;;  %v13868_v41 = vld [vmem:[#allocation4 + $0xe8] ss:$16 sps:$4 sm:$0xff]  }
  0xb7   :  { %v428_v46 = vmul.f32 0.0, %v423_v44  ;;  %13401 = vtanh.f32 %v14144_v43  ;;  %v421_v53 = vadd.f32 0.5, %v415_v50  ;;  %v13869_v42 = vld [vmem:[#allocation4 + $0xc4] ss:$16 sps:$4 sm:$0xff]   ;;  %v13870_v44 = vld [vmem:[#allocation4 + $0xcc] ss:$16 sps:$4 sm:$0xff]  }
  0xb8   :  { %v424_v56 = vadd.f32 0.5, %v418_v51  ;;  %v13873_v48 = vld [vmem:[#allocation4 + $0xa4] ss:$16 sps:$4 sm:$0xff]   ;;  %v13874_v49 = vld [vmem:[#allocation4 + $0xac] ss:$16 sps:$4 sm:$0xff]  }
  0xb9   :  { %v14147_v47 = vadd.f32 %v430_v45, %v428_v46  ;;  %v13871_v45 = vld [vmem:[#allocation4 + $0xc0] ss:$16 sps:$4 sm:$0xff]   ;;  %v13872_v46 = vld [vmem:[#allocation4 + $0xc8] ss:$16 sps:$4 sm:$0xff]  }
  0xba   :  { %v13875_v50 = vld [vmem:[#allocation4 + $0xa0] ss:$16 sps:$4 sm:$0xff]   ;;  %v13876_v51 = vld [vmem:[#allocation4 + $0xa8] ss:$16 sps:$4 sm:$0xff]  }
  0xbb   :  { %13403 = vtanh.f32 %v14147_v47 }
  0xc4   :  { %v13402_v52 = vpop.eup %13401 }
  0xc5   :  { %v435_v4 = vmul.f32 %v13402_v52, %v421_v53  ;;  %v13877_v52 = vld [vmem:[#allocation4 + $0x84] ss:$16 sps:$4 sm:$0xff]   ;;  %v13878_v53 = vld [vmem:[#allocation4 + $0x8c] ss:$16 sps:$4 sm:$0xff]  }
  0xc8   :  { %v13404_v63 = vpop.eup %13403 }
  0xc9   :  { %v436_v5 = vmul.f32 %v13404_v63, %v424_v56  ;;  %v13879_v56 = vld [vmem:[#allocation4 + $0x80] ss:$16 sps:$4 sm:$0xff]   ;;  %v13880_v63 = vld [vmem:[#allocation4 + $0x88] ss:$16 sps:$4 sm:$0xff]  }
  0xcb   :  { %v14158_v8 = vpack.c.bf16 %v436_v5, %v435_v4  ;;  %v13881_v4 = vld [vmem:[#allocation4 + $0x64] ss:$16 sps:$4 sm:$0xff]   ;;  %v13882_v5 = vld [vmem:[#allocation4 + $0x6c] ss:$16 sps:$4 sm:$0xff]  }
  0xcd   :  { %686 = vmatmul.mubr.bf16.vlgmr.msra.gmra.mxu0 %v14158_v8  ;;  %729 = vmatmul.mubr.bf16.vlgmr.msra.gmra.mxu1 %v14158_v8 }
  0xce   :  { %949 = vmatpush1.bf16.msra.mxu0 %v14150_v1  ;;  %992 = vmatpush1.bf16.msra.mxu1 %v14152_v2 }
  0xcf   :  { %950 = vmatprep.subr.bf16.mxu0 %v14154_v6  ;;  %993 = vmatprep.subr.bf16.mxu1 %v14156_v7 }
  0xd0   :  { %980 = vmatprep.mubr.bf16.mxu0 %v17028_v0  ;;  %1023 = vmatprep.mubr.bf16.mxu1 %v17028_v0 }
  0xd2   :  { %951 = vmatpush1.bf16.msra.mxu0 %v14160_v9  ;;  %994 = vmatpush1.bf16.msra.mxu1 %v14162_v11 }
  0xd3   :  { %952 = vmatprep.subr.bf16.mxu0 %v14166_v12  ;;  %995 = vmatprep.subr.bf16.mxu1 %v14168_v13 }
  0xd6   :  { %953 = vmatpush1.bf16.msra.mxu0 %v14174_v14  ;;  %996 = vmatpush1.bf16.msra.mxu1 %v14176_v15 }
  0xd7   :  { %954 = vmatprep.subr.bf16.mxu0 %v14180_v16  ;;  %997 = vmatprep.subr.bf16.mxu1 %v14182_v18 }
  0xda   :  { %955 = vmatpush1.bf16.msra.mxu0 %v14188_v19  ;;  %998 = vmatpush1.bf16.msra.mxu1 %v14190_v20 }
  0xdb   :  { %956 = vmatprep.subr.bf16.mxu0 %v14192_v22  ;;  %999 = vmatprep.subr.bf16.mxu1 %v14194_v23 }
  0xde   :  { %957 = vmatpush1.bf16.msra.mxu0 %v14200_v24  ;;  %1000 = vmatpush1.bf16.msra.mxu1 %v14202_v25 }
  0xdf   :  { %958 = vmatprep.subr.bf16.mxu0 %v14204_v26  ;;  %1001 = vmatprep.subr.bf16.mxu1 %v14206_v27 }
  0xe2   :  { %959 = vmatpush1.bf16.msra.mxu0 %v14212_v28  ;;  %1002 = vmatpush1.bf16.msra.mxu1 %v14214_v29 }
  0xe3   :  { %960 = vmatprep.subr.bf16.mxu0 %v14216_v30  ;;  %1003 = vmatprep.subr.bf16.mxu1 %v14218_v31 }
  0xe6   :  { %961 = vmatpush1.bf16.msra.mxu0 %v14224_v32  ;;  %1004 = vmatpush1.bf16.msra.mxu1 %v14226_v33 }
  0xe7   :  { %962 = vmatprep.subr.bf16.mxu0 %v14228_v34  ;;  %1005 = vmatprep.subr.bf16.mxu1 %v14230_v35 }
  0xea   :  { %963 = vmatpush1.bf16.msra.mxu0 %v14236_v36  ;;  %1006 = vmatpush1.bf16.msra.mxu1 %v14238_v37 }
  0xeb   :  { %1293 = vmatprep.subr.bf16.mxu0 %v13865_v38  ;;  %1336 = vmatprep.subr.bf16.mxu1 %v13866_v39  ;;  %v13884_v38 = vld [vmem:[#allocation4 + $0x68] ss:$16 sps:$4 sm:$0xff]   ;;  %v13885_v39 = vld [vmem:[#allocation4 + $0x44] ss:$16 sps:$4 sm:$0xff]  }
  0xed   :  { %981 = vmatmul.mubr.bf16.vlgmr.msra.gmra.mxu0 %v14158_v8  ;;  %1024 = vmatmul.mubr.bf16.vlgmr.msra.gmra.mxu1 %v14158_v8  ;;  %v13883_v8 = vld [vmem:[#allocation4 + $0x60] ss:$16 sps:$4 sm:$0xff]  }
  0xee   :  { %1294 = vmatpush1.bf16.msra.mxu0 %v13867_v40  ;;  %1337 = vmatpush1.bf16.msra.mxu1 %v13868_v41  ;;  %v13886_v40 = vld [vmem:[#allocation4 + $0x4c] ss:$16 sps:$4 sm:$0xff]   ;;  %v13887_v41 = vld [vmem:[#allocation4 + $0x40] ss:$16 sps:$4 sm:$0xff]  }
  0xef   :  { %1295 = vmatprep.subr.bf16.mxu0 %v13869_v42  ;;  %1338 = vmatprep.subr.bf16.mxu1 %v13870_v44  ;;  %v13888_v42 = vld [vmem:[#allocation4 + $0x48] ss:$16 sps:$4 sm:$0xff]   ;;  %v13889_v44 = vld [vmem:[#allocation4 + $0x24] ss:$16 sps:$4 sm:$0xff]  }
  0xf0   :  { %1325 = vmatprep.mubr.bf16.mxu0 %v17028_v0  ;;  %1368 = vmatprep.mubr.bf16.mxu1 %v17028_v0 }
  0xf2   :  { %1296 = vmatpush1.bf16.msra.mxu0 %v13871_v45  ;;  %1339 = vmatpush1.bf16.msra.mxu1 %v13872_v46  ;;  %v13890_v45 = vld [vmem:[#allocation4 + $0x2c] ss:$16 sps:$4 sm:$0xff]   ;;  %v13891_v46 = vld [vmem:[#allocation4 + $0x20] ss:$16 sps:$4 sm:$0xff]  }
  0xf3   :  { %1297 = vmatprep.subr.bf16.mxu0 %v13873_v48  ;;  %1340 = vmatprep.subr.bf16.mxu1 %v13874_v49  ;;  %v13892_v48 = vld [vmem:[#allocation4 + $0x28] ss:$16 sps:$4 sm:$0xff]   ;;  %v13893_v49 = vld [vmem:[#allocation4 + $0x4] ss:$16 sps:$4 sm:$0xff]  }
  0xf6   :  { %1298 = vmatpush1.bf16.msra.mxu0 %v13875_v50  ;;  %1341 = vmatpush1.bf16.msra.mxu1 %v13876_v51  ;;  %v13894_v50 = vld [vmem:[#allocation4 + $0xc] ss:$16 sps:$4 sm:$0xff]   ;;  %v13895_v51 = vld [vmem:[#allocation4] ss:$16 sps:$4 sm:$0xff]  }
  0xf7   :  { %1299 = vmatprep.subr.bf16.mxu0 %v13877_v52  ;;  %1342 = vmatprep.subr.bf16.mxu1 %v13878_v53  ;;  %v13896_v52 = vld [vmem:[#allocation4 + $0x8] ss:$16 sps:$4 sm:$0xff]   ;;  %v13897_v53 = vld [vmem:[#allocation6 + $0xe4] ss:$16 sps:$4 sm:$0xff]  }
  0xfa   :  { %1300 = vmatpush1.bf16.msra.mxu0 %v13879_v56  ;;  %1343 = vmatpush1.bf16.msra.mxu1 %v13880_v63  ;;  %v13898_v56 = vld [vmem:[#allocation6 + $0xec] ss:$16 sps:$4 sm:$0xff]   ;;  %v11479_v63 = vld [vmem:[%s17022_s4 + $0x4] sm:$0xf] }
  0xfb   :  { %1301 = vmatprep.subr.bf16.mxu0 %v13881_v4  ;;  %1344 = vmatprep.subr.bf16.mxu1 %v13882_v5  ;;  %v476_v4 = vrot.slane %v11479_v63, %v14093_v54  ;;  %v480_v5 = vrot.slane %v11479_v63, %v14095_v55 }
  0xfe   :  { %1302 = vmatpush1.bf16.msra.mxu0 %v13883_v8  ;;  %1345 = vmatpush1.bf16.msra.mxu1 %v13884_v38 }
  0xff   :  { %1303 = vmatprep.subr.bf16.mxu0 %v13885_v39  ;;  %1346 = vmatprep.subr.bf16.mxu1 %v13886_v40  ;;  %v488_v39 = vrot.slane %v11479_v63, %v14100_v57  ;;  %v484_v57 = vrot.slane %v11479_v63, %v14125_v10 }
 0x102   :  { %1304 = vmatpush1.bf16.msra.mxu0 %v13887_v41  ;;  %1347 = vmatpush1.bf16.msra.mxu1 %v13888_v42 }
 0x103   :  { %1305 = vmatprep.subr.bf16.mxu0 %v13889_v44  ;;  %1348 = vmatprep.subr.bf16.mxu1 %v13890_v45 }
 0x106   :  { %1306 = vmatpush1.bf16.msra.mxu0 %v13891_v46  ;;  %1349 = vmatpush1.bf16.msra.mxu1 %v13892_v48 }
 0x107   :  { %1307 = vmatprep.subr.bf16.mxu0 %v13893_v49  ;;  %1350 = vmatprep.subr.bf16.mxu1 %v13894_v50 }
 0x10a   :  { %1308 = vmatpush1.bf16.msra.mxu0 %v13895_v51  ;;  %1351 = vmatpush1.bf16.msra.mxu1 %v13896_v52 }
 0x10b   :  { %1589 = vmatprep.subr.bf16.mxu0 %v13897_v53  ;;  %1632 = vmatprep.subr.bf16.mxu1 %v13898_v56 }
 0x18d   :  { %v687_v8 = vpop.f32.mrf.mxu0  ;;  %v730_v38 = vpop.f32.mrf.mxu1 }
 0x18e   :  { %v688_v40 = vadd.f32 %v687_v8, %v476_v4 }
 0x18f   :  { %v689_v41 = vpop.f32.mrf.mxu0  ;;  %v732_v42 = vpop.f32.mrf.mxu1 }
 0x190   :  { %v5242_v44 = vmul.f32 0.5, %v688_v40  ;;  %v690_v45 = vadd.f32 %v689_v41, %v480_v5  ;;  %v733_v46 = vadd.f32 %v732_v42, %v488_v39  ;;  %v731_v40 = vadd.f32 %v730_v38, %v484_v57 }
 0x191   :  { %v691_v48 = vpop.f32.mrf.mxu0  ;;  %v734_v49 = vpop.f32.mrf.mxu1 }
 0x192   :  { %13405 = vtanh.f32 %v5242_v44  ;;  %v5243_v50 = vmul.f32 0.5, %v690_v45  ;;  %v692_v51 = vadd.f32 %v691_v48, %v476_v4  ;;  %v735_v41 = vadd.f32 %v734_v49, %v484_v57 }
 0x193   :  { %v693_v52 = vpop.f32.mrf.mxu0  ;;  %v736_v0 = vpop.f32.mrf.mxu1  ;;  %v5244_v45 = vmul.f32 0.5, %v731_v40 }
 0x194   :  { %13407 = vtanh.f32 %v5243_v50  ;;  %v5245_v53 = vmul.f32 0.5, %v692_v51  ;;  %v694_v56 = vadd.f32 %v693_v52, %v480_v5  ;;  %v737_v8 = vadd.f32 %v736_v0, %v488_v39 }
 0x195   :  { %13409 = vtanh.f32 %v733_v46  ;;  %v5247_v51 = vmul.f32 0.5, %v735_v41  ;;  %v91_v46 = vpop.permute.xlu1 %90 }
 0x196   :  { %13411 = vtanh.f32 %v5245_v53  ;;  %v5246_v55 = vmul.f32 0.5, %v694_v56  ;;  %v187_v0 = vmul.f32 %v14103_v58, %v91_v46 }
 0x198   :  { %13413 = vtanh.f32 %v5246_v55 }
 0x199   :  { %13415 = vtanh.f32 %v737_v8 }
 0x19a   :  { %13417 = vtanh.f32 %v5244_v45 }
 0x19b   :  { %13419 = vtanh.f32 %v5247_v51 }
 0x19f   :  { %v13406_v42 = vpop.eup %13405 }
 0x1a0   :  { %v5254_v54 = vmul.f32 0.5, %v13406_v42  ;;  %v273_v42 = vadd.f32 %v14112_v61, %v187_v0 }
 0x1a1   :  { %v13408_v44 = vpop.eup %13407 }
 0x1a2   :  { %v13410_v4 = vpop.eup %13409  ;;  %v5260_v48 = vadd.f32 0.5, %v5254_v54  ;;  %v5255_v50 = vmul.f32 0.5, %v13408_v44  ;;  %v188_v54 = vmul.f32 %v14106_v59, %v91_v46  ;;  %v96_v44 = vpop.permute.xlu1 %95 }
 0x1a3   :  { %v13412_v5 = vpop.eup %13411 }
 0x1a4   :  { %v5261_v52 = vadd.f32 0.5, %v5255_v50  ;;  %v5270_v53 = vmul.f32 %v13410_v4, %v5260_v48  ;;  %v5257_v56 = vmul.f32 0.5, %v13412_v5  ;;  %v190_v4 = vmul.f32 %v14109_v60, %v91_v46 }
 0x1a5   :  { %v13414_v55 = vpop.eup %13413  ;;  %v274_v48 = vadd.f32 %v14115_v62, %v188_v54  ;;  %v191_v50 = vmul.f32 %v14103_v58, %v96_v44  ;;  %v194_v54 = vmul.f32 %v14109_v60, %v96_v44 }
 0x1a6   :  { %v5268_v63 = vmul.f32 0.0, %v5261_v52  ;;  %v5263_v38 = vadd.f32 0.5, %v5257_v56  ;;  %v5258_v57 = vmul.f32 0.5, %v13414_v55  ;;  %v13416_v8 = vpop.eup %13415  ;;  %v276_v55 = vadd.f32 %v14120_v3, %v190_v4 }
 0x1a7   :  { %v189_v4 = vmul.f32 %v14134_v17, %v91_v46 }
 0x1a8   :  { %v14258_v39 = vadd.f32 %v5270_v53, %v5268_v63  ;;  %v5264_v49 = vadd.f32 0.5, %v5258_v57  ;;  %v5271_v41 = vmul.f32 %v13416_v8, %v5263_v38  ;;  %v192_v53 = vmul.f32 %v14106_v59, %v96_v44 }
 0x1a9   :  { %v277_v57 = vadd.f32 %v14112_v61, %v191_v50  ;;  %v280_v50 = vadd.f32 %v14120_v3, %v194_v54 }
 0x1aa   :  { %17108 = vst [vmem:[#allocation18_spill] sm:$0xff] %v14258_v39  ;;  %v5269_v40 = vmul.f32 0.0, %v5264_v49  ;;  %13421 = vtanh.f32 %v14258_v39 }
 0x1ac   :  { %v14264_v45 = vadd.f32 %v5271_v41, %v5269_v40  ;;  %v13418_v40 = vpop.eup %13417 }
 0x1ad   :  { %v982_v51 = vpop.f32.mrf.mxu0  ;;  %v1025_v5 = vpop.f32.mrf.mxu1  ;;  %v5256_v61 = vmul.f32 0.5, %v13418_v40 }
 0x1ae   :  { %17109 = vst [vmem:[#allocation19_spill] sm:$0xff] %v14264_v45  ;;  %13423 = vtanh.f32 %v14264_v45  ;;  %v1034_v52 = vadd.f32 %v982_v51, %v273_v42  ;;  %v278_v42 = vadd.f32 %v14115_v62, %v192_v53  ;;  %v13420_v51 = vpop.eup %13419  ;;  %v275_v53 = vadd.f32 %v14138_v21, %v189_v4 }
 0x1af   :  { %v984_v56 = vpop.f32.mrf.mxu0  ;;  %v1027_v0 = vpop.f32.mrf.mxu1  ;;  %v5259_v59 = vmul.f32 0.5, %v13420_v51 }
 0x1b0   :  { %v1042_v63 = vmul.f32 0.5, %v1034_v52  ;;  %v1035_v38 = vadd.f32 %v984_v56, %v274_v48  ;;  %v1037_v45 = vadd.f32 %v1027_v0, %v276_v55 }
 0x1b1   :  { %v986_v49 = vpop.f32.mrf.mxu0  ;;  %v1029_v8 = vpop.f32.mrf.mxu1  ;;  %v5265_v46 = vadd.f32 0.5, %v5259_v59 }
 0x1b2   :  { %13425 = vtanh.f32 %v1042_v63  ;;  %v1043_v41 = vmul.f32 0.5, %v1035_v38  ;;  %v1038_v39 = vadd.f32 %v986_v49, %v277_v57  ;;  %v193_v63 = vmul.f32 %v14134_v17, %v96_v44 }
 0x1b3   :  { %v988_v10 = vpop.f32.mrf.mxu0  ;;  %v1031_v56 = vpop.f32.mrf.mxu1  ;;  %v5262_v38 = vadd.f32 0.5, %v5256_v61 }
 0x1b4   :  { %13427 = vtanh.f32 %v1043_v41  ;;  %v1045_v52 = vmul.f32 0.5, %v1038_v39  ;;  %v1039_v48 = vadd.f32 %v988_v10, %v278_v42  ;;  %v1041_v55 = vadd.f32 %v1031_v56, %v280_v50 }
 0x1b5   :  { %v279_v10 = vadd.f32 %v14138_v21, %v193_v63  ;;  %v1036_v39 = vadd.f32 %v1025_v5, %v275_v53 }
 0x1b6   :  { %13429 = vtanh.f32 %v1045_v52  ;;  %v1046_v60 = vmul.f32 0.5, %v1039_v48 }
 0x1b7   :  { %13431 = vtanh.f32 %v1037_v45  ;;  %v13422_v0 = vpop.eup %13421  ;;  %v1040_v40 = vadd.f32 %v1029_v8, %v279_v10  ;;  %v1044_v44 = vmul.f32 0.5, %v1036_v39 }
 0x1b8   :  { %13433 = vtanh.f32 %v1046_v60  ;;  %v5276_v49 = vmul.f32 %v13422_v0, %v5262_v38 }
 0x1b9   :  { %13435 = vtanh.f32 %v1041_v55  ;;  %v1047_v4 = vmul.f32 0.5, %v1040_v40 }
 0x1ba   :  { %13437 = vtanh.f32 %v1044_v44 }
 0x1bb   :  { %v13424_v57 = vpop.eup %13423  ;;  %13439 = vtanh.f32 %v1047_v4 }
 0x1bc   :  { %v5277_v54 = vmul.f32 %v13424_v57, %v5265_v46 }
 0x1be   :  { %v14279_v41 = vpack.c.bf16 %v5277_v54, %v5276_v49 }
 0x1bf   :  { %v13426_v45 = vpop.eup %13425 }
 0x1c0   :  { %17110 = vst [vmem:[#allocation20_spill] sm:$0xff] %v14279_v41  ;;  %v1054_v42 = vmul.f32 0.5, %v13426_v45 }
 0x1c1   :  { %v13428_v51 = vpop.eup %13427 }
 0x1c2   :  { %v1060_v60 = vadd.f32 0.5, %v1054_v42  ;;  %v1055_v52 = vmul.f32 0.5, %v13428_v51 }
 0x1c3   :  { %v13430_v48 = vpop.eup %13429 }
 0x1c4   :  { %v13432_v61 = vpop.eup %13431  ;;  %v1061_v59 = vadd.f32 0.5, %v1055_v52  ;;  %v1057_v50 = vmul.f32 0.5, %v13430_v48  ;;  %v14411_v52 = vld [vmem:[#allocation4] ss:$16 sps:$4 sm:$0xff]   ;;  %v14413_v48 = vld [vmem:[#allocation4 + $0x8] ss:$16 sps:$4 sm:$0xff]  }
 0x1c5   :  { %v13434_v56 = vpop.eup %13433  ;;  %v1070_v63 = vmul.f32 %v13432_v61, %v1060_v60  ;;  %17112 = vst [vmem:[#allocation21_spill] sm:$0xff] %v14413_v48  ;;  %v14417_v61 = vld [vmem:[#allocation6 + $0xe4] ss:$16 sps:$4 sm:$0xff]  }
 0x1c6   :  { %v1068_v5 = vmul.f32 %v1061_v59, %v14144_v43  ;;  %v1063_v8 = vadd.f32 0.5, %v1057_v50  ;;  %v1058_v53 = vmul.f32 0.5, %v13434_v56  ;;  %v13436_v38 = vpop.eup %13435  ;;  %17113 = vst [vmem:[#allocation22_spill] sm:$0xff] %v14417_v61  ;;  %v14419_v59 = vld [vmem:[#allocation6 + $0xec] ss:$16 sps:$4 sm:$0xff]  }
 0x1c7   :  { %v13438_v39 = vpop.eup %13437  ;;  %17114 = vst [vmem:[#allocation23_spill] sm:$0xff] %v14419_v59 }
 0x1c8   :  { %v14282_v55 = vadd.f32 %v1070_v63, %v1068_v5  ;;  %v1064_v0 = vadd.f32 0.5, %v1058_v53  ;;  %v1071_v57 = vmul.f32 %v13436_v38, %v1063_v8  ;;  %v13440_v49 = vpop.eup %13439  ;;  %v1056_v54 = vmul.f32 0.5, %v13438_v39  ;;  %v101_v8 = vpop.permute.xlu0 %100 }
 0x1c9   :  { %v1059_v43 = vmul.f32 0.5, %v13440_v49  ;;  %v195_v38 = vmul.f32 %v14103_v58, %v101_v8 }
 0x1ca   :  { %v1069_v46 = vmul.f32 %v1064_v0, %v14147_v47  ;;  %13441 = vtanh.f32 %v14282_v55  ;;  %v1062_v45 = vadd.f32 0.5, %v1056_v54  ;;  %v17111_v47 = vmov 0  }
 0x1cb   :  { %v1065_v42 = vadd.f32 0.5, %v1059_v43  ;;  %v17124_v43 = vld [vmem:[#allocation16_spill] sm:$0xff] }
 0x1cc   :  { %v14286_v10 = vadd.f32 %v1071_v57, %v1069_v46  ;;  %v106_v46 = vpop.permute.xlu1 %105  ;;  %v17121_v57 = vld [vmem:[#allocation14_spill] sm:$0xff] }
 0x1cd   :  { %v196_v39 = vmul.f32 %v17121_v57, %v101_v8 }
 0x1ce   :  { %13443 = vtanh.f32 %v14286_v10 }
 0x1d7   :  { %v13442_v40 = vpop.eup %13441 }
 0x1d8   :  { %v1076_v51 = vmul.f32 %v13442_v40, %v1062_v45  ;;  %v281_v40 = vadd.f32 %v17124_v43, %v195_v38  ;;  %v199_v45 = vmul.f32 %v14103_v58, %v106_v46 }
 0x1db   :  { %v13444_v44 = vpop.eup %13443 }
 0x1dc   :  { %v1077_v4 = vmul.f32 %v13444_v44, %v1065_v42 }
 0x1de   :  { %v1078_v60 = vpack.c.bf16 %v1077_v4, %v1076_v51  ;;  %v17125_v51 = vld [vmem:[#allocation15_spill] sm:$0xff] }
 0x1df   :  { %v198_v4 = vmul.f32 %v17125_v51, %v101_v8  ;;  %v202_v58 = vmul.f32 %v17125_v51, %v106_v46 }
 0x1e0   :  { %1326 = vmatmul.mubr.bf16.vlgmr.msra.gmra.mxu0 %v1078_v60  ;;  %1369 = vmatmul.mubr.bf16.vlgmr.msra.gmra.mxu1 %v1078_v60 }
 0x1e1   :  { %1590 = vmatpush1.bf16.msra.mxu0 %v14150_v1  ;;  %1633 = vmatpush1.bf16.msra.mxu1 %v14152_v2  ;;  %v14323_v1 = vld [vmem:[#allocation4 + $0xe4] ss:$16 sps:$4 sm:$0xff]   ;;  %v14325_v2 = vld [vmem:[#allocation4 + $0xec] ss:$16 sps:$4 sm:$0xff]  }
 0x1e2   :  { %1591 = vmatprep.subr.bf16.mxu0 %v14154_v6  ;;  %1634 = vmatprep.subr.bf16.mxu1 %v14156_v7  ;;  %v14327_v6 = vld [vmem:[#allocation4 + $0xe0] ss:$16 sps:$4 sm:$0xff]   ;;  %v14329_v7 = vld [vmem:[#allocation4 + $0xe8] ss:$16 sps:$4 sm:$0xff]  }
 0x1e3   :  { %1621 = vmatprep.mubr.bf16.mxu0 %v17111_v47  ;;  %1664 = vmatprep.mubr.bf16.mxu1 %v17111_v47 }
 0x1e5   :  { %1592 = vmatpush1.bf16.msra.mxu0 %v14160_v9  ;;  %1635 = vmatpush1.bf16.msra.mxu1 %v14162_v11  ;;  %v14335_v9 = vld [vmem:[#allocation4 + $0xc4] ss:$16 sps:$4 sm:$0xff]   ;;  %v14337_v11 = vld [vmem:[#allocation4 + $0xcc] ss:$16 sps:$4 sm:$0xff]  }
 0x1e6   :  { %1593 = vmatprep.subr.bf16.mxu0 %v14166_v12  ;;  %1636 = vmatprep.subr.bf16.mxu1 %v14168_v13  ;;  %v14339_v12 = vld [vmem:[#allocation4 + $0xc0] ss:$16 sps:$4 sm:$0xff]   ;;  %v14341_v13 = vld [vmem:[#allocation4 + $0xc8] ss:$16 sps:$4 sm:$0xff]  }
 0x1e9   :  { %1594 = vmatpush1.bf16.msra.mxu0 %v14174_v14  ;;  %1637 = vmatpush1.bf16.msra.mxu1 %v14176_v15  ;;  %v14347_v14 = vld [vmem:[#allocation4 + $0xa4] ss:$16 sps:$4 sm:$0xff]   ;;  %v14349_v15 = vld [vmem:[#allocation4 + $0xac] ss:$16 sps:$4 sm:$0xff]  }
 0x1ea   :  { %1595 = vmatprep.subr.bf16.mxu0 %v14180_v16  ;;  %1638 = vmatprep.subr.bf16.mxu1 %v14182_v18  ;;  %v14351_v16 = vld [vmem:[#allocation4 + $0xa0] ss:$16 sps:$4 sm:$0xff]   ;;  %v14353_v18 = vld [vmem:[#allocation4 + $0xa8] ss:$16 sps:$4 sm:$0xff]  }
 0x1ed   :  { %1596 = vmatpush1.bf16.msra.mxu0 %v14188_v19  ;;  %1639 = vmatpush1.bf16.msra.mxu1 %v14190_v20  ;;  %v14359_v19 = vld [vmem:[#allocation4 + $0x84] ss:$16 sps:$4 sm:$0xff]   ;;  %v14361_v20 = vld [vmem:[#allocation4 + $0x8c] ss:$16 sps:$4 sm:$0xff]  }
 0x1ee   :  { %1597 = vmatprep.subr.bf16.mxu0 %v14192_v22  ;;  %1640 = vmatprep.subr.bf16.mxu1 %v14194_v23  ;;  %v14363_v22 = vld [vmem:[#allocation4 + $0x80] ss:$16 sps:$4 sm:$0xff]   ;;  %v14365_v23 = vld [vmem:[#allocation4 + $0x88] ss:$16 sps:$4 sm:$0xff]  }
 0x1f1   :  { %1598 = vmatpush1.bf16.msra.mxu0 %v14200_v24  ;;  %1641 = vmatpush1.bf16.msra.mxu1 %v14202_v25  ;;  %v14369_v24 = vld [vmem:[#allocation4 + $0x64] ss:$16 sps:$4 sm:$0xff]   ;;  %v14373_v25 = vld [vmem:[#allocation4 + $0x60] ss:$16 sps:$4 sm:$0xff]  }
 0x1f2   :  { %1599 = vmatprep.subr.bf16.mxu0 %v14204_v26  ;;  %1642 = vmatprep.subr.bf16.mxu1 %v14206_v27  ;;  %v14375_v26 = vld [vmem:[#allocation4 + $0x68] ss:$16 sps:$4 sm:$0xff]   ;;  %v14377_v27 = vld [vmem:[#allocation4 + $0x6c] ss:$16 sps:$4 sm:$0xff]  }
 0x1f5   :  { %1600 = vmatpush1.bf16.msra.mxu0 %v14212_v28  ;;  %1643 = vmatpush1.bf16.msra.mxu1 %v14214_v29  ;;  %v14380_v28 = vld [vmem:[#allocation4 + $0x44] ss:$16 sps:$4 sm:$0xff]   ;;  %v14382_v29 = vld [vmem:[#allocation4 + $0x4c] ss:$16 sps:$4 sm:$0xff]  }
 0x1f6   :  { %1601 = vmatprep.subr.bf16.mxu0 %v14216_v30  ;;  %1644 = vmatprep.subr.bf16.mxu1 %v14218_v31  ;;  %v14387_v30 = vld [vmem:[#allocation4 + $0x40] ss:$16 sps:$4 sm:$0xff]   ;;  %v14389_v31 = vld [vmem:[#allocation4 + $0x48] ss:$16 sps:$4 sm:$0xff]  }
 0x1f9   :  { %1602 = vmatpush1.bf16.msra.mxu0 %v14224_v32  ;;  %1645 = vmatpush1.bf16.msra.mxu1 %v14226_v33  ;;  %v14393_v32 = vld [vmem:[#allocation4 + $0x24] ss:$16 sps:$4 sm:$0xff]   ;;  %v14395_v33 = vld [vmem:[#allocation4 + $0x2c] ss:$16 sps:$4 sm:$0xff]  }
 0x1fa   :  { %1603 = vmatprep.subr.bf16.mxu0 %v14228_v34  ;;  %1646 = vmatprep.subr.bf16.mxu1 %v14230_v35  ;;  %v14399_v34 = vld [vmem:[#allocation4 + $0x20] ss:$16 sps:$4 sm:$0xff]   ;;  %v14401_v35 = vld [vmem:[#allocation4 + $0x28] ss:$16 sps:$4 sm:$0xff]  }
 0x1fd   :  { %1604 = vmatpush1.bf16.msra.mxu0 %v14236_v36  ;;  %1647 = vmatpush1.bf16.msra.mxu1 %v14238_v37  ;;  %v14405_v36 = vld [vmem:[#allocation4 + $0x4] ss:$16 sps:$4 sm:$0xff]   ;;  %v14407_v37 = vld [vmem:[#allocation4 + $0xc] ss:$16 sps:$4 sm:$0xff]  }
 0x1fe   :  { %1934 = vmatprep.subr.bf16.mxu0 %v14323_v1  ;;  %1977 = vmatprep.subr.bf16.mxu1 %v14325_v2 }
 0x200   :  { %1622 = vmatmul.mubr.bf16.vlgmr.msra.gmra.mxu0 %v1078_v60  ;;  %1665 = vmatmul.mubr.bf16.vlgmr.msra.gmra.mxu1 %v1078_v60 }
 0x201   :  { %1966 = vmatprep.mubr.bf16.mxu0 %v17111_v47  ;;  %2009 = vmatprep.mubr.bf16.mxu1 %v17111_v47 }
 0x202   :  { %1935 = vmatpush1.bf16.msra.mxu0 %v14327_v6  ;;  %1978 = vmatpush1.bf16.msra.mxu1 %v14329_v7 }
 0x203   :  { %1936 = vmatprep.subr.bf16.mxu0 %v14335_v9  ;;  %1979 = vmatprep.subr.bf16.mxu1 %v14337_v11 }
 0x206   :  { %1937 = vmatpush1.bf16.msra.mxu0 %v14339_v12  ;;  %1980 = vmatpush1.bf16.msra.mxu1 %v14341_v13 }
 0x207   :  { %1938 = vmatprep.subr.bf16.mxu0 %v14347_v14  ;;  %1981 = vmatprep.subr.bf16.mxu1 %v14349_v15 }
 0x20a   :  { %1939 = vmatpush1.bf16.msra.mxu0 %v14351_v16  ;;  %1982 = vmatpush1.bf16.msra.mxu1 %v14353_v18 }
 0x20b   :  { %1940 = vmatprep.subr.bf16.mxu0 %v14359_v19  ;;  %1983 = vmatprep.subr.bf16.mxu1 %v14361_v20 }
 0x20e   :  { %1941 = vmatpush1.bf16.msra.mxu0 %v14363_v22  ;;  %1984 = vmatpush1.bf16.msra.mxu1 %v14365_v23 }
 0x20f   :  { %1942 = vmatprep.subr.bf16.mxu0 %v14369_v24  ;;  %1985 = vmatprep.subr.bf16.mxu1 %v14377_v27 }
 0x212   :  { %1943 = vmatpush1.bf16.msra.mxu0 %v14373_v25  ;;  %1986 = vmatpush1.bf16.msra.mxu1 %v14375_v26 }
 0x213   :  { %1944 = vmatprep.subr.bf16.mxu0 %v14380_v28  ;;  %1987 = vmatprep.subr.bf16.mxu1 %v14382_v29 }
 0x216   :  { %1945 = vmatpush1.bf16.msra.mxu0 %v14387_v30  ;;  %1988 = vmatpush1.bf16.msra.mxu1 %v14389_v31 }
 0x217   :  { %1946 = vmatprep.subr.bf16.mxu0 %v14393_v32  ;;  %1989 = vmatprep.subr.bf16.mxu1 %v14395_v33 }
 0x21a   :  { %1947 = vmatpush1.bf16.msra.mxu0 %v14399_v34  ;;  %1990 = vmatpush1.bf16.msra.mxu1 %v14401_v35 }
 0x21b   :  { %1948 = vmatprep.subr.bf16.mxu0 %v14405_v36  ;;  %1991 = vmatprep.subr.bf16.mxu1 %v14407_v37 }
 0x21e   :  { %1949 = vmatpush1.bf16.msra.mxu0 %v14411_v52  ;;  %1992 = vmatpush1.bf16.msra.mxu1 %v14413_v48 }
 0x21f   :  { %2230 = vmatprep.subr.bf16.mxu0 %v14417_v61  ;;  %2273 = vmatprep.subr.bf16.mxu1 %v14419_v59 }
 0x2a0   :  { %v14425_v50 = vpop.f32.mrf.mxu0  ;;  %v14427_v56 = vpop.f32.mrf.mxu1 }
 0x2a1   :  { %17115 = vst [vmem:[#allocation24_spill] sm:$0xff] %v14425_v50  ;;  %17116 = vst [vmem:[#allocation25_spill] sm:$0xff] %v14427_v56  ;;  %v200_v56 = vmul.f32 %v17121_v57, %v106_v46 }
 0x2a2   :  { %v14429_v5 = vpop.f32.mrf.mxu0  ;;  %v14431_v63 = vpop.f32.mrf.mxu1 }
 0x2a3   :  { %17117 = vst [vmem:[#allocation26_spill] sm:$0xff] %v14429_v5  ;;  %17118 = vst [vmem:[#allocation27_spill] sm:$0xff] %v14431_v63 }
 0x2a4   :  { %v14433_v53 = vpop.f32.mrf.mxu0  ;;  %v14435_v0 = vpop.f32.mrf.mxu1 }
 0x2a5   :  { %17119 = vst [vmem:[#allocation28_spill] sm:$0xff] %v14433_v53  ;;  %17120 = vst [vmem:[#allocation29_spill] sm:$0xff] %v14435_v0  ;;  %v282_v0 = vadd.f32 %v14115_v62, %v196_v39 }
 0x2a6   :  { %v14439_v49 = vpop.f32.mrf.mxu0  ;;  %v14441_v54 = vpop.f32.mrf.mxu1 }
 0x2a7   :  { %17122 = vst [vmem:[#allocation30_spill] sm:$0xff] %v14439_v49  ;;  %17123 = vst [vmem:[#allocation31_spill] sm:$0xff] %v14441_v54  ;;  %v285_v49 = vadd.f32 %v17124_v43, %v199_v45  ;;  %v284_v54 = vadd.f32 %v14120_v3, %v198_v4  ;;  %v288_v45 = vadd.f32 %v14120_v3, %v202_v58 }
 0x2a8   :  { %v201_v4 = vmul.f32 %v14134_v17, %v106_v46 }
 0x2c0   :  { %v1623_v42 = vpop.f32.mrf.mxu0  ;;  %v1666_v44 = vpop.f32.mrf.mxu1 }
 0x2c1   :  { %v1675_v60 = vadd.f32 %v1623_v42, %v281_v40  ;;  %v286_v40 = vadd.f32 %v14115_v62, %v200_v56  ;;  %v287_v56 = vadd.f32 %v14138_v21, %v201_v4 }
 0x2c2   :  { %v1625_v53 = vpop.f32.mrf.mxu0  ;;  %v1668_v63 = vpop.f32.mrf.mxu1 }
 0x2c3   :  { %v1683_v5 = vmul.f32 0.5, %v1675_v60  ;;  %v1676_v50 = vadd.f32 %v1625_v53, %v282_v0  ;;  %v1678_v39 = vadd.f32 %v1668_v63, %v284_v54  ;;  %v197_v53 = vmul.f32 %v14134_v17, %v101_v8 }
 0x2c4   :  { %v1627_v38 = vpop.f32.mrf.mxu0  ;;  %v1670_v41 = vpop.f32.mrf.mxu1 }
 0x2c5   :  { %13445 = vtanh.f32 %v1683_v5  ;;  %v1684_v59 = vmul.f32 0.5, %v1676_v50  ;;  %v1679_v61 = vadd.f32 %v1627_v38, %v285_v49  ;;  %v283_v5 = vadd.f32 %v14138_v21, %v197_v53 }
 0x2c6   :  { %v1629_v42 = vpop.f32.mrf.mxu0  ;;  %v1672_v60 = vpop.f32.mrf.mxu1 }
 0x2c7   :  { %13447 = vtanh.f32 %v1684_v59  ;;  %v1686_v57 = vmul.f32 0.5, %v1679_v61  ;;  %v1680_v48 = vadd.f32 %v1629_v42, %v286_v40  ;;  %v1682_v50 = vadd.f32 %v1672_v60, %v288_v45 }
 0x2c8   :  { %v1677_v63 = vadd.f32 %v1666_v44, %v283_v5  ;;  %v1681_v61 = vadd.f32 %v1670_v41, %v287_v56 }
 0x2c9   :  { %13449 = vtanh.f32 %v1686_v57  ;;  %v1687_v0 = vmul.f32 0.5, %v1680_v48 }
 0x2ca   :  { %13451 = vtanh.f32 %v1678_v39  ;;  %v1685_v54 = vmul.f32 0.5, %v1677_v63  ;;  %v1688_v57 = vmul.f32 0.5, %v1681_v61 }
 0x2cb   :  { %13453 = vtanh.f32 %v1687_v0 }
 0x2cc   :  { %13455 = vtanh.f32 %v1682_v50 }
 0x2cd   :  { %13457 = vtanh.f32 %v1685_v54 }
 0x2ce   :  { %13459 = vtanh.f32 %v1688_v57 }
 0x2d2   :  { %v13446_v59 = vpop.eup %13445 }
 0x2d3   :  { %v1695_v49 = vmul.f32 0.5, %v13446_v59 }
 0x2d4   :  { %v13448_v8 = vpop.eup %13447 }
 0x2d5   :  { %v1701_v48 = vadd.f32 0.5, %v1695_v49  ;;  %v1696_v38 = vmul.f32 0.5, %v13448_v8 }
 0x2d6   :  { %v13450_v58 = vpop.eup %13449 }
 0x2d7   :  { %v13452_v40 = vpop.eup %13451  ;;  %v1702_v46 = vadd.f32 0.5, %v1696_v38  ;;  %v1698_v39 = vmul.f32 0.5, %v13450_v58  ;;  %v14465_v58 = vld [vmem:[#allocation6 + $0xe0] ss:$16 sps:$4 sm:$0xff]  }
 0x2d8   :  { %v13454_v42 = vpop.eup %13453  ;;  %v1711_v53 = vmul.f32 %v13452_v40, %v1701_v48 }
 0x2d9   :  { %v1709_v60 = vmul.f32 %v1702_v46, %v14282_v55  ;;  %v1704_v44 = vadd.f32 0.5, %v1698_v39  ;;  %v1699_v0 = vmul.f32 0.5, %v13454_v42  ;;  %v13456_v4 = vpop.eup %13455  ;;  %v14471_v46 = vld [vmem:[#allocation6 + $0xc4] ss:$16 sps:$4 sm:$0xff]   ;;  %v14473_v39 = vld [vmem:[#allocation6 + $0xcc] ss:$16 sps:$4 sm:$0xff]  }
 0x2da   :  { %v13458_v63 = vpop.eup %13457  ;;  %v14479_v42 = vld [vmem:[#allocation6 + $0xc0] ss:$16 sps:$4 sm:$0xff]  }
 0x2db   :  { %v14458_v41 = vadd.f32 %v1711_v53, %v1709_v60  ;;  %v1705_v45 = vadd.f32 0.5, %v1699_v0  ;;  %v1712_v5 = vmul.f32 %v13456_v4, %v1704_v44  ;;  %v13460_v61 = vpop.eup %13459  ;;  %v1697_v59 = vmul.f32 0.5, %v13458_v63  ;;  %v14481_v60 = vld [vmem:[#allocation6 + $0xc8] ss:$16 sps:$4 sm:$0xff]   ;;  %v14485_v53 = vld [vmem:[#allocation6 + $0xa4] ss:$16 sps:$4 sm:$0xff]  }
 0x2dc   :  { %v1700_v55 = vmul.f32 0.5, %v13460_v61  ;;  %v14487_v44 = vld [vmem:[#allocation6 + $0xac] ss:$16 sps:$4 sm:$0xff]   ;;  %v14493_v0 = vld [vmem:[#allocation6 + $0xa0] ss:$16 sps:$4 sm:$0xff]  }
 0x2dd   :  { %v1710_v50 = vmul.f32 %v1705_v45, %v14286_v10  ;;  %13461 = vtanh.f32 %v14458_v41  ;;  %v1703_v54 = vadd.f32 0.5, %v1697_v59  ;;  %v14467_v10 = vld [vmem:[#allocation6 + $0xe8] ss:$16 sps:$4 sm:$0xff]   ;;  %v14499_v4 = vld [vmem:[#allocation6 + $0x84] ss:$16 sps:$4 sm:$0xff]  }
 0x2de   :  { %v1706_v8 = vadd.f32 0.5, %v1700_v55  ;;  %v14495_v45 = vld [vmem:[#allocation6 + $0xa8] ss:$16 sps:$4 sm:$0xff]   ;;  %v14511_v61 = vld [vmem:[#allocation6 + $0x64] ss:$16 sps:$4 sm:$0xff]  }
 0x2df   :  { %v14462_v56 = vadd.f32 %v1712_v5, %v1710_v50  ;;  %v14501_v50 = vld [vmem:[#allocation6 + $0x8c] ss:$16 sps:$4 sm:$0xff]   ;;  %v14505_v5 = vld [vmem:[#allocation6 + $0x80] ss:$16 sps:$4 sm:$0xff]   ;;  %v14507_v63 = vld [vmem:[#allocation6 + $0x88] ss:$16 sps:$4 sm:$0xff]  }
 0x2e0   :  { %17126 = vst [vmem:[#allocation16_spill] sm:$0xff] %v14511_v61  ;;  %v14513_v59 = vld [vmem:[#allocation6 + $0x6c] ss:$16 sps:$4 sm:$0xff]   ;;  %v14517_v55 = vld [vmem:[#allocation6 + $0x60] ss:$16 sps:$4 sm:$0xff]  }
 0x2e1   :  { %13463 = vtanh.f32 %v14462_v56  ;;  %17127 = vst [vmem:[#allocation15_spill] sm:$0xff] %v14513_v59  ;;  %17128 = vst [vmem:[#allocation32_spill] sm:$0xff] %v14517_v55 }
 0x2ea   :  { %v13462_v49 = vpop.eup %13461 }
 0x2eb   :  { %v1717_v48 = vmul.f32 %v13462_v49, %v1703_v54  ;;  %v14519_v49 = vld [vmem:[#allocation6 + $0x68] ss:$16 sps:$4 sm:$0xff]   ;;  %v14523_v54 = vld [vmem:[#allocation6 + $0x44] ss:$16 sps:$4 sm:$0xff]  }
 0x2ec   :  { %17129 = vst [vmem:[#allocation33_spill] sm:$0xff] %v14519_v49  ;;  %17130 = vst [vmem:[#allocation34_spill] sm:$0xff] %v14523_v54 }
 0x2ee   :  { %v13464_v57 = vpop.eup %13463 }
 0x2ef   :  { %v1718_v38 = vmul.f32 %v13464_v57, %v1706_v8  ;;  %v14525_v8 = vld [vmem:[#allocation6 + $0x4c] ss:$16 sps:$4 sm:$0xff]   ;;  %v14529_v57 = vld [vmem:[#allocation6 + $0x40] ss:$16 sps:$4 sm:$0xff]  }
 0x2f0   :  { %17131 = vst [vmem:[#allocation35_spill] sm:$0xff] %v14525_v8  ;;  %17132 = vst [vmem:[#allocation36_spill] sm:$0xff] %v14529_v57 }
 0x2f1   :  { %v14469_v40 = vpack.c.bf16 %v1718_v38, %v1717_v48  ;;  %v14531_v48 = vld [vmem:[#allocation6 + $0x48] ss:$16 sps:$4 sm:$0xff]   ;;  %v14535_v38 = vld [vmem:[#allocation6 + $0x24] ss:$16 sps:$4 sm:$0xff]  }
 0x2f3   :  { %1967 = vmatmul.mubr.bf16.vlgmr.msra.gmra.mxu0 %v14469_v40  ;;  %2010 = vmatmul.mubr.bf16.vlgmr.msra.gmra.mxu1 %v14469_v40 }
 0x2f4   :  { %2231 = vmatpush1.bf16.msra.mxu0 %v14465_v58  ;;  %2274 = vmatpush1.bf16.msra.mxu1 %v14467_v10 }
 0x2f5   :  { %2232 = vmatprep.subr.bf16.mxu0 %v14471_v46  ;;  %2275 = vmatprep.subr.bf16.mxu1 %v14473_v39 }
 0x2f6   :  { %2262 = vmatprep.mubr.bf16.mxu0 %v17111_v47  ;;  %2305 = vmatprep.mubr.bf16.mxu1 %v17111_v47 }
 0x2f8   :  { %2233 = vmatpush1.bf16.msra.mxu0 %v14479_v42  ;;  %2276 = vmatpush1.bf16.msra.mxu1 %v14481_v60 }
 0x2f9   :  { %2234 = vmatprep.subr.bf16.mxu0 %v14485_v53  ;;  %2277 = vmatprep.subr.bf16.mxu1 %v14487_v44 }
 0x2fc   :  { %2235 = vmatpush1.bf16.msra.mxu0 %v14493_v0  ;;  %2278 = vmatpush1.bf16.msra.mxu1 %v14495_v45 }
 0x2fd   :  { %2236 = vmatprep.subr.bf16.mxu0 %v14499_v4  ;;  %2279 = vmatprep.subr.bf16.mxu1 %v14501_v50 }
 0x300   :  { %2237 = vmatpush1.bf16.msra.mxu0 %v14505_v5  ;;  %2280 = vmatpush1.bf16.msra.mxu1 %v14507_v63 }
 0x301   :  { %2238 = vmatprep.subr.bf16.mxu0 %v14511_v61  ;;  %2281 = vmatprep.subr.bf16.mxu1 %v14513_v59  ;;  %v14537_v61 = vld [vmem:[#allocation6 + $0x2c] ss:$16 sps:$4 sm:$0xff]   ;;  %v14541_v59 = vld [vmem:[#allocation6 + $0x20] ss:$16 sps:$4 sm:$0xff]  }
 0x304   :  { %2239 = vmatpush1.bf16.msra.mxu0 %v14517_v55  ;;  %2282 = vmatpush1.bf16.msra.mxu1 %v14519_v49  ;;  %v14543_v55 = vld [vmem:[#allocation6 + $0x28] ss:$16 sps:$4 sm:$0xff]   ;;  %v14547_v49 = vld [vmem:[#allocation6 + $0x4] ss:$16 sps:$4 sm:$0xff]  }
 0x305   :  { %2240 = vmatprep.subr.bf16.mxu0 %v14523_v54  ;;  %2283 = vmatprep.subr.bf16.mxu1 %v14525_v8  ;;  %v14549_v54 = vld [vmem:[#allocation6 + $0xc] ss:$16 sps:$4 sm:$0xff]   ;;  %v14553_v8 = vld [vmem:[#allocation6] ss:$16 sps:$4 sm:$0xff]  }
 0x308   :  { %2241 = vmatpush1.bf16.msra.mxu0 %v14529_v57  ;;  %2284 = vmatpush1.bf16.msra.mxu1 %v14531_v48  ;;  %v14555_v57 = vld [vmem:[#allocation6 + $0x8] ss:$16 sps:$4 sm:$0xff]  }
 0x309   :  { %2242 = vmatprep.subr.bf16.mxu0 %v14535_v38  ;;  %2285 = vmatprep.subr.bf16.mxu1 %v14537_v61 }
 0x30c   :  { %2243 = vmatpush1.bf16.msra.mxu0 %v14541_v59  ;;  %2286 = vmatpush1.bf16.msra.mxu1 %v14543_v55 }
 0x30d   :  { %2244 = vmatprep.subr.bf16.mxu0 %v14547_v49  ;;  %2287 = vmatprep.subr.bf16.mxu1 %v14549_v54 }
 0x310   :  { %2245 = vmatpush1.bf16.msra.mxu0 %v14553_v8  ;;  %2288 = vmatpush1.bf16.msra.mxu1 %v14555_v57 }
 0x311   :  { %2575 = vmatprep.subr.bf16.mxu0 %v14323_v1  ;;  %2618 = vmatprep.subr.bf16.mxu1 %v14325_v2  ;;  %v17133_v1 = vld [vmem:[#allocation21_spill] sm:$0xff]  ;;  %v17134_v2 = vld [vmem:[#allocation22_spill] sm:$0xff] }
 0x313   :  { %2263 = vmatmul.mubr.bf16.vlgmr.msra.gmra.mxu0 %v14469_v40  ;;  %2306 = vmatmul.mubr.bf16.vlgmr.msra.gmra.mxu1 %v14469_v40 }
 0x314   :  { %2576 = vmatpush1.bf16.msra.mxu0 %v14327_v6  ;;  %2619 = vmatpush1.bf16.msra.mxu1 %v14329_v7  ;;  %v17135_v6 = vld [vmem:[#allocation23_spill] sm:$0xff] }
 0x315   :  { %2577 = vmatprep.subr.bf16.mxu0 %v14335_v9  ;;  %2620 = vmatprep.subr.bf16.mxu1 %v14337_v11 }
 0x316   :  { %2607 = vmatprep.mubr.bf16.mxu0 %v17111_v47  ;;  %2650 = vmatprep.mubr.bf16.mxu1 %v17111_v47 }
 0x318   :  { %2578 = vmatpush1.bf16.msra.mxu0 %v14339_v12  ;;  %2621 = vmatpush1.bf16.msra.mxu1 %v14341_v13  ;;  %v111_v13 = vpop.permute.xlu0 %110 }
 0x319   :  { %2579 = vmatprep.subr.bf16.mxu0 %v14347_v14  ;;  %2622 = vmatprep.subr.bf16.mxu1 %v14349_v15 }
 0x31c   :  { %2580 = vmatpush1.bf16.msra.mxu0 %v14351_v16  ;;  %2623 = vmatpush1.bf16.msra.mxu1 %v14353_v18  ;;  %v17142_v16 = vld [vmem:[#allocation13_spill] sm:$0xff] }
 0x31d   :  { %2581 = vmatprep.subr.bf16.mxu0 %v14359_v19  ;;  %2624 = vmatprep.subr.bf16.mxu1 %v14361_v20  ;;  %v203_v18 = vmul.f32 %v17142_v16, %v111_v13  ;;  %v116_v19 = vpop.permute.xlu1 %115  ;;  %v17143_v20 = vld [vmem:[#allocation14_spill] sm:$0xff] }
 0x320   :  { %2582 = vmatpush1.bf16.msra.mxu0 %v14363_v22  ;;  %2625 = vmatpush1.bf16.msra.mxu1 %v14365_v23  ;;  %v204_v22 = vmul.f32 %v17143_v20, %v111_v13 }
 0x321   :  { %2583 = vmatprep.subr.bf16.mxu0 %v14369_v24  ;;  %2626 = vmatprep.subr.bf16.mxu1 %v14377_v27 }
 0x324   :  { %2584 = vmatpush1.bf16.msra.mxu0 %v14373_v25  ;;  %2627 = vmatpush1.bf16.msra.mxu1 %v14375_v26  ;;  %v289_v25 = vadd.f32 %v17124_v43, %v203_v18  ;;  %v207_v26 = vmul.f32 %v17142_v16, %v116_v19 }
 0x325   :  { %2585 = vmatprep.subr.bf16.mxu0 %v14380_v28  ;;  %2628 = vmatprep.subr.bf16.mxu1 %v14382_v29  ;;  %v206_v29 = vmul.f32 %v17125_v51, %v111_v13 }
 0x328   :  { %2586 = vmatpush1.bf16.msra.mxu0 %v14387_v30  ;;  %2629 = vmatpush1.bf16.msra.mxu1 %v14389_v31  ;;  %v290_v31 = vadd.f32 %v14115_v62, %v204_v22 }
 0x329   :  { %2587 = vmatprep.subr.bf16.mxu0 %v14393_v32  ;;  %2630 = vmatprep.subr.bf16.mxu1 %v14395_v33  ;;  %v208_v32 = vmul.f32 %v17143_v20, %v116_v19 }
 0x32c   :  { %2588 = vmatpush1.bf16.msra.mxu0 %v14399_v34  ;;  %2631 = vmatpush1.bf16.msra.mxu1 %v14401_v35 }
 0x32d   :  { %2589 = vmatprep.subr.bf16.mxu0 %v14405_v36  ;;  %2632 = vmatprep.subr.bf16.mxu1 %v14407_v37  ;;  %v293_v37 = vadd.f32 %v17124_v43, %v207_v26 }
 0x330   :  { %2590 = vmatpush1.bf16.msra.mxu0 %v14411_v52  ;;  %2633 = vmatpush1.bf16.msra.mxu1 %v17133_v1  ;;  %v292_v52 = vadd.f32 %v14120_v3, %v206_v29 }
 0x331   :  { %2871 = vmatprep.subr.bf16.mxu0 %v17134_v2  ;;  %2914 = vmatprep.subr.bf16.mxu1 %v17135_v6  ;;  %v210_v2 = vmul.f32 %v17125_v51, %v116_v19 }
 0x333   :  { %v296_v29 = vadd.f32 %v14120_v3, %v210_v2 }
 0x3b3   :  { %v14599_v7 = vpop.f32.mrf.mxu0  ;;  %v14601_v9 = vpop.f32.mrf.mxu1 }
 0x3b4   :  { %17136 = vst [vmem:[#allocation21_spill] sm:$0xff] %v14599_v7  ;;  %17137 = vst [vmem:[#allocation22_spill] sm:$0xff] %v14601_v9 }
 0x3b5   :  { %v14603_v11 = vpop.f32.mrf.mxu0  ;;  %v14605_v12 = vpop.f32.mrf.mxu1 }
 0x3b6   :  { %17138 = vst [vmem:[#allocation23_spill] sm:$0xff] %v14603_v11  ;;  %17139 = vst [vmem:[#allocation37_spill] sm:$0xff] %v14605_v12 }
 0x3b7   :  { %v14607_v14 = vpop.f32.mrf.mxu0  ;;  %v14609_v15 = vpop.f32.mrf.mxu1 }
 0x3b8   :  { %17140 = vst [vmem:[#allocation38_spill] sm:$0xff] %v14607_v14  ;;  %17141 = vst [vmem:[#allocation39_spill] sm:$0xff] %v14609_v15 }
 0x3b9   :  { %v14613_v23 = vpop.f32.mrf.mxu0  ;;  %v14615_v24 = vpop.f32.mrf.mxu1 }
 0x3ba   :  { %17144 = vst [vmem:[#allocation40_spill] sm:$0xff] %v14613_v23  ;;  %17145 = vst [vmem:[#allocation41_spill] sm:$0xff] %v14615_v24 }
 0x3d3   :  { %v2264_v27 = vpop.f32.mrf.mxu0  ;;  %v2307_v28 = vpop.f32.mrf.mxu1 }
 0x3d4   :  { %v2316_v30 = vadd.f32 %v2264_v27, %v289_v25  ;;  %v294_v25 = vadd.f32 %v14115_v62, %v208_v32 }
 0x3d5   :  { %v2266_v33 = vpop.f32.mrf.mxu0  ;;  %v2309_v34 = vpop.f32.mrf.mxu1 }
 0x3d6   :  { %v2324_v35 = vmul.f32 0.5, %v2316_v30  ;;  %v2317_v36 = vadd.f32 %v2266_v33, %v290_v31  ;;  %v2319_v22 = vadd.f32 %v2309_v34, %v292_v52  ;;  %v205_v31 = vmul.f32 %v14134_v17, %v111_v13 }
 0x3d7   :  { %v2268_v40 = vpop.f32.mrf.mxu0  ;;  %v2311_v1 = vpop.f32.mrf.mxu1  ;;  %v209_v33 = vmul.f32 %v14134_v17, %v116_v19 }
 0x3d8   :  { %13465 = vtanh.f32 %v2324_v35  ;;  %v2325_v6 = vmul.f32 0.5, %v2317_v36  ;;  %v2320_v18 = vadd.f32 %v2268_v40, %v293_v37  ;;  %v291_v36 = vadd.f32 %v14138_v21, %v205_v31 }
 0x3d9   :  { %v2270_v27 = vpop.f32.mrf.mxu0  ;;  %v2313_v30 = vpop.f32.mrf.mxu1  ;;  %v295_v32 = vadd.f32 %v14138_v21, %v209_v33 }
 0x3da   :  { %13467 = vtanh.f32 %v2325_v6  ;;  %v2327_v15 = vmul.f32 0.5, %v2320_v18  ;;  %v2321_v9 = vadd.f32 %v2270_v27, %v294_v25  ;;  %v2323_v35 = vadd.f32 %v2313_v30, %v296_v29 }
 0x3db   :  { %v2318_v34 = vadd.f32 %v2307_v28, %v291_v36  ;;  %v2322_v37 = vadd.f32 %v2311_v1, %v295_v32 }
 0x3dc   :  { %13469 = vtanh.f32 %v2327_v15  ;;  %v2328_v26 = vmul.f32 0.5, %v2321_v9 }
 0x3dd   :  { %13471 = vtanh.f32 %v2319_v22  ;;  %v2326_v6 = vmul.f32 0.5, %v2318_v34  ;;  %v2329_v15 = vmul.f32 0.5, %v2322_v37 }
 0x3de   :  { %13473 = vtanh.f32 %v2328_v26 }
 0x3df   :  { %13475 = vtanh.f32 %v2323_v35 }
 0x3e0   :  { %13477 = vtanh.f32 %v2326_v6 }
 0x3e1   :  { %13479 = vtanh.f32 %v2329_v15 }
 0x3e5   :  { %v13466_v52 = vpop.eup %13465 }
 0x3e6   :  { %v2336_v40 = vmul.f32 0.5, %v13466_v52 }
 0x3e7   :  { %v13468_v13 = vpop.eup %13467 }
 0x3e8   :  { %v2342_v9 = vadd.f32 0.5, %v2336_v40  ;;  %v2337_v18 = vmul.f32 0.5, %v13468_v13 }
 0x3e9   :  { %v13470_v2 = vpop.eup %13469 }
 0x3ea   :  { %v13472_v25 = vpop.eup %13471  ;;  %v2343_v19 = vadd.f32 0.5, %v2337_v18  ;;  %v2339_v22 = vmul.f32 0.5, %v13470_v2 }
 0x3eb   :  { %v13474_v27 = vpop.eup %13473  ;;  %v2352_v31 = vmul.f32 %v13472_v25, %v2342_v9  ;;  %v14723_v25 = vld [vmem:[#allocation4 + $0x60] ss:$16 sps:$4 sm:$0xff]  }
 0x3ec   :  { %v2350_v30 = vmul.f32 %v2343_v19, %v14458_v41  ;;  %v2345_v28 = vadd.f32 0.5, %v2339_v22  ;;  %v2340_v26 = vmul.f32 0.5, %v13474_v27  ;;  %v13476_v33 = vpop.eup %13475  ;;  %v14725_v19 = vld [vmem:[#allocation4 + $0x68] ss:$16 sps:$4 sm:$0xff]   ;;  %v14727_v22 = vld [vmem:[#allocation4 + $0x6c] ss:$16 sps:$4 sm:$0xff]  }
 0x3ed   :  { %v13478_v34 = vpop.eup %13477  ;;  %v14730_v27 = vld [vmem:[#allocation4 + $0x44] ss:$16 sps:$4 sm:$0xff]  }
 0x3ee   :  { %v14632_v1 = vadd.f32 %v2352_v31, %v2350_v30  ;;  %v2346_v29 = vadd.f32 0.5, %v2340_v26  ;;  %v2353_v36 = vmul.f32 %v13476_v33, %v2345_v28  ;;  %v13480_v37 = vpop.eup %13479  ;;  %v2338_v52 = vmul.f32 0.5, %v13478_v34  ;;  %v14732_v30 = vld [vmem:[#allocation4 + $0x4c] ss:$16 sps:$4 sm:$0xff]   ;;  %v14737_v31 = vld [vmem:[#allocation4 + $0x40] ss:$16 sps:$4 sm:$0xff]  }
 0x3ef   :  { %v2341_v41 = vmul.f32 0.5, %v13480_v37  ;;  %v14739_v28 = vld [vmem:[#allocation4 + $0x48] ss:$16 sps:$4 sm:$0xff]   ;;  %v14743_v26 = vld [vmem:[#allocation4 + $0x24] ss:$16 sps:$4 sm:$0xff]  }
 0x3f0   :  { %v2351_v35 = vmul.f32 %v2346_v29, %v14462_v56  ;;  %13481 = vtanh.f32 %v14632_v1  ;;  %v2344_v6 = vadd.f32 0.5, %v2338_v52  ;;  %v17146_v56 = vld [vmem:[#allocation16_spill] sm:$0xff]  ;;  %v14745_v29 = vld [vmem:[#allocation4 + $0x2c] ss:$16 sps:$4 sm:$0xff]   ;;  %v14763_v52 = vld [vmem:[#allocation4 + $0x8] ss:$16 sps:$4 sm:$0xff]  }
 0x3f1   :  { %v2347_v13 = vadd.f32 0.5, %v2341_v41  ;;  %v14749_v33 = vld [vmem:[#allocation4 + $0x20] ss:$16 sps:$4 sm:$0xff]   ;;  %v14757_v34 = vld [vmem:[#allocation4 + $0xc] ss:$16 sps:$4 sm:$0xff]   ;;  %17153 = vst [vmem:[#allocation16_spill] sm:$0xff] %v14763_v52 }
 0x3f2   :  { %v14636_v32 = vadd.f32 %v2353_v36, %v2351_v35  ;;  %v14751_v35 = vld [vmem:[#allocation4 + $0x28] ss:$16 sps:$4 sm:$0xff]   ;;  %v14755_v36 = vld [vmem:[#allocation4 + $0x4] ss:$16 sps:$4 sm:$0xff]   ;;  %v14761_v37 = vld [vmem:[#allocation4] ss:$16 sps:$4 sm:$0xff]  }
 0x3f3   :  { %v14767_v41 = vld [vmem:[#allocation6 + $0xe4] ss:$16 sps:$4 sm:$0xff]  }
 0x3f4   :  { %13483 = vtanh.f32 %v14636_v32 }
 0x3fd   :  { %v13482_v40 = vpop.eup %13481 }
 0x3fe   :  { %v2358_v9 = vmul.f32 %v13482_v40, %v2344_v6  ;;  %v14769_v40 = vld [vmem:[#allocation6 + $0xec] ss:$16 sps:$4 sm:$0xff]  }
 0x401   :  { %v13484_v15 = vpop.eup %13483 }
 0x402   :  { %v2359_v18 = vmul.f32 %v13484_v15, %v2347_v13 }
 0x404   :  { %v2360_v2 = vpack.c.bf16 %v2359_v18, %v2358_v9  ;;  %v121_v18 = vpop.permute.xlu0 %120 }
 0x406   :  { %2608 = vmatmul.mubr.bf16.vlgmr.msra.gmra.mxu0 %v2360_v2  ;;  %2651 = vmatmul.mubr.bf16.vlgmr.msra.gmra.mxu1 %v2360_v2 }
 0x407   :  { %2872 = vmatpush1.bf16.msra.mxu0 %v14465_v58  ;;  %2915 = vmatpush1.bf16.msra.mxu1 %v14467_v10  ;;  %v17147_v58 = vld [vmem:[#allocation15_spill] sm:$0xff]  ;;  %v17148_v10 = vld [vmem:[#allocation32_spill] sm:$0xff] }
 0x408   :  { %2873 = vmatprep.subr.bf16.mxu0 %v14471_v46  ;;  %2916 = vmatprep.subr.bf16.mxu1 %v14473_v39  ;;  %v17149_v46 = vld [vmem:[#allocation33_spill] sm:$0xff]  ;;  %v17150_v39 = vld [vmem:[#allocation34_spill] sm:$0xff]  ;;  %17154 = vst [vmem:[#allocation15_spill] sm:$0xff] %v14767_v41  ;;  %17155 = vst [vmem:[#allocation32_spill] sm:$0xff] %v14769_v40 }
 0x409   :  { %2903 = vmatprep.mubr.bf16.mxu0 %v17111_v47  ;;  %2946 = vmatprep.mubr.bf16.mxu1 %v17111_v47 }
 0x40b   :  { %2874 = vmatpush1.bf16.msra.mxu0 %v14479_v42  ;;  %2917 = vmatpush1.bf16.msra.mxu1 %v14481_v60  ;;  %v17151_v42 = vld [vmem:[#allocation35_spill] sm:$0xff]  ;;  %v17152_v60 = vld [vmem:[#allocation36_spill] sm:$0xff] }
 0x40c   :  { %2875 = vmatprep.subr.bf16.mxu0 %v14485_v53  ;;  %2918 = vmatprep.subr.bf16.mxu1 %v14487_v44  ;;  %v14673_v53 = vld [vmem:[#allocation4 + $0xe4] ss:$16 sps:$4 sm:$0xff]   ;;  %v14675_v44 = vld [vmem:[#allocation4 + $0xec] ss:$16 sps:$4 sm:$0xff]  }
 0x40f   :  { %2876 = vmatpush1.bf16.msra.mxu0 %v14493_v0  ;;  %2919 = vmatpush1.bf16.msra.mxu1 %v14495_v45  ;;  %v14677_v0 = vld [vmem:[#allocation4 + $0xe0] ss:$16 sps:$4 sm:$0xff]   ;;  %v14679_v45 = vld [vmem:[#allocation4 + $0xe8] ss:$16 sps:$4 sm:$0xff]  }
 0x410   :  { %2877 = vmatprep.subr.bf16.mxu0 %v14499_v4  ;;  %2920 = vmatprep.subr.bf16.mxu1 %v14501_v50  ;;  %v14685_v4 = vld [vmem:[#allocation4 + $0xc4] ss:$16 sps:$4 sm:$0xff]   ;;  %v14687_v50 = vld [vmem:[#allocation4 + $0xcc] ss:$16 sps:$4 sm:$0xff]  }
 0x413   :  { %2878 = vmatpush1.bf16.msra.mxu0 %v14505_v5  ;;  %2921 = vmatpush1.bf16.msra.mxu1 %v14507_v63  ;;  %v14689_v5 = vld [vmem:[#allocation4 + $0xc0] ss:$16 sps:$4 sm:$0xff]   ;;  %v14691_v63 = vld [vmem:[#allocation4 + $0xc8] ss:$16 sps:$4 sm:$0xff]  }
 0x414   :  { %2879 = vmatprep.subr.bf16.mxu0 %v17146_v56  ;;  %2922 = vmatprep.subr.bf16.mxu1 %v17147_v58  ;;  %v211_v58 = vmul.f32 %v17142_v16, %v121_v18 }
 0x417   :  { %2880 = vmatpush1.bf16.msra.mxu0 %v17148_v10  ;;  %2923 = vmatpush1.bf16.msra.mxu1 %v17149_v46  ;;  %v126_v10 = vpop.permute.xlu1 %125  ;;  %v212_v46 = vmul.f32 %v17143_v20, %v121_v18 }
 0x418   :  { %2881 = vmatprep.subr.bf16.mxu0 %v17150_v39  ;;  %2924 = vmatprep.subr.bf16.mxu1 %v17151_v42  ;;  %v216_v24 = vmul.f32 %v17143_v20, %v126_v10 }
 0x41b   :  { %2882 = vmatpush1.bf16.msra.mxu0 %v17152_v60  ;;  %2925 = vmatpush1.bf16.msra.mxu1 %v14531_v48  ;;  %v14715_v48 = vld [vmem:[#allocation4 + $0x88] ss:$16 sps:$4 sm:$0xff]   ;;  %v297_v60 = vadd.f32 %v17124_v43, %v211_v58 }
 0x41c   :  { %2883 = vmatprep.subr.bf16.mxu0 %v14535_v38  ;;  %2926 = vmatprep.subr.bf16.mxu1 %v14537_v61  ;;  %v14697_v61 = vld [vmem:[#allocation4 + $0xa4] ss:$16 sps:$4 sm:$0xff]  }
 0x41d   :  { %v14719_v38 = vld [vmem:[#allocation4 + $0x64] ss:$16 sps:$4 sm:$0xff]  }
 0x41f   :  { %2884 = vmatpush1.bf16.msra.mxu0 %v14541_v59  ;;  %2927 = vmatpush1.bf16.msra.mxu1 %v14543_v55  ;;  %v14699_v59 = vld [vmem:[#allocation4 + $0xac] ss:$16 sps:$4 sm:$0xff]   ;;  %v14701_v55 = vld [vmem:[#allocation4 + $0xa0] ss:$16 sps:$4 sm:$0xff]  }
 0x420   :  { %2885 = vmatprep.subr.bf16.mxu0 %v14547_v49  ;;  %2928 = vmatprep.subr.bf16.mxu1 %v14549_v54  ;;  %v14703_v49 = vld [vmem:[#allocation4 + $0xa8] ss:$16 sps:$4 sm:$0xff]   ;;  %v14709_v54 = vld [vmem:[#allocation4 + $0x84] ss:$16 sps:$4 sm:$0xff]  }
 0x423   :  { %2886 = vmatpush1.bf16.msra.mxu0 %v14553_v8  ;;  %2929 = vmatpush1.bf16.msra.mxu1 %v14555_v57  ;;  %v14711_v8 = vld [vmem:[#allocation4 + $0x8c] ss:$16 sps:$4 sm:$0xff]   ;;  %v14713_v57 = vld [vmem:[#allocation4 + $0x80] ss:$16 sps:$4 sm:$0xff]  }
 0x424   :  { %3216 = vmatprep.subr.bf16.mxu0 %v14673_v53  ;;  %3259 = vmatprep.subr.bf16.mxu1 %v14675_v44 }
 0x426   :  { %2904 = vmatmul.mubr.bf16.vlgmr.msra.gmra.mxu0 %v2360_v2  ;;  %2947 = vmatmul.mubr.bf16.vlgmr.msra.gmra.mxu1 %v2360_v2 }
 0x427   :  { %3248 = vmatprep.mubr.bf16.mxu0 %v17111_v47  ;;  %3291 = vmatprep.mubr.bf16.mxu1 %v17111_v47 }
 0x428   :  { %3217 = vmatpush1.bf16.msra.mxu0 %v14677_v0  ;;  %3260 = vmatpush1.bf16.msra.mxu1 %v14679_v45 }
 0x429   :  { %3218 = vmatprep.subr.bf16.mxu0 %v14685_v4  ;;  %3261 = vmatprep.subr.bf16.mxu1 %v14687_v50 }
 0x42c   :  { %3219 = vmatpush1.bf16.msra.mxu0 %v14689_v5  ;;  %3262 = vmatpush1.bf16.msra.mxu1 %v14691_v63 }
 0x42d   :  { %3220 = vmatprep.subr.bf16.mxu0 %v14697_v61  ;;  %3263 = vmatprep.subr.bf16.mxu1 %v14699_v59 }
 0x430   :  { %3221 = vmatpush1.bf16.msra.mxu0 %v14701_v55  ;;  %3264 = vmatpush1.bf16.msra.mxu1 %v14703_v49 }
 0x431   :  { %3222 = vmatprep.subr.bf16.mxu0 %v14709_v54  ;;  %3265 = vmatprep.subr.bf16.mxu1 %v14711_v8 }
 0x434   :  { %3223 = vmatpush1.bf16.msra.mxu0 %v14713_v57  ;;  %3266 = vmatpush1.bf16.msra.mxu1 %v14715_v48 }
 0x435   :  { %3224 = vmatprep.subr.bf16.mxu0 %v14719_v38  ;;  %3267 = vmatprep.subr.bf16.mxu1 %v14727_v22 }
 0x438   :  { %3225 = vmatpush1.bf16.msra.mxu0 %v14723_v25  ;;  %3268 = vmatpush1.bf16.msra.mxu1 %v14725_v19 }
 0x439   :  { %3226 = vmatprep.subr.bf16.mxu0 %v14730_v27  ;;  %3269 = vmatprep.subr.bf16.mxu1 %v14732_v30 }
 0x43c   :  { %3227 = vmatpush1.bf16.msra.mxu0 %v14737_v31  ;;  %3270 = vmatpush1.bf16.msra.mxu1 %v14739_v28 }
 0x43d   :  { %3228 = vmatprep.subr.bf16.mxu0 %v14743_v26  ;;  %3271 = vmatprep.subr.bf16.mxu1 %v14745_v29 }
 0x440   :  { %3229 = vmatpush1.bf16.msra.mxu0 %v14749_v33  ;;  %3272 = vmatpush1.bf16.msra.mxu1 %v14751_v35 }
 0x441   :  { %3230 = vmatprep.subr.bf16.mxu0 %v14755_v36  ;;  %3273 = vmatprep.subr.bf16.mxu1 %v14757_v34 }
 0x444   :  { %3231 = vmatpush1.bf16.msra.mxu0 %v14761_v37  ;;  %3274 = vmatpush1.bf16.msra.mxu1 %v14763_v52 }
 0x445   :  { %3512 = vmatprep.subr.bf16.mxu0 %v14767_v41  ;;  %3555 = vmatprep.subr.bf16.mxu1 %v14769_v40 }
 0x4c6   :  { %v14775_v6 = vpop.f32.mrf.mxu0  ;;  %v14777_v13 = vpop.f32.mrf.mxu1 }
 0x4c7   :  { %17156 = vst [vmem:[#allocation33_spill] sm:$0xff] %v14775_v6  ;;  %17157 = vst [vmem:[#allocation34_spill] sm:$0xff] %v14777_v13  ;;  %v215_v13 = vmul.f32 %v17142_v16, %v126_v10  ;;  %v214_v6 = vmul.f32 %v17125_v51, %v121_v18  ;;  %v218_v16 = vmul.f32 %v17125_v51, %v126_v10 }
 0x4c8   :  { %v14779_v15 = vpop.f32.mrf.mxu0  ;;  %v14781_v9 = vpop.f32.mrf.mxu1 }
 0x4c9   :  { %17158 = vst [vmem:[#allocation35_spill] sm:$0xff] %v14779_v15  ;;  %17159 = vst [vmem:[#allocation36_spill] sm:$0xff] %v14781_v9 }
 0x4ca   :  { %v14783_v2 = vpop.f32.mrf.mxu0  ;;  %v14785_v56 = vpop.f32.mrf.mxu1 }
 0x4cb   :  { %17160 = vst [vmem:[#allocation42_spill] sm:$0xff] %v14783_v2  ;;  %17161 = vst [vmem:[#allocation43_spill] sm:$0xff] %v14785_v56  ;;  %v298_v56 = vadd.f32 %v14115_v62, %v212_v46 }
 0x4cc   :  { %v14789_v39 = vpop.f32.mrf.mxu0  ;;  %v14791_v42 = vpop.f32.mrf.mxu1 }
 0x4cd   :  { %17162 = vst [vmem:[#allocation44_spill] sm:$0xff] %v14789_v39  ;;  %17163 = vst [vmem:[#allocation45_spill] sm:$0xff] %v14791_v42  ;;  %v301_v39 = vadd.f32 %v17124_v43, %v215_v13  ;;  %v300_v42 = vadd.f32 %v14120_v3, %v214_v6  ;;  %v304_v6 = vadd.f32 %v14120_v3, %v218_v16 }
 0x4e6   :  { %v2905_v15 = vpop.f32.mrf.mxu0  ;;  %v2948_v9 = vpop.f32.mrf.mxu1 }
 0x4e7   :  { %v2957_v2 = vadd.f32 %v2905_v15, %v297_v60  ;;  %v302_v15 = vadd.f32 %v14115_v62, %v216_v24 }
 0x4e8   :  { %v2907_v23 = vpop.f32.mrf.mxu0  ;;  %v2950_v14 = vpop.f32.mrf.mxu1 }
 0x4e9   :  { %v2965_v12 = vmul.f32 0.5, %v2957_v2  ;;  %v2958_v11 = vadd.f32 %v2907_v23, %v298_v56  ;;  %v2960_v46 = vadd.f32 %v2950_v14, %v300_v42  ;;  %v213_v23 = vmul.f32 %v14134_v17, %v121_v18 }
 0x4ea   :  { %v2909_v58 = vpop.f32.mrf.mxu0  ;;  %v2952_v7 = vpop.f32.mrf.mxu1  ;;  %v217_v56 = vmul.f32 %v14134_v17, %v126_v10 }
 0x4eb   :  { %13485 = vtanh.f32 %v2965_v12  ;;  %v2966_v40 = vmul.f32 0.5, %v2958_v11  ;;  %v2961_v41 = vadd.f32 %v2909_v58, %v301_v39  ;;  %v299_v12 = vadd.f32 %v14138_v21, %v213_v23 }
 0x4ec   :  { %v2911_v60 = vpop.f32.mrf.mxu0  ;;  %v2954_v2 = vpop.f32.mrf.mxu1  ;;  %v303_v14 = vadd.f32 %v14138_v21, %v217_v56 }
 0x4ed   :  { %13487 = vtanh.f32 %v2966_v40  ;;  %v2968_v20 = vmul.f32 0.5, %v2961_v41  ;;  %v2962_v52 = vadd.f32 %v2911_v60, %v302_v15  ;;  %v2964_v11 = vadd.f32 %v2954_v2, %v304_v6 }
 0x4ee   :  { %v2959_v24 = vadd.f32 %v2948_v9, %v299_v12  ;;  %v2963_v41 = vadd.f32 %v2952_v7, %v303_v14 }
 0x4ef   :  { %13489 = vtanh.f32 %v2968_v20  ;;  %v2969_v13 = vmul.f32 0.5, %v2962_v52 }
 0x4f0   :  { %13491 = vtanh.f32 %v2960_v46  ;;  %v2967_v42 = vmul.f32 0.5, %v2959_v24  ;;  %v2970_v20 = vmul.f32 0.5, %v2963_v41 }
 0x4f1   :  { %13493 = vtanh.f32 %v2969_v13 }
 0x4f2   :  { %13495 = vtanh.f32 %v2964_v11 }
 0x4f3   :  { %13497 = vtanh.f32 %v2967_v42 }
 0x4f4   :  { %13499 = vtanh.f32 %v2970_v20 }
 0x4f8   :  { %v13486_v40 = vpop.eup %13485 }
 0x4f9   :  { %v2977_v39 = vmul.f32 0.5, %v13486_v40 }
 0x4fa   :  { %v13488_v18 = vpop.eup %13487 }
 0x4fb   :  { %v2983_v52 = vadd.f32 0.5, %v2977_v39  ;;  %v2978_v58 = vmul.f32 0.5, %v13488_v18 }
 0x4fc   :  { %v13490_v16 = vpop.eup %13489 }
 0x4fd   :  { %v13492_v15 = vpop.eup %13491  ;;  %v2984_v10 = vadd.f32 0.5, %v2978_v58  ;;  %v2980_v46 = vmul.f32 0.5, %v13490_v16  ;;  %v14815_v16 = vld [vmem:[#allocation6 + $0xe0] ss:$16 sps:$4 sm:$0xff]  }
 0x4fe   :  { %v13494_v60 = vpop.eup %13493  ;;  %v2993_v23 = vmul.f32 %v13492_v15, %v2983_v52 }
 0x4ff   :  { %v2991_v2 = vmul.f32 %v2984_v10, %v14632_v1  ;;  %v2986_v9 = vadd.f32 0.5, %v2980_v46  ;;  %v2981_v13 = vmul.f32 0.5, %v13494_v60  ;;  %v13496_v56 = vpop.eup %13495  ;;  %v14821_v10 = vld [vmem:[#allocation6 + $0xc4] ss:$16 sps:$4 sm:$0xff]   ;;  %v14823_v46 = vld [vmem:[#allocation6 + $0xcc] ss:$16 sps:$4 sm:$0xff]  }
 0x500   :  { %v13498_v24 = vpop.eup %13497  ;;  %v14829_v60 = vld [vmem:[#allocation6 + $0xc0] ss:$16 sps:$4 sm:$0xff]  }
 0x501   :  { %v14808_v7 = vadd.f32 %v2993_v23, %v2991_v2  ;;  %v2987_v6 = vadd.f32 0.5, %v2981_v13  ;;  %v2994_v12 = vmul.f32 %v13496_v56, %v2986_v9  ;;  %v13500_v41 = vpop.eup %13499  ;;  %v2979_v40 = vmul.f32 0.5, %v13498_v24  ;;  %v14831_v2 = vld [vmem:[#allocation6 + $0xc8] ss:$16 sps:$4 sm:$0xff]   ;;  %v14835_v23 = vld [vmem:[#allocation6 + $0xa4] ss:$16 sps:$4 sm:$0xff]  }
 0x502   :  { %v2982_v1 = vmul.f32 0.5, %v13500_v41  ;;  %v14837_v9 = vld [vmem:[#allocation6 + $0xac] ss:$16 sps:$4 sm:$0xff]   ;;  %v14843_v13 = vld [vmem:[#allocation6 + $0xa0] ss:$16 sps:$4 sm:$0xff]  }
 0x503   :  { %v2992_v11 = vmul.f32 %v2987_v6, %v14636_v32  ;;  %13501 = vtanh.f32 %v14808_v7  ;;  %v2985_v42 = vadd.f32 0.5, %v2979_v40  ;;  %v14817_v32 = vld [vmem:[#allocation6 + $0xe8] ss:$16 sps:$4 sm:$0xff]   ;;  %v14849_v56 = vld [vmem:[#allocation6 + $0x84] ss:$16 sps:$4 sm:$0xff]  }
 0x504   :  { %v2988_v18 = vadd.f32 0.5, %v2982_v1  ;;  %v14845_v6 = vld [vmem:[#allocation6 + $0xa8] ss:$16 sps:$4 sm:$0xff]   ;;  %v14861_v41 = vld [vmem:[#allocation6 + $0x64] ss:$16 sps:$4 sm:$0xff]  }
 0x505   :  { %v14812_v14 = vadd.f32 %v2994_v12, %v2992_v11  ;;  %v14851_v11 = vld [vmem:[#allocation6 + $0x8c] ss:$16 sps:$4 sm:$0xff]   ;;  %v14855_v12 = vld [vmem:[#allocation6 + $0x80] ss:$16 sps:$4 sm:$0xff]   ;;  %v14857_v24 = vld [vmem:[#allocation6 + $0x88] ss:$16 sps:$4 sm:$0xff]  }
 0x506   :  { %17164 = vst [vmem:[#allocation46_spill] sm:$0xff] %v14861_v41  ;;  %v14863_v40 = vld [vmem:[#allocation6 + $0x6c] ss:$16 sps:$4 sm:$0xff]   ;;  %v14867_v1 = vld [vmem:[#allocation6 + $0x60] ss:$16 sps:$4 sm:$0xff]  }
 0x507   :  { %13503 = vtanh.f32 %v14812_v14  ;;  %17165 = vst [vmem:[#allocation47_spill] sm:$0xff] %v14863_v40  ;;  %17166 = vst [vmem:[#allocation48_spill] sm:$0xff] %v14867_v1 }
 0x510   :  { %v13502_v39 = vpop.eup %13501 }
 0x511   :  { %v2999_v52 = vmul.f32 %v13502_v39, %v2985_v42  ;;  %v14869_v39 = vld [vmem:[#allocation6 + $0x68] ss:$16 sps:$4 sm:$0xff]   ;;  %v14873_v42 = vld [vmem:[#allocation6 + $0x44] ss:$16 sps:$4 sm:$0xff]  }
 0x512   :  { %17167 = vst [vmem:[#allocation49_spill] sm:$0xff] %v14869_v39  ;;  %17168 = vst [vmem:[#allocation50_spill] sm:$0xff] %v14873_v42 }
 0x514   :  { %v13504_v20 = vpop.eup %13503 }
 0x515   :  { %v3000_v58 = vmul.f32 %v13504_v20, %v2988_v18  ;;  %v14875_v18 = vld [vmem:[#allocation6 + $0x4c] ss:$16 sps:$4 sm:$0xff]   ;;  %v14879_v20 = vld [vmem:[#allocation6 + $0x40] ss:$16 sps:$4 sm:$0xff]  }
 0x516   :  { %17169 = vst [vmem:[#allocation51_spill] sm:$0xff] %v14875_v18  ;;  %17170 = vst [vmem:[#allocation52_spill] sm:$0xff] %v14879_v20 }
 0x517   :  { %v14819_v15 = vpack.c.bf16 %v3000_v58, %v2999_v52  ;;  %v14881_v52 = vld [vmem:[#allocation6 + $0x48] ss:$16 sps:$4 sm:$0xff]   ;;  %v14885_v58 = vld [vmem:[#allocation6 + $0x24] ss:$16 sps:$4 sm:$0xff]  }
 0x519   :  { %3249 = vmatmul.mubr.bf16.vlgmr.msra.gmra.mxu0 %v14819_v15  ;;  %3292 = vmatmul.mubr.bf16.vlgmr.msra.gmra.mxu1 %v14819_v15 }
 0x51a   :  { %3513 = vmatpush1.bf16.msra.mxu0 %v14815_v16  ;;  %3556 = vmatpush1.bf16.msra.mxu1 %v14817_v32 }
 0x51b   :  { %3514 = vmatprep.subr.bf16.mxu0 %v14821_v10  ;;  %3557 = vmatprep.subr.bf16.mxu1 %v14823_v46 }
 0x51c   :  { %3544 = vmatprep.mubr.bf16.mxu0 %v17111_v47  ;;  %3587 = vmatprep.mubr.bf16.mxu1 %v17111_v47 }
 0x51e   :  { %3515 = vmatpush1.bf16.msra.mxu0 %v14829_v60  ;;  %3558 = vmatpush1.bf16.msra.mxu1 %v14831_v2 }
 0x51f   :  { %3516 = vmatprep.subr.bf16.mxu0 %v14835_v23  ;;  %3559 = vmatprep.subr.bf16.mxu1 %v14837_v9 }
 0x522   :  { %3517 = vmatpush1.bf16.msra.mxu0 %v14843_v13  ;;  %3560 = vmatpush1.bf16.msra.mxu1 %v14845_v6 }
 0x523   :  { %3518 = vmatprep.subr.bf16.mxu0 %v14849_v56  ;;  %3561 = vmatprep.subr.bf16.mxu1 %v14851_v11 }
 0x526   :  { %3519 = vmatpush1.bf16.msra.mxu0 %v14855_v12  ;;  %3562 = vmatpush1.bf16.msra.mxu1 %v14857_v24 }
 0x527   :  { %3520 = vmatprep.subr.bf16.mxu0 %v14861_v41  ;;  %3563 = vmatprep.subr.bf16.mxu1 %v14863_v40  ;;  %v14887_v41 = vld [vmem:[#allocation6 + $0x2c] ss:$16 sps:$4 sm:$0xff]   ;;  %v14891_v40 = vld [vmem:[#allocation6 + $0x20] ss:$16 sps:$4 sm:$0xff]  }
 0x52a   :  { %3521 = vmatpush1.bf16.msra.mxu0 %v14867_v1  ;;  %3564 = vmatpush1.bf16.msra.mxu1 %v14869_v39  ;;  %v14893_v1 = vld [vmem:[#allocation6 + $0x28] ss:$16 sps:$4 sm:$0xff]   ;;  %v14897_v39 = vld [vmem:[#allocation6 + $0x4] ss:$16 sps:$4 sm:$0xff]  }
 0x52b   :  { %3522 = vmatprep.subr.bf16.mxu0 %v14873_v42  ;;  %3565 = vmatprep.subr.bf16.mxu1 %v14875_v18  ;;  %v14899_v42 = vld [vmem:[#allocation6 + $0xc] ss:$16 sps:$4 sm:$0xff]   ;;  %v14903_v18 = vld [vmem:[#allocation6] ss:$16 sps:$4 sm:$0xff]  }
 0x52e   :  { %3523 = vmatpush1.bf16.msra.mxu0 %v14879_v20  ;;  %3566 = vmatpush1.bf16.msra.mxu1 %v14881_v52  ;;  %v14905_v20 = vld [vmem:[#allocation6 + $0x8] ss:$16 sps:$4 sm:$0xff]  }
 0x52f   :  { %3524 = vmatprep.subr.bf16.mxu0 %v14885_v58  ;;  %3567 = vmatprep.subr.bf16.mxu1 %v14887_v41 }
 0x532   :  { %3525 = vmatpush1.bf16.msra.mxu0 %v14891_v40  ;;  %3568 = vmatpush1.bf16.msra.mxu1 %v14893_v1 }
 0x533   :  { %3526 = vmatprep.subr.bf16.mxu0 %v14897_v39  ;;  %3569 = vmatprep.subr.bf16.mxu1 %v14899_v42 }
 0x536   :  { %3527 = vmatpush1.bf16.msra.mxu0 %v14903_v18  ;;  %3570 = vmatpush1.bf16.msra.mxu1 %v14905_v20 }
 0x537   :  { %3857 = vmatprep.subr.bf16.mxu0 %v14673_v53  ;;  %3900 = vmatprep.subr.bf16.mxu1 %v14675_v44  ;;  %v17171_v53 = vld [vmem:[#allocation16_spill] sm:$0xff]  ;;  %v17172_v44 = vld [vmem:[#allocation15_spill] sm:$0xff] }
 0x539   :  { %3545 = vmatmul.mubr.bf16.vlgmr.msra.gmra.mxu0 %v14819_v15  ;;  %3588 = vmatmul.mubr.bf16.vlgmr.msra.gmra.mxu1 %v14819_v15 }
 0x53a   :  { %3858 = vmatpush1.bf16.msra.mxu0 %v14677_v0  ;;  %3901 = vmatpush1.bf16.msra.mxu1 %v14679_v45  ;;  %v17173_v0 = vld [vmem:[#allocation32_spill] sm:$0xff] }
 0x53b   :  { %3859 = vmatprep.subr.bf16.mxu0 %v14685_v4  ;;  %3902 = vmatprep.subr.bf16.mxu1 %v14687_v50 }
 0x53c   :  { %3889 = vmatprep.mubr.bf16.mxu0 %v17111_v47  ;;  %3932 = vmatprep.mubr.bf16.mxu1 %v17111_v47 }
 0x53e   :  { %3860 = vmatpush1.bf16.msra.mxu0 %v14689_v5  ;;  %3903 = vmatpush1.bf16.msra.mxu1 %v14691_v63  ;;  %v131_v63 = vpop.permute.xlu0 %130 }
 0x53f   :  { %3861 = vmatprep.subr.bf16.mxu0 %v14697_v61  ;;  %3904 = vmatprep.subr.bf16.mxu1 %v14699_v59 }
 0x542   :  { %3862 = vmatpush1.bf16.msra.mxu0 %v14701_v55  ;;  %3905 = vmatpush1.bf16.msra.mxu1 %v14703_v49  ;;  %v17180_v55 = vld [vmem:[#allocation13_spill] sm:$0xff] }
 0x543   :  { %3863 = vmatprep.subr.bf16.mxu0 %v14709_v54  ;;  %3906 = vmatprep.subr.bf16.mxu1 %v14711_v8  ;;  %v219_v49 = vmul.f32 %v17180_v55, %v131_v63  ;;  %v136_v54 = vpop.permute.xlu1 %135  ;;  %v17181_v8 = vld [vmem:[#allocation14_spill] sm:$0xff] }
 0x546   :  { %3864 = vmatpush1.bf16.msra.mxu0 %v14713_v57  ;;  %3907 = vmatpush1.bf16.msra.mxu1 %v14715_v48  ;;  %v220_v57 = vmul.f32 %v17181_v8, %v131_v63 }
 0x547   :  { %3865 = vmatprep.subr.bf16.mxu0 %v14719_v38  ;;  %3908 = vmatprep.subr.bf16.mxu1 %v14727_v22 }
 0x54a   :  { %3866 = vmatpush1.bf16.msra.mxu0 %v14723_v25  ;;  %3909 = vmatpush1.bf16.msra.mxu1 %v14725_v19  ;;  %v305_v25 = vadd.f32 %v17124_v43, %v219_v49  ;;  %v223_v19 = vmul.f32 %v17180_v55, %v136_v54 }
 0x54b   :  { %3867 = vmatprep.subr.bf16.mxu0 %v14730_v27  ;;  %3910 = vmatprep.subr.bf16.mxu1 %v14732_v30  ;;  %v222_v30 = vmul.f32 %v17125_v51, %v131_v63 }
 0x54e   :  { %3868 = vmatpush1.bf16.msra.mxu0 %v14737_v31  ;;  %3911 = vmatpush1.bf16.msra.mxu1 %v14739_v28  ;;  %v306_v28 = vadd.f32 %v14115_v62, %v220_v57 }
 0x54f   :  { %3869 = vmatprep.subr.bf16.mxu0 %v14743_v26  ;;  %3912 = vmatprep.subr.bf16.mxu1 %v14745_v29  ;;  %v224_v26 = vmul.f32 %v17181_v8, %v136_v54 }
 0x552   :  { %3870 = vmatpush1.bf16.msra.mxu0 %v14749_v33  ;;  %3913 = vmatpush1.bf16.msra.mxu1 %v14751_v35 }
 0x553   :  { %3871 = vmatprep.subr.bf16.mxu0 %v14755_v36  ;;  %3914 = vmatprep.subr.bf16.mxu1 %v14757_v34  ;;  %v309_v34 = vadd.f32 %v17124_v43, %v223_v19 }
 0x556   :  { %3872 = vmatpush1.bf16.msra.mxu0 %v14761_v37  ;;  %3915 = vmatpush1.bf16.msra.mxu1 %v17171_v53  ;;  %v308_v37 = vadd.f32 %v14120_v3, %v222_v30 }
 0x557   :  { %4153 = vmatprep.subr.bf16.mxu0 %v17172_v44  ;;  %4196 = vmatprep.subr.bf16.mxu1 %v17173_v0  ;;  %v226_v44 = vmul.f32 %v17125_v51, %v136_v54 }
 0x559   :  { %v312_v30 = vadd.f32 %v14120_v3, %v226_v44 }
 0x5d9   :  { %v14949_v45 = vpop.f32.mrf.mxu0  ;;  %v14951_v4 = vpop.f32.mrf.mxu1 }
 0x5da   :  { %17174 = vst [vmem:[#allocation16_spill] sm:$0xff] %v14949_v45  ;;  %17175 = vst [vmem:[#allocation15_spill] sm:$0xff] %v14951_v4 }
 0x5db   :  { %v14953_v50 = vpop.f32.mrf.mxu0  ;;  %v14955_v5 = vpop.f32.mrf.mxu1 }
 0x5dc   :  { %17176 = vst [vmem:[#allocation32_spill] sm:$0xff] %v14953_v50  ;;  %17177 = vst [vmem:[#allocation53_spill] sm:$0xff] %v14955_v5 }
 0x5dd   :  { %v14957_v61 = vpop.f32.mrf.mxu0  ;;  %v14959_v59 = vpop.f32.mrf.mxu1 }
 0x5de   :  { %17178 = vst [vmem:[#allocation54_spill] sm:$0xff] %v14957_v61  ;;  %17179 = vst [vmem:[#allocation55_spill] sm:$0xff] %v14959_v59 }
 0x5df   :  { %v14963_v48 = vpop.f32.mrf.mxu0  ;;  %v14965_v38 = vpop.f32.mrf.mxu1 }
 0x5e0   :  { %17182 = vst [vmem:[#allocation56_spill] sm:$0xff] %v14963_v48  ;;  %17183 = vst [vmem:[#allocation57_spill] sm:$0xff] %v14965_v38 }
 0x5f9   :  { %v3546_v22 = vpop.f32.mrf.mxu0  ;;  %v3589_v27 = vpop.f32.mrf.mxu1 }
 0x5fa   :  { %v3598_v31 = vadd.f32 %v3546_v22, %v305_v25  ;;  %v310_v25 = vadd.f32 %v14115_v62, %v224_v26 }
 0x5fb   :  { %v3548_v29 = vpop.f32.mrf.mxu0  ;;  %v3591_v33 = vpop.f32.mrf.mxu1 }
 0x5fc   :  { %v3606_v35 = vmul.f32 0.5, %v3598_v31  ;;  %v3599_v36 = vadd.f32 %v3548_v29, %v306_v28  ;;  %v3601_v57 = vadd.f32 %v3591_v33, %v308_v37  ;;  %v221_v28 = vmul.f32 %v14134_v17, %v131_v63 }
 0x5fd   :  { %v3550_v15 = vpop.f32.mrf.mxu0  ;;  %v3593_v53 = vpop.f32.mrf.mxu1  ;;  %v225_v29 = vmul.f32 %v14134_v17, %v136_v54 }
 0x5fe   :  { %13505 = vtanh.f32 %v3606_v35  ;;  %v3607_v0 = vmul.f32 0.5, %v3599_v36  ;;  %v3602_v49 = vadd.f32 %v3550_v15, %v309_v34  ;;  %v307_v36 = vadd.f32 %v14138_v21, %v221_v28 }
 0x5ff   :  { %v3552_v22 = vpop.f32.mrf.mxu0  ;;  %v3595_v31 = vpop.f32.mrf.mxu1  ;;  %v311_v26 = vadd.f32 %v14138_v21, %v225_v29 }
 0x600   :  { %13507 = vtanh.f32 %v3607_v0  ;;  %v3609_v59 = vmul.f32 0.5, %v3602_v49  ;;  %v3603_v4 = vadd.f32 %v3552_v22, %v310_v25  ;;  %v3605_v35 = vadd.f32 %v3595_v31, %v312_v30 }
 0x601   :  { %v3600_v33 = vadd.f32 %v3589_v27, %v307_v36  ;;  %v3604_v34 = vadd.f32 %v3593_v53, %v311_v26 }
 0x602   :  { %13509 = vtanh.f32 %v3609_v59  ;;  %v3610_v19 = vmul.f32 0.5, %v3603_v4 }
 0x603   :  { %13511 = vtanh.f32 %v3601_v57  ;;  %v3608_v0 = vmul.f32 0.5, %v3600_v33  ;;  %v3611_v59 = vmul.f32 0.5, %v3604_v34 }
 0x604   :  { %13513 = vtanh.f32 %v3610_v19 }
 0x605   :  { %13515 = vtanh.f32 %v3605_v35 }
 0x606   :  { %13517 = vtanh.f32 %v3608_v0 }
 0x607   :  { %13519 = vtanh.f32 %v3611_v59 }
 0x60b   :  { %v13506_v37 = vpop.eup %13505 }
 0x60c   :  { %v3618_v15 = vmul.f32 0.5, %v13506_v37 }
 0x60d   :  { %v13508_v63 = vpop.eup %13507 }
 0x60e   :  { %v3624_v4 = vadd.f32 0.5, %v3618_v15  ;;  %v3619_v49 = vmul.f32 0.5, %v13508_v63 }
 0x60f   :  { %v13510_v44 = vpop.eup %13509 }
 0x610   :  { %v13512_v25 = vpop.eup %13511  ;;  %v3625_v54 = vadd.f32 0.5, %v3619_v49  ;;  %v3621_v57 = vmul.f32 0.5, %v13510_v44 }
 0x611   :  { %v13514_v22 = vpop.eup %13513  ;;  %v3634_v28 = vmul.f32 %v13512_v25, %v3624_v4  ;;  %v15073_v25 = vld [vmem:[#allocation4 + $0x60] ss:$16 sps:$4 sm:$0xff]  }
 0x612   :  { %v3632_v31 = vmul.f32 %v3625_v54, %v14808_v7  ;;  %v3627_v27 = vadd.f32 0.5, %v3621_v57  ;;  %v3622_v19 = vmul.f32 0.5, %v13514_v22  ;;  %v13516_v29 = vpop.eup %13515  ;;  %v15075_v54 = vld [vmem:[#allocation4 + $0x68] ss:$16 sps:$4 sm:$0xff]   ;;  %v15077_v57 = vld [vmem:[#allocation4 + $0x6c] ss:$16 sps:$4 sm:$0xff]  }
 0x613   :  { %v13518_v33 = vpop.eup %13517  ;;  %v15080_v22 = vld [vmem:[#allocation4 + $0x44] ss:$16 sps:$4 sm:$0xff]  }
 0x614   :  { %v14982_v53 = vadd.f32 %v3634_v28, %v3632_v31  ;;  %v3628_v30 = vadd.f32 0.5, %v3622_v19  ;;  %v3635_v36 = vmul.f32 %v13516_v29, %v3627_v27  ;;  %v13520_v34 = vpop.eup %13519  ;;  %v3620_v37 = vmul.f32 0.5, %v13518_v33  ;;  %v15082_v31 = vld [vmem:[#allocation4 + $0x4c] ss:$16 sps:$4 sm:$0xff]   ;;  %v15087_v28 = vld [vmem:[#allocation4 + $0x40] ss:$16 sps:$4 sm:$0xff]  }
 0x615   :  { %v3623_v7 = vmul.f32 0.5, %v13520_v34  ;;  %v15089_v27 = vld [vmem:[#allocation4 + $0x48] ss:$16 sps:$4 sm:$0xff]   ;;  %v15093_v19 = vld [vmem:[#allocation4 + $0x24] ss:$16 sps:$4 sm:$0xff]  }
 0x616   :  { %v3633_v35 = vmul.f32 %v3628_v30, %v14812_v14  ;;  %13521 = vtanh.f32 %v14982_v53  ;;  %v3626_v0 = vadd.f32 0.5, %v3620_v37  ;;  %v17184_v14 = vld [vmem:[#allocation46_spill] sm:$0xff]  ;;  %v15095_v30 = vld [vmem:[#allocation4 + $0x2c] ss:$16 sps:$4 sm:$0xff]   ;;  %v15113_v37 = vld [vmem:[#allocation4 + $0x8] ss:$16 sps:$4 sm:$0xff]  }
 0x617   :  { %v3629_v63 = vadd.f32 0.5, %v3623_v7  ;;  %v15099_v29 = vld [vmem:[#allocation4 + $0x20] ss:$16 sps:$4 sm:$0xff]   ;;  %v15107_v33 = vld [vmem:[#allocation4 + $0xc] ss:$16 sps:$4 sm:$0xff]   ;;  %17191 = vst [vmem:[#allocation46_spill] sm:$0xff] %v15113_v37 }
 0x618   :  { %v14986_v26 = vadd.f32 %v3635_v36, %v3633_v35  ;;  %v15101_v35 = vld [vmem:[#allocation4 + $0x28] ss:$16 sps:$4 sm:$0xff]   ;;  %v15105_v36 = vld [vmem:[#allocation4 + $0x4] ss:$16 sps:$4 sm:$0xff]   ;;  %v15111_v34 = vld [vmem:[#allocation4] ss:$16 sps:$4 sm:$0xff]  }
 0x619   :  { %v12895_v7 = vld [vmem:[#allocation6 + $0xe4] ss:$16 sps:$4 sm:$0xff]  }
 0x61a   :  { %13523 = vtanh.f32 %v14986_v26 }
 0x623   :  { %v13522_v15 = vpop.eup %13521 }
 0x624   :  { %v3640_v4 = vmul.f32 %v13522_v15, %v3626_v0  ;;  %v12898_v15 = vld [vmem:[#allocation6 + $0xec] ss:$16 sps:$4 sm:$0xff]  }
 0x627   :  { %v13524_v59 = vpop.eup %13523 }
 0x628   :  { %v3641_v49 = vmul.f32 %v13524_v59, %v3629_v63 }
 0x62a   :  { %v3642_v44 = vpack.c.bf16 %v3641_v49, %v3640_v4  ;;  %v141_v49 = vpop.permute.xlu0 %140 }
 0x62c   :  { %3890 = vmatmul.mubr.bf16.vlgmr.msra.gmra.mxu0 %v3642_v44  ;;  %3933 = vmatmul.mubr.bf16.vlgmr.msra.gmra.mxu1 %v3642_v44 }
 0x62d   :  { %4154 = vmatpush1.bf16.msra.mxu0 %v14815_v16  ;;  %4197 = vmatpush1.bf16.msra.mxu1 %v14817_v32  ;;  %v17185_v16 = vld [vmem:[#allocation47_spill] sm:$0xff]  ;;  %v17186_v32 = vld [vmem:[#allocation48_spill] sm:$0xff] }
 0x62e   :  { %4155 = vmatprep.subr.bf16.mxu0 %v14821_v10  ;;  %4198 = vmatprep.subr.bf16.mxu1 %v14823_v46  ;;  %v17187_v10 = vld [vmem:[#allocation49_spill] sm:$0xff]  ;;  %v17188_v46 = vld [vmem:[#allocation50_spill] sm:$0xff] }
 0x62f   :  { %4185 = vmatprep.mubr.bf16.mxu0 %v17111_v47  ;;  %4228 = vmatprep.mubr.bf16.mxu1 %v17111_v47 }
 0x631   :  { %4156 = vmatpush1.bf16.msra.mxu0 %v14829_v60  ;;  %4199 = vmatpush1.bf16.msra.mxu1 %v14831_v2  ;;  %v17189_v60 = vld [vmem:[#allocation51_spill] sm:$0xff]  ;;  %v17190_v2 = vld [vmem:[#allocation52_spill] sm:$0xff] }
 0x632   :  { %4157 = vmatprep.subr.bf16.mxu0 %v14835_v23  ;;  %4200 = vmatprep.subr.bf16.mxu1 %v14837_v9  ;;  %v15023_v23 = vld [vmem:[#allocation4 + $0xe4] ss:$16 sps:$4 sm:$0xff]   ;;  %v15025_v9 = vld [vmem:[#allocation4 + $0xec] ss:$16 sps:$4 sm:$0xff]  }
 0x635   :  { %4158 = vmatpush1.bf16.msra.mxu0 %v14843_v13  ;;  %4201 = vmatpush1.bf16.msra.mxu1 %v14845_v6  ;;  %v15027_v13 = vld [vmem:[#allocation4 + $0xe0] ss:$16 sps:$4 sm:$0xff]   ;;  %v15029_v6 = vld [vmem:[#allocation4 + $0xe8] ss:$16 sps:$4 sm:$0xff]  }
 0x636   :  { %4159 = vmatprep.subr.bf16.mxu0 %v14849_v56  ;;  %4202 = vmatprep.subr.bf16.mxu1 %v14851_v11  ;;  %v15035_v56 = vld [vmem:[#allocation4 + $0xc4] ss:$16 sps:$4 sm:$0xff]   ;;  %v15037_v11 = vld [vmem:[#allocation4 + $0xcc] ss:$16 sps:$4 sm:$0xff]  }
 0x639   :  { %4160 = vmatpush1.bf16.msra.mxu0 %v14855_v12  ;;  %4203 = vmatpush1.bf16.msra.mxu1 %v14857_v24  ;;  %v15039_v12 = vld [vmem:[#allocation4 + $0xc0] ss:$16 sps:$4 sm:$0xff]   ;;  %v15041_v24 = vld [vmem:[#allocation4 + $0xc8] ss:$16 sps:$4 sm:$0xff]  }
 0x63a   :  { %4161 = vmatprep.subr.bf16.mxu0 %v17184_v14  ;;  %4204 = vmatprep.subr.bf16.mxu1 %v17185_v16  ;;  %v227_v16 = vmul.f32 %v17180_v55, %v141_v49 }
 0x63d   :  { %4162 = vmatpush1.bf16.msra.mxu0 %v17186_v32  ;;  %4205 = vmatpush1.bf16.msra.mxu1 %v17187_v10  ;;  %v146_v32 = vpop.permute.xlu1 %145  ;;  %v228_v10 = vmul.f32 %v17181_v8, %v141_v49 }
 0x63e   :  { %4163 = vmatprep.subr.bf16.mxu0 %v17188_v46  ;;  %4206 = vmatprep.subr.bf16.mxu1 %v17189_v60  ;;  %v234_v50 = vmul.f32 %v17125_v51, %v146_v32 }
 0x641   :  { %4164 = vmatpush1.bf16.msra.mxu0 %v17190_v2  ;;  %4207 = vmatpush1.bf16.msra.mxu1 %v14881_v52  ;;  %v15065_v52 = vld [vmem:[#allocation4 + $0x88] ss:$16 sps:$4 sm:$0xff]   ;;  %v313_v2 = vadd.f32 %v17124_v43, %v227_v16 }
 0x642   :  { %4165 = vmatprep.subr.bf16.mxu0 %v14885_v58  ;;  %4208 = vmatprep.subr.bf16.mxu1 %v14887_v41  ;;  %v15047_v41 = vld [vmem:[#allocation4 + $0xa4] ss:$16 sps:$4 sm:$0xff]  }
 0x643   :  { %v15069_v58 = vld [vmem:[#allocation4 + $0x64] ss:$16 sps:$4 sm:$0xff]  }
 0x645   :  { %4166 = vmatpush1.bf16.msra.mxu0 %v14891_v40  ;;  %4209 = vmatpush1.bf16.msra.mxu1 %v14893_v1  ;;  %v15049_v40 = vld [vmem:[#allocation4 + $0xac] ss:$16 sps:$4 sm:$0xff]   ;;  %v15051_v1 = vld [vmem:[#allocation4 + $0xa0] ss:$16 sps:$4 sm:$0xff]  }
 0x646   :  { %4167 = vmatprep.subr.bf16.mxu0 %v14897_v39  ;;  %4210 = vmatprep.subr.bf16.mxu1 %v14899_v42  ;;  %v15053_v39 = vld [vmem:[#allocation4 + $0xa8] ss:$16 sps:$4 sm:$0xff]   ;;  %v15059_v42 = vld [vmem:[#allocation4 + $0x84] ss:$16 sps:$4 sm:$0xff]  }
 0x649   :  { %4168 = vmatpush1.bf16.msra.mxu0 %v14903_v18  ;;  %4211 = vmatpush1.bf16.msra.mxu1 %v14905_v20  ;;  %v15061_v18 = vld [vmem:[#allocation4 + $0x8c] ss:$16 sps:$4 sm:$0xff]   ;;  %v15063_v20 = vld [vmem:[#allocation4 + $0x80] ss:$16 sps:$4 sm:$0xff]  }
 0x64a   :  { %4498 = vmatprep.subr.bf16.mxu0 %v15023_v23  ;;  %4541 = vmatprep.subr.bf16.mxu1 %v15025_v9 }
 0x64c   :  { %4186 = vmatmul.mubr.bf16.vlgmr.msra.gmra.mxu0 %v3642_v44  ;;  %4229 = vmatmul.mubr.bf16.vlgmr.msra.gmra.mxu1 %v3642_v44 }
 0x64d   :  { %4530 = vmatprep.mubr.bf16.mxu0 %v17111_v47  ;;  %4573 = vmatprep.mubr.bf16.mxu1 %v17111_v47 }
 0x64e   :  { %4499 = vmatpush1.bf16.msra.mxu0 %v15027_v13  ;;  %4542 = vmatpush1.bf16.msra.mxu1 %v15029_v6 }
 0x64f   :  { %4500 = vmatprep.subr.bf16.mxu0 %v15035_v56  ;;  %4543 = vmatprep.subr.bf16.mxu1 %v15037_v11 }
 0x652   :  { %4501 = vmatpush1.bf16.msra.mxu0 %v15039_v12  ;;  %4544 = vmatpush1.bf16.msra.mxu1 %v15041_v24 }
 0x653   :  { %4502 = vmatprep.subr.bf16.mxu0 %v15047_v41  ;;  %4545 = vmatprep.subr.bf16.mxu1 %v15049_v40 }
 0x656   :  { %4503 = vmatpush1.bf16.msra.mxu0 %v15051_v1  ;;  %4546 = vmatpush1.bf16.msra.mxu1 %v15053_v39 }
 0x657   :  { %4504 = vmatprep.subr.bf16.mxu0 %v15059_v42  ;;  %4547 = vmatprep.subr.bf16.mxu1 %v15061_v18 }
 0x65a   :  { %4505 = vmatpush1.bf16.msra.mxu0 %v15063_v20  ;;  %4548 = vmatpush1.bf16.msra.mxu1 %v15065_v52 }
 0x65b   :  { %4506 = vmatprep.subr.bf16.mxu0 %v15069_v58  ;;  %4549 = vmatprep.subr.bf16.mxu1 %v15077_v57 }
 0x65e   :  { %4507 = vmatpush1.bf16.msra.mxu0 %v15073_v25  ;;  %4550 = vmatpush1.bf16.msra.mxu1 %v15075_v54 }
 0x65f   :  { %4508 = vmatprep.subr.bf16.mxu0 %v15080_v22  ;;  %4551 = vmatprep.subr.bf16.mxu1 %v15082_v31 }
 0x662   :  { %4509 = vmatpush1.bf16.msra.mxu0 %v15087_v28  ;;  %4552 = vmatpush1.bf16.msra.mxu1 %v15089_v27 }
 0x663   :  { %4510 = vmatprep.subr.bf16.mxu0 %v15093_v19  ;;  %4553 = vmatprep.subr.bf16.mxu1 %v15095_v30 }
 0x666   :  { %4511 = vmatpush1.bf16.msra.mxu0 %v15099_v29  ;;  %4554 = vmatpush1.bf16.msra.mxu1 %v15101_v35 }
 0x667   :  { %4512 = vmatprep.subr.bf16.mxu0 %v15105_v36  ;;  %4555 = vmatprep.subr.bf16.mxu1 %v15107_v33 }
 0x66a   :  { %4513 = vmatpush1.bf16.msra.mxu0 %v15111_v34  ;;  %4556 = vmatpush1.bf16.msra.mxu1 %v15113_v37 }
 0x66b   :  { %4794 = vmatprep.subr.bf16.mxu0 %v12895_v7  ;;  %4837 = vmatprep.subr.bf16.mxu1 %v12898_v15  ;;  %v231_v7 = vmul.f32 %v17180_v55, %v146_v32 }
 0x6ec   :  { %v15119_v0 = vpop.f32.mrf.mxu0  ;;  %v15121_v63 = vpop.f32.mrf.mxu1 }
 0x6ed   :  { %17192 = vst [vmem:[#allocation47_spill] sm:$0xff] %v15119_v0  ;;  %17193 = vst [vmem:[#allocation48_spill] sm:$0xff] %v15121_v63 }
 0x6ee   :  { %v15123_v59 = vpop.f32.mrf.mxu0  ;;  %v15125_v4 = vpop.f32.mrf.mxu1 }
 0x6ef   :  { %17194 = vst [vmem:[#allocation49_spill] sm:$0xff] %v15123_v59  ;;  %17195 = vst [vmem:[#allocation50_spill] sm:$0xff] %v15125_v4  ;;  %v230_v4 = vmul.f32 %v17125_v51, %v141_v49  ;;  %v232_v59 = vmul.f32 %v17181_v8, %v146_v32 }
 0x6f0   :  { %v15127_v44 = vpop.f32.mrf.mxu0  ;;  %v15129_v14 = vpop.f32.mrf.mxu1 }
 0x6f1   :  { %17196 = vst [vmem:[#allocation51_spill] sm:$0xff] %v15127_v44  ;;  %17197 = vst [vmem:[#allocation52_spill] sm:$0xff] %v15129_v14  ;;  %v314_v14 = vadd.f32 %v14115_v62, %v228_v10 }
 0x6f2   :  { %v15133_v46 = vpop.f32.mrf.mxu0  ;;  %v15135_v60 = vpop.f32.mrf.mxu1 }
 0x6f3   :  { %17198 = vst [vmem:[#allocation58_spill] sm:$0xff] %v15133_v46  ;;  %17199 = vst [vmem:[#allocation59_spill] sm:$0xff] %v15135_v60  ;;  %v317_v46 = vadd.f32 %v17124_v43, %v231_v7  ;;  %v316_v60 = vadd.f32 %v14120_v3, %v230_v4  ;;  %v320_v4 = vadd.f32 %v14120_v3, %v234_v50 }
 0x6f4   :  { %v233_v7 = vmul.f32 %v14134_v17, %v146_v32 }
 0x70c   :  { %v4187_v15 = vpop.f32.mrf.mxu0  ;;  %v4230_v63 = vpop.f32.mrf.mxu1 }
 0x70d   :  { %v4239_v44 = vadd.f32 %v4187_v15, %v313_v2  ;;  %v318_v2 = vadd.f32 %v14115_v62, %v232_v59 }
 0x70e   :  { %v4189_v0 = vpop.f32.mrf.mxu0  ;;  %v4232_v38 = vpop.f32.mrf.mxu1 }
 0x70f   :  { %v4247_v48 = vmul.f32 0.5, %v4239_v44  ;;  %v4240_v61 = vadd.f32 %v4189_v0, %v314_v14  ;;  %v4242_v10 = vadd.f32 %v4232_v38, %v316_v60  ;;  %v229_v0 = vmul.f32 %v14134_v17, %v141_v49 }
 0x710   :  { %v4191_v16 = vpop.f32.mrf.mxu0  ;;  %v4234_v5 = vpop.f32.mrf.mxu1  ;;  %v319_v38 = vadd.f32 %v14138_v21, %v233_v7 }
 0x711   :  { %13525 = vtanh.f32 %v4247_v48  ;;  %v4248_v45 = vmul.f32 0.5, %v4240_v61  ;;  %v4243_v55 = vadd.f32 %v4191_v16, %v317_v46  ;;  %v315_v48 = vadd.f32 %v14138_v21, %v229_v0 }
 0x712   :  { %v4193_v15 = vpop.f32.mrf.mxu0  ;;  %v4236_v44 = vpop.f32.mrf.mxu1 }
 0x713   :  { %13527 = vtanh.f32 %v4248_v45  ;;  %v4250_v8 = vmul.f32 0.5, %v4243_v55  ;;  %v4244_v37 = vadd.f32 %v4193_v15, %v318_v2  ;;  %v4246_v61 = vadd.f32 %v4236_v44, %v320_v4 }
 0x714   :  { %v4241_v59 = vadd.f32 %v4230_v63, %v315_v48  ;;  %v4245_v45 = vadd.f32 %v4234_v5, %v319_v38 }
 0x715   :  { %13529 = vtanh.f32 %v4250_v8  ;;  %v4251_v14 = vmul.f32 0.5, %v4244_v37 }
 0x716   :  { %13531 = vtanh.f32 %v4242_v10  ;;  %v4249_v60 = vmul.f32 0.5, %v4241_v59  ;;  %v4252_v8 = vmul.f32 0.5, %v4245_v45 }
 0x717   :  { %13533 = vtanh.f32 %v4251_v14 }
 0x718   :  { %13535 = vtanh.f32 %v4246_v61 }
 0x719   :  { %13537 = vtanh.f32 %v4249_v60 }
 0x71a   :  { %13539 = vtanh.f32 %v4252_v8 }
 0x71e   :  { %v13526_v55 = vpop.eup %13525 }
 0x71f   :  { %v4259_v46 = vmul.f32 0.5, %v13526_v55 }
 0x720   :  { %v13528_v49 = vpop.eup %13527 }
 0x721   :  { %v4265_v37 = vadd.f32 0.5, %v4259_v46  ;;  %v4260_v16 = vmul.f32 0.5, %v13528_v49 }
 0x722   :  { %v13530_v50 = vpop.eup %13529 }
 0x723   :  { %v13532_v2 = vpop.eup %13531  ;;  %v4266_v32 = vadd.f32 0.5, %v4260_v16  ;;  %v4262_v10 = vmul.f32 0.5, %v13530_v50  ;;  %v12893_v50 = vld [vmem:[#allocation6 + $0xe0] ss:$16 sps:$4 sm:$0xff]  }
 0x724   :  { %v13534_v15 = vpop.eup %13533  ;;  %v4275_v0 = vmul.f32 %v13532_v2, %v4265_v37  ;;  %v12896_v2 = vld [vmem:[#allocation6 + $0xe8] ss:$16 sps:$4 sm:$0xff]  }
 0x725   :  { %v4273_v44 = vmul.f32 %v4266_v32, %v14982_v53  ;;  %v4268_v63 = vadd.f32 0.5, %v4262_v10  ;;  %v4263_v14 = vmul.f32 0.5, %v13534_v15  ;;  %v13536_v7 = vpop.eup %13535  ;;  %v12901_v32 = vld [vmem:[#allocation6 + $0xc4] ss:$16 sps:$4 sm:$0xff]   ;;  %v12904_v10 = vld [vmem:[#allocation6 + $0xcc] ss:$16 sps:$4 sm:$0xff]  }
 0x726   :  { %v13538_v59 = vpop.eup %13537  ;;  %v12899_v15 = vld [vmem:[#allocation6 + $0xc0] ss:$16 sps:$4 sm:$0xff]  }
 0x727   :  { %v15152_v5 = vadd.f32 %v4275_v0, %v4273_v44  ;;  %v4269_v4 = vadd.f32 0.5, %v4263_v14  ;;  %v4276_v48 = vmul.f32 %v13536_v7, %v4268_v63  ;;  %v13540_v45 = vpop.eup %13539  ;;  %v4261_v55 = vmul.f32 0.5, %v13538_v59  ;;  %v12902_v44 = vld [vmem:[#allocation6 + $0xc8] ss:$16 sps:$4 sm:$0xff]   ;;  %v12907_v0 = vld [vmem:[#allocation6 + $0xa4] ss:$16 sps:$4 sm:$0xff]  }
 0x728   :  { %v4264_v53 = vmul.f32 0.5, %v13540_v45  ;;  %v12910_v63 = vld [vmem:[#allocation6 + $0xac] ss:$16 sps:$4 sm:$0xff]   ;;  %v12905_v14 = vld [vmem:[#allocation6 + $0xa0] ss:$16 sps:$4 sm:$0xff]  }
 0x729   :  { %v4274_v61 = vmul.f32 %v4269_v4, %v14986_v26  ;;  %13541 = vtanh.f32 %v15152_v5  ;;  %v4267_v60 = vadd.f32 0.5, %v4261_v55  ;;  %v12908_v4 = vld [vmem:[#allocation6 + $0xa8] ss:$16 sps:$4 sm:$0xff]   ;;  %v12913_v7 = vld [vmem:[#allocation6 + $0x84] ss:$16 sps:$4 sm:$0xff]  }
 0x72a   :  { %v4270_v49 = vadd.f32 0.5, %v4264_v53  ;;  %v12914_v59 = vld [vmem:[#allocation6 + $0x88] ss:$16 sps:$4 sm:$0xff]   ;;  %v12919_v45 = vld [vmem:[#allocation6 + $0x64] ss:$16 sps:$4 sm:$0xff]  }
 0x72b   :  { %v15156_v38 = vadd.f32 %v4276_v48, %v4274_v61  ;;  %v12916_v61 = vld [vmem:[#allocation6 + $0x8c] ss:$16 sps:$4 sm:$0xff]   ;;  %v12911_v48 = vld [vmem:[#allocation6 + $0x80] ss:$16 sps:$4 sm:$0xff]  }
 0x72c   :  { %v12922_v55 = vld [vmem:[#allocation6 + $0x6c] ss:$16 sps:$4 sm:$0xff]   ;;  %v12917_v53 = vld [vmem:[#allocation6 + $0x60] ss:$16 sps:$4 sm:$0xff]  }
 0x72d   :  { %13543 = vtanh.f32 %v15156_v38 }
 0x736   :  { %v13542_v46 = vpop.eup %13541 }
 0x737   :  { %v4281_v37 = vmul.f32 %v13542_v46, %v4267_v60  ;;  %v12920_v46 = vld [vmem:[#allocation6 + $0x68] ss:$16 sps:$4 sm:$0xff]   ;;  %v12925_v60 = vld [vmem:[#allocation6 + $0x44] ss:$16 sps:$4 sm:$0xff]  }
 0x73a   :  { %v13544_v8 = vpop.eup %13543 }
 0x73b   :  { %v4282_v16 = vmul.f32 %v13544_v8, %v4270_v49  ;;  %v12928_v49 = vld [vmem:[#allocation6 + $0x4c] ss:$16 sps:$4 sm:$0xff]   ;;  %v12923_v8 = vld [vmem:[#allocation6 + $0x40] ss:$16 sps:$4 sm:$0xff]  }
 0x73d   :  { %v15159_v26 = vpack.c.bf16 %v4282_v16, %v4281_v37  ;;  %v12926_v37 = vld [vmem:[#allocation6 + $0x48] ss:$16 sps:$4 sm:$0xff]   ;;  %v12931_v16 = vld [vmem:[#allocation6 + $0x24] ss:$16 sps:$4 sm:$0xff]  }
 0x73f   :  { %4531 = vmatmul.mubr.bf16.vlgmr.msra.gmra.mxu0 %v15159_v26  ;;  %4574 = vmatmul.mubr.bf16.vlgmr.msra.gmra.mxu1 %v15159_v26 }
 0x740   :  { %4795 = vmatpush1.bf16.msra.mxu0 %v12893_v50  ;;  %4838 = vmatpush1.bf16.msra.mxu1 %v12896_v2  ;;  %v12934_v50 = vld [vmem:[#allocation6 + $0x2c] ss:$16 sps:$4 sm:$0xff]   ;;  %v12929_v2 = vld [vmem:[#allocation6 + $0x20] ss:$16 sps:$4 sm:$0xff]  }
 0x741   :  { %4796 = vmatprep.subr.bf16.mxu0 %v12901_v32  ;;  %4839 = vmatprep.subr.bf16.mxu1 %v12904_v10  ;;  %v12932_v32 = vld [vmem:[#allocation6 + $0x28] ss:$16 sps:$4 sm:$0xff]   ;;  %v12937_v10 = vld [vmem:[#allocation6 + $0x4] ss:$16 sps:$4 sm:$0xff]  }
 0x742   :  { %4826 = vmatprep.mubr.bf16.mxu0 %v17111_v47  ;;  %4869 = vmatprep.mubr.bf16.mxu1 %v17111_v47 }
 0x744   :  { %4797 = vmatpush1.bf16.msra.mxu0 %v12899_v15  ;;  %4840 = vmatpush1.bf16.msra.mxu1 %v12902_v44  ;;  %v12940_v15 = vld [vmem:[#allocation6 + $0xc] ss:$16 sps:$4 sm:$0xff]   ;;  %v12935_v44 = vld [vmem:[#allocation6] ss:$16 sps:$4 sm:$0xff]  }
 0x745   :  { %4798 = vmatprep.subr.bf16.mxu0 %v12907_v0  ;;  %4841 = vmatprep.subr.bf16.mxu1 %v12910_v63  ;;  %v12938_v0 = vld [vmem:[#allocation6 + $0x8] ss:$16 sps:$4 sm:$0xff]  }
 0x748   :  { %4799 = vmatpush1.bf16.msra.mxu0 %v12905_v14  ;;  %4842 = vmatpush1.bf16.msra.mxu1 %v12908_v4 }
 0x749   :  { %4800 = vmatprep.subr.bf16.mxu0 %v12913_v7  ;;  %4843 = vmatprep.subr.bf16.mxu1 %v12916_v61 }
 0x74c   :  { %4801 = vmatpush1.bf16.msra.mxu0 %v12911_v48  ;;  %4844 = vmatpush1.bf16.msra.mxu1 %v12914_v59 }
 0x74d   :  { %4802 = vmatprep.subr.bf16.mxu0 %v12919_v45  ;;  %4845 = vmatprep.subr.bf16.mxu1 %v12922_v55 }
 0x750   :  { %4803 = vmatpush1.bf16.msra.mxu0 %v12917_v53  ;;  %4846 = vmatpush1.bf16.msra.mxu1 %v12920_v46 }
 0x751   :  { %4804 = vmatprep.subr.bf16.mxu0 %v12925_v60  ;;  %4847 = vmatprep.subr.bf16.mxu1 %v12928_v49 }
 0x754   :  { %4805 = vmatpush1.bf16.msra.mxu0 %v12923_v8  ;;  %4848 = vmatpush1.bf16.msra.mxu1 %v12926_v37 }
 0x755   :  { %4806 = vmatprep.subr.bf16.mxu0 %v12931_v16  ;;  %4849 = vmatprep.subr.bf16.mxu1 %v12934_v50 }
 0x758   :  { %4807 = vmatpush1.bf16.msra.mxu0 %v12929_v2  ;;  %4850 = vmatpush1.bf16.msra.mxu1 %v12932_v32 }
 0x759   :  { %4808 = vmatprep.subr.bf16.mxu0 %v12937_v10  ;;  %4851 = vmatprep.subr.bf16.mxu1 %v12940_v15 }
 0x75c   :  { %4809 = vmatpush1.bf16.msra.mxu0 %v12935_v44  ;;  %4852 = vmatpush1.bf16.msra.mxu1 %v12938_v0 }
 0x75d   :  { %5139 = vmatprep.subr.bf16.mxu0 %v15023_v23  ;;  %5182 = vmatprep.subr.bf16.mxu1 %v15025_v9  ;;  %v17200_v23 = vld [vmem:[#allocation46_spill] sm:$0xff] }
 0x75e   :  { %v15201_v9 = vld [vmem:[#allocation4 + $0x1e4] ss:$16 sps:$4 sm:$0xff]  }
 0x75f   :  { %4827 = vmatmul.mubr.bf16.vlgmr.msra.gmra.mxu0 %v15159_v26  ;;  %4870 = vmatmul.mubr.bf16.vlgmr.msra.gmra.mxu1 %v15159_v26 }
 0x760   :  { %5140 = vmatpush1.bf16.msra.mxu0 %v15027_v13  ;;  %5183 = vmatpush1.bf16.msra.mxu1 %v15029_v6  ;;  %v15203_v13 = vld [vmem:[#allocation4 + $0x1ec] ss:$16 sps:$4 sm:$0xff]  }
 0x761   :  { %5141 = vmatprep.subr.bf16.mxu0 %v15035_v56  ;;  %5184 = vmatprep.subr.bf16.mxu1 %v15037_v11 }
 0x762   :  { %5171 = vmatprep.mubr.bf16.mxu0 %v17111_v47  ;;  %5214 = vmatprep.mubr.bf16.mxu1 %v17111_v47 }
 0x764   :  { %5142 = vmatpush1.bf16.msra.mxu0 %v15039_v12  ;;  %5185 = vmatpush1.bf16.msra.mxu1 %v15041_v24  ;;  %v151_v24 = vpop.permute.xlu0 %150 }
 0x765   :  { %5143 = vmatprep.subr.bf16.mxu0 %v15047_v41  ;;  %5186 = vmatprep.subr.bf16.mxu1 %v15049_v40  ;;  %v237_v46 = vmul.f32 %v14134_v17, %v151_v24 }
 0x767   :  { %v323_v8 = vadd.f32 %v14138_v21, %v237_v46  ;;  %v15273_v46 = vld [vmem:[#allocation4 + $0x18c] ss:$16 sps:$4 sm:$0xff]  }
 0x768   :  { %5144 = vmatpush1.bf16.msra.mxu0 %v15051_v1  ;;  %5187 = vmatpush1.bf16.msra.mxu1 %v15053_v39  ;;  %v17207_v1 = vld [vmem:[#allocation13_spill] sm:$0xff] }
 0x769   :  { %5145 = vmatprep.subr.bf16.mxu0 %v15059_v42  ;;  %5188 = vmatprep.subr.bf16.mxu1 %v15061_v18  ;;  %v235_v39 = vmul.f32 %v17207_v1, %v151_v24  ;;  %v156_v42 = vpop.permute.xlu1 %155  ;;  %v17208_v18 = vld [vmem:[#allocation14_spill] sm:$0xff] }
 0x76a   :  { %v241_v60 = vmul.f32 %v14134_v17, %v156_v42 }
 0x76c   :  { %5146 = vmatpush1.bf16.msra.mxu0 %v15063_v20  ;;  %5189 = vmatpush1.bf16.msra.mxu1 %v15065_v52  ;;  %v236_v20 = vmul.f32 %v17208_v18, %v151_v24 }
 0x76d   :  { %5147 = vmatprep.subr.bf16.mxu0 %v15069_v58  ;;  %5190 = vmatprep.subr.bf16.mxu1 %v15077_v57  ;;  %v238_v57 = vmul.f32 %v17125_v51, %v151_v24 }
 0x76f   :  { %v324_v26 = vadd.f32 %v14120_v3, %v238_v57 }
 0x770   :  { %5148 = vmatpush1.bf16.msra.mxu0 %v15073_v25  ;;  %5191 = vmatpush1.bf16.msra.mxu1 %v15075_v54  ;;  %v239_v25 = vmul.f32 %v17207_v1, %v156_v42  ;;  %v321_v54 = vadd.f32 %v17124_v43, %v235_v39 }
 0x771   :  { %5149 = vmatprep.subr.bf16.mxu0 %v15080_v22  ;;  %5192 = vmatprep.subr.bf16.mxu1 %v15082_v31 }
 0x774   :  { %5150 = vmatpush1.bf16.msra.mxu0 %v15087_v28  ;;  %5193 = vmatpush1.bf16.msra.mxu1 %v15089_v27  ;;  %v240_v28 = vmul.f32 %v17208_v18, %v156_v42 }
 0x775   :  { %5151 = vmatprep.subr.bf16.mxu0 %v15093_v19  ;;  %5194 = vmatprep.subr.bf16.mxu1 %v15095_v30  ;;  %v322_v19 = vadd.f32 %v14115_v62, %v236_v20 }
 0x776   :  { %v326_v61 = vadd.f32 %v14115_v62, %v240_v28  ;;  %v327_v62 = vadd.f32 %v14138_v21, %v241_v60  ;;  %v15283_v60 = vld [vmem:[#allocation4 + $0x164] ss:$16 sps:$4 sm:$0xff]  }
 0x778   :  { %5152 = vmatpush1.bf16.msra.mxu0 %v15099_v29  ;;  %5195 = vmatpush1.bf16.msra.mxu1 %v15101_v35 }
 0x779   :  { %5153 = vmatprep.subr.bf16.mxu0 %v15105_v36  ;;  %5196 = vmatprep.subr.bf16.mxu1 %v15107_v33  ;;  %v325_v33 = vadd.f32 %v17124_v43, %v239_v25 }
 0x77c   :  { %5154 = vmatpush1.bf16.msra.mxu0 %v15111_v34  ;;  %5197 = vmatpush1.bf16.msra.mxu1 %v17200_v23  ;;  %v242_v34 = vmul.f32 %v17125_v51, %v156_v42 }
 0x77d   :  { %5495 = vmatprep.subr.bf16.mxu0 %v15201_v9  ;;  %5538 = vmatprep.subr.bf16.mxu1 %v15203_v13 }
 0x77e   :  { %v328_v51 = vadd.f32 %v14120_v3, %v242_v34 }
 0x7ff   :  { %v15207_v6 = vpop.f32.mrf.mxu0  ;;  %v15209_v56 = vpop.f32.mrf.mxu1 }
 0x800   :  { %17201 = vst [vmem:[#allocation46_spill] sm:$0xff] %v15207_v6  ;;  %17202 = vst [vmem:[#allocation60_spill] sm:$0xff] %v15209_v56  ;;  %v15403_v56 = vld [vmem:[#allocation6 + $0x148] ss:$16 sps:$4 sm:$0xff]   ;;  %v15421_v6 = vld [vmem:[#allocation6 + $0x10c] ss:$16 sps:$4 sm:$0xff]  }
 0x801   :  { %v15211_v11 = vpop.f32.mrf.mxu0  ;;  %v15213_v12 = vpop.f32.mrf.mxu1 }
 0x802   :  { %17203 = vst [vmem:[#allocation61_spill] sm:$0xff] %v15211_v11  ;;  %17204 = vst [vmem:[#allocation62_spill] sm:$0xff] %v15213_v12  ;;  %v15415_v12 = vld [vmem:[#allocation6 + $0x128] ss:$16 sps:$4 sm:$0xff]   ;;  %v15419_v11 = vld [vmem:[#allocation6 + $0x104] ss:$16 sps:$4 sm:$0xff]  }
 0x803   :  { %v15215_v41 = vpop.f32.mrf.mxu0  ;;  %v15217_v40 = vpop.f32.mrf.mxu1 }
 0x804   :  { %17205 = vst [vmem:[#allocation63_spill] sm:$0xff] %v15215_v41  ;;  %17206 = vst [vmem:[#allocation64_spill] sm:$0xff] %v15217_v40  ;;  %v15401_v40 = vld [vmem:[#allocation6 + $0x140] ss:$16 sps:$4 sm:$0xff]  }
 0x805   :  { %v15221_v52 = vpop.f32.mrf.mxu0  ;;  %v15223_v58 = vpop.f32.mrf.mxu1  ;;  %17213 = vst [vmem:[#allocation65_spill] sm:$0xff] %v15401_v40  ;;  %v15413_v41 = vld [vmem:[#allocation6 + $0x120] ss:$16 sps:$4 sm:$0xff]  }
 0x806   :  { %17209 = vst [vmem:[#allocation13_spill] sm:$0xff] %v15221_v52  ;;  %17210 = vst [vmem:[#allocation14_spill] sm:$0xff] %v15223_v58  ;;  %v15407_v58 = vld [vmem:[#allocation6 + $0x124] ss:$16 sps:$4 sm:$0xff]   ;;  %v15409_v52 = vld [vmem:[#allocation6 + $0x12c] ss:$16 sps:$4 sm:$0xff]  }
 0x81f   :  { %v4828_v22 = vpop.f32.mrf.mxu0  ;;  %v4871_v31 = vpop.f32.mrf.mxu1 }
 0x820   :  { %v4880_v27 = vadd.f32 %v4828_v22, %v321_v54  ;;  %v4882_v37 = vadd.f32 %v4871_v31, %v323_v8  ;;  %v15289_v8 = vld [vmem:[#allocation4 + $0x160] ss:$16 sps:$4 sm:$0xff]  }
 0x821   :  { %v4830_v30 = vpop.f32.mrf.mxu0  ;;  %v4873_v29 = vpop.f32.mrf.mxu1 }
 0x822   :  { %v4888_v35 = vmul.f32 0.5, %v4880_v27  ;;  %v4881_v36 = vadd.f32 %v4830_v30, %v322_v19  ;;  %v4883_v48 = vadd.f32 %v4873_v29, %v324_v26  ;;  %v4890_v32 = vmul.f32 0.5, %v4882_v37  ;;  %v15241_v26 = vld [vmem:[#allocation4 + $0x1e0] ss:$16 sps:$4 sm:$0xff]   ;;  %v15295_v37 = vld [vmem:[#allocation4 + $0x144] ss:$16 sps:$4 sm:$0xff]  }
 0x823   :  { %v4832_v63 = vpop.f32.mrf.mxu0  ;;  %v4875_v14 = vpop.f32.mrf.mxu1 }
 0x824   :  { %13545 = vtanh.f32 %v4888_v35  ;;  %v4889_v4 = vmul.f32 0.5, %v4881_v36  ;;  %v4884_v7 = vadd.f32 %v4832_v63, %v325_v33  ;;  %v4886_v16 = vadd.f32 %v4875_v14, %v327_v62  ;;  %v15243_v63 = vld [vmem:[#allocation4 + $0x1e8] ss:$16 sps:$4 sm:$0xff]  }
 0x825   :  { %v4834_v59 = vpop.f32.mrf.mxu0  ;;  %v4877_v53 = vpop.f32.mrf.mxu1  ;;  %v15291_v62 = vld [vmem:[#allocation4 + $0x168] ss:$16 sps:$4 sm:$0xff]  }
 0x826   :  { %13547 = vtanh.f32 %v4889_v4  ;;  %v4891_v45 = vmul.f32 0.5, %v4884_v7  ;;  %v4885_v55 = vadd.f32 %v4834_v59, %v326_v61  ;;  %v4887_v49 = vadd.f32 %v4877_v53, %v328_v51  ;;  %v15247_v4 = vld [vmem:[#allocation4 + $0x1cc] ss:$16 sps:$4 sm:$0xff]   ;;  %v15251_v7 = vld [vmem:[#allocation4 + $0x1c0] ss:$16 sps:$4 sm:$0xff]  }
 0x827   :  { %v4893_v15 = vmul.f32 0.5, %v4886_v16  ;;  %v15253_v61 = vld [vmem:[#allocation4 + $0x1c8] ss:$16 sps:$4 sm:$0xff]   ;;  %v15259_v59 = vld [vmem:[#allocation4 + $0x1ac] ss:$16 sps:$4 sm:$0xff]  }
 0x828   :  { %13549 = vtanh.f32 %v4891_v45  ;;  %v4892_v43 = vmul.f32 0.5, %v4885_v55  ;;  %v15265_v45 = vld [vmem:[#allocation4 + $0x1a0] ss:$16 sps:$4 sm:$0xff]   ;;  %v15267_v55 = vld [vmem:[#allocation4 + $0x1a8] ss:$16 sps:$4 sm:$0xff]  }
 0x829   :  { %13551 = vtanh.f32 %v4883_v48  ;;  %v15257_v48 = vld [vmem:[#allocation4 + $0x1a4] ss:$16 sps:$4 sm:$0xff]   ;;  %v15279_v51 = vld [vmem:[#allocation4 + $0x188] ss:$16 sps:$4 sm:$0xff]   ;;  %v15297_v16 = vld [vmem:[#allocation4 + $0x14c] ss:$16 sps:$4 sm:$0xff]  }
 0x82a   :  { %13553 = vtanh.f32 %v4892_v43  ;;  %v15271_v53 = vld [vmem:[#allocation4 + $0x184] ss:$16 sps:$4 sm:$0xff]   ;;  %v15277_v43 = vld [vmem:[#allocation4 + $0x180] ss:$16 sps:$4 sm:$0xff]  }
 0x82b   :  { %13555 = vtanh.f32 %v4887_v49  ;;  %v15285_v49 = vld [vmem:[#allocation4 + $0x16c] ss:$16 sps:$4 sm:$0xff]  }
 0x82c   :  { %13557 = vtanh.f32 %v4890_v32  ;;  %v15307_v32 = vld [vmem:[#allocation4 + $0x124] ss:$16 sps:$4 sm:$0xff]  }
 0x82d   :  { %13559 = vtanh.f32 %v4893_v15  ;;  %v15313_v15 = vld [vmem:[#allocation4 + $0x120] ss:$16 sps:$4 sm:$0xff]  }
 0x831   :  { %v13546_v50 = vpop.eup %13545 }
 0x832   :  { %v4900_v2 = vmul.f32 0.5, %v13546_v50  ;;  %v15301_v50 = vld [vmem:[#allocation4 + $0x140] ss:$16 sps:$4 sm:$0xff]  }
 0x833   :  { %v13548_v10 = vpop.eup %13547 }
 0x834   :  { %v4906_v44 = vadd.f32 0.5, %v4900_v2  ;;  %v4901_v0 = vmul.f32 0.5, %v13548_v10  ;;  %v15303_v2 = vld [vmem:[#allocation4 + $0x148] ss:$16 sps:$4 sm:$0xff]   ;;  %v15309_v10 = vld [vmem:[#allocation4 + $0x12c] ss:$16 sps:$4 sm:$0xff]  }
 0x835   :  { %v13550_v3 = vpop.eup %13549 }
 0x836   :  { %v13552_v23 = vpop.eup %13551  ;;  %v4907_v17 = vadd.f32 0.5, %v4901_v0  ;;  %v4903_v24 = vmul.f32 0.5, %v13550_v3  ;;  %v15319_v0 = vld [vmem:[#allocation4 + $0x104] ss:$16 sps:$4 sm:$0xff]   ;;  %v15321_v3 = vld [vmem:[#allocation4 + $0x10c] ss:$16 sps:$4 sm:$0xff]  }
 0x837   :  { %v13554_v1 = vpop.eup %13553  ;;  %v4916_v21 = vmul.f32 %v13552_v23, %v4906_v44  ;;  %v15315_v44 = vld [vmem:[#allocation4 + $0x128] ss:$16 sps:$4 sm:$0xff]   ;;  %v15325_v23 = vld [vmem:[#allocation4 + $0x100] ss:$16 sps:$4 sm:$0xff]  }
 0x838   :  { %v4914_v39 = vmul.f32 %v4907_v17, %v15152_v5  ;;  %v4909_v42 = vadd.f32 0.5, %v4903_v24  ;;  %v4904_v18 = vmul.f32 0.5, %v13554_v1  ;;  %v13556_v54 = vpop.eup %13555  ;;  %v15327_v17 = vld [vmem:[#allocation4 + $0x108] ss:$16 sps:$4 sm:$0xff]   ;;  %v15331_v24 = vld [vmem:[#allocation6 + $0x1e4] ss:$16 sps:$4 sm:$0xff]  }
 0x839   :  { %v13558_v28 = vpop.eup %13557  ;;  %v15333_v1 = vld [vmem:[#allocation6 + $0x1ec] ss:$16 sps:$4 sm:$0xff]  }
 0x83a   :  { %v4918_v20 = vadd.f32 %v4916_v21, %v4914_v39  ;;  %v4910_v25 = vadd.f32 0.5, %v4904_v18  ;;  %v4917_v22 = vmul.f32 %v13556_v54, %v4909_v42  ;;  %v13560_v27 = vpop.eup %13559  ;;  %v4902_v19 = vmul.f32 0.5, %v13558_v28  ;;  %v15337_v39 = vld [vmem:[#allocation6 + $0x1e0] ss:$16 sps:$4 sm:$0xff]   ;;  %v15339_v21 = vld [vmem:[#allocation6 + $0x1e8] ss:$16 sps:$4 sm:$0xff]  }
 0x83b   :  { %v4905_v30 = vmul.f32 0.5, %v13560_v27  ;;  %v15343_v42 = vld [vmem:[#allocation6 + $0x1c4] ss:$16 sps:$4 sm:$0xff]   ;;  %v15345_v18 = vld [vmem:[#allocation6 + $0x1cc] ss:$16 sps:$4 sm:$0xff]  }
 0x83c   :  { %v4915_v57 = vmul.f32 %v4910_v25, %v15156_v38  ;;  %13561 = vtanh.f32 %v4918_v20  ;;  %v4908_v35 = vadd.f32 0.5, %v4902_v19  ;;  %v15245_v38 = vld [vmem:[#allocation4 + $0x1c4] ss:$16 sps:$4 sm:$0xff]   ;;  %v15351_v25 = vld [vmem:[#allocation6 + $0x1c0] ss:$16 sps:$4 sm:$0xff]  }
 0x83d   :  { %v4911_v36 = vadd.f32 0.5, %v4905_v30  ;;  %v17211_v20 = vld [vmem:[#allocation20_spill] sm:$0xff]  ;;  %v15353_v54 = vld [vmem:[#allocation6 + $0x1c8] ss:$16 sps:$4 sm:$0xff]   ;;  %v15373_v19 = vld [vmem:[#allocation6 + $0x18c] ss:$16 sps:$4 sm:$0xff]  }
 0x83e   :  { %v4919_v31 = vadd.f32 %v4917_v22, %v4915_v57  ;;  %v15357_v57 = vld [vmem:[#allocation6 + $0x1a4] ss:$16 sps:$4 sm:$0xff]   ;;  %v15359_v22 = vld [vmem:[#allocation6 + $0x1ac] ss:$16 sps:$4 sm:$0xff]   ;;  %v15367_v28 = vld [vmem:[#allocation6 + $0x1a8] ss:$16 sps:$4 sm:$0xff]  }
 0x83f   :  { %v15371_v27 = vld [vmem:[#allocation6 + $0x184] ss:$16 sps:$4 sm:$0xff]   ;;  %v15377_v30 = vld [vmem:[#allocation6 + $0x180] ss:$16 sps:$4 sm:$0xff]  }
 0x840   :  { %13563 = vtanh.f32 %v4919_v31  ;;  %v15365_v31 = vld [vmem:[#allocation6 + $0x1a0] ss:$16 sps:$4 sm:$0xff]  }
 0x849   :  { %v13562_v29 = vpop.eup %13561 }
 0x84a   :  { %v4922_v33 = vmul.f32 %v13562_v29, %v4908_v35  ;;  %v15379_v29 = vld [vmem:[#allocation6 + $0x188] ss:$16 sps:$4 sm:$0xff]   ;;  %v15383_v35 = vld [vmem:[#allocation6 + $0x164] ss:$16 sps:$4 sm:$0xff]  }
 0x84d   :  { %v13564_v5 = vpop.eup %13563 }
 0x84e   :  { %v4923_v34 = vmul.f32 %v13564_v5, %v4911_v36  ;;  %v15385_v36 = vld [vmem:[#allocation6 + $0x16c] ss:$16 sps:$4 sm:$0xff]   ;;  %v15389_v5 = vld [vmem:[#allocation6 + $0x160] ss:$16 sps:$4 sm:$0xff]  }
 0x850   :  { %v4924_v14 = vpack.c.bf16 %v4923_v34, %v4922_v33  ;;  %v15391_v33 = vld [vmem:[#allocation6 + $0x168] ss:$16 sps:$4 sm:$0xff]   ;;  %v15395_v34 = vld [vmem:[#allocation6 + $0x144] ss:$16 sps:$4 sm:$0xff]  }
 0x852   :  { %5172 = vmatmul.mubr.bf16.vlgmr.msra.gmra.mxu0 %v4924_v14  ;;  %5215 = vmatmul.mubr.bf16.vlgmr.msra.gmra.mxu1 %v4924_v14  ;;  %v15397_v14 = vld [vmem:[#allocation6 + $0x14c] ss:$16 sps:$4 sm:$0xff]  }
 0x853   :  { %5496 = vmatpush1.bf16.msra.mxu0 %v15241_v26  ;;  %5539 = vmatpush1.bf16.msra.mxu1 %v15243_v63  ;;  %17212 = vst [vmem:[#allocation20_spill] sm:$0xff] %v15397_v14 }
 0x854   :  { %5497 = vmatprep.subr.bf16.mxu0 %v15245_v38  ;;  %5540 = vmatprep.subr.bf16.mxu1 %v15247_v4 }
 0x855   :  { %5527 = vmatprep.mubr.bf16.mxu0 %v17111_v47  ;;  %5570 = vmatprep.mubr.bf16.mxu1 %v17111_v47 }
 0x857   :  { %5498 = vmatpush1.bf16.msra.mxu0 %v15251_v7  ;;  %5541 = vmatpush1.bf16.msra.mxu1 %v15253_v61 }
 0x858   :  { %5499 = vmatprep.subr.bf16.mxu0 %v15257_v48  ;;  %5542 = vmatprep.subr.bf16.mxu1 %v15259_v59 }
 0x85b   :  { %5500 = vmatpush1.bf16.msra.mxu0 %v15265_v45  ;;  %5543 = vmatpush1.bf16.msra.mxu1 %v15267_v55 }
 0x85c   :  { %5501 = vmatprep.subr.bf16.mxu0 %v15271_v53  ;;  %5544 = vmatprep.subr.bf16.mxu1 %v15273_v46 }
 0x85f   :  { %5502 = vmatpush1.bf16.msra.mxu0 %v15277_v43  ;;  %5545 = vmatpush1.bf16.msra.mxu1 %v15279_v51 }
 0x860   :  { %5503 = vmatprep.subr.bf16.mxu0 %v15283_v60  ;;  %5546 = vmatprep.subr.bf16.mxu1 %v15285_v49 }
 0x863   :  { %5504 = vmatpush1.bf16.msra.mxu0 %v15289_v8  ;;  %5547 = vmatpush1.bf16.msra.mxu1 %v15291_v62 }
 0x864   :  { %5505 = vmatprep.subr.bf16.mxu0 %v15295_v37  ;;  %5548 = vmatprep.subr.bf16.mxu1 %v15297_v16 }
 0x867   :  { %5506 = vmatpush1.bf16.msra.mxu0 %v15301_v50  ;;  %5549 = vmatpush1.bf16.msra.mxu1 %v15303_v2 }
 0x868   :  { %5507 = vmatprep.subr.bf16.mxu0 %v15307_v32  ;;  %5550 = vmatprep.subr.bf16.mxu1 %v15309_v10 }
 0x86b   :  { %5508 = vmatpush1.bf16.msra.mxu0 %v15313_v15  ;;  %5551 = vmatpush1.bf16.msra.mxu1 %v15315_v44 }
 0x86c   :  { %5509 = vmatprep.subr.bf16.mxu0 %v15319_v0  ;;  %5552 = vmatprep.subr.bf16.mxu1 %v15321_v3 }
 0x86f   :  { %5510 = vmatpush1.bf16.msra.mxu0 %v15325_v23  ;;  %5553 = vmatpush1.bf16.msra.mxu1 %v15327_v17 }
 0x870   :  { %5790 = vmatprep.subr.bf16.mxu0 %v15331_v24  ;;  %5833 = vmatprep.subr.bf16.mxu1 %v15333_v1 }
 0x872   :  { %5528 = vmatmul.mubr.bf16.vlgmr.msra.gmra.mxu0 %v17211_v20  ;;  %5571 = vmatmul.mubr.bf16.vlgmr.msra.gmra.mxu1 %v17211_v20 }
 0x873   :  { %5791 = vmatpush1.bf16.msra.mxu0 %v15337_v39  ;;  %5834 = vmatpush1.bf16.msra.mxu1 %v15339_v21 }
 0x874   :  { %5792 = vmatprep.subr.bf16.mxu0 %v15343_v42  ;;  %5835 = vmatprep.subr.bf16.mxu1 %v15345_v18 }
 0x875   :  { %5822 = vmatprep.mubr.bf16.mxu0 %v17111_v47  ;;  %5865 = vmatprep.mubr.bf16.mxu1 %v17111_v47 }
 0x877   :  { %5793 = vmatpush1.bf16.msra.mxu0 %v15351_v25  ;;  %5836 = vmatpush1.bf16.msra.mxu1 %v15353_v54 }
 0x878   :  { %5794 = vmatprep.subr.bf16.mxu0 %v15357_v57  ;;  %5837 = vmatprep.subr.bf16.mxu1 %v15359_v22 }
 0x87b   :  { %5795 = vmatpush1.bf16.msra.mxu0 %v15365_v31  ;;  %5838 = vmatpush1.bf16.msra.mxu1 %v15367_v28 }
 0x87c   :  { %5796 = vmatprep.subr.bf16.mxu0 %v15371_v27  ;;  %5839 = vmatprep.subr.bf16.mxu1 %v15373_v19 }
 0x87f   :  { %5797 = vmatpush1.bf16.msra.mxu0 %v15377_v30  ;;  %5840 = vmatpush1.bf16.msra.mxu1 %v15379_v29 }
 0x880   :  { %5798 = vmatprep.subr.bf16.mxu0 %v15383_v35  ;;  %5841 = vmatprep.subr.bf16.mxu1 %v15385_v36 }
 0x883   :  { %5799 = vmatpush1.bf16.msra.mxu0 %v15389_v5  ;;  %5842 = vmatpush1.bf16.msra.mxu1 %v15391_v33 }
 0x884   :  { %5800 = vmatprep.subr.bf16.mxu0 %v15395_v34  ;;  %5843 = vmatprep.subr.bf16.mxu1 %v15397_v14  ;;  %v15425_v14 = vld [vmem:[#allocation6 + $0x100] ss:$16 sps:$4 sm:$0xff]  }
 0x887   :  { %5801 = vmatpush1.bf16.msra.mxu0 %v15401_v40  ;;  %5844 = vmatpush1.bf16.msra.mxu1 %v15403_v56  ;;  %v15427_v40 = vld [vmem:[#allocation6 + $0x108] ss:$16 sps:$4 sm:$0xff]  }
 0x888   :  { %5802 = vmatprep.subr.bf16.mxu0 %v15407_v58  ;;  %5845 = vmatprep.subr.bf16.mxu1 %v15409_v52 }
 0x88b   :  { %5803 = vmatpush1.bf16.msra.mxu0 %v15413_v41  ;;  %5846 = vmatpush1.bf16.msra.mxu1 %v15415_v12 }
 0x88c   :  { %5804 = vmatprep.subr.bf16.mxu0 %v15419_v11  ;;  %5847 = vmatprep.subr.bf16.mxu1 %v15421_v6 }
 0x88f   :  { %5805 = vmatpush1.bf16.msra.mxu0 %v15425_v14  ;;  %5848 = vmatpush1.bf16.msra.mxu1 %v15427_v40 }
 0x890   :  { %6135 = vmatprep.subr.bf16.mxu0 %v15201_v9  ;;  %6178 = vmatprep.subr.bf16.mxu1 %v15203_v13 }
 0x892   :  { %5823 = vmatmul.mubr.bf16.vlgmr.msra.gmra.mxu0 %v17211_v20  ;;  %5866 = vmatmul.mubr.bf16.vlgmr.msra.gmra.mxu1 %v17211_v20 }
 0x893   :  { %6136 = vmatpush1.bf16.msra.mxu0 %v15241_v26  ;;  %6179 = vmatpush1.bf16.msra.mxu1 %v15243_v63 }
 0x894   :  { %6137 = vmatprep.subr.bf16.mxu0 %v15245_v38  ;;  %6180 = vmatprep.subr.bf16.mxu1 %v15247_v4 }
 0x895   :  { %6167 = vmatprep.mubr.bf16.mxu0 %v17111_v47  ;;  %6210 = vmatprep.mubr.bf16.mxu1 %v17111_v47 }
 0x897   :  { %6138 = vmatpush1.bf16.msra.mxu0 %v15251_v7  ;;  %6181 = vmatpush1.bf16.msra.mxu1 %v15253_v61  ;;  %v11967_v7 = vld [vmem:[%s17022_s4 + $0x8] sm:$0xf]  ;;  %v17220_v61 = vld [vmem:[#allocation10_spill] sm:$0xff] }
 0x898   :  { %6139 = vmatprep.subr.bf16.mxu0 %v15257_v48  ;;  %6182 = vmatprep.subr.bf16.mxu1 %v15259_v59  ;;  %v5318_v48 = vrot.slane %v11967_v7, %v17220_v61 }
 0x89b   :  { %6140 = vmatpush1.bf16.msra.mxu0 %v15265_v45  ;;  %6183 = vmatpush1.bf16.msra.mxu1 %v15267_v55  ;;  %v17223_v55 = vld [vmem:[#allocation11_spill] sm:$0xff] }
 0x89c   :  { %6141 = vmatprep.subr.bf16.mxu0 %v15271_v53  ;;  %6184 = vmatprep.subr.bf16.mxu1 %v15273_v46  ;;  %v5322_v53 = vrot.slane %v11967_v7, %v17223_v55 }
 0x89f   :  { %6142 = vmatpush1.bf16.msra.mxu0 %v15277_v43  ;;  %6185 = vmatpush1.bf16.msra.mxu1 %v15279_v51  ;;  %v17224_v51 = vld [vmem:[#allocation12_spill] sm:$0xff] }
 0x8a0   :  { %6143 = vmatprep.subr.bf16.mxu0 %v15283_v60  ;;  %6186 = vmatprep.subr.bf16.mxu1 %v15285_v49  ;;  %v5330_v60 = vrot.slane %v11967_v7, %v17224_v51 }
 0x8a3   :  { %6144 = vmatpush1.bf16.msra.mxu0 %v15289_v8  ;;  %6187 = vmatpush1.bf16.msra.mxu1 %v15291_v62 }
 0x8a4   :  { %6145 = vmatprep.subr.bf16.mxu0 %v15295_v37  ;;  %6188 = vmatprep.subr.bf16.mxu1 %v15297_v16 }
 0x8a7   :  { %6146 = vmatpush1.bf16.msra.mxu0 %v15301_v50  ;;  %6189 = vmatpush1.bf16.msra.mxu1 %v15303_v2 }
 0x8a8   :  { %6147 = vmatprep.subr.bf16.mxu0 %v15307_v32  ;;  %6190 = vmatprep.subr.bf16.mxu1 %v15309_v10 }
 0x8ab   :  { %6148 = vmatpush1.bf16.msra.mxu0 %v15313_v15  ;;  %6191 = vmatpush1.bf16.msra.mxu1 %v15315_v44 }
 0x8ac   :  { %6149 = vmatprep.subr.bf16.mxu0 %v15319_v0  ;;  %6192 = vmatprep.subr.bf16.mxu1 %v15321_v3 }
 0x8af   :  { %6150 = vmatpush1.bf16.msra.mxu0 %v15325_v23  ;;  %6193 = vmatpush1.bf16.msra.mxu1 %v15327_v17 }
 0x8b0   :  { %6429 = vmatprep.subr.bf16.mxu0 %v15331_v24  ;;  %6472 = vmatprep.subr.bf16.mxu1 %v15333_v1  ;;  %v17225_v1 = vld [vmem:[#allocation17_spill] sm:$0xff] }
 0x8b1   :  { %v5326_v20 = vrot.slane %v11967_v7, %v17225_v1  ;;  %v11544_v7 = vld [vmem:[%s17022_s4 + $0x4] sm:$0xf] }
 0x912   :  { %v15471_v9 = vpop.f32.mrf.mxu0  ;;  %v15473_v13 = vpop.f32.mrf.mxu1 }
 0x913   :  { %17214 = vst [vmem:[#allocation66_spill] sm:$0xff] %v15471_v9  ;;  %17215 = vst [vmem:[#allocation67_spill] sm:$0xff] %v15473_v13 }
 0x914   :  { %v15475_v26 = vpop.f32.mrf.mxu0  ;;  %v15477_v63 = vpop.f32.mrf.mxu1 }
 0x915   :  { %17216 = vst [vmem:[#allocation68_spill] sm:$0xff] %v15475_v26  ;;  %17217 = vst [vmem:[#allocation69_spill] sm:$0xff] %v15477_v63 }
 0x916   :  { %v15479_v38 = vpop.f32.mrf.mxu0  ;;  %v15481_v4 = vpop.f32.mrf.mxu1 }
 0x917   :  { %17218 = vst [vmem:[#allocation70_spill] sm:$0xff] %v15479_v38  ;;  %17219 = vst [vmem:[#allocation71_spill] sm:$0xff] %v15481_v4 }
 0x918   :  { %v15487_v59 = vpop.f32.mrf.mxu0  ;;  %v15489_v45 = vpop.f32.mrf.mxu1 }
 0x919   :  { %17221 = vst [vmem:[#allocation72_spill] sm:$0xff] %v15487_v59  ;;  %17222 = vst [vmem:[#allocation73_spill] sm:$0xff] %v15489_v45 }
 0x932   :  { %v5529_v46 = vpop.f32.mrf.mxu0  ;;  %v5572_v43 = vpop.f32.mrf.mxu1 }
 0x933   :  { %v5530_v49 = vadd.f32 %v5529_v46, %v5318_v48  ;;  %v5573_v46 = vadd.f32 %v5572_v43, %v5326_v20 }
 0x934   :  { %v5531_v8 = vpop.f32.mrf.mxu0  ;;  %v5574_v62 = vpop.f32.mrf.mxu1 }
 0x935   :  { %v10071_v37 = vmul.f32 0.5, %v5530_v49  ;;  %v5532_v16 = vadd.f32 %v5531_v8, %v5322_v53  ;;  %v5575_v50 = vadd.f32 %v5574_v62, %v5330_v60 }
 0x936   :  { %v5533_v2 = vpop.f32.mrf.mxu0  ;;  %v5576_v32 = vpop.f32.mrf.mxu1 }
 0x937   :  { %13565 = vtanh.f32 %v10071_v37  ;;  %v10072_v10 = vmul.f32 0.5, %v5532_v16  ;;  %v5534_v15 = vadd.f32 %v5533_v2, %v5318_v48  ;;  %v5577_v49 = vadd.f32 %v5576_v32, %v5326_v20 }
 0x938   :  { %v5535_v44 = vpop.f32.mrf.mxu0  ;;  %v5578_v0 = vpop.f32.mrf.mxu1  ;;  %v10073_v16 = vmul.f32 0.5, %v5573_v46 }
 0x939   :  { %13567 = vtanh.f32 %v10072_v10  ;;  %v10074_v3 = vmul.f32 0.5, %v5534_v15  ;;  %v5536_v23 = vadd.f32 %v5535_v44, %v5322_v53  ;;  %v5579_v24 = vadd.f32 %v5578_v0, %v5330_v60 }
 0x93a   :  { %13569 = vtanh.f32 %v5575_v50  ;;  %v10076_v10 = vmul.f32 0.5, %v5577_v49  ;;  %v1128_v49 = vrot.slane %v11544_v7, %v17224_v51 }
 0x93b   :  { %13571 = vtanh.f32 %v10074_v3  ;;  %v10075_v17 = vmul.f32 0.5, %v5536_v23  ;;  %v1116_v23 = vrot.slane %v11544_v7, %v17220_v61 }
 0x93d   :  { %13573 = vtanh.f32 %v10075_v17 }
 0x93e   :  { %13575 = vtanh.f32 %v5579_v24 }
 0x93f   :  { %13577 = vtanh.f32 %v10073_v16 }
 0x940   :  { %13579 = vtanh.f32 %v10076_v10 }
 0x944   :  { %v13566_v8 = vpop.eup %13565 }
 0x945   :  { %v10083_v62 = vmul.f32 0.5, %v13566_v8  ;;  %v17227_v8 = vld [vmem:[#allocation24_spill] sm:$0xff] }
 0x946   :  { %v13568_v37 = vpop.eup %13567 }
 0x947   :  { %v13570_v48 = vpop.eup %13569  ;;  %v10089_v2 = vadd.f32 0.5, %v10083_v62  ;;  %v10084_v4 = vmul.f32 0.5, %v13568_v37  ;;  %v1328_v62 = vadd.f32 %v17227_v8, %v1116_v23 }
 0x948   :  { %v13572_v15 = vpop.eup %13571 }
 0x949   :  { %v10090_v53 = vadd.f32 0.5, %v10084_v4  ;;  %v10099_v50 = vmul.f32 %v13570_v48, %v10089_v2  ;;  %v10086_v44 = vmul.f32 0.5, %v13572_v15  ;;  %v1120_v4 = vrot.slane %v11544_v7, %v17223_v55  ;;  %v17229_v2 = vld [vmem:[#allocation26_spill] sm:$0xff] }
 0x94a   :  { %v13574_v3 = vpop.eup %13573 }
 0x94b   :  { %v10097_v43 = vmul.f32 0.0, %v10090_v53  ;;  %v10092_v60 = vadd.f32 0.5, %v10086_v44  ;;  %v10087_v32 = vmul.f32 0.5, %v13574_v3  ;;  %v13576_v0 = vpop.eup %13575  ;;  %v1330_v10 = vadd.f32 %v17229_v2, %v1120_v4  ;;  %v17230_v53 = vld [vmem:[#allocation27_spill] sm:$0xff] }
 0x94d   :  { %v15498_v17 = vadd.f32 %v10099_v50, %v10097_v43  ;;  %v10093_v24 = vadd.f32 0.5, %v10087_v32  ;;  %v10100_v20 = vmul.f32 %v13576_v0, %v10092_v60  ;;  %v1373_v50 = vadd.f32 %v17230_v53, %v1128_v49  ;;  %v17231_v43 = vld [vmem:[#allocation28_spill] sm:$0xff]  ;;  %v17233_v53 = vld [vmem:[#allocation31_spill] sm:$0xff] }
 0x94e   :  { %v1332_v60 = vadd.f32 %v17231_v43, %v1116_v23  ;;  %v1377_v38 = vadd.f32 %v17233_v53, %v1128_v49 }
 0x94f   :  { %17226 = vst [vmem:[#allocation17_spill] sm:$0xff] %v15498_v17  ;;  %v10098_v46 = vmul.f32 0.0, %v10093_v24  ;;  %13581 = vtanh.f32 %v15498_v17 }
 0x951   :  { %v15504_v37 = vadd.f32 %v10100_v20, %v10098_v46  ;;  %v13578_v20 = vpop.eup %13577  ;;  %v17232_v46 = vld [vmem:[#allocation30_spill] sm:$0xff] }
 0x952   :  { %v5824_v16 = vpop.f32.mrf.mxu0  ;;  %v5867_v48 = vpop.f32.mrf.mxu1  ;;  %v1334_v13 = vadd.f32 %v17232_v46, %v1120_v4 }
 0x953   :  { %17228 = vst [vmem:[#allocation24_spill] sm:$0xff] %v15504_v37  ;;  %13583 = vtanh.f32 %v15504_v37  ;;  %v5876_v15 = vadd.f32 %v5824_v16, %v1328_v62  ;;  %v13580_v59 = vpop.eup %13579 }
 0x954   :  { %v5826_v44 = vpop.f32.mrf.mxu0  ;;  %v5869_v3 = vpop.f32.mrf.mxu1 }
 0x955   :  { %v5884_v32 = vmul.f32 0.5, %v5876_v15  ;;  %v5877_v0 = vadd.f32 %v5826_v44, %v1330_v10  ;;  %v5879_v24 = vadd.f32 %v5869_v3, %v1373_v50  ;;  %v10085_v15 = vmul.f32 0.5, %v13578_v20 }
 0x956   :  { %v5828_v8 = vpop.f32.mrf.mxu0  ;;  %v5871_v17 = vpop.f32.mrf.mxu1  ;;  %v10088_v10 = vmul.f32 0.5, %v13580_v59  ;;  %v1124_v44 = vrot.slane %v11544_v7, %v17225_v1 }
 0x957   :  { %13585 = vtanh.f32 %v5884_v32  ;;  %v5885_v45 = vmul.f32 0.5, %v5877_v0  ;;  %v5880_v2 = vadd.f32 %v5828_v8, %v1332_v60  ;;  %v10091_v43 = vadd.f32 0.5, %v10085_v15  ;;  %v17234_v0 = vld [vmem:[#allocation25_spill] sm:$0xff] }
 0x958   :  { %v5830_v37 = vpop.f32.mrf.mxu0  ;;  %v5873_v23 = vpop.f32.mrf.mxu1  ;;  %v10094_v60 = vadd.f32 0.5, %v10088_v10  ;;  %v17235_v8 = vld [vmem:[#allocation29_spill] sm:$0xff] }
 0x959   :  { %13587 = vtanh.f32 %v5885_v45  ;;  %v5887_v62 = vmul.f32 0.5, %v5880_v2  ;;  %v5881_v16 = vadd.f32 %v5830_v37, %v1334_v13  ;;  %v5883_v4 = vadd.f32 %v5873_v23, %v1377_v38 }
 0x95a   :  { %13589 = vtanh.f32 %v5879_v24  ;;  %v1371_v45 = vadd.f32 %v17234_v0, %v1124_v44  ;;  %v1375_v13 = vadd.f32 %v17235_v8, %v1124_v44 }
 0x95b   :  { %13591 = vtanh.f32 %v5887_v62  ;;  %v5888_v50 = vmul.f32 0.5, %v5881_v16 }
 0x95c   :  { %v13582_v3 = vpop.eup %13581  ;;  %v5878_v24 = vadd.f32 %v5867_v48, %v1371_v45  ;;  %v5882_v20 = vadd.f32 %v5871_v17, %v1375_v13  ;;  %v17238_v45 = vld [vmem:[#allocation19_spill] sm:$0xff] }
 0x95d   :  { %13593 = vtanh.f32 %v5888_v50  ;;  %v10105_v49 = vmul.f32 %v13582_v3, %v10091_v43 }
 0x95e   :  { %13595 = vtanh.f32 %v5883_v4  ;;  %v5886_v62 = vmul.f32 0.5, %v5878_v24  ;;  %v5889_v23 = vmul.f32 0.5, %v5882_v20  ;;  %v17237_v4 = vld [vmem:[#allocation18_spill] sm:$0xff] }
 0x960   :  { %v13584_v32 = vpop.eup %13583  ;;  %13597 = vtanh.f32 %v5886_v62 }
 0x961   :  { %v10106_v37 = vmul.f32 %v13584_v32, %v10094_v60  ;;  %13599 = vtanh.f32 %v5889_v23 }
 0x963   :  { %v15515_v59 = vpack.c.bf16 %v10106_v37, %v10105_v49 }
 0x964   :  { %v13586_v46 = vpop.eup %13585 }
 0x965   :  { %17236 = vst [vmem:[#allocation26_spill] sm:$0xff] %v15515_v59  ;;  %v5896_v2 = vmul.f32 0.5, %v13586_v46 }
 0x966   :  { %v13588_v7 = vpop.eup %13587 }
 0x967   :  { %v13590_v38 = vpop.eup %13589  ;;  %v5902_v16 = vadd.f32 0.5, %v5896_v2  ;;  %v5897_v53 = vmul.f32 0.5, %v13588_v7 }
 0x968   :  { %v13592_v15 = vpop.eup %13591 }
 0x969   :  { %v5903_v10 = vadd.f32 0.5, %v5897_v53  ;;  %v5912_v50 = vmul.f32 %v13590_v38, %v5902_v16  ;;  %v5899_v0 = vmul.f32 0.5, %v13592_v15  ;;  %v15635_v15 = vld [vmem:[#allocation4 + $0x120] ss:$16 sps:$4 sm:$0xff]  }
 0x96a   :  { %v13594_v44 = vpop.eup %13593 }
 0x96b   :  { %v5910_v3 = vmul.f32 %v5903_v10, %v17237_v4  ;;  %v5905_v48 = vadd.f32 0.5, %v5899_v0  ;;  %v5900_v17 = vmul.f32 0.5, %v13594_v44  ;;  %v13596_v32 = vpop.eup %13595  ;;  %v15637_v10 = vld [vmem:[#allocation4 + $0x128] ss:$16 sps:$4 sm:$0xff]   ;;  %v15643_v0 = vld [vmem:[#allocation4 + $0x10c] ss:$16 sps:$4 sm:$0xff]  }
 0x96c   :  { %v15647_v44 = vld [vmem:[#allocation4 + $0x100] ss:$16 sps:$4 sm:$0xff]   ;;  %v15649_v4 = vld [vmem:[#allocation4 + $0x108] ss:$16 sps:$4 sm:$0xff]  }
 0x96d   :  { %v15518_v43 = vadd.f32 %v5912_v50, %v5910_v3  ;;  %v5906_v60 = vadd.f32 0.5, %v5900_v17  ;;  %v5913_v13 = vmul.f32 %v13596_v32, %v5905_v48  ;;  %v13598_v37 = vpop.eup %13597  ;;  %v15641_v50 = vld [vmem:[#allocation4 + $0x104] ss:$16 sps:$4 sm:$0xff]   ;;  %v15655_v48 = vld [vmem:[#allocation6 + $0x1ec] ss:$16 sps:$4 sm:$0xff]  }
 0x96e   :  { %v13600_v24 = vpop.eup %13599  ;;  %v5898_v20 = vmul.f32 0.5, %v13598_v37  ;;  %v15653_v3 = vld [vmem:[#allocation6 + $0x1e4] ss:$16 sps:$4 sm:$0xff]   ;;  %17241 = vst [vmem:[#allocation27_spill] sm:$0xff] %v15655_v48 }
 0x96f   :  { %v5911_v8 = vmul.f32 %v5906_v60, %v17238_v45  ;;  %13601 = vtanh.f32 %v15518_v43  ;;  %v5901_v46 = vmul.f32 0.5, %v13600_v24 }
 0x970   :  { %v5904_v7 = vadd.f32 0.5, %v5898_v20 }
 0x971   :  { %v15522_v49 = vadd.f32 %v5913_v13, %v5911_v8  ;;  %v5907_v62 = vadd.f32 0.5, %v5901_v46  ;;  %v11609_v8 = vld [vmem:[%s17022_s4 + $0x4] sm:$0xf] }
 0x972   :  { %v1757_v24 = vrot.slane %v11609_v8, %v17220_v61  ;;  %v1761_v20 = vrot.slane %v11609_v8, %v17223_v55  ;;  %v1769_v46 = vrot.slane %v11609_v8, %v17224_v51  ;;  %v17254_v51 = vld [vmem:[#allocation40_spill] sm:$0xff] }
 0x973   :  { %13603 = vtanh.f32 %v15522_v49 }
 0x97c   :  { %v13602_v2 = vpop.eup %13601 }
 0x97d   :  { %v5918_v16 = vmul.f32 %v13602_v2, %v5904_v7 }
 0x980   :  { %v13604_v38 = vpop.eup %13603 }
 0x981   :  { %v5919_v53 = vmul.f32 %v13604_v38, %v5907_v62  ;;  %v17250_v62 = vld [vmem:[#allocation21_spill] sm:$0xff] }
 0x982   :  { %v1969_v38 = vadd.f32 %v17250_v62, %v1757_v24 }
 0x983   :  { %v5920_v23 = vpack.c.bf16 %v5919_v53, %v5918_v16 }
 0x985   :  { %6168 = vmatmul.mubr.bf16.vlgmr.msra.gmra.mxu0 %v5920_v23  ;;  %6211 = vmatmul.mubr.bf16.vlgmr.msra.gmra.mxu1 %v5920_v23 }
 0x986   :  { %6430 = vmatpush1.bf16.msra.mxu0 %v15337_v39  ;;  %6473 = vmatpush1.bf16.msra.mxu1 %v15339_v21  ;;  %v17239_v39 = vld [vmem:[#allocation20_spill] sm:$0xff]  ;;  %v17240_v21 = vld [vmem:[#allocation65_spill] sm:$0xff] }
 0x987   :  { %6431 = vmatprep.subr.bf16.mxu0 %v15343_v42  ;;  %6474 = vmatprep.subr.bf16.mxu1 %v15345_v18  ;;  %v15583_v42 = vld [vmem:[#allocation4 + $0x1a4] ss:$16 sps:$4 sm:$0xff]   ;;  %v15585_v18 = vld [vmem:[#allocation4 + $0x1ac] ss:$16 sps:$4 sm:$0xff]  }
 0x988   :  { %6461 = vmatprep.mubr.bf16.mxu0 %v17111_v47  ;;  %6504 = vmatprep.mubr.bf16.mxu1 %v17111_v47 }
 0x98a   :  { %6432 = vmatpush1.bf16.msra.mxu0 %v15351_v25  ;;  %6475 = vmatpush1.bf16.msra.mxu1 %v15353_v54  ;;  %v15587_v25 = vld [vmem:[#allocation4 + $0x1a0] ss:$16 sps:$4 sm:$0xff]   ;;  %v15589_v54 = vld [vmem:[#allocation4 + $0x1a8] ss:$16 sps:$4 sm:$0xff]  }
 0x98b   :  { %6433 = vmatprep.subr.bf16.mxu0 %v15357_v57  ;;  %6476 = vmatprep.subr.bf16.mxu1 %v15359_v22  ;;  %v15595_v57 = vld [vmem:[#allocation4 + $0x184] ss:$16 sps:$4 sm:$0xff]   ;;  %v15597_v22 = vld [vmem:[#allocation4 + $0x18c] ss:$16 sps:$4 sm:$0xff]  }
 0x98e   :  { %6434 = vmatpush1.bf16.msra.mxu0 %v15365_v31  ;;  %6477 = vmatpush1.bf16.msra.mxu1 %v15367_v28  ;;  %v15599_v31 = vld [vmem:[#allocation4 + $0x180] ss:$16 sps:$4 sm:$0xff]   ;;  %v15601_v28 = vld [vmem:[#allocation4 + $0x188] ss:$16 sps:$4 sm:$0xff]  }
 0x98f   :  { %6435 = vmatprep.subr.bf16.mxu0 %v15371_v27  ;;  %6478 = vmatprep.subr.bf16.mxu1 %v15373_v19  ;;  %v15605_v27 = vld [vmem:[#allocation4 + $0x164] ss:$16 sps:$4 sm:$0xff]   ;;  %v15609_v19 = vld [vmem:[#allocation4 + $0x160] ss:$16 sps:$4 sm:$0xff]  }
 0x992   :  { %6436 = vmatpush1.bf16.msra.mxu0 %v15377_v30  ;;  %6479 = vmatpush1.bf16.msra.mxu1 %v15379_v29  ;;  %v15611_v30 = vld [vmem:[#allocation4 + $0x168] ss:$16 sps:$4 sm:$0xff]   ;;  %v15613_v29 = vld [vmem:[#allocation4 + $0x16c] ss:$16 sps:$4 sm:$0xff]  }
 0x993   :  { %6437 = vmatprep.subr.bf16.mxu0 %v15383_v35  ;;  %6480 = vmatprep.subr.bf16.mxu1 %v15385_v36  ;;  %v15616_v35 = vld [vmem:[#allocation4 + $0x144] ss:$16 sps:$4 sm:$0xff]   ;;  %v15618_v36 = vld [vmem:[#allocation4 + $0x14c] ss:$16 sps:$4 sm:$0xff]  }
 0x996   :  { %6438 = vmatpush1.bf16.msra.mxu0 %v15389_v5  ;;  %6481 = vmatpush1.bf16.msra.mxu1 %v15391_v33  ;;  %v15623_v5 = vld [vmem:[#allocation4 + $0x140] ss:$16 sps:$4 sm:$0xff]   ;;  %v15625_v33 = vld [vmem:[#allocation4 + $0x148] ss:$16 sps:$4 sm:$0xff]  }
 0x997   :  { %6439 = vmatprep.subr.bf16.mxu0 %v15395_v34  ;;  %6482 = vmatprep.subr.bf16.mxu1 %v17239_v39  ;;  %v15629_v34 = vld [vmem:[#allocation4 + $0x124] ss:$16 sps:$4 sm:$0xff]  }
 0x99a   :  { %6440 = vmatpush1.bf16.msra.mxu0 %v17240_v21  ;;  %6483 = vmatpush1.bf16.msra.mxu1 %v15403_v56  ;;  %v15559_v56 = vld [vmem:[#allocation4 + $0x1e4] ss:$16 sps:$4 sm:$0xff]  }
 0x99b   :  { %6441 = vmatprep.subr.bf16.mxu0 %v15407_v58  ;;  %6484 = vmatprep.subr.bf16.mxu1 %v15409_v52  ;;  %v15561_v52 = vld [vmem:[#allocation4 + $0x1ec] ss:$16 sps:$4 sm:$0xff]   ;;  %v15577_v58 = vld [vmem:[#allocation4 + $0x1c8] ss:$16 sps:$4 sm:$0xff]  }
 0x99e   :  { %6442 = vmatpush1.bf16.msra.mxu0 %v15413_v41  ;;  %6485 = vmatpush1.bf16.msra.mxu1 %v15415_v12  ;;  %v15563_v41 = vld [vmem:[#allocation4 + $0x1e0] ss:$16 sps:$4 sm:$0xff]   ;;  %v15565_v12 = vld [vmem:[#allocation4 + $0x1e8] ss:$16 sps:$4 sm:$0xff]  }
 0x99f   :  { %6443 = vmatprep.subr.bf16.mxu0 %v15419_v11  ;;  %6486 = vmatprep.subr.bf16.mxu1 %v15421_v6  ;;  %v15571_v6 = vld [vmem:[#allocation4 + $0x1c4] ss:$16 sps:$4 sm:$0xff]   ;;  %v15573_v11 = vld [vmem:[#allocation4 + $0x1cc] ss:$16 sps:$4 sm:$0xff]  }
 0x9a2   :  { %6444 = vmatpush1.bf16.msra.mxu0 %v15425_v14  ;;  %6487 = vmatpush1.bf16.msra.mxu1 %v15427_v40  ;;  %v15575_v40 = vld [vmem:[#allocation4 + $0x1c0] ss:$16 sps:$4 sm:$0xff]   ;;  %v15631_v14 = vld [vmem:[#allocation4 + $0x12c] ss:$16 sps:$4 sm:$0xff]  }
 0x9a3   :  { %6774 = vmatprep.subr.bf16.mxu0 %v15559_v56  ;;  %6817 = vmatprep.subr.bf16.mxu1 %v15561_v52 }
 0x9a5   :  { %6462 = vmatmul.mubr.bf16.vlgmr.msra.gmra.mxu0 %v5920_v23  ;;  %6505 = vmatmul.mubr.bf16.vlgmr.msra.gmra.mxu1 %v5920_v23  ;;  %v17251_v23 = vld [vmem:[#allocation23_spill] sm:$0xff] }
 0x9a6   :  { %6806 = vmatprep.mubr.bf16.mxu0 %v17111_v47  ;;  %6849 = vmatprep.mubr.bf16.mxu1 %v17111_v47  ;;  %v1971_v39 = vadd.f32 %v17251_v23, %v1761_v20 }
 0x9a7   :  { %6775 = vmatpush1.bf16.msra.mxu0 %v15563_v41  ;;  %6818 = vmatpush1.bf16.msra.mxu1 %v15565_v12 }
 0x9a8   :  { %6776 = vmatprep.subr.bf16.mxu0 %v15571_v6  ;;  %6819 = vmatprep.subr.bf16.mxu1 %v15573_v11 }
 0x9ab   :  { %6777 = vmatpush1.bf16.msra.mxu0 %v15575_v40  ;;  %6820 = vmatpush1.bf16.msra.mxu1 %v15577_v58 }
 0x9ac   :  { %6778 = vmatprep.subr.bf16.mxu0 %v15583_v42  ;;  %6821 = vmatprep.subr.bf16.mxu1 %v15585_v18 }
 0x9af   :  { %6779 = vmatpush1.bf16.msra.mxu0 %v15587_v25  ;;  %6822 = vmatpush1.bf16.msra.mxu1 %v15589_v54 }
 0x9b0   :  { %6780 = vmatprep.subr.bf16.mxu0 %v15595_v57  ;;  %6823 = vmatprep.subr.bf16.mxu1 %v15597_v22 }
 0x9b3   :  { %6781 = vmatpush1.bf16.msra.mxu0 %v15599_v31  ;;  %6824 = vmatpush1.bf16.msra.mxu1 %v15601_v28 }
 0x9b4   :  { %6782 = vmatprep.subr.bf16.mxu0 %v15605_v27  ;;  %6825 = vmatprep.subr.bf16.mxu1 %v15613_v29 }
 0x9b7   :  { %6783 = vmatpush1.bf16.msra.mxu0 %v15609_v19  ;;  %6826 = vmatpush1.bf16.msra.mxu1 %v15611_v30 }
 0x9b8   :  { %6784 = vmatprep.subr.bf16.mxu0 %v15616_v35  ;;  %6827 = vmatprep.subr.bf16.mxu1 %v15618_v36 }
 0x9bb   :  { %6785 = vmatpush1.bf16.msra.mxu0 %v15623_v5  ;;  %6828 = vmatpush1.bf16.msra.mxu1 %v15625_v33 }
 0x9bc   :  { %6786 = vmatprep.subr.bf16.mxu0 %v15629_v34  ;;  %6829 = vmatprep.subr.bf16.mxu1 %v15631_v14 }
 0x9bf   :  { %6787 = vmatpush1.bf16.msra.mxu0 %v15635_v15  ;;  %6830 = vmatpush1.bf16.msra.mxu1 %v15637_v10 }
 0x9c0   :  { %6788 = vmatprep.subr.bf16.mxu0 %v15641_v50  ;;  %6831 = vmatprep.subr.bf16.mxu1 %v15643_v0 }
 0x9c3   :  { %6789 = vmatpush1.bf16.msra.mxu0 %v15647_v44  ;;  %6832 = vmatpush1.bf16.msra.mxu1 %v15649_v4 }
 0x9c4   :  { %7068 = vmatprep.subr.bf16.mxu0 %v15653_v3  ;;  %7111 = vmatprep.subr.bf16.mxu1 %v15655_v48 }
 0xa45   :  { %v15661_v17 = vpop.f32.mrf.mxu0  ;;  %v15663_v60 = vpop.f32.mrf.mxu1 }
 0xa46   :  { %17242 = vst [vmem:[#allocation28_spill] sm:$0xff] %v15661_v17  ;;  %17243 = vst [vmem:[#allocation30_spill] sm:$0xff] %v15663_v60  ;;  %v17252_v60 = vld [vmem:[#allocation37_spill] sm:$0xff] }
 0xa47   :  { %v15665_v32 = vpop.f32.mrf.mxu0  ;;  %v15667_v45 = vpop.f32.mrf.mxu1 }
 0xa48   :  { %17244 = vst [vmem:[#allocation31_spill] sm:$0xff] %v15665_v32  ;;  %17245 = vst [vmem:[#allocation25_spill] sm:$0xff] %v15667_v45  ;;  %v17253_v32 = vld [vmem:[#allocation38_spill] sm:$0xff] }
 0xa49   :  { %v15672_v13 = vpop.f32.mrf.mxu0  ;;  %v15674_v37 = vpop.f32.mrf.mxu1  ;;  %v1973_v17 = vadd.f32 %v17253_v32, %v1757_v24 }
 0xa4a   :  { %17246 = vst [vmem:[#allocation29_spill] sm:$0xff] %v15672_v13  ;;  %17247 = vst [vmem:[#allocation18_spill] sm:$0xff] %v15674_v37  ;;  %v2014_v13 = vadd.f32 %v17252_v60, %v1769_v46 }
 0xa4b   :  { %v15679_v2 = vpop.f32.mrf.mxu0  ;;  %v15681_v7 = vpop.f32.mrf.mxu1 }
 0xa4c   :  { %17248 = vst [vmem:[#allocation19_spill] sm:$0xff] %v15679_v2  ;;  %17249 = vst [vmem:[#allocation20_spill] sm:$0xff] %v15681_v7  ;;  %v1975_v7 = vadd.f32 %v17254_v51, %v1761_v20  ;;  %v17257_v51 = vld [vmem:[#allocation39_spill] sm:$0xff] }
 0xa65   :  { %v6463_v16 = vpop.f32.mrf.mxu0  ;;  %v6506_v53 = vpop.f32.mrf.mxu1 }
 0xa66   :  { %v6515_v21 = vadd.f32 %v6463_v16, %v1969_v38  ;;  %v17255_v16 = vld [vmem:[#allocation41_spill] sm:$0xff] }
 0xa67   :  { %v6465_v37 = vpop.f32.mrf.mxu0  ;;  %v6508_v45 = vpop.f32.mrf.mxu1  ;;  %v2018_v48 = vadd.f32 %v17255_v16, %v1769_v46 }
 0xa68   :  { %v6523_v59 = vmul.f32 0.5, %v6515_v21  ;;  %v6516_v63 = vadd.f32 %v6465_v37, %v1971_v39  ;;  %v6518_v26 = vadd.f32 %v6508_v45, %v2014_v13  ;;  %v1765_v37 = vrot.slane %v11609_v8, %v17225_v1  ;;  %v17256_v13 = vld [vmem:[#allocation22_spill] sm:$0xff] }
 0xa69   :  { %v6467_v9 = vpop.f32.mrf.mxu0  ;;  %v6510_v2 = vpop.f32.mrf.mxu1 }
 0xa6a   :  { %13605 = vtanh.f32 %v6523_v59  ;;  %v6524_v62 = vmul.f32 0.5, %v6516_v63  ;;  %v6519_v55 = vadd.f32 %v6467_v9, %v1973_v17  ;;  %v2012_v24 = vadd.f32 %v17256_v13, %v1765_v37 }
 0xa6b   :  { %v6469_v61 = vpop.f32.mrf.mxu0  ;;  %v6512_v60 = vpop.f32.mrf.mxu1  ;;  %v2016_v59 = vadd.f32 %v17257_v51, %v1765_v37 }
 0xa6c   :  { %13607 = vtanh.f32 %v6524_v62  ;;  %v6526_v23 = vmul.f32 0.5, %v6519_v55  ;;  %v6520_v38 = vadd.f32 %v6469_v61, %v1975_v7  ;;  %v6522_v45 = vadd.f32 %v6512_v60, %v2018_v48 }
 0xa6d   :  { %13609 = vtanh.f32 %v6518_v26  ;;  %v6517_v9 = vadd.f32 %v6506_v53, %v2012_v24  ;;  %v6521_v63 = vadd.f32 %v6510_v2, %v2016_v59 }
 0xa6e   :  { %13611 = vtanh.f32 %v6526_v23  ;;  %v6527_v32 = vmul.f32 0.5, %v6520_v38 }
 0xa6f   :  { %v6525_v26 = vmul.f32 0.5, %v6517_v9  ;;  %v6528_v39 = vmul.f32 0.5, %v6521_v63 }
 0xa70   :  { %13613 = vtanh.f32 %v6527_v32 }
 0xa71   :  { %13615 = vtanh.f32 %v6522_v45 }
 0xa72   :  { %13617 = vtanh.f32 %v6525_v26 }
 0xa73   :  { %13619 = vtanh.f32 %v6528_v39  ;;  %v15708_v39 = vld [vmem:[#allocation6 + $0x1cc] ss:$16 sps:$4 sm:$0xff]  }
 0xa77   :  { %v13606_v17 = vpop.eup %13605 }
 0xa78   :  { %v6535_v55 = vmul.f32 0.5, %v13606_v17 }
 0xa79   :  { %v13608_v61 = vpop.eup %13607 }
 0xa7a   :  { %v13610_v20 = vpop.eup %13609  ;;  %v6541_v7 = vadd.f32 0.5, %v6535_v55  ;;  %v6536_v46 = vmul.f32 0.5, %v13608_v61 }
 0xa7b   :  { %v13612_v21 = vpop.eup %13611 }
 0xa7c   :  { %v6542_v62 = vadd.f32 0.5, %v6536_v46  ;;  %v6551_v8 = vmul.f32 %v13610_v20, %v6541_v7  ;;  %v6538_v23 = vmul.f32 0.5, %v13612_v21  ;;  %v15700_v20 = vld [vmem:[#allocation6 + $0x1e0] ss:$16 sps:$4 sm:$0xff]   ;;  %v15706_v46 = vld [vmem:[#allocation6 + $0x1c4] ss:$16 sps:$4 sm:$0xff]  }
 0xa7d   :  { %v13614_v48 = vpop.eup %13613  ;;  %v15714_v21 = vld [vmem:[#allocation6 + $0x1c0] ss:$16 sps:$4 sm:$0xff]  }
 0xa7e   :  { %v6549_v38 = vmul.f32 %v6542_v62, %v15518_v43  ;;  %v6544_v60 = vadd.f32 0.5, %v6538_v23  ;;  %v6539_v53 = vmul.f32 0.5, %v13614_v48  ;;  %v13616_v32 = vpop.eup %13615  ;;  %v15716_v62 = vld [vmem:[#allocation6 + $0x1c8] ss:$16 sps:$4 sm:$0xff]   ;;  %v15722_v23 = vld [vmem:[#allocation6 + $0x1ac] ss:$16 sps:$4 sm:$0xff]  }
 0xa7f   :  { %v13618_v24 = vpop.eup %13617  ;;  %v15728_v48 = vld [vmem:[#allocation6 + $0x1a0] ss:$16 sps:$4 sm:$0xff]  }
 0xa80   :  { %v15693_v2 = vadd.f32 %v6551_v8, %v6549_v38  ;;  %v6545_v16 = vadd.f32 0.5, %v6539_v53  ;;  %v6552_v45 = vmul.f32 %v13616_v32, %v6544_v60  ;;  %v13620_v51 = vpop.eup %13619  ;;  %v6537_v59 = vmul.f32 0.5, %v13618_v24  ;;  %v15720_v8 = vld [vmem:[#allocation6 + $0x1a4] ss:$16 sps:$4 sm:$0xff]   ;;  %v15730_v38 = vld [vmem:[#allocation6 + $0x1a8] ss:$16 sps:$4 sm:$0xff]  }
 0xa81   :  { %v6540_v43 = vmul.f32 0.5, %v13620_v51  ;;  %v15734_v60 = vld [vmem:[#allocation6 + $0x184] ss:$16 sps:$4 sm:$0xff]   ;;  %v15736_v53 = vld [vmem:[#allocation6 + $0x18c] ss:$16 sps:$4 sm:$0xff]  }
 0xa82   :  { %v6550_v37 = vmul.f32 %v6545_v16, %v15522_v49  ;;  %13621 = vtanh.f32 %v15693_v2  ;;  %v6543_v63 = vadd.f32 0.5, %v6537_v59  ;;  %v15702_v49 = vld [vmem:[#allocation6 + $0x1e8] ss:$16 sps:$4 sm:$0xff]   ;;  %v15740_v16 = vld [vmem:[#allocation6 + $0x180] ss:$16 sps:$4 sm:$0xff]  }
 0xa83   :  { %v6546_v17 = vadd.f32 0.5, %v6540_v43  ;;  %v15742_v32 = vld [vmem:[#allocation6 + $0x188] ss:$16 sps:$4 sm:$0xff]   ;;  %v15752_v24 = vld [vmem:[#allocation6 + $0x160] ss:$16 sps:$4 sm:$0xff]  }
 0xa84   :  { %v15697_v13 = vadd.f32 %v6552_v45, %v6550_v37  ;;  %v15746_v37 = vld [vmem:[#allocation6 + $0x164] ss:$16 sps:$4 sm:$0xff]   ;;  %v15748_v45 = vld [vmem:[#allocation6 + $0x16c] ss:$16 sps:$4 sm:$0xff]   ;;  %v15754_v51 = vld [vmem:[#allocation6 + $0x168] ss:$16 sps:$4 sm:$0xff]  }
 0xa85   :  { %17258 = vst [vmem:[#allocation65_spill] sm:$0xff] %v15754_v51  ;;  %v15758_v59 = vld [vmem:[#allocation6 + $0x144] ss:$16 sps:$4 sm:$0xff]   ;;  %v15760_v43 = vld [vmem:[#allocation6 + $0x14c] ss:$16 sps:$4 sm:$0xff]  }
 0xa86   :  { %13623 = vtanh.f32 %v15697_v13  ;;  %17259 = vst [vmem:[#allocation21_spill] sm:$0xff] %v15758_v59  ;;  %17260 = vst [vmem:[#allocation23_spill] sm:$0xff] %v15760_v43 }
 0xa8f   :  { %v13622_v9 = vpop.eup %13621 }
 0xa90   :  { %v6557_v61 = vmul.f32 %v13622_v9, %v6543_v63  ;;  %v15764_v9 = vld [vmem:[#allocation6 + $0x140] ss:$16 sps:$4 sm:$0xff]   ;;  %v15766_v63 = vld [vmem:[#allocation6 + $0x148] ss:$16 sps:$4 sm:$0xff]  }
 0xa91   :  { %17261 = vst [vmem:[#allocation37_spill] sm:$0xff] %v15764_v9 }
 0xa93   :  { %v13624_v55 = vpop.eup %13623 }
 0xa94   :  { %v6558_v26 = vmul.f32 %v13624_v55, %v6546_v17  ;;  %v15770_v17 = vld [vmem:[#allocation6 + $0x124] ss:$16 sps:$4 sm:$0xff]   ;;  %v15772_v55 = vld [vmem:[#allocation6 + $0x12c] ss:$16 sps:$4 sm:$0xff]  }
 0xa96   :  { %v15704_v7 = vpack.c.bf16 %v6558_v26, %v6557_v61  ;;  %v15776_v61 = vld [vmem:[#allocation6 + $0x120] ss:$16 sps:$4 sm:$0xff]   ;;  %v15778_v26 = vld [vmem:[#allocation6 + $0x128] ss:$16 sps:$4 sm:$0xff]  }
 0xa98   :  { %6807 = vmatmul.mubr.bf16.vlgmr.msra.gmra.mxu0 %v15704_v7  ;;  %6850 = vmatmul.mubr.bf16.vlgmr.msra.gmra.mxu1 %v15704_v7 }
 0xa99   :  { %7069 = vmatpush1.bf16.msra.mxu0 %v15700_v20  ;;  %7112 = vmatpush1.bf16.msra.mxu1 %v15702_v49 }
 0xa9a   :  { %7070 = vmatprep.subr.bf16.mxu0 %v15706_v46  ;;  %7113 = vmatprep.subr.bf16.mxu1 %v15708_v39 }
 0xa9b   :  { %7100 = vmatprep.mubr.bf16.mxu0 %v17111_v47  ;;  %7143 = vmatprep.mubr.bf16.mxu1 %v17111_v47 }
 0xa9d   :  { %7071 = vmatpush1.bf16.msra.mxu0 %v15714_v21  ;;  %7114 = vmatpush1.bf16.msra.mxu1 %v15716_v62 }
 0xa9e   :  { %7072 = vmatprep.subr.bf16.mxu0 %v15720_v8  ;;  %7115 = vmatprep.subr.bf16.mxu1 %v15722_v23 }
 0xaa1   :  { %7073 = vmatpush1.bf16.msra.mxu0 %v15728_v48  ;;  %7116 = vmatpush1.bf16.msra.mxu1 %v15730_v38 }
 0xaa2   :  { %7074 = vmatprep.subr.bf16.mxu0 %v15734_v60  ;;  %7117 = vmatprep.subr.bf16.mxu1 %v15736_v53 }
 0xaa5   :  { %7075 = vmatpush1.bf16.msra.mxu0 %v15740_v16  ;;  %7118 = vmatpush1.bf16.msra.mxu1 %v15742_v32 }
 0xaa6   :  { %7076 = vmatprep.subr.bf16.mxu0 %v15746_v37  ;;  %7119 = vmatprep.subr.bf16.mxu1 %v15748_v45 }
 0xaa9   :  { %7077 = vmatpush1.bf16.msra.mxu0 %v15752_v24  ;;  %7120 = vmatpush1.bf16.msra.mxu1 %v15754_v51  ;;  %v15782_v51 = vld [vmem:[#allocation6 + $0x104] ss:$16 sps:$4 sm:$0xff]  }
 0xaaa   :  { %7078 = vmatprep.subr.bf16.mxu0 %v15758_v59  ;;  %7121 = vmatprep.subr.bf16.mxu1 %v15760_v43  ;;  %v15784_v59 = vld [vmem:[#allocation6 + $0x10c] ss:$16 sps:$4 sm:$0xff]   ;;  %v15788_v43 = vld [vmem:[#allocation6 + $0x100] ss:$16 sps:$4 sm:$0xff]  }
 0xaad   :  { %7079 = vmatpush1.bf16.msra.mxu0 %v15764_v9  ;;  %7122 = vmatpush1.bf16.msra.mxu1 %v15766_v63  ;;  %v15790_v9 = vld [vmem:[#allocation6 + $0x108] ss:$16 sps:$4 sm:$0xff]  }
 0xaae   :  { %7080 = vmatprep.subr.bf16.mxu0 %v15770_v17  ;;  %7123 = vmatprep.subr.bf16.mxu1 %v15772_v55 }
 0xab1   :  { %7081 = vmatpush1.bf16.msra.mxu0 %v15776_v61  ;;  %7124 = vmatpush1.bf16.msra.mxu1 %v15778_v26 }
 0xab2   :  { %7082 = vmatprep.subr.bf16.mxu0 %v15782_v51  ;;  %7125 = vmatprep.subr.bf16.mxu1 %v15784_v59 }
 0xab5   :  { %7083 = vmatpush1.bf16.msra.mxu0 %v15788_v43  ;;  %7126 = vmatpush1.bf16.msra.mxu1 %v15790_v9 }
 0xab6   :  { %7413 = vmatprep.subr.bf16.mxu0 %v15559_v56  ;;  %7456 = vmatprep.subr.bf16.mxu1 %v15561_v52  ;;  %v17262_v56 = vld [vmem:[#allocation27_spill] sm:$0xff] }
 0xab8   :  { %7101 = vmatmul.mubr.bf16.vlgmr.msra.gmra.mxu0 %v15704_v7  ;;  %7144 = vmatmul.mubr.bf16.vlgmr.msra.gmra.mxu1 %v15704_v7 }
 0xab9   :  { %7414 = vmatpush1.bf16.msra.mxu0 %v15563_v41  ;;  %7457 = vmatpush1.bf16.msra.mxu1 %v15565_v12 }
 0xaba   :  { %7415 = vmatprep.subr.bf16.mxu0 %v15571_v6  ;;  %7458 = vmatprep.subr.bf16.mxu1 %v15573_v11  ;;  %v11674_v11 = vld [vmem:[%s17022_s4 + $0x4] sm:$0xf] }
 0xabb   :  { %7445 = vmatprep.mubr.bf16.mxu0 %v17111_v47  ;;  %7488 = vmatprep.mubr.bf16.mxu1 %v17111_v47 }
 0xabd   :  { %7416 = vmatpush1.bf16.msra.mxu0 %v15575_v40  ;;  %7459 = vmatpush1.bf16.msra.mxu1 %v15577_v58 }
 0xabe   :  { %7417 = vmatprep.subr.bf16.mxu0 %v15583_v42  ;;  %7460 = vmatprep.subr.bf16.mxu1 %v15585_v18  ;;  %v17269_v42 = vld [vmem:[#allocation10_spill] sm:$0xff] }
 0xabf   :  { %v2398_v18 = vrot.slane %v11674_v11, %v17269_v42 }
 0xac1   :  { %7418 = vmatpush1.bf16.msra.mxu0 %v15587_v25  ;;  %7461 = vmatpush1.bf16.msra.mxu1 %v15589_v54  ;;  %v17270_v25 = vld [vmem:[#allocation11_spill] sm:$0xff] }
 0xac2   :  { %7419 = vmatprep.subr.bf16.mxu0 %v15595_v57  ;;  %7462 = vmatprep.subr.bf16.mxu1 %v15597_v22  ;;  %v2402_v54 = vrot.slane %v11674_v11, %v17270_v25  ;;  %v17271_v57 = vld [vmem:[#allocation12_spill] sm:$0xff] }
 0xac3   :  { %v2410_v22 = vrot.slane %v11674_v11, %v17271_v57 }
 0xac5   :  { %7420 = vmatpush1.bf16.msra.mxu0 %v15599_v31  ;;  %7463 = vmatpush1.bf16.msra.mxu1 %v15601_v28 }
 0xac6   :  { %7421 = vmatprep.subr.bf16.mxu0 %v15605_v27  ;;  %7464 = vmatprep.subr.bf16.mxu1 %v15613_v29  ;;  %v17274_v27 = vld [vmem:[#allocation33_spill] sm:$0xff] }
 0xac9   :  { %7422 = vmatpush1.bf16.msra.mxu0 %v15609_v19  ;;  %7465 = vmatpush1.bf16.msra.mxu1 %v15611_v30  ;;  %v2610_v19 = vadd.f32 %v17274_v27, %v2398_v18 }
 0xaca   :  { %7423 = vmatprep.subr.bf16.mxu0 %v15616_v35  ;;  %7466 = vmatprep.subr.bf16.mxu1 %v15618_v36  ;;  %v17275_v35 = vld [vmem:[#allocation35_spill] sm:$0xff] }
 0xacb   :  { %v2612_v36 = vadd.f32 %v17275_v35, %v2402_v54 }
 0xacd   :  { %7424 = vmatpush1.bf16.msra.mxu0 %v15623_v5  ;;  %7467 = vmatpush1.bf16.msra.mxu1 %v15625_v33  ;;  %v17276_v33 = vld [vmem:[#allocation36_spill] sm:$0xff] }
 0xace   :  { %7425 = vmatprep.subr.bf16.mxu0 %v15629_v34  ;;  %7468 = vmatprep.subr.bf16.mxu1 %v15631_v14  ;;  %v2655_v34 = vadd.f32 %v17276_v33, %v2410_v22  ;;  %v17279_v33 = vld [vmem:[#allocation45_spill] sm:$0xff] }
 0xad1   :  { %7426 = vmatpush1.bf16.msra.mxu0 %v15635_v15  ;;  %7469 = vmatpush1.bf16.msra.mxu1 %v15637_v10  ;;  %v17277_v10 = vld [vmem:[#allocation42_spill] sm:$0xff] }
 0xad2   :  { %7427 = vmatprep.subr.bf16.mxu0 %v15641_v50  ;;  %7470 = vmatprep.subr.bf16.mxu1 %v15643_v0  ;;  %v2614_v50 = vadd.f32 %v17277_v10, %v2398_v18 }
 0xad5   :  { %7428 = vmatpush1.bf16.msra.mxu0 %v15647_v44  ;;  %7471 = vmatpush1.bf16.msra.mxu1 %v15649_v4 }
 0xad6   :  { %7707 = vmatprep.subr.bf16.mxu0 %v15653_v3  ;;  %7750 = vmatprep.subr.bf16.mxu1 %v17262_v56  ;;  %v17278_v56 = vld [vmem:[#allocation44_spill] sm:$0xff] }
 0xb58   :  { %v15834_v52 = vpop.f32.mrf.mxu0  ;;  %v15836_v41 = vpop.f32.mrf.mxu1 }
 0xb59   :  { %17263 = vst [vmem:[#allocation38_spill] sm:$0xff] %v15834_v52  ;;  %17264 = vst [vmem:[#allocation40_spill] sm:$0xff] %v15836_v41 }
 0xb5a   :  { %v15838_v12 = vpop.f32.mrf.mxu0  ;;  %v15840_v6 = vpop.f32.mrf.mxu1 }
 0xb5b   :  { %17265 = vst [vmem:[#allocation41_spill] sm:$0xff] %v15838_v12  ;;  %17266 = vst [vmem:[#allocation22_spill] sm:$0xff] %v15840_v6 }
 0xb5c   :  { %v15845_v40 = vpop.f32.mrf.mxu0  ;;  %v15847_v58 = vpop.f32.mrf.mxu1 }
 0xb5d   :  { %17267 = vst [vmem:[#allocation39_spill] sm:$0xff] %v15845_v40  ;;  %17268 = vst [vmem:[#allocation27_spill] sm:$0xff] %v15847_v58  ;;  %v2616_v58 = vadd.f32 %v17278_v56, %v2402_v54  ;;  %v17281_v54 = vld [vmem:[#allocation43_spill] sm:$0xff] }
 0xb5e   :  { %v15852_v31 = vpop.f32.mrf.mxu0  ;;  %v15854_v28 = vpop.f32.mrf.mxu1 }
 0xb5f   :  { %17272 = vst [vmem:[#allocation74_spill] sm:$0xff] %v15852_v31  ;;  %17273 = vst [vmem:[#allocation75_spill] sm:$0xff] %v15854_v28  ;;  %v2659_v31 = vadd.f32 %v17279_v33, %v2410_v22 }
 0xb78   :  { %v7102_v30 = vpop.f32.mrf.mxu0  ;;  %v7145_v29 = vpop.f32.mrf.mxu1 }
 0xb79   :  { %v7154_v5 = vadd.f32 %v7102_v30, %v2610_v19 }
 0xb7a   :  { %v7104_v14 = vpop.f32.mrf.mxu0  ;;  %v7147_v15 = vpop.f32.mrf.mxu1 }
 0xb7b   :  { %v7162_v0 = vmul.f32 0.5, %v7154_v5  ;;  %v7155_v44 = vadd.f32 %v7104_v14, %v2612_v36  ;;  %v7157_v4 = vadd.f32 %v7147_v15, %v2655_v34  ;;  %v2406_v36 = vrot.slane %v11674_v11, %v17225_v1  ;;  %v17280_v34 = vld [vmem:[#allocation34_spill] sm:$0xff] }
 0xb7c   :  { %v7106_v3 = vpop.f32.mrf.mxu0  ;;  %v7149_v7 = vpop.f32.mrf.mxu1 }
 0xb7d   :  { %13625 = vtanh.f32 %v7162_v0  ;;  %v7163_v27 = vmul.f32 0.5, %v7155_v44  ;;  %v7158_v41 = vadd.f32 %v7106_v3, %v2614_v50  ;;  %v2653_v14 = vadd.f32 %v17280_v34, %v2406_v36 }
 0xb7e   :  { %v7108_v28 = vpop.f32.mrf.mxu0  ;;  %v7151_v30 = vpop.f32.mrf.mxu1  ;;  %v2657_v15 = vadd.f32 %v17281_v54, %v2406_v36 }
 0xb7f   :  { %13627 = vtanh.f32 %v7163_v27  ;;  %v7165_v35 = vmul.f32 0.5, %v7158_v41  ;;  %v7159_v19 = vadd.f32 %v7108_v28, %v2616_v58  ;;  %v7161_v5 = vadd.f32 %v7151_v30, %v2659_v31 }
 0xb80   :  { %13629 = vtanh.f32 %v7157_v4  ;;  %v7156_v10 = vadd.f32 %v7145_v29, %v2653_v14  ;;  %v7160_v50 = vadd.f32 %v7149_v7, %v2657_v15 }
 0xb81   :  { %13631 = vtanh.f32 %v7165_v35  ;;  %v7166_v18 = vmul.f32 0.5, %v7159_v19 }
 0xb82   :  { %v7164_v28 = vmul.f32 0.5, %v7156_v10  ;;  %v7167_v3 = vmul.f32 0.5, %v7160_v50 }
 0xb83   :  { %13633 = vtanh.f32 %v7166_v18 }
 0xb84   :  { %13635 = vtanh.f32 %v7161_v5 }
 0xb85   :  { %13637 = vtanh.f32 %v7164_v28 }
 0xb86   :  { %13639 = vtanh.f32 %v7167_v3  ;;  %v15979_v3 = vld [vmem:[#allocation4 + $0x12c] ss:$16 sps:$4 sm:$0xff]  }
 0xb8a   :  { %v13626_v0 = vpop.eup %13625 }
 0xb8b   :  { %v7174_v41 = vmul.f32 0.5, %v13626_v0 }
 0xb8c   :  { %v13628_v58 = vpop.eup %13627 }
 0xb8d   :  { %v13630_v44 = vpop.eup %13629  ;;  %v7180_v4 = vadd.f32 0.5, %v7174_v41  ;;  %v7175_v22 = vmul.f32 0.5, %v13628_v58 }
 0xb8e   :  { %v13632_v56 = vpop.eup %13631 }
 0xb8f   :  { %v7181_v27 = vadd.f32 0.5, %v7175_v22  ;;  %v7190_v11 = vmul.f32 %v13630_v44, %v7180_v4  ;;  %v7177_v35 = vmul.f32 0.5, %v13632_v56  ;;  %v15973_v4 = vld [vmem:[#allocation4 + $0x148] ss:$16 sps:$4 sm:$0xff]   ;;  %v15977_v22 = vld [vmem:[#allocation4 + $0x124] ss:$16 sps:$4 sm:$0xff]  }
 0xb90   :  { %v13634_v31 = vpop.eup %13633  ;;  %v15983_v56 = vld [vmem:[#allocation4 + $0x120] ss:$16 sps:$4 sm:$0xff]  }
 0xb91   :  { %v7188_v19 = vmul.f32 %v7181_v27, %v15693_v2  ;;  %v7183_v30 = vadd.f32 0.5, %v7177_v35  ;;  %v7178_v29 = vmul.f32 0.5, %v13634_v31  ;;  %v13636_v18 = vpop.eup %13635  ;;  %v15985_v27 = vld [vmem:[#allocation4 + $0x128] ss:$16 sps:$4 sm:$0xff]   ;;  %v15991_v35 = vld [vmem:[#allocation4 + $0x10c] ss:$16 sps:$4 sm:$0xff]  }
 0xb92   :  { %v13638_v14 = vpop.eup %13637  ;;  %v15995_v31 = vld [vmem:[#allocation4 + $0x100] ss:$16 sps:$4 sm:$0xff]  }
 0xb93   :  { %v15866_v7 = vadd.f32 %v7190_v11, %v7188_v19  ;;  %v7184_v33 = vadd.f32 0.5, %v7178_v29  ;;  %v7191_v5 = vmul.f32 %v13636_v18, %v7183_v30  ;;  %v13640_v54 = vpop.eup %13639  ;;  %v7176_v15 = vmul.f32 0.5, %v13638_v14  ;;  %v15989_v11 = vld [vmem:[#allocation4 + $0x104] ss:$16 sps:$4 sm:$0xff]   ;;  %v15997_v19 = vld [vmem:[#allocation4 + $0x108] ss:$16 sps:$4 sm:$0xff]  }
 0xb94   :  { %v7179_v2 = vmul.f32 0.5, %v13640_v54  ;;  %v16001_v30 = vld [vmem:[#allocation6 + $0x1e4] ss:$16 sps:$4 sm:$0xff]   ;;  %v16003_v29 = vld [vmem:[#allocation6 + $0x1ec] ss:$16 sps:$4 sm:$0xff]  }
 0xb95   :  { %v7189_v36 = vmul.f32 %v7184_v33, %v15697_v13  ;;  %13641 = vtanh.f32 %v15866_v7  ;;  %v7182_v50 = vadd.f32 0.5, %v7176_v15  ;;  %v17282_v13 = vld [vmem:[#allocation65_spill] sm:$0xff]  ;;  %17286 = vst [vmem:[#allocation33_spill] sm:$0xff] %v16003_v29  ;;  %v11739_v14 = vld [vmem:[%s17022_s4 + $0x4] sm:$0xf] }
 0xb96   :  { %v7185_v0 = vadd.f32 0.5, %v7179_v2  ;;  %v3039_v2 = vrot.slane %v11739_v14, %v17269_v42 }
 0xb97   :  { %v15870_v34 = vadd.f32 %v7191_v5, %v7189_v36 }
 0xb99   :  { %13643 = vtanh.f32 %v15870_v34 }
 0xba2   :  { %v13642_v10 = vpop.eup %13641 }
 0xba3   :  { %v7196_v58 = vmul.f32 %v13642_v10, %v7182_v50  ;;  %v3043_v10 = vrot.slane %v11739_v14, %v17270_v25  ;;  %v3051_v50 = vrot.slane %v11739_v14, %v17271_v57  ;;  %v17299_v57 = vld [vmem:[#allocation56_spill] sm:$0xff] }
 0xba6   :  { %v13644_v41 = vpop.eup %13643 }
 0xba7   :  { %v7197_v28 = vmul.f32 %v13644_v41, %v7185_v0 }
 0xba9   :  { %v7198_v44 = vpack.c.bf16 %v7197_v28, %v7196_v58  ;;  %v17295_v58 = vld [vmem:[#allocation16_spill] sm:$0xff] }
 0xbaa   :  { %v3251_v28 = vadd.f32 %v17295_v58, %v3039_v2 }
 0xbab   :  { %7446 = vmatmul.mubr.bf16.vlgmr.msra.gmra.mxu0 %v7198_v44  ;;  %7489 = vmatmul.mubr.bf16.vlgmr.msra.gmra.mxu1 %v7198_v44 }
 0xbac   :  { %7708 = vmatpush1.bf16.msra.mxu0 %v15700_v20  ;;  %7751 = vmatpush1.bf16.msra.mxu1 %v15702_v49  ;;  %v17283_v20 = vld [vmem:[#allocation21_spill] sm:$0xff]  ;;  %v17284_v49 = vld [vmem:[#allocation23_spill] sm:$0xff] }
 0xbad   :  { %7709 = vmatprep.subr.bf16.mxu0 %v15706_v46  ;;  %7752 = vmatprep.subr.bf16.mxu1 %v15708_v39  ;;  %v17285_v46 = vld [vmem:[#allocation37_spill] sm:$0xff]  ;;  %v15907_v39 = vld [vmem:[#allocation4 + $0x1e4] ss:$16 sps:$4 sm:$0xff]  }
 0xbae   :  { %7739 = vmatprep.mubr.bf16.mxu0 %v17111_v47  ;;  %7782 = vmatprep.mubr.bf16.mxu1 %v17111_v47 }
 0xbb0   :  { %7710 = vmatpush1.bf16.msra.mxu0 %v15714_v21  ;;  %7753 = vmatpush1.bf16.msra.mxu1 %v15716_v62  ;;  %v15909_v21 = vld [vmem:[#allocation4 + $0x1ec] ss:$16 sps:$4 sm:$0xff]   ;;  %v15911_v62 = vld [vmem:[#allocation4 + $0x1e0] ss:$16 sps:$4 sm:$0xff]  }
 0xbb1   :  { %7711 = vmatprep.subr.bf16.mxu0 %v15720_v8  ;;  %7754 = vmatprep.subr.bf16.mxu1 %v15722_v23  ;;  %v15913_v8 = vld [vmem:[#allocation4 + $0x1e8] ss:$16 sps:$4 sm:$0xff]   ;;  %v15919_v23 = vld [vmem:[#allocation4 + $0x1c4] ss:$16 sps:$4 sm:$0xff]  }
 0xbb4   :  { %7712 = vmatpush1.bf16.msra.mxu0 %v15728_v48  ;;  %7755 = vmatpush1.bf16.msra.mxu1 %v15730_v38  ;;  %v15921_v48 = vld [vmem:[#allocation4 + $0x1cc] ss:$16 sps:$4 sm:$0xff]   ;;  %v15923_v38 = vld [vmem:[#allocation4 + $0x1c0] ss:$16 sps:$4 sm:$0xff]  }
 0xbb5   :  { %7713 = vmatprep.subr.bf16.mxu0 %v15734_v60  ;;  %7756 = vmatprep.subr.bf16.mxu1 %v15736_v53  ;;  %v15925_v60 = vld [vmem:[#allocation4 + $0x1c8] ss:$16 sps:$4 sm:$0xff]   ;;  %v15931_v53 = vld [vmem:[#allocation4 + $0x1a4] ss:$16 sps:$4 sm:$0xff]  }
 0xbb8   :  { %7714 = vmatpush1.bf16.msra.mxu0 %v15740_v16  ;;  %7757 = vmatpush1.bf16.msra.mxu1 %v15742_v32  ;;  %v15933_v16 = vld [vmem:[#allocation4 + $0x1ac] ss:$16 sps:$4 sm:$0xff]   ;;  %v15935_v32 = vld [vmem:[#allocation4 + $0x1a0] ss:$16 sps:$4 sm:$0xff]  }
 0xbb9   :  { %7715 = vmatprep.subr.bf16.mxu0 %v15746_v37  ;;  %7758 = vmatprep.subr.bf16.mxu1 %v15748_v45  ;;  %v15937_v37 = vld [vmem:[#allocation4 + $0x1a8] ss:$16 sps:$4 sm:$0xff]   ;;  %v15943_v45 = vld [vmem:[#allocation4 + $0x184] ss:$16 sps:$4 sm:$0xff]  }
 0xbbc   :  { %7716 = vmatpush1.bf16.msra.mxu0 %v15752_v24  ;;  %7759 = vmatpush1.bf16.msra.mxu1 %v17282_v13  ;;  %v15945_v24 = vld [vmem:[#allocation4 + $0x18c] ss:$16 sps:$4 sm:$0xff]  }
 0xbbd   :  { %7717 = vmatprep.subr.bf16.mxu0 %v17283_v20  ;;  %7760 = vmatprep.subr.bf16.mxu1 %v17284_v49  ;;  %v17296_v20 = vld [vmem:[#allocation32_spill] sm:$0xff] }
 0xbbe   :  { %v3253_v49 = vadd.f32 %v17296_v20, %v3043_v10 }
 0xbc0   :  { %7718 = vmatpush1.bf16.msra.mxu0 %v17285_v46  ;;  %7761 = vmatpush1.bf16.msra.mxu1 %v15766_v63  ;;  %v15959_v63 = vld [vmem:[#allocation4 + $0x168] ss:$16 sps:$4 sm:$0xff]  }
 0xbc1   :  { %7719 = vmatprep.subr.bf16.mxu0 %v15770_v17  ;;  %7762 = vmatprep.subr.bf16.mxu1 %v15772_v55  ;;  %v15961_v17 = vld [vmem:[#allocation4 + $0x16c] ss:$16 sps:$4 sm:$0xff]   ;;  %v15964_v55 = vld [vmem:[#allocation4 + $0x144] ss:$16 sps:$4 sm:$0xff]  }
 0xbc4   :  { %7720 = vmatpush1.bf16.msra.mxu0 %v15776_v61  ;;  %7763 = vmatpush1.bf16.msra.mxu1 %v15778_v26  ;;  %v15966_v61 = vld [vmem:[#allocation4 + $0x14c] ss:$16 sps:$4 sm:$0xff]   ;;  %v15971_v26 = vld [vmem:[#allocation4 + $0x140] ss:$16 sps:$4 sm:$0xff]  }
 0xbc5   :  { %7721 = vmatprep.subr.bf16.mxu0 %v15782_v51  ;;  %7764 = vmatprep.subr.bf16.mxu1 %v15784_v59  ;;  %v15947_v51 = vld [vmem:[#allocation4 + $0x180] ss:$16 sps:$4 sm:$0xff]   ;;  %v15949_v59 = vld [vmem:[#allocation4 + $0x188] ss:$16 sps:$4 sm:$0xff]  }
 0xbc8   :  { %7722 = vmatpush1.bf16.msra.mxu0 %v15788_v43  ;;  %7765 = vmatpush1.bf16.msra.mxu1 %v15790_v9  ;;  %v15953_v43 = vld [vmem:[#allocation4 + $0x164] ss:$16 sps:$4 sm:$0xff]   ;;  %v15957_v9 = vld [vmem:[#allocation4 + $0x160] ss:$16 sps:$4 sm:$0xff]  }
 0xbc9   :  { %8052 = vmatprep.subr.bf16.mxu0 %v15907_v39  ;;  %8095 = vmatprep.subr.bf16.mxu1 %v15909_v21 }
 0xbcb   :  { %7740 = vmatmul.mubr.bf16.vlgmr.msra.gmra.mxu0 %v7198_v44  ;;  %7783 = vmatmul.mubr.bf16.vlgmr.msra.gmra.mxu1 %v7198_v44 }
 0xbcc   :  { %8084 = vmatprep.mubr.bf16.mxu0 %v17111_v47  ;;  %8127 = vmatprep.mubr.bf16.mxu1 %v17111_v47 }
 0xbcd   :  { %8053 = vmatpush1.bf16.msra.mxu0 %v15911_v62  ;;  %8096 = vmatpush1.bf16.msra.mxu1 %v15913_v8 }
 0xbce   :  { %8054 = vmatprep.subr.bf16.mxu0 %v15919_v23  ;;  %8097 = vmatprep.subr.bf16.mxu1 %v15921_v48 }
 0xbd1   :  { %8055 = vmatpush1.bf16.msra.mxu0 %v15923_v38  ;;  %8098 = vmatpush1.bf16.msra.mxu1 %v15925_v60 }
 0xbd2   :  { %8056 = vmatprep.subr.bf16.mxu0 %v15931_v53  ;;  %8099 = vmatprep.subr.bf16.mxu1 %v15933_v16 }
 0xbd5   :  { %8057 = vmatpush1.bf16.msra.mxu0 %v15935_v32  ;;  %8100 = vmatpush1.bf16.msra.mxu1 %v15937_v37 }
 0xbd6   :  { %8058 = vmatprep.subr.bf16.mxu0 %v15943_v45  ;;  %8101 = vmatprep.subr.bf16.mxu1 %v15945_v24 }
 0xbd9   :  { %8059 = vmatpush1.bf16.msra.mxu0 %v15947_v51  ;;  %8102 = vmatpush1.bf16.msra.mxu1 %v15949_v59 }
 0xbda   :  { %8060 = vmatprep.subr.bf16.mxu0 %v15953_v43  ;;  %8103 = vmatprep.subr.bf16.mxu1 %v15961_v17 }
 0xbdd   :  { %8061 = vmatpush1.bf16.msra.mxu0 %v15957_v9  ;;  %8104 = vmatpush1.bf16.msra.mxu1 %v15959_v63 }
 0xbde   :  { %8062 = vmatprep.subr.bf16.mxu0 %v15964_v55  ;;  %8105 = vmatprep.subr.bf16.mxu1 %v15966_v61 }
 0xbe1   :  { %8063 = vmatpush1.bf16.msra.mxu0 %v15971_v26  ;;  %8106 = vmatpush1.bf16.msra.mxu1 %v15973_v4 }
 0xbe2   :  { %8064 = vmatprep.subr.bf16.mxu0 %v15977_v22  ;;  %8107 = vmatprep.subr.bf16.mxu1 %v15979_v3 }
 0xbe5   :  { %8065 = vmatpush1.bf16.msra.mxu0 %v15983_v56  ;;  %8108 = vmatpush1.bf16.msra.mxu1 %v15985_v27 }
 0xbe6   :  { %8066 = vmatprep.subr.bf16.mxu0 %v15989_v11  ;;  %8109 = vmatprep.subr.bf16.mxu1 %v15991_v35 }
 0xbe9   :  { %8067 = vmatpush1.bf16.msra.mxu0 %v15995_v31  ;;  %8110 = vmatpush1.bf16.msra.mxu1 %v15997_v19 }
 0xbea   :  { %8346 = vmatprep.subr.bf16.mxu0 %v16001_v30  ;;  %8389 = vmatprep.subr.bf16.mxu1 %v16003_v29 }
 0xc6b   :  { %v16009_v33 = vpop.f32.mrf.mxu0  ;;  %v16011_v18 = vpop.f32.mrf.mxu1 }
 0xc6c   :  { %17287 = vst [vmem:[#allocation35_spill] sm:$0xff] %v16009_v33  ;;  %17288 = vst [vmem:[#allocation36_spill] sm:$0xff] %v16011_v18  ;;  %v17297_v18 = vld [vmem:[#allocation53_spill] sm:$0xff] }
 0xc6d   :  { %v16013_v36 = vpop.f32.mrf.mxu0  ;;  %v16015_v5 = vpop.f32.mrf.mxu1 }
 0xc6e   :  { %17289 = vst [vmem:[#allocation42_spill] sm:$0xff] %v16013_v36  ;;  %17290 = vst [vmem:[#allocation44_spill] sm:$0xff] %v16015_v5  ;;  %v17298_v36 = vld [vmem:[#allocation54_spill] sm:$0xff] }
 0xc6f   :  { %v16020_v54 = vpop.f32.mrf.mxu0  ;;  %v16022_v15 = vpop.f32.mrf.mxu1  ;;  %v3255_v33 = vadd.f32 %v17298_v36, %v3039_v2 }
 0xc70   :  { %17291 = vst [vmem:[#allocation45_spill] sm:$0xff] %v16020_v54  ;;  %17292 = vst [vmem:[#allocation34_spill] sm:$0xff] %v16022_v15  ;;  %v3296_v54 = vadd.f32 %v17297_v18, %v3051_v50 }
 0xc71   :  { %v16027_v0 = vpop.f32.mrf.mxu0  ;;  %v16029_v41 = vpop.f32.mrf.mxu1 }
 0xc72   :  { %17293 = vst [vmem:[#allocation43_spill] sm:$0xff] %v16027_v0  ;;  %17294 = vst [vmem:[#allocation65_spill] sm:$0xff] %v16029_v41  ;;  %v3257_v41 = vadd.f32 %v17299_v57, %v3043_v10  ;;  %v17302_v57 = vld [vmem:[#allocation55_spill] sm:$0xff] }
 0xc8b   :  { %v7741_v44 = vpop.f32.mrf.mxu0  ;;  %v7784_v13 = vpop.f32.mrf.mxu1 }
 0xc8c   :  { %v7793_v46 = vadd.f32 %v7741_v44, %v3251_v28  ;;  %v17300_v44 = vld [vmem:[#allocation57_spill] sm:$0xff] }
 0xc8d   :  { %v7743_v15 = vpop.f32.mrf.mxu0  ;;  %v7786_v5 = vpop.f32.mrf.mxu1  ;;  %v3300_v29 = vadd.f32 %v17300_v44, %v3051_v50 }
 0xc8e   :  { %v7801_v40 = vmul.f32 0.5, %v7793_v46  ;;  %v7794_v6 = vadd.f32 %v7743_v15, %v3253_v49  ;;  %v7796_v12 = vadd.f32 %v7786_v5, %v3296_v54  ;;  %v3047_v15 = vrot.slane %v11739_v14, %v17225_v1  ;;  %v17301_v54 = vld [vmem:[#allocation15_spill] sm:$0xff] }
 0xc8f   :  { %v7745_v52 = vpop.f32.mrf.mxu0  ;;  %v7788_v0 = vpop.f32.mrf.mxu1 }
 0xc90   :  { %13645 = vtanh.f32 %v7801_v40  ;;  %v7802_v58 = vmul.f32 0.5, %v7794_v6  ;;  %v7797_v25 = vadd.f32 %v7745_v52, %v3255_v33  ;;  %v3294_v2 = vadd.f32 %v17301_v54, %v3047_v15 }
 0xc91   :  { %v7747_v42 = vpop.f32.mrf.mxu0  ;;  %v7790_v18 = vpop.f32.mrf.mxu1  ;;  %v3298_v40 = vadd.f32 %v17302_v57, %v3047_v15 }
 0xc92   :  { %13647 = vtanh.f32 %v7802_v58  ;;  %v7804_v20 = vmul.f32 0.5, %v7797_v25  ;;  %v7798_v28 = vadd.f32 %v7747_v42, %v3257_v41  ;;  %v7800_v5 = vadd.f32 %v7790_v18, %v3300_v29 }
 0xc93   :  { %13649 = vtanh.f32 %v7796_v12  ;;  %v7795_v52 = vadd.f32 %v7784_v13, %v3294_v2  ;;  %v7799_v6 = vadd.f32 %v7788_v0, %v3298_v40 }
 0xc94   :  { %13651 = vtanh.f32 %v7804_v20  ;;  %v7805_v36 = vmul.f32 0.5, %v7798_v28 }
 0xc95   :  { %v7803_v12 = vmul.f32 0.5, %v7795_v52  ;;  %v7806_v49 = vmul.f32 0.5, %v7799_v6 }
 0xc96   :  { %13653 = vtanh.f32 %v7805_v36 }
 0xc97   :  { %13655 = vtanh.f32 %v7800_v5 }
 0xc98   :  { %13657 = vtanh.f32 %v7803_v12 }
 0xc99   :  { %13659 = vtanh.f32 %v7806_v49  ;;  %v16056_v49 = vld [vmem:[#allocation6 + $0x1cc] ss:$16 sps:$4 sm:$0xff]  }
 0xc9d   :  { %v13646_v33 = vpop.eup %13645 }
 0xc9e   :  { %v7813_v25 = vmul.f32 0.5, %v13646_v33 }
 0xc9f   :  { %v13648_v42 = vpop.eup %13647 }
 0xca0   :  { %v13650_v10 = vpop.eup %13649  ;;  %v7819_v41 = vadd.f32 0.5, %v7813_v25  ;;  %v7814_v50 = vmul.f32 0.5, %v13648_v42 }
 0xca1   :  { %v13652_v46 = vpop.eup %13651 }
 0xca2   :  { %v7820_v58 = vadd.f32 0.5, %v7814_v50  ;;  %v7829_v14 = vmul.f32 %v13650_v10, %v7819_v41  ;;  %v7816_v20 = vmul.f32 0.5, %v13652_v46  ;;  %v16048_v10 = vld [vmem:[#allocation6 + $0x1e0] ss:$16 sps:$4 sm:$0xff]   ;;  %v16054_v50 = vld [vmem:[#allocation6 + $0x1c4] ss:$16 sps:$4 sm:$0xff]  }
 0xca3   :  { %v13654_v29 = vpop.eup %13653  ;;  %v16062_v46 = vld [vmem:[#allocation6 + $0x1c0] ss:$16 sps:$4 sm:$0xff]  }
 0xca4   :  { %v7827_v28 = vmul.f32 %v7820_v58, %v15866_v7  ;;  %v7822_v18 = vadd.f32 0.5, %v7816_v20  ;;  %v7817_v13 = vmul.f32 0.5, %v13654_v29  ;;  %v13656_v36 = vpop.eup %13655  ;;  %v16064_v58 = vld [vmem:[#allocation6 + $0x1c8] ss:$16 sps:$4 sm:$0xff]   ;;  %v16070_v20 = vld [vmem:[#allocation6 + $0x1ac] ss:$16 sps:$4 sm:$0xff]  }
 0xca5   :  { %v13658_v2 = vpop.eup %13657  ;;  %v16076_v29 = vld [vmem:[#allocation6 + $0x1a0] ss:$16 sps:$4 sm:$0xff]  }
 0xca6   :  { %v16041_v0 = vadd.f32 %v7829_v14, %v7827_v28  ;;  %v7823_v44 = vadd.f32 0.5, %v7817_v13  ;;  %v7830_v5 = vmul.f32 %v13656_v36, %v7822_v18  ;;  %v13660_v57 = vpop.eup %13659  ;;  %v7815_v40 = vmul.f32 0.5, %v13658_v2  ;;  %v16068_v14 = vld [vmem:[#allocation6 + $0x1a4] ss:$16 sps:$4 sm:$0xff]   ;;  %v16078_v28 = vld [vmem:[#allocation6 + $0x1a8] ss:$16 sps:$4 sm:$0xff]  }
 0xca7   :  { %v7818_v7 = vmul.f32 0.5, %v13660_v57  ;;  %v16082_v18 = vld [vmem:[#allocation6 + $0x184] ss:$16 sps:$4 sm:$0xff]   ;;  %v16084_v13 = vld [vmem:[#allocation6 + $0x18c] ss:$16 sps:$4 sm:$0xff]  }
 0xca8   :  { %v7828_v15 = vmul.f32 %v7823_v44, %v15870_v34  ;;  %13661 = vtanh.f32 %v16041_v0  ;;  %v7821_v6 = vadd.f32 0.5, %v7815_v40  ;;  %v16050_v34 = vld [vmem:[#allocation6 + $0x1e8] ss:$16 sps:$4 sm:$0xff]   ;;  %v16088_v44 = vld [vmem:[#allocation6 + $0x180] ss:$16 sps:$4 sm:$0xff]  }
 0xca9   :  { %v7824_v33 = vadd.f32 0.5, %v7818_v7  ;;  %v16090_v36 = vld [vmem:[#allocation6 + $0x188] ss:$16 sps:$4 sm:$0xff]   ;;  %v16100_v2 = vld [vmem:[#allocation6 + $0x160] ss:$16 sps:$4 sm:$0xff]  }
 0xcaa   :  { %v16045_v54 = vadd.f32 %v7830_v5, %v7828_v15  ;;  %v16094_v15 = vld [vmem:[#allocation6 + $0x164] ss:$16 sps:$4 sm:$0xff]   ;;  %v16096_v5 = vld [vmem:[#allocation6 + $0x16c] ss:$16 sps:$4 sm:$0xff]   ;;  %v16102_v57 = vld [vmem:[#allocation6 + $0x168] ss:$16 sps:$4 sm:$0xff]  }
 0xcab   :  { %17303 = vst [vmem:[#allocation21_spill] sm:$0xff] %v16102_v57  ;;  %v16106_v40 = vld [vmem:[#allocation6 + $0x144] ss:$16 sps:$4 sm:$0xff]   ;;  %v16108_v7 = vld [vmem:[#allocation6 + $0x14c] ss:$16 sps:$4 sm:$0xff]  }
 0xcac   :  { %13663 = vtanh.f32 %v16045_v54  ;;  %17304 = vst [vmem:[#allocation23_spill] sm:$0xff] %v16106_v40  ;;  %17305 = vst [vmem:[#allocation37_spill] sm:$0xff] %v16108_v7 }
 0xcb5   :  { %v13662_v52 = vpop.eup %13661 }
 0xcb6   :  { %v7835_v42 = vmul.f32 %v13662_v52, %v7821_v6  ;;  %v16112_v52 = vld [vmem:[#allocation6 + $0x140] ss:$16 sps:$4 sm:$0xff]   ;;  %v16114_v6 = vld [vmem:[#allocation6 + $0x148] ss:$16 sps:$4 sm:$0xff]  }
 0xcb7   :  { %17306 = vst [vmem:[#allocation16_spill] sm:$0xff] %v16112_v52 }
 0xcb9   :  { %v13664_v25 = vpop.eup %13663 }
 0xcba   :  { %v7836_v12 = vmul.f32 %v13664_v25, %v7824_v33  ;;  %v16118_v33 = vld [vmem:[#allocation6 + $0x124] ss:$16 sps:$4 sm:$0xff]   ;;  %v16120_v25 = vld [vmem:[#allocation6 + $0x12c] ss:$16 sps:$4 sm:$0xff]  }
 0xcbc   :  { %v16052_v41 = vpack.c.bf16 %v7836_v12, %v7835_v42  ;;  %v16124_v42 = vld [vmem:[#allocation6 + $0x120] ss:$16 sps:$4 sm:$0xff]   ;;  %v16126_v12 = vld [vmem:[#allocation6 + $0x128] ss:$16 sps:$4 sm:$0xff]  }
 0xcbe   :  { %8085 = vmatmul.mubr.bf16.vlgmr.msra.gmra.mxu0 %v16052_v41  ;;  %8128 = vmatmul.mubr.bf16.vlgmr.msra.gmra.mxu1 %v16052_v41 }
 0xcbf   :  { %8347 = vmatpush1.bf16.msra.mxu0 %v16048_v10  ;;  %8390 = vmatpush1.bf16.msra.mxu1 %v16050_v34 }
 0xcc0   :  { %8348 = vmatprep.subr.bf16.mxu0 %v16054_v50  ;;  %8391 = vmatprep.subr.bf16.mxu1 %v16056_v49 }
 0xcc1   :  { %8378 = vmatprep.mubr.bf16.mxu0 %v17111_v47  ;;  %8421 = vmatprep.mubr.bf16.mxu1 %v17111_v47 }
 0xcc3   :  { %8349 = vmatpush1.bf16.msra.mxu0 %v16062_v46  ;;  %8392 = vmatpush1.bf16.msra.mxu1 %v16064_v58 }
 0xcc4   :  { %8350 = vmatprep.subr.bf16.mxu0 %v16068_v14  ;;  %8393 = vmatprep.subr.bf16.mxu1 %v16070_v20 }
 0xcc7   :  { %8351 = vmatpush1.bf16.msra.mxu0 %v16076_v29  ;;  %8394 = vmatpush1.bf16.msra.mxu1 %v16078_v28 }
 0xcc8   :  { %8352 = vmatprep.subr.bf16.mxu0 %v16082_v18  ;;  %8395 = vmatprep.subr.bf16.mxu1 %v16084_v13 }
 0xccb   :  { %8353 = vmatpush1.bf16.msra.mxu0 %v16088_v44  ;;  %8396 = vmatpush1.bf16.msra.mxu1 %v16090_v36 }
 0xccc   :  { %8354 = vmatprep.subr.bf16.mxu0 %v16094_v15  ;;  %8397 = vmatprep.subr.bf16.mxu1 %v16096_v5 }
 0xccf   :  { %8355 = vmatpush1.bf16.msra.mxu0 %v16100_v2  ;;  %8398 = vmatpush1.bf16.msra.mxu1 %v16102_v57  ;;  %v16130_v57 = vld [vmem:[#allocation6 + $0x104] ss:$16 sps:$4 sm:$0xff]  }
 0xcd0   :  { %8356 = vmatprep.subr.bf16.mxu0 %v16106_v40  ;;  %8399 = vmatprep.subr.bf16.mxu1 %v16108_v7  ;;  %v16132_v40 = vld [vmem:[#allocation6 + $0x10c] ss:$16 sps:$4 sm:$0xff]   ;;  %v16136_v7 = vld [vmem:[#allocation6 + $0x100] ss:$16 sps:$4 sm:$0xff]  }
 0xcd3   :  { %8357 = vmatpush1.bf16.msra.mxu0 %v16112_v52  ;;  %8400 = vmatpush1.bf16.msra.mxu1 %v16114_v6  ;;  %v16138_v52 = vld [vmem:[#allocation6 + $0x108] ss:$16 sps:$4 sm:$0xff]  }
 0xcd4   :  { %8358 = vmatprep.subr.bf16.mxu0 %v16118_v33  ;;  %8401 = vmatprep.subr.bf16.mxu1 %v16120_v25 }
 0xcd7   :  { %8359 = vmatpush1.bf16.msra.mxu0 %v16124_v42  ;;  %8402 = vmatpush1.bf16.msra.mxu1 %v16126_v12 }
 0xcd8   :  { %8360 = vmatprep.subr.bf16.mxu0 %v16130_v57  ;;  %8403 = vmatprep.subr.bf16.mxu1 %v16132_v40 }
 0xcdb   :  { %8361 = vmatpush1.bf16.msra.mxu0 %v16136_v7  ;;  %8404 = vmatpush1.bf16.msra.mxu1 %v16138_v52 }
 0xcdc   :  { %8691 = vmatprep.subr.bf16.mxu0 %v15907_v39  ;;  %8734 = vmatprep.subr.bf16.mxu1 %v15909_v21  ;;  %v17307_v39 = vld [vmem:[#allocation33_spill] sm:$0xff] }
 0xcde   :  { %8379 = vmatmul.mubr.bf16.vlgmr.msra.gmra.mxu0 %v16052_v41  ;;  %8422 = vmatmul.mubr.bf16.vlgmr.msra.gmra.mxu1 %v16052_v41 }
 0xcdf   :  { %8692 = vmatpush1.bf16.msra.mxu0 %v15911_v62  ;;  %8735 = vmatpush1.bf16.msra.mxu1 %v15913_v8 }
 0xce0   :  { %8693 = vmatprep.subr.bf16.mxu0 %v15919_v23  ;;  %8736 = vmatprep.subr.bf16.mxu1 %v15921_v48  ;;  %v11804_v48 = vld [vmem:[%s17022_s4 + $0x4] sm:$0xf] }
 0xce1   :  { %8723 = vmatprep.mubr.bf16.mxu0 %v17111_v47  ;;  %8766 = vmatprep.mubr.bf16.mxu1 %v17111_v47 }
 0xce3   :  { %8694 = vmatpush1.bf16.msra.mxu0 %v15923_v38  ;;  %8737 = vmatpush1.bf16.msra.mxu1 %v15925_v60 }
 0xce4   :  { %8695 = vmatprep.subr.bf16.mxu0 %v15931_v53  ;;  %8738 = vmatprep.subr.bf16.mxu1 %v15933_v16  ;;  %v17314_v53 = vld [vmem:[#allocation10_spill] sm:$0xff] }
 0xce5   :  { %v3680_v16 = vrot.slane %v11804_v48, %v17314_v53 }
 0xce7   :  { %8696 = vmatpush1.bf16.msra.mxu0 %v15935_v32  ;;  %8739 = vmatpush1.bf16.msra.mxu1 %v15937_v37  ;;  %v17315_v32 = vld [vmem:[#allocation11_spill] sm:$0xff] }
 0xce8   :  { %8697 = vmatprep.subr.bf16.mxu0 %v15943_v45  ;;  %8740 = vmatprep.subr.bf16.mxu1 %v15945_v24  ;;  %v3684_v37 = vrot.slane %v11804_v48, %v17315_v32  ;;  %v17316_v45 = vld [vmem:[#allocation12_spill] sm:$0xff] }
 0xce9   :  { %v3692_v24 = vrot.slane %v11804_v48, %v17316_v45 }
 0xceb   :  { %8698 = vmatpush1.bf16.msra.mxu0 %v15947_v51  ;;  %8741 = vmatpush1.bf16.msra.mxu1 %v15949_v59 }
 0xcec   :  { %8699 = vmatprep.subr.bf16.mxu0 %v15953_v43  ;;  %8742 = vmatprep.subr.bf16.mxu1 %v15961_v17  ;;  %v17319_v43 = vld [vmem:[#allocation47_spill] sm:$0xff] }
 0xcef   :  { %8700 = vmatpush1.bf16.msra.mxu0 %v15957_v9  ;;  %8743 = vmatpush1.bf16.msra.mxu1 %v15959_v63  ;;  %v3892_v9 = vadd.f32 %v17319_v43, %v3680_v16 }
 0xcf0   :  { %8701 = vmatprep.subr.bf16.mxu0 %v15964_v55  ;;  %8744 = vmatprep.subr.bf16.mxu1 %v15966_v61  ;;  %v17320_v55 = vld [vmem:[#allocation49_spill] sm:$0xff] }
 0xcf1   :  { %v3894_v61 = vadd.f32 %v17320_v55, %v3684_v37  ;;  %v17324_v55 = vld [vmem:[#allocation59_spill] sm:$0xff] }
 0xcf3   :  { %8702 = vmatpush1.bf16.msra.mxu0 %v15971_v26  ;;  %8745 = vmatpush1.bf16.msra.mxu1 %v15973_v4  ;;  %v17321_v4 = vld [vmem:[#allocation50_spill] sm:$0xff] }
 0xcf4   :  { %8703 = vmatprep.subr.bf16.mxu0 %v15977_v22  ;;  %8746 = vmatprep.subr.bf16.mxu1 %v15979_v3  ;;  %v3937_v22 = vadd.f32 %v17321_v4, %v3692_v24 }
 0xcf7   :  { %8704 = vmatpush1.bf16.msra.mxu0 %v15983_v56  ;;  %8747 = vmatpush1.bf16.msra.mxu1 %v15985_v27  ;;  %v17322_v27 = vld [vmem:[#allocation51_spill] sm:$0xff] }
 0xcf8   :  { %8705 = vmatprep.subr.bf16.mxu0 %v15989_v11  ;;  %8748 = vmatprep.subr.bf16.mxu1 %v15991_v35  ;;  %v3896_v11 = vadd.f32 %v17322_v27, %v3680_v16 }
 0xcfb   :  { %8706 = vmatpush1.bf16.msra.mxu0 %v15995_v31  ;;  %8749 = vmatpush1.bf16.msra.mxu1 %v15997_v19 }
 0xcfc   :  { %8985 = vmatprep.subr.bf16.mxu0 %v16001_v30  ;;  %9028 = vmatprep.subr.bf16.mxu1 %v17307_v39  ;;  %v17323_v39 = vld [vmem:[#allocation58_spill] sm:$0xff] }
 0xd7e   :  { %v16182_v21 = vpop.f32.mrf.mxu0  ;;  %v16184_v62 = vpop.f32.mrf.mxu1 }
 0xd7f   :  { %17308 = vst [vmem:[#allocation32_spill] sm:$0xff] %v16182_v21  ;;  %17309 = vst [vmem:[#allocation53_spill] sm:$0xff] %v16184_v62 }
 0xd80   :  { %v16186_v8 = vpop.f32.mrf.mxu0  ;;  %v16188_v23 = vpop.f32.mrf.mxu1 }
 0xd81   :  { %17310 = vst [vmem:[#allocation54_spill] sm:$0xff] %v16186_v8  ;;  %17311 = vst [vmem:[#allocation56_spill] sm:$0xff] %v16188_v23  ;;  %v17343_v8 = vld [vmem:[#allocation13_spill] sm:$0xff] }
 0xd82   :  { %v16193_v38 = vpop.f32.mrf.mxu0  ;;  %v16195_v60 = vpop.f32.mrf.mxu1 }
 0xd83   :  { %17312 = vst [vmem:[#allocation57_spill] sm:$0xff] %v16193_v38  ;;  %17313 = vst [vmem:[#allocation15_spill] sm:$0xff] %v16195_v60  ;;  %v3898_v60 = vadd.f32 %v17323_v39, %v3684_v37 }
 0xd84   :  { %v16200_v51 = vpop.f32.mrf.mxu0  ;;  %v16202_v59 = vpop.f32.mrf.mxu1 }
 0xd85   :  { %17317 = vst [vmem:[#allocation55_spill] sm:$0xff] %v16200_v51  ;;  %17318 = vst [vmem:[#allocation33_spill] sm:$0xff] %v16202_v59 }
 0xd9e   :  { %v8380_v63 = vpop.f32.mrf.mxu0  ;;  %v8423_v17 = vpop.f32.mrf.mxu1 }
 0xd9f   :  { %v8432_v26 = vadd.f32 %v8380_v63, %v3892_v9  ;;  %v3941_v9 = vadd.f32 %v17324_v55, %v3692_v24 }
 0xda0   :  { %v8382_v3 = vpop.f32.mrf.mxu0  ;;  %v8425_v56 = vpop.f32.mrf.mxu1 }
 0xda1   :  { %v8440_v35 = vmul.f32 0.5, %v8432_v26  ;;  %v8433_v31 = vadd.f32 %v8382_v3, %v3894_v61  ;;  %v8435_v19 = vadd.f32 %v8425_v56, %v3937_v22  ;;  %v3688_v61 = vrot.slane %v11804_v48, %v17225_v1  ;;  %v17325_v22 = vld [vmem:[#allocation48_spill] sm:$0xff] }
 0xda2   :  { %v8384_v30 = vpop.f32.mrf.mxu0  ;;  %v8427_v41 = vpop.f32.mrf.mxu1  ;;  %v17326_v3 = vld [vmem:[#allocation52_spill] sm:$0xff] }
 0xda3   :  { %13665 = vtanh.f32 %v8440_v35  ;;  %v8441_v43 = vmul.f32 0.5, %v8433_v31  ;;  %v8436_v62 = vadd.f32 %v8384_v30, %v3896_v11  ;;  %v3935_v37 = vadd.f32 %v17325_v22, %v3688_v61 }
 0xda4   :  { %v8386_v59 = vpop.f32.mrf.mxu0  ;;  %v8429_v51 = vpop.f32.mrf.mxu1  ;;  %v3939_v56 = vadd.f32 %v17326_v3, %v3688_v61 }
 0xda5   :  { %13667 = vtanh.f32 %v8441_v43  ;;  %v8443_v63 = vmul.f32 0.5, %v8436_v62  ;;  %v8437_v4 = vadd.f32 %v8386_v59, %v3898_v60  ;;  %v8439_v26 = vadd.f32 %v8429_v51, %v3941_v9 }
 0xda6   :  { %13669 = vtanh.f32 %v8435_v19  ;;  %v8434_v27 = vadd.f32 %v8423_v17, %v3935_v37  ;;  %v8438_v11 = vadd.f32 %v8427_v41, %v3939_v56 }
 0xda7   :  { %13671 = vtanh.f32 %v8443_v63  ;;  %v8444_v16 = vmul.f32 0.5, %v8437_v4 }
 0xda8   :  { %v8442_v30 = vmul.f32 0.5, %v8434_v27  ;;  %v8445_v19 = vmul.f32 0.5, %v8438_v11 }
 0xda9   :  { %13673 = vtanh.f32 %v8444_v16 }
 0xdaa   :  { %13675 = vtanh.f32 %v8439_v26 }
 0xdab   :  { %13677 = vtanh.f32 %v8442_v30 }
 0xdac   :  { %13679 = vtanh.f32 %v8445_v19  ;;  %v16327_v19 = vld [vmem:[#allocation4 + $0x12c] ss:$16 sps:$4 sm:$0xff]  }
 0xdb0   :  { %v13666_v35 = vpop.eup %13665 }
 0xdb1   :  { %v8452_v31 = vmul.f32 0.5, %v13666_v35 }
 0xdb2   :  { %v13668_v24 = vpop.eup %13667 }
 0xdb3   :  { %v13670_v62 = vpop.eup %13669  ;;  %v8458_v60 = vadd.f32 0.5, %v8452_v31  ;;  %v8453_v59 = vmul.f32 0.5, %v13668_v24 }
 0xdb4   :  { %v13672_v39 = vpop.eup %13671 }
 0xdb5   :  { %v8459_v51 = vadd.f32 0.5, %v8453_v59  ;;  %v8468_v43 = vmul.f32 %v13670_v62, %v8458_v60  ;;  %v8455_v48 = vmul.f32 0.5, %v13672_v39  ;;  %v16321_v60 = vld [vmem:[#allocation4 + $0x148] ss:$16 sps:$4 sm:$0xff]   ;;  %v16325_v59 = vld [vmem:[#allocation4 + $0x124] ss:$16 sps:$4 sm:$0xff]  }
 0xdb6   :  { %v13674_v55 = vpop.eup %13673  ;;  %v16331_v39 = vld [vmem:[#allocation4 + $0x120] ss:$16 sps:$4 sm:$0xff]  }
 0xdb7   :  { %v8466_v9 = vmul.f32 %v8459_v51, %v16041_v0  ;;  %v8461_v63 = vadd.f32 0.5, %v8455_v48  ;;  %v8456_v17 = vmul.f32 0.5, %v13674_v55  ;;  %v13676_v41 = vpop.eup %13675  ;;  %v16333_v51 = vld [vmem:[#allocation4 + $0x128] ss:$16 sps:$4 sm:$0xff]   ;;  %v16339_v48 = vld [vmem:[#allocation4 + $0x10c] ss:$16 sps:$4 sm:$0xff]  }
 0xdb8   :  { %v13678_v37 = vpop.eup %13677  ;;  %v16343_v55 = vld [vmem:[#allocation4 + $0x100] ss:$16 sps:$4 sm:$0xff]  }
 0xdb9   :  { %v16214_v4 = vadd.f32 %v8468_v43, %v8466_v9  ;;  %v8462_v16 = vadd.f32 0.5, %v8456_v17  ;;  %v8469_v26 = vmul.f32 %v13676_v41, %v8461_v63  ;;  %v13680_v3 = vpop.eup %13679  ;;  %v8454_v56 = vmul.f32 0.5, %v13678_v37  ;;  %v16337_v43 = vld [vmem:[#allocation4 + $0x104] ss:$16 sps:$4 sm:$0xff]   ;;  %v16345_v9 = vld [vmem:[#allocation4 + $0x108] ss:$16 sps:$4 sm:$0xff]  }
 0xdba   :  { %v8457_v0 = vmul.f32 0.5, %v13680_v3  ;;  %v13279_v63 = vld [vmem:[#allocation6 + $0x1e4] ss:$16 sps:$4 sm:$0xff]   ;;  %v13282_v17 = vld [vmem:[#allocation6 + $0x1ec] ss:$16 sps:$4 sm:$0xff]  }
 0xdbb   :  { %v8467_v61 = vmul.f32 %v8462_v16, %v16045_v54  ;;  %13681 = vtanh.f32 %v16214_v4  ;;  %v8460_v11 = vadd.f32 0.5, %v8454_v56  ;;  %v17327_v54 = vld [vmem:[#allocation21_spill] sm:$0xff]  ;;  %v11869_v37 = vld [vmem:[%s17022_s4 + $0x4] sm:$0xf] }
 0xdbc   :  { %v8463_v35 = vadd.f32 0.5, %v8457_v0  ;;  %v4321_v0 = vrot.slane %v11869_v37, %v17314_v53 }
 0xdbd   :  { %v16218_v22 = vadd.f32 %v8469_v26, %v8467_v61 }
 0xdbf   :  { %13683 = vtanh.f32 %v16218_v22 }
 0xdc8   :  { %v13682_v27 = vpop.eup %13681 }
 0xdc9   :  { %v8474_v24 = vmul.f32 %v13682_v27, %v8460_v11  ;;  %v4325_v27 = vrot.slane %v11869_v37, %v17315_v32  ;;  %v4333_v11 = vrot.slane %v11869_v37, %v17316_v45 }
 0xdcc   :  { %v13684_v31 = vpop.eup %13683 }
 0xdcd   :  { %v8475_v30 = vmul.f32 %v13684_v31, %v8463_v35 }
 0xdcf   :  { %v8476_v62 = vpack.c.bf16 %v8475_v30, %v8474_v24  ;;  %v17339_v24 = vld [vmem:[#allocation46_spill] sm:$0xff] }
 0xdd0   :  { %v4533_v30 = vadd.f32 %v17339_v24, %v4321_v0 }
 0xdd1   :  { %8724 = vmatmul.mubr.bf16.vlgmr.msra.gmra.mxu0 %v8476_v62  ;;  %8767 = vmatmul.mubr.bf16.vlgmr.msra.gmra.mxu1 %v8476_v62 }
 0xdd2   :  { %8986 = vmatpush1.bf16.msra.mxu0 %v16048_v10  ;;  %9029 = vmatpush1.bf16.msra.mxu1 %v16050_v34  ;;  %v17328_v10 = vld [vmem:[#allocation23_spill] sm:$0xff]  ;;  %v17329_v34 = vld [vmem:[#allocation37_spill] sm:$0xff] }
 0xdd3   :  { %8987 = vmatprep.subr.bf16.mxu0 %v16054_v50  ;;  %9030 = vmatprep.subr.bf16.mxu1 %v16056_v49  ;;  %v17330_v50 = vld [vmem:[#allocation16_spill] sm:$0xff] }
 0xdd4   :  { %9017 = vmatprep.mubr.bf16.mxu0 %v17111_v47  ;;  %9060 = vmatprep.mubr.bf16.mxu1 %v17111_v47  ;;  %v16255_v49 = vld [vmem:[#allocation4 + $0x1e4] ss:$16 sps:$4 sm:$0xff]  }
 0xdd6   :  { %8988 = vmatpush1.bf16.msra.mxu0 %v16062_v46  ;;  %9031 = vmatpush1.bf16.msra.mxu1 %v16064_v58  ;;  %v16257_v46 = vld [vmem:[#allocation4 + $0x1ec] ss:$16 sps:$4 sm:$0xff]   ;;  %v16259_v58 = vld [vmem:[#allocation4 + $0x1e0] ss:$16 sps:$4 sm:$0xff]  }
 0xdd7   :  { %8989 = vmatprep.subr.bf16.mxu0 %v16068_v14  ;;  %9032 = vmatprep.subr.bf16.mxu1 %v16070_v20  ;;  %v16261_v14 = vld [vmem:[#allocation4 + $0x1e8] ss:$16 sps:$4 sm:$0xff]   ;;  %v16267_v20 = vld [vmem:[#allocation4 + $0x1c4] ss:$16 sps:$4 sm:$0xff]  }
 0xdda   :  { %8990 = vmatpush1.bf16.msra.mxu0 %v16076_v29  ;;  %9033 = vmatpush1.bf16.msra.mxu1 %v16078_v28  ;;  %v16269_v29 = vld [vmem:[#allocation4 + $0x1cc] ss:$16 sps:$4 sm:$0xff]   ;;  %v16271_v28 = vld [vmem:[#allocation4 + $0x1c0] ss:$16 sps:$4 sm:$0xff]  }
 0xddb   :  { %8991 = vmatprep.subr.bf16.mxu0 %v16082_v18  ;;  %9034 = vmatprep.subr.bf16.mxu1 %v16084_v13  ;;  %v16273_v18 = vld [vmem:[#allocation4 + $0x1c8] ss:$16 sps:$4 sm:$0xff]   ;;  %v16279_v13 = vld [vmem:[#allocation4 + $0x1a4] ss:$16 sps:$4 sm:$0xff]  }
 0xdde   :  { %8992 = vmatpush1.bf16.msra.mxu0 %v16088_v44  ;;  %9035 = vmatpush1.bf16.msra.mxu1 %v16090_v36  ;;  %v16281_v44 = vld [vmem:[#allocation4 + $0x1ac] ss:$16 sps:$4 sm:$0xff]   ;;  %v16283_v36 = vld [vmem:[#allocation4 + $0x1a0] ss:$16 sps:$4 sm:$0xff]  }
 0xddf   :  { %8993 = vmatprep.subr.bf16.mxu0 %v16094_v15  ;;  %9036 = vmatprep.subr.bf16.mxu1 %v16096_v5  ;;  %v16285_v15 = vld [vmem:[#allocation4 + $0x1a8] ss:$16 sps:$4 sm:$0xff]   ;;  %v16291_v5 = vld [vmem:[#allocation4 + $0x184] ss:$16 sps:$4 sm:$0xff]  }
 0xde2   :  { %8994 = vmatpush1.bf16.msra.mxu0 %v16100_v2  ;;  %9037 = vmatpush1.bf16.msra.mxu1 %v17327_v54  ;;  %v16293_v2 = vld [vmem:[#allocation4 + $0x18c] ss:$16 sps:$4 sm:$0xff]  }
 0xde3   :  { %8995 = vmatprep.subr.bf16.mxu0 %v17328_v10  ;;  %9038 = vmatprep.subr.bf16.mxu1 %v17329_v34  ;;  %v17340_v10 = vld [vmem:[#allocation61_spill] sm:$0xff] }
 0xde4   :  { %v4535_v34 = vadd.f32 %v17340_v10, %v4325_v27  ;;  %v17344_v10 = vld [vmem:[#allocation14_spill] sm:$0xff] }
 0xde6   :  { %8996 = vmatpush1.bf16.msra.mxu0 %v17330_v50  ;;  %9039 = vmatpush1.bf16.msra.mxu1 %v16114_v6  ;;  %v16307_v6 = vld [vmem:[#allocation4 + $0x168] ss:$16 sps:$4 sm:$0xff]  }
 0xde7   :  { %8997 = vmatprep.subr.bf16.mxu0 %v16118_v33  ;;  %9040 = vmatprep.subr.bf16.mxu1 %v16120_v25  ;;  %v16309_v33 = vld [vmem:[#allocation4 + $0x16c] ss:$16 sps:$4 sm:$0xff]   ;;  %v16312_v25 = vld [vmem:[#allocation4 + $0x144] ss:$16 sps:$4 sm:$0xff]  }
 0xdea   :  { %8998 = vmatpush1.bf16.msra.mxu0 %v16124_v42  ;;  %9041 = vmatpush1.bf16.msra.mxu1 %v16126_v12  ;;  %v16314_v42 = vld [vmem:[#allocation4 + $0x14c] ss:$16 sps:$4 sm:$0xff]   ;;  %v16319_v12 = vld [vmem:[#allocation4 + $0x140] ss:$16 sps:$4 sm:$0xff]  }
 0xdeb   :  { %8999 = vmatprep.subr.bf16.mxu0 %v16130_v57  ;;  %9042 = vmatprep.subr.bf16.mxu1 %v16132_v40  ;;  %v16295_v57 = vld [vmem:[#allocation4 + $0x180] ss:$16 sps:$4 sm:$0xff]   ;;  %v16297_v40 = vld [vmem:[#allocation4 + $0x188] ss:$16 sps:$4 sm:$0xff]  }
 0xdee   :  { %9000 = vmatpush1.bf16.msra.mxu0 %v16136_v7  ;;  %9043 = vmatpush1.bf16.msra.mxu1 %v16138_v52  ;;  %v16301_v7 = vld [vmem:[#allocation4 + $0x164] ss:$16 sps:$4 sm:$0xff]   ;;  %v16305_v52 = vld [vmem:[#allocation4 + $0x160] ss:$16 sps:$4 sm:$0xff]  }
 0xdef   :  { %9330 = vmatprep.subr.bf16.mxu0 %v16255_v49  ;;  %9373 = vmatprep.subr.bf16.mxu1 %v16257_v46 }
 0xdf1   :  { %9018 = vmatmul.mubr.bf16.vlgmr.msra.gmra.mxu0 %v8476_v62  ;;  %9061 = vmatmul.mubr.bf16.vlgmr.msra.gmra.mxu1 %v8476_v62 }
 0xdf2   :  { %9362 = vmatprep.mubr.bf16.mxu0 %v17111_v47  ;;  %9405 = vmatprep.mubr.bf16.mxu1 %v17111_v47 }
 0xdf3   :  { %9331 = vmatpush1.bf16.msra.mxu0 %v16259_v58  ;;  %9374 = vmatpush1.bf16.msra.mxu1 %v16261_v14 }
 0xdf4   :  { %9332 = vmatprep.subr.bf16.mxu0 %v16267_v20  ;;  %9375 = vmatprep.subr.bf16.mxu1 %v16269_v29 }
 0xdf7   :  { %9333 = vmatpush1.bf16.msra.mxu0 %v16271_v28  ;;  %9376 = vmatpush1.bf16.msra.mxu1 %v16273_v18 }
 0xdf8   :  { %9334 = vmatprep.subr.bf16.mxu0 %v16279_v13  ;;  %9377 = vmatprep.subr.bf16.mxu1 %v16281_v44 }
 0xdfb   :  { %9335 = vmatpush1.bf16.msra.mxu0 %v16283_v36  ;;  %9378 = vmatpush1.bf16.msra.mxu1 %v16285_v15 }
 0xdfc   :  { %9336 = vmatprep.subr.bf16.mxu0 %v16291_v5  ;;  %9379 = vmatprep.subr.bf16.mxu1 %v16293_v2 }
 0xdff   :  { %9337 = vmatpush1.bf16.msra.mxu0 %v16295_v57  ;;  %9380 = vmatpush1.bf16.msra.mxu1 %v16297_v40 }
 0xe00   :  { %9338 = vmatprep.subr.bf16.mxu0 %v16301_v7  ;;  %9381 = vmatprep.subr.bf16.mxu1 %v16309_v33 }
 0xe03   :  { %9339 = vmatpush1.bf16.msra.mxu0 %v16305_v52  ;;  %9382 = vmatpush1.bf16.msra.mxu1 %v16307_v6 }
 0xe04   :  { %9340 = vmatprep.subr.bf16.mxu0 %v16312_v25  ;;  %9383 = vmatprep.subr.bf16.mxu1 %v16314_v42 }
 0xe07   :  { %9341 = vmatpush1.bf16.msra.mxu0 %v16319_v12  ;;  %9384 = vmatpush1.bf16.msra.mxu1 %v16321_v60 }
 0xe08   :  { %9342 = vmatprep.subr.bf16.mxu0 %v16325_v59  ;;  %9385 = vmatprep.subr.bf16.mxu1 %v16327_v19 }
 0xe0b   :  { %9343 = vmatpush1.bf16.msra.mxu0 %v16331_v39  ;;  %9386 = vmatpush1.bf16.msra.mxu1 %v16333_v51 }
 0xe0c   :  { %9344 = vmatprep.subr.bf16.mxu0 %v16337_v43  ;;  %9387 = vmatprep.subr.bf16.mxu1 %v16339_v48 }
 0xe0f   :  { %9345 = vmatpush1.bf16.msra.mxu0 %v16343_v55  ;;  %9388 = vmatpush1.bf16.msra.mxu1 %v16345_v9 }
 0xe10   :  { %9624 = vmatprep.subr.bf16.mxu0 %v13279_v63  ;;  %9667 = vmatprep.subr.bf16.mxu1 %v13282_v17  ;;  %v17341_v63 = vld [vmem:[#allocation62_spill] sm:$0xff] }
 0xe11   :  { %v4578_v17 = vadd.f32 %v17341_v63, %v4333_v11 }
 0xe91   :  { %v16351_v41 = vpop.f32.mrf.mxu0  ;;  %v16353_v16 = vpop.f32.mrf.mxu1 }
 0xe92   :  { %17331 = vst [vmem:[#allocation10_spill] sm:$0xff] %v16351_v41  ;;  %17332 = vst [vmem:[#allocation47_spill] sm:$0xff] %v16353_v16 }
 0xe93   :  { %v16355_v26 = vpop.f32.mrf.mxu0  ;;  %v16357_v61 = vpop.f32.mrf.mxu1 }
 0xe94   :  { %17333 = vst [vmem:[#allocation49_spill] sm:$0xff] %v16355_v26  ;;  %17334 = vst [vmem:[#allocation50_spill] sm:$0xff] %v16357_v61 }
 0xe95   :  { %v16362_v3 = vpop.f32.mrf.mxu0  ;;  %v16364_v56 = vpop.f32.mrf.mxu1 }
 0xe96   :  { %17335 = vst [vmem:[#allocation51_spill] sm:$0xff] %v16362_v3  ;;  %17336 = vst [vmem:[#allocation58_spill] sm:$0xff] %v16364_v56  ;;  %v17342_v3 = vld [vmem:[#allocation63_spill] sm:$0xff] }
 0xe97   :  { %v16369_v35 = vpop.f32.mrf.mxu0  ;;  %v16371_v31 = vpop.f32.mrf.mxu1  ;;  %v4537_v61 = vadd.f32 %v17342_v3, %v4321_v0 }
 0xe98   :  { %17337 = vst [vmem:[#allocation59_spill] sm:$0xff] %v16369_v35  ;;  %17338 = vst [vmem:[#allocation48_spill] sm:$0xff] %v16371_v31  ;;  %v4539_v31 = vadd.f32 %v17343_v8, %v4325_v27 }
 0xeb1   :  { %v9019_v62 = vpop.f32.mrf.mxu0  ;;  %v9062_v54 = vpop.f32.mrf.mxu1 }
 0xeb2   :  { %v9071_v50 = vadd.f32 %v9019_v62, %v4533_v30  ;;  %v4582_v30 = vadd.f32 %v17344_v10, %v4333_v11 }
 0xeb3   :  { %v9021_v56 = vpop.f32.mrf.mxu0  ;;  %v9064_v16 = vpop.f32.mrf.mxu1 }
 0xeb4   :  { %v9079_v26 = vmul.f32 0.5, %v9071_v50  ;;  %v9072_v41 = vadd.f32 %v9021_v56, %v4535_v34  ;;  %v9074_v38 = vadd.f32 %v9064_v16, %v4578_v17  ;;  %v4329_v16 = vrot.slane %v11869_v37, %v17225_v1  ;;  %v17345_v56 = vld [vmem:[#allocation60_spill] sm:$0xff] }
 0xeb5   :  { %v9023_v23 = vpop.f32.mrf.mxu0  ;;  %v9066_v35 = vpop.f32.mrf.mxu1 }
 0xeb6   :  { %13685 = vtanh.f32 %v9079_v26  ;;  %v9080_v24 = vmul.f32 0.5, %v9072_v41  ;;  %v9075_v21 = vadd.f32 %v9023_v23, %v4537_v61  ;;  %v4576_v8 = vadd.f32 %v17345_v56, %v4329_v16  ;;  %v17346_v26 = vld [vmem:[#allocation64_spill] sm:$0xff] }
 0xeb7   :  { %v9025_v45 = vpop.f32.mrf.mxu0  ;;  %v9068_v32 = vpop.f32.mrf.mxu1  ;;  %v4580_v41 = vadd.f32 %v17346_v26, %v4329_v16 }
 0xeb8   :  { %13687 = vtanh.f32 %v9080_v24  ;;  %v9082_v62 = vmul.f32 0.5, %v9075_v21  ;;  %v9076_v63 = vadd.f32 %v9025_v45, %v4539_v31  ;;  %v9078_v0 = vadd.f32 %v9068_v32, %v4582_v30 }
 0xeb9   :  { %13689 = vtanh.f32 %v9074_v38  ;;  %v9073_v23 = vadd.f32 %v9062_v54, %v4576_v8  ;;  %v9077_v61 = vadd.f32 %v9066_v35, %v4580_v41 }
 0xeba   :  { %13691 = vtanh.f32 %v9082_v62  ;;  %v9083_v3 = vmul.f32 0.5, %v9076_v63 }
 0xebb   :  { %v9081_v50 = vmul.f32 0.5, %v9073_v23  ;;  %v9084_v31 = vmul.f32 0.5, %v9077_v61 }
 0xebc   :  { %13693 = vtanh.f32 %v9083_v3 }
 0xebd   :  { %13695 = vtanh.f32 %v9078_v0 }
 0xebe   :  { %13697 = vtanh.f32 %v9081_v50 }
 0xebf   :  { %13699 = vtanh.f32 %v9084_v31  ;;  %v13288_v31 = vld [vmem:[#allocation6 + $0x1cc] ss:$16 sps:$4 sm:$0xff]  }
 0xec3   :  { %v13686_v27 = vpop.eup %13685 }
 0xec4   :  { %v9091_v34 = vmul.f32 0.5, %v13686_v27 }
 0xec5   :  { %v13688_v11 = vpop.eup %13687 }
 0xec6   :  { %v13690_v21 = vpop.eup %13689  ;;  %v9097_v45 = vadd.f32 0.5, %v9091_v34  ;;  %v9092_v38 = vmul.f32 0.5, %v13688_v11 }
 0xec7   :  { %v13692_v17 = vpop.eup %13691 }
 0xec8   :  { %v9098_v32 = vadd.f32 0.5, %v9092_v38  ;;  %v9107_v24 = vmul.f32 %v13690_v21, %v9097_v45  ;;  %v9094_v37 = vmul.f32 0.5, %v13692_v17  ;;  %v13277_v21 = vld [vmem:[#allocation6 + $0x1e0] ss:$16 sps:$4 sm:$0xff]   ;;  %v13280_v45 = vld [vmem:[#allocation6 + $0x1e8] ss:$16 sps:$4 sm:$0xff]  }
 0xec9   :  { %v13694_v10 = vpop.eup %13693  ;;  %v13283_v17 = vld [vmem:[#allocation6 + $0x1c0] ss:$16 sps:$4 sm:$0xff]  }
 0xeca   :  { %v9105_v30 = vmul.f32 %v9098_v32, %v16214_v4  ;;  %v9100_v62 = vadd.f32 0.5, %v9094_v37  ;;  %v9095_v54 = vmul.f32 0.5, %v13694_v10  ;;  %v13696_v35 = vpop.eup %13695  ;;  %v13286_v32 = vld [vmem:[#allocation6 + $0x1c8] ss:$16 sps:$4 sm:$0xff]   ;;  %v13294_v37 = vld [vmem:[#allocation6 + $0x1ac] ss:$16 sps:$4 sm:$0xff]  }
 0xecb   :  { %v13698_v8 = vpop.eup %13697  ;;  %v13289_v10 = vld [vmem:[#allocation6 + $0x1a0] ss:$16 sps:$4 sm:$0xff]  }
 0xecc   :  { %v16383_v63 = vadd.f32 %v9107_v24, %v9105_v30  ;;  %v9101_v3 = vadd.f32 0.5, %v9095_v54  ;;  %v9108_v0 = vmul.f32 %v13696_v35, %v9100_v62  ;;  %v13700_v26 = vpop.eup %13699  ;;  %v9093_v41 = vmul.f32 0.5, %v13698_v8  ;;  %v13291_v24 = vld [vmem:[#allocation6 + $0x1a4] ss:$16 sps:$4 sm:$0xff]   ;;  %v13292_v30 = vld [vmem:[#allocation6 + $0x1a8] ss:$16 sps:$4 sm:$0xff]  }
 0xecd   :  { %v9096_v4 = vmul.f32 0.5, %v13700_v26  ;;  %v13297_v62 = vld [vmem:[#allocation6 + $0x184] ss:$16 sps:$4 sm:$0xff]   ;;  %v13300_v54 = vld [vmem:[#allocation6 + $0x18c] ss:$16 sps:$4 sm:$0xff]  }
 0xece   :  { %v9106_v16 = vmul.f32 %v9101_v3, %v16218_v22  ;;  %13701 = vtanh.f32 %v16383_v63  ;;  %v9099_v61 = vadd.f32 0.5, %v9093_v41  ;;  %v13285_v22 = vld [vmem:[#allocation6 + $0x1c4] ss:$16 sps:$4 sm:$0xff]   ;;  %v13295_v35 = vld [vmem:[#allocation6 + $0x180] ss:$16 sps:$4 sm:$0xff]  }
 0xecf   :  { %v9102_v27 = vadd.f32 0.5, %v9096_v4  ;;  %v13298_v3 = vld [vmem:[#allocation6 + $0x188] ss:$16 sps:$4 sm:$0xff]   ;;  %v13301_v8 = vld [vmem:[#allocation6 + $0x160] ss:$16 sps:$4 sm:$0xff]  }
 0xed0   :  { %v16387_v56 = vadd.f32 %v9108_v0, %v9106_v16  ;;  %v13303_v0 = vld [vmem:[#allocation6 + $0x164] ss:$16 sps:$4 sm:$0xff]   ;;  %v13306_v16 = vld [vmem:[#allocation6 + $0x16c] ss:$16 sps:$4 sm:$0xff]   ;;  %v13304_v26 = vld [vmem:[#allocation6 + $0x168] ss:$16 sps:$4 sm:$0xff]  }
 0xed1   :  { %v13309_v41 = vld [vmem:[#allocation6 + $0x144] ss:$16 sps:$4 sm:$0xff]   ;;  %v13312_v4 = vld [vmem:[#allocation6 + $0x14c] ss:$16 sps:$4 sm:$0xff]  }
 0xed2   :  { %13703 = vtanh.f32 %v16387_v56 }
 0xedb   :  { %v13702_v23 = vpop.eup %13701 }
 0xedc   :  { %v9113_v11 = vmul.f32 %v13702_v23, %v9099_v61  ;;  %v13307_v23 = vld [vmem:[#allocation6 + $0x140] ss:$16 sps:$4 sm:$0xff]   ;;  %v13310_v61 = vld [vmem:[#allocation6 + $0x148] ss:$16 sps:$4 sm:$0xff]  }
 0xedf   :  { %v13704_v34 = vpop.eup %13703 }
 0xee0   :  { %v9114_v50 = vmul.f32 %v13704_v34, %v9102_v27  ;;  %v13315_v27 = vld [vmem:[#allocation6 + $0x124] ss:$16 sps:$4 sm:$0xff]   ;;  %v13318_v34 = vld [vmem:[#allocation6 + $0x12c] ss:$16 sps:$4 sm:$0xff]  }
 0xee2   :  { %v16390_v38 = vpack.c.bf16 %v9114_v50, %v9113_v11  ;;  %v13313_v11 = vld [vmem:[#allocation6 + $0x120] ss:$16 sps:$4 sm:$0xff]   ;;  %v13316_v50 = vld [vmem:[#allocation6 + $0x128] ss:$16 sps:$4 sm:$0xff]  }
 0xee4   :  { %9363 = vmatmul.mubr.bf16.vlgmr.msra.gmra.mxu0 %v16390_v38  ;;  %9406 = vmatmul.mubr.bf16.vlgmr.msra.gmra.mxu1 %v16390_v38 }
 0xee5   :  { %9625 = vmatpush1.bf16.msra.mxu0 %v13277_v21  ;;  %9668 = vmatpush1.bf16.msra.mxu1 %v13280_v45  ;;  %v13321_v21 = vld [vmem:[#allocation6 + $0x104] ss:$16 sps:$4 sm:$0xff]   ;;  %v13324_v45 = vld [vmem:[#allocation6 + $0x10c] ss:$16 sps:$4 sm:$0xff]  }
 0xee6   :  { %9626 = vmatprep.subr.bf16.mxu0 %v13285_v22  ;;  %9669 = vmatprep.subr.bf16.mxu1 %v13288_v31  ;;  %v13319_v22 = vld [vmem:[#allocation6 + $0x100] ss:$16 sps:$4 sm:$0xff]   ;;  %v13322_v31 = vld [vmem:[#allocation6 + $0x108] ss:$16 sps:$4 sm:$0xff]  }
 0xee7   :  { %9656 = vmatprep.mubr.bf16.mxu0 %v17111_v47  ;;  %9699 = vmatprep.mubr.bf16.mxu1 %v17111_v47 }
 0xee9   :  { %9627 = vmatpush1.bf16.msra.mxu0 %v13283_v17  ;;  %9670 = vmatpush1.bf16.msra.mxu1 %v13286_v32  ;;  %v17361_v32 = vld [vmem:[#allocation72_spill] sm:$0xff] }
 0xeea   :  { %9628 = vmatprep.subr.bf16.mxu0 %v13291_v24  ;;  %9671 = vmatprep.subr.bf16.mxu1 %v13294_v37 }
 0xeed   :  { %9629 = vmatpush1.bf16.msra.mxu0 %v13289_v10  ;;  %9672 = vmatpush1.bf16.msra.mxu1 %v13292_v30 }
 0xeee   :  { %9630 = vmatprep.subr.bf16.mxu0 %v13297_v62  ;;  %9673 = vmatprep.subr.bf16.mxu1 %v13300_v54 }
 0xef1   :  { %9631 = vmatpush1.bf16.msra.mxu0 %v13295_v35  ;;  %9674 = vmatpush1.bf16.msra.mxu1 %v13298_v3  ;;  %v17362_v35 = vld [vmem:[#allocation73_spill] sm:$0xff] }
 0xef2   :  { %9632 = vmatprep.subr.bf16.mxu0 %v13303_v0  ;;  %9675 = vmatprep.subr.bf16.mxu1 %v13306_v16 }
 0xef5   :  { %9633 = vmatpush1.bf16.msra.mxu0 %v13301_v8  ;;  %9676 = vmatpush1.bf16.msra.mxu1 %v13304_v26 }
 0xef6   :  { %9634 = vmatprep.subr.bf16.mxu0 %v13309_v41  ;;  %9677 = vmatprep.subr.bf16.mxu1 %v13312_v4  ;;  %v17363_v41 = vld [vmem:[#allocation67_spill] sm:$0xff] }
 0xef9   :  { %9635 = vmatpush1.bf16.msra.mxu0 %v13307_v23  ;;  %9678 = vmatpush1.bf16.msra.mxu1 %v13310_v61  ;;  %v17364_v61 = vld [vmem:[#allocation71_spill] sm:$0xff] }
 0xefa   :  { %9636 = vmatprep.subr.bf16.mxu0 %v13315_v27  ;;  %9679 = vmatprep.subr.bf16.mxu1 %v13318_v34 }
 0xefd   :  { %9637 = vmatpush1.bf16.msra.mxu0 %v13313_v11  ;;  %9680 = vmatpush1.bf16.msra.mxu1 %v13316_v50 }
 0xefe   :  { %9638 = vmatprep.subr.bf16.mxu0 %v13321_v21  ;;  %9681 = vmatprep.subr.bf16.mxu1 %v13324_v45 }
 0xf01   :  { %9639 = vmatpush1.bf16.msra.mxu0 %v13319_v22  ;;  %9682 = vmatpush1.bf16.msra.mxu1 %v13322_v31 }
 0xf02   :  { %9969 = vmatprep.subr.bf16.mxu0 %v16255_v49  ;;  %10012 = vmatprep.subr.bf16.mxu1 %v16257_v46  ;;  %v16432_v49 = vld [vmem:[#allocation6 + $0x2e4] ss:$16 sps:$4 sm:$0xff]   ;;  %v16434_v46 = vld [vmem:[#allocation6 + $0x2ec] ss:$16 sps:$4 sm:$0xff]  }
 0xf04   :  { %9657 = vmatmul.mubr.bf16.vlgmr.msra.gmra.mxu0 %v16390_v38  ;;  %9700 = vmatmul.mubr.bf16.vlgmr.msra.gmra.mxu1 %v16390_v38 }
 0xf05   :  { %9970 = vmatpush1.bf16.msra.mxu0 %v16259_v58  ;;  %10013 = vmatpush1.bf16.msra.mxu1 %v16261_v14 }
 0xf06   :  { %9971 = vmatprep.subr.bf16.mxu0 %v16267_v20  ;;  %10014 = vmatprep.subr.bf16.mxu1 %v16269_v29 }
 0xf07   :  { %10001 = vmatprep.mubr.bf16.mxu0 %v17111_v47  ;;  %10044 = vmatprep.mubr.bf16.mxu1 %v17111_v47 }
 0xf09   :  { %9972 = vmatpush1.bf16.msra.mxu0 %v16271_v28  ;;  %10015 = vmatpush1.bf16.msra.mxu1 %v16273_v18  ;;  %v11934_v28 = vld [vmem:[%s17022_s4 + $0x4] sm:$0xf] }
 0xf0a   :  { %9973 = vmatprep.subr.bf16.mxu0 %v16279_v13  ;;  %10016 = vmatprep.subr.bf16.mxu1 %v16281_v44  ;;  %v4962_v44 = vrot.slane %v11934_v28, %v17314_v53  ;;  %v4970_v30 = vrot.slane %v11934_v28, %v17225_v1 }
 0xf0c   :  { %v5217_v4 = vadd.f32 %v17363_v41, %v4970_v30  ;;  %v5221_v27 = vadd.f32 %v17364_v61, %v4970_v30  ;;  %v16473_v30 = vld [vmem:[#allocation6 + $0x2e8] ss:$16 sps:$4 sm:$0xff]   ;;  %v16501_v41 = vld [vmem:[#allocation6 + $0x284] ss:$16 sps:$4 sm:$0xff]  }
 0xf0d   :  { %9974 = vmatpush1.bf16.msra.mxu0 %v16283_v36  ;;  %10017 = vmatpush1.bf16.msra.mxu1 %v16285_v15  ;;  %v17353_v36 = vld [vmem:[#allocation11_spill] sm:$0xff] }
 0xf0e   :  { %9975 = vmatprep.subr.bf16.mxu0 %v16291_v5  ;;  %10018 = vmatprep.subr.bf16.mxu1 %v16293_v2  ;;  %v4966_v15 = vrot.slane %v11934_v28, %v17353_v36  ;;  %v17354_v5 = vld [vmem:[#allocation12_spill] sm:$0xff]  ;;  %v16509_v61 = vld [vmem:[#allocation6 + $0x288] ss:$16 sps:$4 sm:$0xff]  }
 0xf0f   :  { %v4974_v2 = vrot.slane %v11934_v28, %v17354_v5 }
 0xf10   :  { %v5180_v24 = vadd.f32 %v17361_v32, %v4966_v15 }
 0xf11   :  { %9976 = vmatpush1.bf16.msra.mxu0 %v16295_v57  ;;  %10019 = vmatpush1.bf16.msra.mxu1 %v16297_v40  ;;  %v5223_v3 = vadd.f32 %v17362_v35, %v4974_v2  ;;  %v16481_v35 = vld [vmem:[#allocation6 + $0x2c0] ss:$16 sps:$4 sm:$0xff]  }
 0xf12   :  { %9977 = vmatprep.subr.bf16.mxu0 %v16301_v7  ;;  %10020 = vmatprep.subr.bf16.mxu1 %v16309_v33  ;;  %v17357_v7 = vld [vmem:[#allocation66_spill] sm:$0xff] }
 0xf15   :  { %9978 = vmatpush1.bf16.msra.mxu0 %v16305_v52  ;;  %10021 = vmatpush1.bf16.msra.mxu1 %v16307_v6  ;;  %v5174_v52 = vadd.f32 %v17357_v7, %v4962_v44 }
 0xf16   :  { %9979 = vmatprep.subr.bf16.mxu0 %v16312_v25  ;;  %10022 = vmatprep.subr.bf16.mxu1 %v16314_v42  ;;  %v17358_v25 = vld [vmem:[#allocation68_spill] sm:$0xff] }
 0xf17   :  { %v5176_v42 = vadd.f32 %v17358_v25, %v4966_v15 }
 0xf19   :  { %9980 = vmatpush1.bf16.msra.mxu0 %v16319_v12  ;;  %10023 = vmatpush1.bf16.msra.mxu1 %v16321_v60  ;;  %v17359_v60 = vld [vmem:[#allocation69_spill] sm:$0xff] }
 0xf1a   :  { %9981 = vmatprep.subr.bf16.mxu0 %v16325_v59  ;;  %10024 = vmatprep.subr.bf16.mxu1 %v16327_v19  ;;  %v5219_v59 = vadd.f32 %v17359_v60, %v4974_v2 }
 0xf1d   :  { %9982 = vmatpush1.bf16.msra.mxu0 %v16331_v39  ;;  %10025 = vmatpush1.bf16.msra.mxu1 %v16333_v51  ;;  %v17360_v51 = vld [vmem:[#allocation70_spill] sm:$0xff] }
 0xf1e   :  { %9983 = vmatprep.subr.bf16.mxu0 %v16337_v43  ;;  %10026 = vmatprep.subr.bf16.mxu1 %v16339_v48  ;;  %v5178_v43 = vadd.f32 %v17360_v51, %v4962_v44 }
 0xf21   :  { %9984 = vmatpush1.bf16.msra.mxu0 %v16343_v55  ;;  %10027 = vmatpush1.bf16.msra.mxu1 %v16345_v9 }
 0xf22   :  { %10309 = vmatprep.subr.bf16.mxu0 %v16432_v49  ;;  %10352 = vmatprep.subr.bf16.mxu1 %v16434_v46 }
 0xfa4   :  { %v16438_v58 = vpop.f32.mrf.mxu0  ;;  %v16440_v14 = vpop.f32.mrf.mxu1 }
 0xfa5   :  { %17347 = vst [vmem:[#allocation52_spill] sm:$0xff] %v16438_v58  ;;  %17348 = vst [vmem:[#allocation21_spill] sm:$0xff] %v16440_v14 }
 0xfa6   :  { %v16442_v20 = vpop.f32.mrf.mxu0  ;;  %v16444_v29 = vpop.f32.mrf.mxu1 }
 0xfa7   :  { %17349 = vst [vmem:[#allocation23_spill] sm:$0xff] %v16442_v20  ;;  %17350 = vst [vmem:[#allocation37_spill] sm:$0xff] %v16444_v29 }
 0xfa8   :  { %v16449_v18 = vpop.f32.mrf.mxu0  ;;  %v16451_v13 = vpop.f32.mrf.mxu1 }
 0xfa9   :  { %17351 = vst [vmem:[#allocation16_spill] sm:$0xff] %v16449_v18  ;;  %17352 = vst [vmem:[#allocation46_spill] sm:$0xff] %v16451_v13  ;;  %v17378_v18 = vld [vmem:[#allocation19_spill] sm:$0xff] }
 0xfaa   :  { %v16456_v57 = vpop.f32.mrf.mxu0  ;;  %v16458_v40 = vpop.f32.mrf.mxu1 }
 0xfab   :  { %17355 = vst [vmem:[#allocation61_spill] sm:$0xff] %v16456_v57  ;;  %17356 = vst [vmem:[#allocation62_spill] sm:$0xff] %v16458_v40 }
 0xfc4   :  { %v9658_v6 = vpop.f32.mrf.mxu0  ;;  %v9701_v33 = vpop.f32.mrf.mxu1 }
 0xfc5   :  { %v9710_v12 = vadd.f32 %v9658_v6, %v5174_v52  ;;  %v9712_v23 = vadd.f32 %v9701_v33, %v5217_v4  ;;  %v16503_v4 = vld [vmem:[#allocation6 + $0x28c] ss:$16 sps:$4 sm:$0xff]  }
 0xfc6   :  { %v9660_v19 = vpop.f32.mrf.mxu0  ;;  %v9703_v39 = vpop.f32.mrf.mxu1 }
 0xfc7   :  { %v9718_v48 = vmul.f32 0.5, %v9710_v12  ;;  %v9711_v55 = vadd.f32 %v9660_v19, %v5176_v42  ;;  %v9713_v9 = vadd.f32 %v9703_v39, %v5219_v59  ;;  %v9720_v34 = vmul.f32 0.5, %v9712_v23  ;;  %v16507_v23 = vld [vmem:[#allocation6 + $0x280] ss:$16 sps:$4 sm:$0xff]  }
 0xfc8   :  { %v9662_v38 = vpop.f32.mrf.mxu0  ;;  %v9705_v17 = vpop.f32.mrf.mxu1 }
 0xfc9   :  { %13705 = vtanh.f32 %v9718_v48  ;;  %v9719_v37 = vmul.f32 0.5, %v9711_v55  ;;  %v9714_v10 = vadd.f32 %v9662_v38, %v5178_v43  ;;  %v9716_v11 = vadd.f32 %v9705_v17, %v5221_v27  ;;  %v16513_v27 = vld [vmem:[#allocation6 + $0x264] ss:$16 sps:$4 sm:$0xff]  }
 0xfca   :  { %v9664_v62 = vpop.f32.mrf.mxu0  ;;  %v9707_v54 = vpop.f32.mrf.mxu1 }
 0xfcb   :  { %13707 = vtanh.f32 %v9719_v37  ;;  %v9721_v0 = vmul.f32 0.5, %v9714_v10  ;;  %v9715_v16 = vadd.f32 %v9664_v62, %v5180_v24  ;;  %v9717_v26 = vadd.f32 %v9707_v54, %v5223_v3  ;;  %v16471_v10 = vld [vmem:[#allocation6 + $0x2e0] ss:$16 sps:$4 sm:$0xff]   ;;  %v16475_v54 = vld [vmem:[#allocation6 + $0x2c4] ss:$16 sps:$4 sm:$0xff]  }
 0xfcc   :  { %13709 = vtanh.f32 %v9713_v9  ;;  %v9723_v44 = vmul.f32 0.5, %v9716_v11  ;;  %v16483_v3 = vld [vmem:[#allocation6 + $0x2c8] ss:$16 sps:$4 sm:$0xff]   ;;  %v16519_v11 = vld [vmem:[#allocation6 + $0x260] ss:$16 sps:$4 sm:$0xff]  }
 0xfcd   :  { %13711 = vtanh.f32 %v9721_v0  ;;  %v9722_v8 = vmul.f32 0.5, %v9715_v16  ;;  %v16487_v0 = vld [vmem:[#allocation6 + $0x2a4] ss:$16 sps:$4 sm:$0xff]   ;;  %v16489_v16 = vld [vmem:[#allocation6 + $0x2ac] ss:$16 sps:$4 sm:$0xff]  }
 0xfcf   :  { %13713 = vtanh.f32 %v9722_v8  ;;  %v16495_v8 = vld [vmem:[#allocation6 + $0x2a0] ss:$16 sps:$4 sm:$0xff]  }
 0xfd0   :  { %13715 = vtanh.f32 %v9717_v26  ;;  %v16497_v26 = vld [vmem:[#allocation6 + $0x2a8] ss:$16 sps:$4 sm:$0xff]  }
 0xfd1   :  { %13717 = vtanh.f32 %v9720_v34  ;;  %v16515_v34 = vld [vmem:[#allocation6 + $0x26c] ss:$16 sps:$4 sm:$0xff]  }
 0xfd2   :  { %13719 = vtanh.f32 %v9723_v44  ;;  %v16539_v44 = vld [vmem:[#allocation6 + $0x22c] ss:$16 sps:$4 sm:$0xff]  }
 0xfd6   :  { %v13706_v50 = vpop.eup %13705 }
 0xfd7   :  { %v9730_v21 = vmul.f32 0.5, %v13706_v50  ;;  %v16521_v50 = vld [vmem:[#allocation6 + $0x268] ss:$16 sps:$4 sm:$0xff]  }
 0xfd8   :  { %v13708_v45 = vpop.eup %13707 }
 0xfd9   :  { %v13710_v22 = vpop.eup %13709  ;;  %v9736_v31 = vadd.f32 0.5, %v9730_v21  ;;  %v9731_v28 = vmul.f32 0.5, %v13708_v45  ;;  %v16525_v21 = vld [vmem:[#allocation6 + $0x244] ss:$16 sps:$4 sm:$0xff]   ;;  %v16527_v45 = vld [vmem:[#allocation6 + $0x24c] ss:$16 sps:$4 sm:$0xff]  }
 0xfda   :  { %v13712_v15 = vpop.eup %13711 }
 0xfdb   :  { %v9737_v2 = vadd.f32 0.5, %v9731_v28  ;;  %v9746_v7 = vmul.f32 %v13710_v22, %v9736_v31  ;;  %v9733_v52 = vmul.f32 0.5, %v13712_v15  ;;  %v16531_v22 = vld [vmem:[#allocation6 + $0x240] ss:$16 sps:$4 sm:$0xff]   ;;  %v16533_v31 = vld [vmem:[#allocation6 + $0x248] ss:$16 sps:$4 sm:$0xff]  }
 0xfdc   :  { %v13714_v6 = vpop.eup %13713  ;;  %v16537_v28 = vld [vmem:[#allocation6 + $0x224] ss:$16 sps:$4 sm:$0xff]   ;;  %v16543_v15 = vld [vmem:[#allocation6 + $0x220] ss:$16 sps:$4 sm:$0xff]  }
 0xfdd   :  { %v9744_v33 = vmul.f32 %v9737_v2, %v16383_v63  ;;  %v9739_v25 = vadd.f32 0.5, %v9733_v52  ;;  %v9734_v42 = vmul.f32 0.5, %v13714_v6  ;;  %v13716_v12 = vpop.eup %13715  ;;  %v16545_v2 = vld [vmem:[#allocation6 + $0x228] ss:$16 sps:$4 sm:$0xff]   ;;  %v16551_v52 = vld [vmem:[#allocation6 + $0x20c] ss:$16 sps:$4 sm:$0xff]  }
 0xfde   :  { %v13718_v43 = vpop.eup %13717  ;;  %v16555_v6 = vld [vmem:[#allocation6 + $0x200] ss:$16 sps:$4 sm:$0xff]  }
 0xfdf   :  { %v9748_v60 = vadd.f32 %v9746_v7, %v9744_v33  ;;  %v9740_v59 = vadd.f32 0.5, %v9734_v42  ;;  %v9747_v19 = vmul.f32 %v13716_v12, %v9739_v25  ;;  %v9732_v48 = vmul.f32 0.5, %v13718_v43  ;;  %v13720_v55 = vpop.eup %13719  ;;  %v16549_v7 = vld [vmem:[#allocation6 + $0x204] ss:$16 sps:$4 sm:$0xff]   ;;  %v16557_v33 = vld [vmem:[#allocation6 + $0x208] ss:$16 sps:$4 sm:$0xff]  }
 0xfe0   :  { %v9735_v38 = vmul.f32 0.5, %v13720_v55  ;;  %v17365_v25 = vld [vmem:[#allocation26_spill] sm:$0xff] }
 0xfe1   :  { %13721 = vtanh.f32 %v9748_v60  ;;  %v9745_v39 = vmul.f32 %v9740_v59, %v16387_v56  ;;  %v9738_v9 = vadd.f32 0.5, %v9732_v48  ;;  %v16477_v56 = vld [vmem:[#allocation6 + $0x2cc] ss:$16 sps:$4 sm:$0xff]  }
 0xfe2   :  { %v9741_v63 = vadd.f32 0.5, %v9735_v38 }
 0xfe3   :  { %v9749_v51 = vadd.f32 %v9747_v19, %v9745_v39  ;;  %v12032_v19 = vld [vmem:[%s17022_s4 + $0x8] sm:$0xf] }
 0xfe4   :  { %v5958_v43 = vrot.slane %v12032_v19, %v17314_v53  ;;  %v5962_v48 = vrot.slane %v12032_v19, %v17353_v36  ;;  %v5970_v55 = vrot.slane %v12032_v19, %v17354_v5 }
 0xfe5   :  { %13723 = vtanh.f32 %v9749_v51 }
 0xfee   :  { %v13722_v17 = vpop.eup %13721 }
 0xfef   :  { %v9752_v32 = vmul.f32 %v13722_v17, %v9738_v9  ;;  %v17374_v17 = vld [vmem:[#allocation28_spill] sm:$0xff] }
 0xff2   :  { %v13724_v24 = vpop.eup %13723 }
 0xff3   :  { %v9753_v37 = vmul.f32 %v13724_v24, %v9741_v63 }
 0xff5   :  { %v9754_v62 = vpack.c.bf16 %v9753_v37, %v9752_v32  ;;  %v6170_v32 = vadd.f32 %v17374_v17, %v5958_v43  ;;  %v17375_v37 = vld [vmem:[#allocation31_spill] sm:$0xff] }
 0xff7   :  { %10002 = vmatmul.mubr.bf16.vlgmr.msra.gmra.mxu0 %v9754_v62  ;;  %10045 = vmatmul.mubr.bf16.vlgmr.msra.gmra.mxu1 %v9754_v62  ;;  %v6172_v62 = vadd.f32 %v17375_v37, %v5962_v48  ;;  %v17379_v37 = vld [vmem:[#allocation20_spill] sm:$0xff] }
 0xff8   :  { %10310 = vmatpush1.bf16.msra.mxu0 %v16471_v10  ;;  %10353 = vmatpush1.bf16.msra.mxu1 %v16473_v30 }
 0xff9   :  { %10311 = vmatprep.subr.bf16.mxu0 %v16475_v54  ;;  %10354 = vmatprep.subr.bf16.mxu1 %v16477_v56 }
 0xffa   :  { %10341 = vmatprep.mubr.bf16.mxu0 %v17111_v47  ;;  %10384 = vmatprep.mubr.bf16.mxu1 %v17111_v47 }
 0xffc   :  { %10312 = vmatpush1.bf16.msra.mxu0 %v16481_v35  ;;  %10355 = vmatpush1.bf16.msra.mxu1 %v16483_v3 }
 0xffd   :  { %10313 = vmatprep.subr.bf16.mxu0 %v16487_v0  ;;  %10356 = vmatprep.subr.bf16.mxu1 %v16489_v16 }
0x1000   :  { %10314 = vmatpush1.bf16.msra.mxu0 %v16495_v8  ;;  %10357 = vmatpush1.bf16.msra.mxu1 %v16497_v26 }
0x1001   :  { %10315 = vmatprep.subr.bf16.mxu0 %v16501_v41  ;;  %10358 = vmatprep.subr.bf16.mxu1 %v16503_v4 }
0x1004   :  { %10316 = vmatpush1.bf16.msra.mxu0 %v16507_v23  ;;  %10359 = vmatpush1.bf16.msra.mxu1 %v16509_v61 }
0x1005   :  { %10317 = vmatprep.subr.bf16.mxu0 %v16513_v27  ;;  %10360 = vmatprep.subr.bf16.mxu1 %v16515_v34 }
0x1008   :  { %10318 = vmatpush1.bf16.msra.mxu0 %v16519_v11  ;;  %10361 = vmatpush1.bf16.msra.mxu1 %v16521_v50 }
0x1009   :  { %10319 = vmatprep.subr.bf16.mxu0 %v16525_v21  ;;  %10362 = vmatprep.subr.bf16.mxu1 %v16527_v45 }
0x100c   :  { %10320 = vmatpush1.bf16.msra.mxu0 %v16531_v22  ;;  %10363 = vmatpush1.bf16.msra.mxu1 %v16533_v31 }
0x100d   :  { %10321 = vmatprep.subr.bf16.mxu0 %v16537_v28  ;;  %10364 = vmatprep.subr.bf16.mxu1 %v16539_v44 }
0x1010   :  { %10322 = vmatpush1.bf16.msra.mxu0 %v16543_v15  ;;  %10365 = vmatpush1.bf16.msra.mxu1 %v16545_v2 }
0x1011   :  { %10323 = vmatprep.subr.bf16.mxu0 %v16549_v7  ;;  %10366 = vmatprep.subr.bf16.mxu1 %v16551_v52 }
0x1014   :  { %10324 = vmatpush1.bf16.msra.mxu0 %v16555_v6  ;;  %10367 = vmatpush1.bf16.msra.mxu1 %v16557_v33 }
0x1015   :  { %10448 = vmatprep.subr.bf16.mxu0 %v16432_v49  ;;  %10491 = vmatprep.subr.bf16.mxu1 %v16434_v46 }
0x1017   :  { %10342 = vmatmul.mubr.bf16.vlgmr.msra.gmra.mxu0 %v17365_v25  ;;  %10385 = vmatmul.mubr.bf16.vlgmr.msra.gmra.mxu1 %v17365_v25 }
0x1018   :  { %10449 = vmatpush1.bf16.msra.mxu0 %v16471_v10  ;;  %10492 = vmatpush1.bf16.msra.mxu1 %v16473_v30 }
0x1019   :  { %10450 = vmatprep.subr.bf16.mxu0 %v16475_v54  ;;  %10493 = vmatprep.subr.bf16.mxu1 %v16477_v56 }
0x101a   :  { %10480 = vmatprep.mubr.bf16.mxu0 %v17111_v47  ;;  %10523 = vmatprep.mubr.bf16.mxu1 %v17111_v47 }
0x101c   :  { %10451 = vmatpush1.bf16.msra.mxu0 %v16481_v35  ;;  %10494 = vmatpush1.bf16.msra.mxu1 %v16483_v3 }
0x101d   :  { %10452 = vmatprep.subr.bf16.mxu0 %v16487_v0  ;;  %10495 = vmatprep.subr.bf16.mxu1 %v16489_v16 }
0x1020   :  { %10453 = vmatpush1.bf16.msra.mxu0 %v16495_v8  ;;  %10496 = vmatpush1.bf16.msra.mxu1 %v16497_v26 }
0x1021   :  { %10454 = vmatprep.subr.bf16.mxu0 %v16501_v41  ;;  %10497 = vmatprep.subr.bf16.mxu1 %v16503_v4 }
0x1024   :  { %10455 = vmatpush1.bf16.msra.mxu0 %v16507_v23  ;;  %10498 = vmatpush1.bf16.msra.mxu1 %v16509_v61 }
0x1025   :  { %10456 = vmatprep.subr.bf16.mxu0 %v16513_v27  ;;  %10499 = vmatprep.subr.bf16.mxu1 %v16515_v34 }
0x1028   :  { %10457 = vmatpush1.bf16.msra.mxu0 %v16519_v11  ;;  %10500 = vmatpush1.bf16.msra.mxu1 %v16521_v50 }
0x1029   :  { %10458 = vmatprep.subr.bf16.mxu0 %v16525_v21  ;;  %10501 = vmatprep.subr.bf16.mxu1 %v16527_v45 }
0x102c   :  { %10459 = vmatpush1.bf16.msra.mxu0 %v16531_v22  ;;  %10502 = vmatpush1.bf16.msra.mxu1 %v16533_v31 }
0x102d   :  { %10460 = vmatprep.subr.bf16.mxu0 %v16537_v28  ;;  %10503 = vmatprep.subr.bf16.mxu1 %v16539_v44 }
0x1030   :  { %10461 = vmatpush1.bf16.msra.mxu0 %v16543_v15  ;;  %10504 = vmatpush1.bf16.msra.mxu1 %v16545_v2 }
0x1031   :  { %10462 = vmatprep.subr.bf16.mxu0 %v16549_v7  ;;  %10505 = vmatprep.subr.bf16.mxu1 %v16551_v52 }
0x1034   :  { %10463 = vmatpush1.bf16.msra.mxu0 %v16555_v6  ;;  %10506 = vmatpush1.bf16.msra.mxu1 %v16557_v33 }
0x1035   :  { %10587 = vmatprep.subr.bf16.mxu0 %v16432_v49  ;;  %10630 = vmatprep.subr.bf16.mxu1 %v16434_v46 }
0x10b7   :  { %v16601_v42 = vpop.f32.mrf.mxu0  ;;  %v16603_v12 = vpop.f32.mrf.mxu1 }
0x10b8   :  { %17366 = vst [vmem:[#allocation63_spill] sm:$0xff] %v16601_v42  ;;  %17367 = vst [vmem:[#allocation13_spill] sm:$0xff] %v16603_v12  ;;  %v17376_v12 = vld [vmem:[#allocation25_spill] sm:$0xff] }
0x10b9   :  { %v16605_v60 = vpop.f32.mrf.mxu0  ;;  %v16607_v59 = vpop.f32.mrf.mxu1 }
0x10ba   :  { %17368 = vst [vmem:[#allocation14_spill] sm:$0xff] %v16605_v60  ;;  %17369 = vst [vmem:[#allocation60_spill] sm:$0xff] %v16607_v59  ;;  %v17377_v60 = vld [vmem:[#allocation29_spill] sm:$0xff] }
0x10bb   :  { %v16612_v39 = vpop.f32.mrf.mxu0  ;;  %v16614_v51 = vpop.f32.mrf.mxu1  ;;  %v6174_v42 = vadd.f32 %v17377_v60, %v5958_v43 }
0x10bc   :  { %17370 = vst [vmem:[#allocation64_spill] sm:$0xff] %v16612_v39  ;;  %17371 = vst [vmem:[#allocation66_spill] sm:$0xff] %v16614_v51  ;;  %v6215_v39 = vadd.f32 %v17376_v12, %v5970_v55 }
0x10bd   :  { %v16619_v9 = vpop.f32.mrf.mxu0  ;;  %v16621_v38 = vpop.f32.mrf.mxu1 }
0x10be   :  { %17372 = vst [vmem:[#allocation68_spill] sm:$0xff] %v16619_v9  ;;  %17373 = vst [vmem:[#allocation69_spill] sm:$0xff] %v16621_v38  ;;  %v6176_v38 = vadd.f32 %v17378_v18, %v5962_v48 }
0x10d7   :  { %v10343_v63 = vpop.f32.mrf.mxu0  ;;  %v10386_v24 = vpop.f32.mrf.mxu1 }
0x10d8   :  { %v10395_v25 = vadd.f32 %v10343_v63, %v6170_v32  ;;  %v6219_v32 = vadd.f32 %v17379_v37, %v5970_v55 }
0x10d9   :  { %v10345_v51 = vpop.f32.mrf.mxu0  ;;  %v10388_v59 = vpop.f32.mrf.mxu1 }
0x10da   :  { %v10403_v13 = vmul.f32 0.5, %v10395_v25  ;;  %v10396_v14 = vadd.f32 %v10345_v51, %v6172_v62  ;;  %v10398_v40 = vadd.f32 %v10388_v59, %v6215_v39  ;;  %v5966_v59 = vrot.slane %v12032_v19, %v17225_v1  ;;  %v17380_v39 = vld [vmem:[#allocation30_spill] sm:$0xff] }
0x10db   :  { %v10347_v57 = vpop.f32.mrf.mxu0  ;;  %v10390_v9 = vpop.f32.mrf.mxu1 }
0x10dc   :  { %13725 = vtanh.f32 %v10403_v13  ;;  %v10404_v17 = vmul.f32 0.5, %v10396_v14  ;;  %v10399_v29 = vadd.f32 %v10347_v57, %v6174_v42  ;;  %v6213_v18 = vadd.f32 %v17380_v39, %v5966_v59  ;;  %v17381_v13 = vld [vmem:[#allocation18_spill] sm:$0xff]  ;;  %v17383_v39 = vld [vmem:[#allocation24_spill] sm:$0xff] }
0x10dd   :  { %v10349_v20 = vpop.f32.mrf.mxu0  ;;  %v10392_v58 = vpop.f32.mrf.mxu1  ;;  %v6217_v14 = vadd.f32 %v17381_v13, %v5966_v59 }
0x10de   :  { %13727 = vtanh.f32 %v10404_v17  ;;  %v10406_v12 = vmul.f32 0.5, %v10399_v29  ;;  %v10400_v63 = vadd.f32 %v10349_v20, %v6176_v38  ;;  %v10402_v43 = vadd.f32 %v10392_v58, %v6219_v32  ;;  %v17382_v32 = vld [vmem:[#allocation17_spill] sm:$0xff] }
0x10df   :  { %13729 = vtanh.f32 %v10398_v40  ;;  %v10397_v57 = vadd.f32 %v10386_v24, %v6213_v18  ;;  %v10401_v42 = vadd.f32 %v10390_v9, %v6217_v14 }
0x10e0   :  { %13731 = vtanh.f32 %v10406_v12  ;;  %v10407_v60 = vmul.f32 0.5, %v10400_v63 }
0x10e1   :  { %v10405_v62 = vmul.f32 0.5, %v10397_v57  ;;  %v10408_v38 = vmul.f32 0.5, %v10401_v42 }
0x10e2   :  { %13733 = vtanh.f32 %v10407_v60 }
0x10e3   :  { %13735 = vtanh.f32 %v10402_v43 }
0x10e4   :  { %13737 = vtanh.f32 %v10405_v62 }
0x10e5   :  { %13739 = vtanh.f32 %v10408_v38 }
0x10e9   :  { %v13726_v51 = vpop.eup %13725 }
0x10ea   :  { %v10415_v48 = vmul.f32 0.5, %v13726_v51 }
0x10eb   :  { %v13728_v55 = vpop.eup %13727 }
0x10ec   :  { %v13730_v29 = vpop.eup %13729  ;;  %v10421_v20 = vadd.f32 0.5, %v10415_v48  ;;  %v10416_v40 = vmul.f32 0.5, %v13728_v55 }
0x10ed   :  { %v13732_v25 = vpop.eup %13731 }
0x10ee   :  { %v10422_v58 = vadd.f32 0.5, %v10416_v40  ;;  %v10431_v17 = vmul.f32 %v13730_v29, %v10421_v20  ;;  %v10418_v19 = vmul.f32 0.5, %v13732_v25  ;;  %v12097_v25 = vld [vmem:[%s17022_s4 + $0x8] sm:$0xf] }
0x10ef   :  { %v13734_v37 = vpop.eup %13733 }
0x10f0   :  { %v10429_v12 = vmul.f32 %v10422_v58, %v17382_v32  ;;  %v10424_v63 = vadd.f32 0.5, %v10418_v19  ;;  %v10419_v24 = vmul.f32 0.5, %v13734_v37  ;;  %v13736_v9 = vpop.eup %13735  ;;  %v6597_v58 = vrot.slane %v12097_v25, %v17314_v53  ;;  %v17384_v37 = vld [vmem:[#allocation38_spill] sm:$0xff] }
0x10f1   :  { %v13738_v14 = vpop.eup %13737  ;;  %v6609_v19 = vrot.slane %v12097_v25, %v17354_v5 }
0x10f2   :  { %v16633_v60 = vadd.f32 %v10431_v17, %v10429_v12  ;;  %v10425_v43 = vadd.f32 0.5, %v10419_v24  ;;  %v10432_v59 = vmul.f32 %v13736_v9, %v10424_v63  ;;  %v13740_v57 = vpop.eup %13739  ;;  %v10417_v42 = vmul.f32 0.5, %v13738_v14  ;;  %v17385_v24 = vld [vmem:[#allocation41_spill] sm:$0xff] }
0x10f3   :  { %v10420_v51 = vmul.f32 0.5, %v13740_v57  ;;  %v6601_v17 = vrot.slane %v12097_v25, %v17353_v36  ;;  %v6809_v32 = vadd.f32 %v17384_v37, %v6597_v58  ;;  %v17387_v57 = vld [vmem:[#allocation39_spill] sm:$0xff] }
0x10f4   :  { %v10430_v18 = vmul.f32 %v10425_v43, %v17383_v39  ;;  %13741 = vtanh.f32 %v16633_v60  ;;  %v10423_v55 = vadd.f32 0.5, %v10417_v42  ;;  %v6813_v42 = vadd.f32 %v17387_v57, %v6597_v58 }
0x10f5   :  { %v10426_v62 = vadd.f32 0.5, %v10420_v51  ;;  %v6811_v9 = vadd.f32 %v17385_v24, %v6601_v17  ;;  %v17389_v24 = vld [vmem:[#allocation75_spill] sm:$0xff] }
0x10f6   :  { %v16637_v13 = vadd.f32 %v10432_v59, %v10430_v18  ;;  %v17386_v59 = vld [vmem:[#allocation22_spill] sm:$0xff] }
0x10f7   :  { %v6854_v39 = vadd.f32 %v17386_v59, %v6609_v19 }
0x10f8   :  { %13743 = vtanh.f32 %v16637_v13 }
0x1101   :  { %v13742_v48 = vpop.eup %13741 }
0x1102   :  { %v10437_v20 = vmul.f32 %v13742_v48, %v10423_v55 }
0x1105   :  { %v13744_v29 = vpop.eup %13743 }
0x1106   :  { %v10438_v40 = vmul.f32 %v13744_v29, %v10426_v62 }
0x1108   :  { %v10447_v38 = vpack.c.bf16 %v10438_v40, %v10437_v20  ;;  %v17388_v20 = vld [vmem:[#allocation74_spill] sm:$0xff] }
0x1109   :  { %v6815_v40 = vadd.f32 %v17388_v20, %v6601_v17 }
0x110a   :  { %10481 = vmatmul.mubr.bf16.vlgmr.msra.gmra.mxu0 %v10447_v38  ;;  %10524 = vmatmul.mubr.bf16.vlgmr.msra.gmra.mxu1 %v10447_v38 }
0x110b   :  { %10588 = vmatpush1.bf16.msra.mxu0 %v16471_v10  ;;  %10631 = vmatpush1.bf16.msra.mxu1 %v16473_v30 }
0x110c   :  { %10589 = vmatprep.subr.bf16.mxu0 %v16475_v54  ;;  %10632 = vmatprep.subr.bf16.mxu1 %v16477_v56 }
0x110d   :  { %10619 = vmatprep.mubr.bf16.mxu0 %v17111_v47  ;;  %10662 = vmatprep.mubr.bf16.mxu1 %v17111_v47 }
0x110f   :  { %10590 = vmatpush1.bf16.msra.mxu0 %v16481_v35  ;;  %10633 = vmatpush1.bf16.msra.mxu1 %v16483_v3 }
0x1110   :  { %10591 = vmatprep.subr.bf16.mxu0 %v16487_v0  ;;  %10634 = vmatprep.subr.bf16.mxu1 %v16489_v16 }
0x1113   :  { %10592 = vmatpush1.bf16.msra.mxu0 %v16495_v8  ;;  %10635 = vmatpush1.bf16.msra.mxu1 %v16497_v26 }
0x1114   :  { %10593 = vmatprep.subr.bf16.mxu0 %v16501_v41  ;;  %10636 = vmatprep.subr.bf16.mxu1 %v16503_v4 }
0x1117   :  { %10594 = vmatpush1.bf16.msra.mxu0 %v16507_v23  ;;  %10637 = vmatpush1.bf16.msra.mxu1 %v16509_v61 }
0x1118   :  { %10595 = vmatprep.subr.bf16.mxu0 %v16513_v27  ;;  %10638 = vmatprep.subr.bf16.mxu1 %v16515_v34 }
0x111b   :  { %10596 = vmatpush1.bf16.msra.mxu0 %v16519_v11  ;;  %10639 = vmatpush1.bf16.msra.mxu1 %v16521_v50 }
0x111c   :  { %10597 = vmatprep.subr.bf16.mxu0 %v16525_v21  ;;  %10640 = vmatprep.subr.bf16.mxu1 %v16527_v45 }
0x111f   :  { %10598 = vmatpush1.bf16.msra.mxu0 %v16531_v22  ;;  %10641 = vmatpush1.bf16.msra.mxu1 %v16533_v31 }
0x1120   :  { %10599 = vmatprep.subr.bf16.mxu0 %v16537_v28  ;;  %10642 = vmatprep.subr.bf16.mxu1 %v16539_v44 }
0x1123   :  { %10600 = vmatpush1.bf16.msra.mxu0 %v16543_v15  ;;  %10643 = vmatpush1.bf16.msra.mxu1 %v16545_v2 }
0x1124   :  { %10601 = vmatprep.subr.bf16.mxu0 %v16549_v7  ;;  %10644 = vmatprep.subr.bf16.mxu1 %v16551_v52 }
0x1127   :  { %10602 = vmatpush1.bf16.msra.mxu0 %v16555_v6  ;;  %10645 = vmatpush1.bf16.msra.mxu1 %v16557_v33 }
0x1128   :  { %10726 = vmatprep.subr.bf16.mxu0 %v16432_v49  ;;  %10769 = vmatprep.subr.bf16.mxu1 %v16434_v46 }
0x11ca   :  { %v10482_v12 = vpop.f32.mrf.mxu0  ;;  %v10525_v63 = vpop.f32.mrf.mxu1 }
0x11cb   :  { %v10534_v43 = vadd.f32 %v10482_v12, %v6809_v32  ;;  %v6858_v32 = vadd.f32 %v17389_v24, %v6609_v19 }
0x11cc   :  { %v10484_v18 = vpop.f32.mrf.mxu0  ;;  %v10527_v14 = vpop.f32.mrf.mxu1 }
0x11cd   :  { %v10542_v51 = vmul.f32 0.5, %v10534_v43  ;;  %v10535_v48 = vadd.f32 %v10484_v18, %v6811_v9  ;;  %v10537_v55 = vadd.f32 %v10527_v14, %v6854_v39  ;;  %v6605_v9 = vrot.slane %v12097_v25, %v17225_v1  ;;  %v17390_v39 = vld [vmem:[#allocation40_spill] sm:$0xff]  ;;  %v17391_v18 = vld [vmem:[#allocation27_spill] sm:$0xff] }
0x11ce   :  { %v10486_v62 = vpop.f32.mrf.mxu0  ;;  %v10529_v29 = vpop.f32.mrf.mxu1 }
0x11cf   :  { %13745 = vtanh.f32 %v10542_v51  ;;  %v10543_v38 = vmul.f32 0.5, %v10535_v48  ;;  %v10538_v37 = vadd.f32 %v10486_v62, %v6813_v42  ;;  %v6852_v17 = vadd.f32 %v17390_v39, %v6605_v9 }
0x11d0   :  { %v10488_v5 = vpop.f32.mrf.mxu0  ;;  %v10531_v36 = vpop.f32.mrf.mxu1  ;;  %v6856_v14 = vadd.f32 %v17391_v18, %v6605_v9 }
0x11d1   :  { %13747 = vtanh.f32 %v10543_v38  ;;  %v10545_v12 = vmul.f32 0.5, %v10538_v37  ;;  %v10539_v59 = vadd.f32 %v10488_v5, %v6815_v40  ;;  %v10541_v43 = vadd.f32 %v10531_v36, %v6858_v32 }
0x11d2   :  { %13749 = vtanh.f32 %v10537_v55  ;;  %v10536_v57 = vadd.f32 %v10525_v63, %v6852_v17  ;;  %v10540_v42 = vadd.f32 %v10529_v29, %v6856_v14 }
0x11d3   :  { %13751 = vtanh.f32 %v10545_v12  ;;  %v10546_v58 = vmul.f32 0.5, %v10539_v59 }
0x11d4   :  { %v10544_v62 = vmul.f32 0.5, %v10536_v57  ;;  %v10547_v40 = vmul.f32 0.5, %v10540_v42 }
0x11d5   :  { %13753 = vtanh.f32 %v10546_v58 }
0x11d6   :  { %13755 = vtanh.f32 %v10541_v43 }
0x11d7   :  { %13757 = vtanh.f32 %v10544_v62 }
0x11d8   :  { %13759 = vtanh.f32 %v10547_v40 }
0x11dc   :  { %v13746_v51 = vpop.eup %13745 }
0x11dd   :  { %v10554_v48 = vmul.f32 0.5, %v13746_v51 }
0x11de   :  { %v13748_v19 = vpop.eup %13747 }
0x11df   :  { %v13750_v20 = vpop.eup %13749  ;;  %v10560_v5 = vadd.f32 0.5, %v10554_v48  ;;  %v10555_v55 = vmul.f32 0.5, %v13748_v19 }
0x11e0   :  { %v13752_v38 = vpop.eup %13751 }
0x11e1   :  { %v10561_v36 = vadd.f32 0.5, %v10555_v55  ;;  %v10570_v37 = vmul.f32 %v13750_v20, %v10560_v5  ;;  %v10557_v25 = vmul.f32 0.5, %v13752_v38  ;;  %v17392_v55 = vld [vmem:[#allocation11_spill] sm:$0xff]  ;;  %v17393_v38 = vld [vmem:[#allocation12_spill] sm:$0xff] }
0x11e2   :  { %v13754_v24 = vpop.eup %13753 }
0x11e3   :  { %v10568_v32 = vmul.f32 %v10561_v36, %v16633_v60  ;;  %v10563_v12 = vadd.f32 0.5, %v10557_v25  ;;  %v10558_v63 = vmul.f32 0.5, %v13754_v24  ;;  %v13756_v29 = vpop.eup %13755 }
0x11e4   :  { %v13758_v17 = vpop.eup %13757 }
0x11e5   :  { %v16690_v59 = vadd.f32 %v10570_v37, %v10568_v32  ;;  %v10564_v58 = vadd.f32 0.5, %v10558_v63  ;;  %v10571_v43 = vmul.f32 %v13756_v29, %v10563_v12  ;;  %v13760_v18 = vpop.eup %13759  ;;  %v10556_v14 = vmul.f32 0.5, %v13758_v17  ;;  %v17394_v37 = vld [vmem:[#allocation35_spill] sm:$0xff]  ;;  %v17395_v12 = vld [vmem:[#allocation42_spill] sm:$0xff] }
0x11e6   :  { %v10559_v60 = vmul.f32 0.5, %v13760_v18 }
0x11e7   :  { %v10569_v9 = vmul.f32 %v10564_v58, %v16637_v13  ;;  %13761 = vtanh.f32 %v16690_v59  ;;  %v10562_v42 = vadd.f32 0.5, %v10556_v14  ;;  %v12162_v13 = vld [vmem:[%s17022_s4 + $0x8] sm:$0xf] }
0x11e8   :  { %v10565_v51 = vadd.f32 0.5, %v10559_v60  ;;  %v7236_v5 = vrot.slane %v12162_v13, %v17314_v53  ;;  %v7240_v40 = vrot.slane %v12162_v13, %v17392_v55  ;;  %v7248_v36 = vrot.slane %v12162_v13, %v17393_v38 }
0x11e9   :  { %v16694_v39 = vadd.f32 %v10571_v43, %v10569_v9  ;;  %v17397_v9 = vld [vmem:[#allocation45_spill] sm:$0xff] }
0x11ea   :  { %v7448_v25 = vadd.f32 %v17394_v37, %v7236_v5  ;;  %v7450_v63 = vadd.f32 %v17395_v12, %v7240_v40  ;;  %v7452_v17 = vadd.f32 %v17397_v9, %v7236_v5  ;;  %v17399_v12 = vld [vmem:[#allocation65_spill] sm:$0xff] }
0x11eb   :  { %13763 = vtanh.f32 %v16694_v39 }
0x11f4   :  { %v13762_v57 = vpop.eup %13761 }
0x11f5   :  { %v10576_v19 = vmul.f32 %v13762_v57, %v10562_v42 }
0x11f8   :  { %v13764_v48 = vpop.eup %13763 }
0x11f9   :  { %v10577_v62 = vmul.f32 %v13764_v48, %v10565_v51  ;;  %v17398_v51 = vld [vmem:[#allocation43_spill] sm:$0xff] }
0x11fa   :  { %v7454_v48 = vadd.f32 %v17398_v51, %v7240_v40 }
0x11fb   :  { %v10586_v20 = vpack.c.bf16 %v10577_v62, %v10576_v19 }
0x11fd   :  { %10620 = vmatmul.mubr.bf16.vlgmr.msra.gmra.mxu0 %v10586_v20  ;;  %10663 = vmatmul.mubr.bf16.vlgmr.msra.gmra.mxu1 %v10586_v20 }
0x11fe   :  { %10727 = vmatpush1.bf16.msra.mxu0 %v16471_v10  ;;  %10770 = vmatpush1.bf16.msra.mxu1 %v16473_v30 }
0x11ff   :  { %10728 = vmatprep.subr.bf16.mxu0 %v16475_v54  ;;  %10771 = vmatprep.subr.bf16.mxu1 %v16477_v56 }
0x1200   :  { %10758 = vmatprep.mubr.bf16.mxu0 %v17111_v47  ;;  %10801 = vmatprep.mubr.bf16.mxu1 %v17111_v47 }
0x1202   :  { %10729 = vmatpush1.bf16.msra.mxu0 %v16481_v35  ;;  %10772 = vmatpush1.bf16.msra.mxu1 %v16483_v3 }
0x1203   :  { %10730 = vmatprep.subr.bf16.mxu0 %v16487_v0  ;;  %10773 = vmatprep.subr.bf16.mxu1 %v16489_v16 }
0x1206   :  { %10731 = vmatpush1.bf16.msra.mxu0 %v16495_v8  ;;  %10774 = vmatpush1.bf16.msra.mxu1 %v16497_v26 }
0x1207   :  { %10732 = vmatprep.subr.bf16.mxu0 %v16501_v41  ;;  %10775 = vmatprep.subr.bf16.mxu1 %v16503_v4 }
0x120a   :  { %10733 = vmatpush1.bf16.msra.mxu0 %v16507_v23  ;;  %10776 = vmatpush1.bf16.msra.mxu1 %v16509_v61 }
0x120b   :  { %10734 = vmatprep.subr.bf16.mxu0 %v16513_v27  ;;  %10777 = vmatprep.subr.bf16.mxu1 %v16515_v34 }
0x120e   :  { %10735 = vmatpush1.bf16.msra.mxu0 %v16519_v11  ;;  %10778 = vmatpush1.bf16.msra.mxu1 %v16521_v50 }
0x120f   :  { %10736 = vmatprep.subr.bf16.mxu0 %v16525_v21  ;;  %10779 = vmatprep.subr.bf16.mxu1 %v16527_v45 }
0x1212   :  { %10737 = vmatpush1.bf16.msra.mxu0 %v16531_v22  ;;  %10780 = vmatpush1.bf16.msra.mxu1 %v16533_v31 }
0x1213   :  { %10738 = vmatprep.subr.bf16.mxu0 %v16537_v28  ;;  %10781 = vmatprep.subr.bf16.mxu1 %v16539_v44 }
0x1216   :  { %10739 = vmatpush1.bf16.msra.mxu0 %v16543_v15  ;;  %10782 = vmatpush1.bf16.msra.mxu1 %v16545_v2 }
0x1217   :  { %10740 = vmatprep.subr.bf16.mxu0 %v16549_v7  ;;  %10783 = vmatprep.subr.bf16.mxu1 %v16551_v52 }
0x121a   :  { %10741 = vmatpush1.bf16.msra.mxu0 %v16555_v6  ;;  %10784 = vmatpush1.bf16.msra.mxu1 %v16557_v33 }
0x121b   :  { %10865 = vmatprep.subr.bf16.mxu0 %v16432_v49  ;;  %10908 = vmatprep.subr.bf16.mxu1 %v16434_v46  ;;  %v17396_v49 = vld [vmem:[#allocation44_spill] sm:$0xff] }
0x121c   :  { %v7493_v58 = vadd.f32 %v17396_v49, %v7248_v36 }
0x12bd   :  { %v10621_v24 = vpop.f32.mrf.mxu0  ;;  %v10664_v32 = vpop.f32.mrf.mxu1 }
0x12be   :  { %v10673_v29 = vadd.f32 %v10621_v24, %v7448_v25  ;;  %v7497_v25 = vadd.f32 %v17399_v12, %v7248_v36 }
0x12bf   :  { %v10623_v46 = vpop.f32.mrf.mxu0  ;;  %v10666_v43 = vpop.f32.mrf.mxu1 }
0x12c0   :  { %v10681_v18 = vmul.f32 0.5, %v10673_v29  ;;  %v10674_v14 = vadd.f32 %v10623_v46, %v7450_v63  ;;  %v10676_v60 = vadd.f32 %v10666_v43, %v7493_v58  ;;  %v7244_v63 = vrot.slane %v12162_v13, %v17225_v1  ;;  %v17400_v58 = vld [vmem:[#allocation36_spill] sm:$0xff]  ;;  %v17401_v46 = vld [vmem:[#allocation34_spill] sm:$0xff] }
0x12c1   :  { %v10625_v57 = vpop.f32.mrf.mxu0  ;;  %v10668_v42 = vpop.f32.mrf.mxu1 }
0x12c2   :  { %13765 = vtanh.f32 %v10681_v18  ;;  %v10682_v19 = vmul.f32 0.5, %v10674_v14  ;;  %v10677_v62 = vadd.f32 %v10625_v57, %v7452_v17  ;;  %v7491_v40 = vadd.f32 %v17400_v58, %v7244_v63 }
0x12c3   :  { %v10627_v20 = vpop.f32.mrf.mxu0  ;;  %v10670_v37 = vpop.f32.mrf.mxu1  ;;  %v7495_v43 = vadd.f32 %v17401_v46, %v7244_v63 }
0x12c4   :  { %13767 = vtanh.f32 %v10682_v19  ;;  %v10684_v24 = vmul.f32 0.5, %v10677_v62  ;;  %v10678_v49 = vadd.f32 %v10627_v20, %v7454_v48  ;;  %v10680_v29 = vadd.f32 %v10670_v37, %v7497_v25 }
0x12c5   :  { %13769 = vtanh.f32 %v10676_v60  ;;  %v10675_v9 = vadd.f32 %v10664_v32, %v7491_v40  ;;  %v10679_v17 = vadd.f32 %v10668_v42, %v7495_v43 }
0x12c6   :  { %13771 = vtanh.f32 %v10684_v24  ;;  %v10685_v5 = vmul.f32 0.5, %v10678_v49 }
0x12c7   :  { %v10683_v57 = vmul.f32 0.5, %v10675_v9  ;;  %v10686_v19 = vmul.f32 0.5, %v10679_v17 }
0x12c8   :  { %13773 = vtanh.f32 %v10685_v5 }
0x12c9   :  { %13775 = vtanh.f32 %v10680_v29 }
0x12ca   :  { %13777 = vtanh.f32 %v10683_v57 }
0x12cb   :  { %13779 = vtanh.f32 %v10686_v19  ;;  %v17405_v19 = vld [vmem:[#allocation57_spill] sm:$0xff] }
0x12cf   :  { %v13766_v18 = vpop.eup %13765 }
0x12d0   :  { %v10693_v14 = vmul.f32 0.5, %v13766_v18 }
0x12d1   :  { %v13768_v36 = vpop.eup %13767 }
0x12d2   :  { %v13770_v51 = vpop.eup %13769  ;;  %v10699_v48 = vadd.f32 0.5, %v10693_v14  ;;  %v10694_v60 = vmul.f32 0.5, %v13768_v36 }
0x12d3   :  { %v13772_v62 = vpop.eup %13771 }
0x12d4   :  { %v10700_v20 = vadd.f32 0.5, %v10694_v60  ;;  %v10709_v37 = vmul.f32 %v13770_v51, %v10699_v48  ;;  %v10696_v13 = vmul.f32 0.5, %v13772_v62 }
0x12d5   :  { %v13774_v12 = vpop.eup %13773 }
0x12d6   :  { %v10707_v25 = vmul.f32 %v10700_v20, %v16690_v59  ;;  %v10702_v24 = vadd.f32 0.5, %v10696_v13  ;;  %v10697_v32 = vmul.f32 0.5, %v13774_v12  ;;  %v13776_v42 = vpop.eup %13775 }
0x12d7   :  { %v13778_v40 = vpop.eup %13777 }
0x12d8   :  { %v16747_v49 = vadd.f32 %v10709_v37, %v10707_v25  ;;  %v10703_v5 = vadd.f32 0.5, %v10697_v32  ;;  %v10710_v29 = vmul.f32 %v13776_v42, %v10702_v24  ;;  %v13780_v46 = vpop.eup %13779  ;;  %v10695_v43 = vmul.f32 0.5, %v13778_v40  ;;  %v17406_v24 = vld [vmem:[#allocation55_spill] sm:$0xff]  ;;  %v17407_v40 = vld [vmem:[#allocation33_spill] sm:$0xff] }
0x12d9   :  { %v10698_v59 = vmul.f32 0.5, %v13780_v46 }
0x12da   :  { %v10708_v63 = vmul.f32 %v10703_v5, %v16694_v39  ;;  %13781 = vtanh.f32 %v16747_v49  ;;  %v10701_v17 = vadd.f32 0.5, %v10695_v43 }
0x12db   :  { %v10704_v18 = vadd.f32 0.5, %v10698_v59 }
0x12dc   :  { %v16751_v58 = vadd.f32 %v10710_v29, %v10708_v63 }
0x12de   :  { %13783 = vtanh.f32 %v16751_v58 }
0x12e7   :  { %v13782_v9 = vpop.eup %13781 }
0x12e8   :  { %v10715_v36 = vmul.f32 %v13782_v9, %v10701_v17 }
0x12eb   :  { %v13784_v14 = vpop.eup %13783 }
0x12ec   :  { %v10716_v57 = vmul.f32 %v13784_v14, %v10704_v18  ;;  %v17408_v14 = vld [vmem:[#allocation53_spill] sm:$0xff] }
0x12ee   :  { %v10725_v51 = vpack.c.bf16 %v10716_v57, %v10715_v36  ;;  %v17409_v57 = vld [vmem:[#allocation15_spill] sm:$0xff] }
0x12f0   :  { %10759 = vmatmul.mubr.bf16.vlgmr.msra.gmra.mxu0 %v10725_v51  ;;  %10802 = vmatmul.mubr.bf16.vlgmr.msra.gmra.mxu1 %v10725_v51 }
0x12f1   :  { %10866 = vmatpush1.bf16.msra.mxu0 %v16471_v10  ;;  %10909 = vmatpush1.bf16.msra.mxu1 %v16473_v30  ;;  %v16786_v10 = vld [vmem:[#allocation6 + $0x2e4] ss:$16 sps:$4 sm:$0xff]   ;;  %v16789_v30 = vld [vmem:[#allocation6 + $0x2ec] ss:$16 sps:$4 sm:$0xff]  }
0x12f2   :  { %10867 = vmatprep.subr.bf16.mxu0 %v16475_v54  ;;  %10910 = vmatprep.subr.bf16.mxu1 %v16477_v56  ;;  %v12227_v54 = vld [vmem:[%s17022_s4 + $0x8] sm:$0xf] }
0x12f3   :  { %10897 = vmatprep.mubr.bf16.mxu0 %v17111_v47  ;;  %10940 = vmatprep.mubr.bf16.mxu1 %v17111_v47  ;;  %v7875_v56 = vrot.slane %v12227_v54, %v17314_v53  ;;  %v7883_v18 = vrot.slane %v12227_v54, %v17225_v1 }
0x12f5   :  { %10868 = vmatpush1.bf16.msra.mxu0 %v16481_v35  ;;  %10911 = vmatpush1.bf16.msra.mxu1 %v16483_v3  ;;  %v7879_v35 = vrot.slane %v12227_v54, %v17392_v55  ;;  %v7887_v3 = vrot.slane %v12227_v54, %v17393_v38  ;;  %v8091_v62 = vadd.f32 %v17405_v19, %v7875_v56 }
0x12f6   :  { %10869 = vmatprep.subr.bf16.mxu0 %v16487_v0  ;;  %10912 = vmatprep.subr.bf16.mxu1 %v16489_v16  ;;  %v17402_v0 = vld [vmem:[#allocation32_spill] sm:$0xff]  ;;  %v8130_v36 = vadd.f32 %v17408_v14, %v7883_v18  ;;  %v8134_v51 = vadd.f32 %v17409_v57, %v7883_v18  ;;  %v16818_v18 = vld [vmem:[#allocation6 + $0x2e8] ss:$16 sps:$4 sm:$0xff]  }
0x12f7   :  { %v8087_v16 = vadd.f32 %v17402_v0, %v7875_v56  ;;  %v8093_v32 = vadd.f32 %v17406_v24, %v7879_v35  ;;  %v8136_v46 = vadd.f32 %v17407_v40, %v7887_v3  ;;  %v16821_v14 = vld [vmem:[#allocation6 + $0x2c4] ss:$16 sps:$4 sm:$0xff]   ;;  %v16829_v57 = vld [vmem:[#allocation6 + $0x2c0] ss:$16 sps:$4 sm:$0xff]  }
0x12f9   :  { %10870 = vmatpush1.bf16.msra.mxu0 %v16495_v8  ;;  %10913 = vmatpush1.bf16.msra.mxu1 %v16497_v26 }
0x12fa   :  { %10871 = vmatprep.subr.bf16.mxu0 %v16501_v41  ;;  %10914 = vmatprep.subr.bf16.mxu1 %v16503_v4  ;;  %v17403_v41 = vld [vmem:[#allocation54_spill] sm:$0xff] }
0x12fb   :  { %v8089_v4 = vadd.f32 %v17403_v41, %v7879_v35 }
0x12fd   :  { %10872 = vmatpush1.bf16.msra.mxu0 %v16507_v23  ;;  %10915 = vmatpush1.bf16.msra.mxu1 %v16509_v61  ;;  %v17404_v61 = vld [vmem:[#allocation56_spill] sm:$0xff] }
0x12fe   :  { %10873 = vmatprep.subr.bf16.mxu0 %v16513_v27  ;;  %10916 = vmatprep.subr.bf16.mxu1 %v16515_v34  ;;  %v8132_v39 = vadd.f32 %v17404_v61, %v7887_v3 }
0x1301   :  { %10874 = vmatpush1.bf16.msra.mxu0 %v16519_v11  ;;  %10917 = vmatpush1.bf16.msra.mxu1 %v16521_v50 }
0x1302   :  { %10875 = vmatprep.subr.bf16.mxu0 %v16525_v21  ;;  %10918 = vmatprep.subr.bf16.mxu1 %v16527_v45 }
0x1305   :  { %10876 = vmatpush1.bf16.msra.mxu0 %v16531_v22  ;;  %10919 = vmatpush1.bf16.msra.mxu1 %v16533_v31 }
0x1306   :  { %10877 = vmatprep.subr.bf16.mxu0 %v16537_v28  ;;  %10920 = vmatprep.subr.bf16.mxu1 %v16539_v44 }
0x1309   :  { %10878 = vmatpush1.bf16.msra.mxu0 %v16543_v15  ;;  %10921 = vmatpush1.bf16.msra.mxu1 %v16545_v2 }
0x130a   :  { %10879 = vmatprep.subr.bf16.mxu0 %v16549_v7  ;;  %10922 = vmatprep.subr.bf16.mxu1 %v16551_v52 }
0x130d   :  { %10880 = vmatpush1.bf16.msra.mxu0 %v16555_v6  ;;  %10923 = vmatpush1.bf16.msra.mxu1 %v16557_v33 }
0x130e   :  { %11004 = vmatprep.subr.bf16.mxu0 %v16786_v10  ;;  %11047 = vmatprep.subr.bf16.mxu1 %v16789_v30 }
0x13b0   :  { %v10760_v8 = vpop.f32.mrf.mxu0  ;;  %v10803_v26 = vpop.f32.mrf.mxu1 }
0x13b1   :  { %v10812_v23 = vadd.f32 %v10760_v8, %v8087_v16  ;;  %v10814_v56 = vadd.f32 %v10803_v26, %v8130_v36  ;;  %v16824_v36 = vld [vmem:[#allocation6 + $0x2cc] ss:$16 sps:$4 sm:$0xff]  }
0x13b2   :  { %v10762_v48 = vpop.f32.mrf.mxu0  ;;  %v10805_v60 = vpop.f32.mrf.mxu1 }
0x13b3   :  { %v10820_v20 = vmul.f32 0.5, %v10812_v23  ;;  %v10813_v37 = vadd.f32 %v10762_v48, %v8089_v4  ;;  %v10815_v13 = vadd.f32 %v10805_v60, %v8132_v39  ;;  %v10822_v8 = vmul.f32 0.5, %v10814_v56  ;;  %v16835_v56 = vld [vmem:[#allocation6 + $0x2a4] ss:$16 sps:$4 sm:$0xff]  }
0x13b4   :  { %v10764_v12 = vpop.f32.mrf.mxu0  ;;  %v10807_v25 = vpop.f32.mrf.mxu1 }
0x13b5   :  { %13785 = vtanh.f32 %v10820_v20  ;;  %v10821_v42 = vmul.f32 0.5, %v10813_v37  ;;  %v10816_v5 = vadd.f32 %v10764_v12, %v8091_v62  ;;  %v10818_v35 = vadd.f32 %v10807_v25, %v8134_v51  ;;  %v16832_v51 = vld [vmem:[#allocation6 + $0x2c8] ss:$16 sps:$4 sm:$0xff]  }
0x13b6   :  { %v10766_v29 = vpop.f32.mrf.mxu0  ;;  %v10809_v63 = vpop.f32.mrf.mxu1 }
0x13b7   :  { %13787 = vtanh.f32 %v10821_v42  ;;  %v10823_v43 = vmul.f32 0.5, %v10816_v5  ;;  %v10817_v59 = vadd.f32 %v10766_v29, %v8093_v32  ;;  %v10819_v17 = vadd.f32 %v10809_v63, %v8136_v46 }
0x13b8   :  { %13789 = vtanh.f32 %v10815_v13  ;;  %v10825_v61 = vmul.f32 0.5, %v10818_v35  ;;  %v16838_v35 = vld [vmem:[#allocation6 + $0x2ac] ss:$16 sps:$4 sm:$0xff]  }
0x13b9   :  { %13791 = vtanh.f32 %v10823_v43  ;;  %v10824_v9 = vmul.f32 0.5, %v10817_v59 }
0x13bb   :  { %13793 = vtanh.f32 %v10824_v9 }
0x13bc   :  { %13795 = vtanh.f32 %v10819_v17 }
0x13bd   :  { %13797 = vtanh.f32 %v10822_v8  ;;  %v16850_v8 = vld [vmem:[#allocation6 + $0x28c] ss:$16 sps:$4 sm:$0xff]  }
0x13be   :  { %13799 = vtanh.f32 %v10825_v61 }
0x13c2   :  { %v13786_v0 = vpop.eup %13785 }
0x13c3   :  { %v10832_v16 = vmul.f32 0.5, %v13786_v0  ;;  %v16841_v0 = vld [vmem:[#allocation6 + $0x2a0] ss:$16 sps:$4 sm:$0xff]  }
0x13c4   :  { %v13788_v3 = vpop.eup %13787 }
0x13c5   :  { %v13790_v41 = vpop.eup %13789  ;;  %v10838_v4 = vadd.f32 0.5, %v10832_v16  ;;  %v10833_v23 = vmul.f32 0.5, %v13788_v3  ;;  %v16844_v16 = vld [vmem:[#allocation6 + $0x2a8] ss:$16 sps:$4 sm:$0xff]   ;;  %v16847_v3 = vld [vmem:[#allocation6 + $0x284] ss:$16 sps:$4 sm:$0xff]  }
0x13c6   :  { %v13792_v39 = vpop.eup %13791 }
0x13c7   :  { %v10839_v48 = vadd.f32 0.5, %v10833_v23  ;;  %v10848_v60 = vmul.f32 %v13790_v41, %v10838_v4  ;;  %v10835_v54 = vmul.f32 0.5, %v13792_v39  ;;  %v16853_v41 = vld [vmem:[#allocation6 + $0x280] ss:$16 sps:$4 sm:$0xff]   ;;  %v16856_v4 = vld [vmem:[#allocation6 + $0x288] ss:$16 sps:$4 sm:$0xff]  }
0x13c8   :  { %v13794_v19 = vpop.eup %13793 }
0x13c9   :  { %v10846_v62 = vmul.f32 %v10839_v48, %v16747_v49  ;;  %v10841_v20 = vadd.f32 0.5, %v10835_v54  ;;  %v10836_v26 = vmul.f32 0.5, %v13794_v19  ;;  %v13796_v37 = vpop.eup %13795 }
0x13ca   :  { %v13798_v42 = vpop.eup %13797 }
0x13cb   :  { %v16808_v13 = vadd.f32 %v10848_v60, %v10846_v62  ;;  %v10842_v12 = vadd.f32 0.5, %v10836_v26  ;;  %v10849_v25 = vmul.f32 %v13796_v37, %v10841_v20  ;;  %v13800_v5 = vpop.eup %13799  ;;  %v10834_v29 = vmul.f32 0.5, %v13798_v42  ;;  %v17414_v60 = vld [vmem:[#allocation59_spill] sm:$0xff]  ;;  %v17415_v37 = vld [vmem:[#allocation48_spill] sm:$0xff] }
0x13cc   :  { %v10837_v49 = vmul.f32 0.5, %v13800_v5 }
0x13cd   :  { %v10847_v24 = vmul.f32 %v10842_v12, %v16751_v58  ;;  %13801 = vtanh.f32 %v16808_v13  ;;  %v10840_v40 = vadd.f32 0.5, %v10834_v29  ;;  %v16815_v58 = vld [vmem:[#allocation6 + $0x2e0] ss:$16 sps:$4 sm:$0xff]  }
0x13ce   :  { %v10843_v46 = vadd.f32 0.5, %v10837_v49  ;;  %v17416_v49 = vld [vmem:[#allocation47_spill] sm:$0xff] }
0x13cf   :  { %v16812_v32 = vadd.f32 %v10849_v25, %v10847_v24 }
0x13d1   :  { %13803 = vtanh.f32 %v16812_v32 }
0x13da   :  { %v13802_v63 = vpop.eup %13801 }
0x13db   :  { %v10854_v59 = vmul.f32 %v13802_v63, %v10840_v40  ;;  %v17417_v40 = vld [vmem:[#allocation58_spill] sm:$0xff] }
0x13de   :  { %v13804_v43 = vpop.eup %13803 }
0x13df   :  { %v10855_v9 = vmul.f32 %v13804_v43, %v10843_v46 }
0x13e1   :  { %v10864_v17 = vpack.c.bf16 %v10855_v9, %v10854_v59 }
0x13e3   :  { %10898 = vmatmul.mubr.bf16.vlgmr.msra.gmra.mxu0 %v10864_v17  ;;  %10941 = vmatmul.mubr.bf16.vlgmr.msra.gmra.mxu1 %v10864_v17 }
0x13e4   :  { %11005 = vmatpush1.bf16.msra.mxu0 %v16815_v58  ;;  %11048 = vmatpush1.bf16.msra.mxu1 %v16818_v18 }
0x13e5   :  { %11006 = vmatprep.subr.bf16.mxu0 %v16821_v14  ;;  %11049 = vmatprep.subr.bf16.mxu1 %v16824_v36 }
0x13e6   :  { %11036 = vmatprep.mubr.bf16.mxu0 %v17111_v47  ;;  %11079 = vmatprep.mubr.bf16.mxu1 %v17111_v47 }
0x13e8   :  { %11007 = vmatpush1.bf16.msra.mxu0 %v16829_v57  ;;  %11050 = vmatpush1.bf16.msra.mxu1 %v16832_v51 }
0x13e9   :  { %11008 = vmatprep.subr.bf16.mxu0 %v16835_v56  ;;  %11051 = vmatprep.subr.bf16.mxu1 %v16838_v35 }
0x13ec   :  { %11009 = vmatpush1.bf16.msra.mxu0 %v16841_v0  ;;  %11052 = vmatpush1.bf16.msra.mxu1 %v16844_v16 }
0x13ed   :  { %11010 = vmatprep.subr.bf16.mxu0 %v16847_v3  ;;  %11053 = vmatprep.subr.bf16.mxu1 %v16850_v8 }
0x13f0   :  { %11011 = vmatpush1.bf16.msra.mxu0 %v16853_v41  ;;  %11054 = vmatpush1.bf16.msra.mxu1 %v16856_v4 }
0x13f1   :  { %11012 = vmatprep.subr.bf16.mxu0 %v16513_v27  ;;  %11055 = vmatprep.subr.bf16.mxu1 %v16515_v34  ;;  %v12292_v27 = vld [vmem:[%s17022_s4 + $0x8] sm:$0xf] }
0x13f2   :  { %v8514_v34 = vrot.slane %v12292_v27, %v17314_v53  ;;  %v8522_v29 = vrot.slane %v12292_v27, %v17225_v1 }
0x13f4   :  { %11013 = vmatpush1.bf16.msra.mxu0 %v16519_v11  ;;  %11056 = vmatpush1.bf16.msra.mxu1 %v16521_v50  ;;  %v8518_v11 = vrot.slane %v12292_v27, %v17392_v55  ;;  %v8526_v50 = vrot.slane %v12292_v27, %v17393_v38  ;;  %v8769_v63 = vadd.f32 %v17416_v49, %v8522_v29 }
0x13f5   :  { %11014 = vmatprep.subr.bf16.mxu0 %v16525_v21  ;;  %11057 = vmatprep.subr.bf16.mxu1 %v16527_v45  ;;  %v17410_v21 = vld [vmem:[#allocation10_spill] sm:$0xff]  ;;  %v8773_v46 = vadd.f32 %v17417_v40, %v8522_v29  ;;  %v17418_v29 = vld [vmem:[#allocation52_spill] sm:$0xff] }
0x13f6   :  { %v8726_v45 = vadd.f32 %v17410_v21, %v8514_v34  ;;  %v8732_v54 = vadd.f32 %v17414_v60, %v8518_v11  ;;  %v8775_v12 = vadd.f32 %v17415_v37, %v8526_v50 }
0x13f8   :  { %11015 = vmatpush1.bf16.msra.mxu0 %v16531_v22  ;;  %11058 = vmatpush1.bf16.msra.mxu1 %v16533_v31 }
0x13f9   :  { %11016 = vmatprep.subr.bf16.mxu0 %v16537_v28  ;;  %11059 = vmatprep.subr.bf16.mxu1 %v16539_v44  ;;  %v17411_v28 = vld [vmem:[#allocation49_spill] sm:$0xff] }
0x13fa   :  { %v8728_v44 = vadd.f32 %v17411_v28, %v8518_v11 }
0x13fc   :  { %11017 = vmatpush1.bf16.msra.mxu0 %v16543_v15  ;;  %11060 = vmatpush1.bf16.msra.mxu1 %v16545_v2  ;;  %v17412_v2 = vld [vmem:[#allocation50_spill] sm:$0xff] }
0x13fd   :  { %11018 = vmatprep.subr.bf16.mxu0 %v16549_v7  ;;  %11061 = vmatprep.subr.bf16.mxu1 %v16551_v52  ;;  %v8771_v7 = vadd.f32 %v17412_v2, %v8526_v50 }
0x1400   :  { %11019 = vmatpush1.bf16.msra.mxu0 %v16555_v6  ;;  %11062 = vmatpush1.bf16.msra.mxu1 %v16557_v33  ;;  %v17413_v33 = vld [vmem:[#allocation51_spill] sm:$0xff] }
0x1401   :  { %11143 = vmatprep.subr.bf16.mxu0 %v16786_v10  ;;  %11186 = vmatprep.subr.bf16.mxu1 %v16789_v30  ;;  %v8730_v10 = vadd.f32 %v17413_v33, %v8514_v34 }
0x14a3   :  { %v10899_v22 = vpop.f32.mrf.mxu0  ;;  %v10942_v31 = vpop.f32.mrf.mxu1 }
0x14a4   :  { %v10951_v15 = vadd.f32 %v10899_v22, %v8726_v45  ;;  %v10953_v43 = vadd.f32 %v10942_v31, %v8769_v63 }
0x14a5   :  { %v10901_v52 = vpop.f32.mrf.mxu0  ;;  %v10944_v6 = vpop.f32.mrf.mxu1 }
0x14a6   :  { %v10959_v30 = vmul.f32 0.5, %v10951_v15  ;;  %v10952_v23 = vadd.f32 %v10901_v52, %v8728_v44  ;;  %v10954_v61 = vadd.f32 %v10944_v6, %v8771_v7  ;;  %v10961_v11 = vmul.f32 0.5, %v10953_v43 }
0x14a7   :  { %v10903_v39 = vpop.f32.mrf.mxu0  ;;  %v10946_v48 = vpop.f32.mrf.mxu1 }
0x14a8   :  { %13805 = vtanh.f32 %v10959_v30  ;;  %v10960_v19 = vmul.f32 0.5, %v10952_v23  ;;  %v10955_v62 = vadd.f32 %v10903_v39, %v8730_v10  ;;  %v10957_v59 = vadd.f32 %v10946_v48, %v8773_v46  ;;  %v17419_v46 = vld [vmem:[#allocation23_spill] sm:$0xff] }
0x14a9   :  { %v10905_v20 = vpop.f32.mrf.mxu0  ;;  %v10948_v26 = vpop.f32.mrf.mxu1 }
0x14aa   :  { %13807 = vtanh.f32 %v10960_v19  ;;  %v10962_v25 = vmul.f32 0.5, %v10955_v62  ;;  %v10956_v24 = vadd.f32 %v10905_v20, %v8732_v54  ;;  %v10958_v5 = vadd.f32 %v10948_v26, %v8775_v12 }
0x14ab   :  { %13809 = vtanh.f32 %v10954_v61  ;;  %v10964_v22 = vmul.f32 0.5, %v10957_v59 }
0x14ac   :  { %13811 = vtanh.f32 %v10962_v25  ;;  %v10963_v42 = vmul.f32 0.5, %v10956_v24  ;;  %v12357_v25 = vld [vmem:[%s17022_s4 + $0x8] sm:$0xf] }
0x14ad   :  { %v9153_v24 = vrot.slane %v12357_v25, %v17314_v53 }
0x14ae   :  { %13813 = vtanh.f32 %v10963_v42  ;;  %v9157_v42 = vrot.slane %v12357_v25, %v17392_v55 }
0x14af   :  { %13815 = vtanh.f32 %v10958_v5  ;;  %v9165_v5 = vrot.slane %v12357_v25, %v17393_v38  ;;  %v9365_v49 = vadd.f32 %v17418_v29, %v9153_v24 }
0x14b0   :  { %13817 = vtanh.f32 %v10961_v11  ;;  %v9367_v43 = vadd.f32 %v17419_v46, %v9157_v42 }
0x14b1   :  { %13819 = vtanh.f32 %v10964_v22 }
0x14b5   :  { %v13806_v9 = vpop.eup %13805 }
0x14b6   :  { %v10971_v17 = vmul.f32 0.5, %v13806_v9  ;;  %v17420_v9 = vld [vmem:[#allocation37_spill] sm:$0xff] }
0x14b7   :  { %v13808_v34 = vpop.eup %13807 }
0x14b8   :  { %v13810_v50 = vpop.eup %13809  ;;  %v10977_v21 = vadd.f32 0.5, %v10971_v17  ;;  %v10972_v45 = vmul.f32 0.5, %v13808_v34  ;;  %v9410_v17 = vadd.f32 %v17420_v9, %v9165_v5 }
0x14b9   :  { %v13812_v28 = vpop.eup %13811 }
0x14ba   :  { %v10978_v44 = vadd.f32 0.5, %v10972_v45  ;;  %v10987_v15 = vmul.f32 %v13810_v50, %v10977_v21  ;;  %v10974_v27 = vmul.f32 0.5, %v13812_v28  ;;  %v17421_v50 = vld [vmem:[#allocation16_spill] sm:$0xff] }
0x14bb   :  { %v13814_v2 = vpop.eup %13813  ;;  %v9369_v21 = vadd.f32 %v17421_v50, %v9153_v24  ;;  %v13980_v50 = vmov 0.0  }
0x14bc   :  { %v10985_v7 = vmul.f32 %v10978_v44, %v16808_v13  ;;  %v10980_v52 = vadd.f32 0.5, %v10974_v27  ;;  %v10975_v31 = vmul.f32 0.5, %v13814_v2  ;;  %v13816_v6 = vpop.eup %13815  ;;  %v17422_v27 = vld [vmem:[#allocation61_spill] sm:$0xff] }
0x14bd   :  { %v13818_v39 = vpop.eup %13817  ;;  %v9371_v2 = vadd.f32 %v17422_v27, %v9157_v42  ;;  %v13380_v27 = vld [vmem:[%s17023_s5] sm:$0xff]  }
0x14be   :  { %v16893_v33 = vadd.f32 %v10987_v15, %v10985_v7  ;;  %v10981_v10 = vadd.f32 0.5, %v10975_v31  ;;  %v10988_v30 = vmul.f32 %v13816_v6, %v10980_v52  ;;  %v13820_v48 = vpop.eup %13819  ;;  %v10973_v60 = vmul.f32 0.5, %v13818_v39 }
0x14bf   :  { %v10976_v13 = vmul.f32 0.5, %v13820_v48 }
0x14c0   :  { %v10986_v23 = vmul.f32 %v10981_v10, %v16812_v32  ;;  %13821 = vtanh.f32 %v16893_v33  ;;  %v10979_v19 = vadd.f32 0.5, %v10973_v60  ;;  %v13916_v32 = vld [vmem:[#allocation6 + $0x26c] ss:$16 sps:$4 sm:$0xff]   ;;  %v17423_v10 = vld [vmem:[#allocation62_spill] sm:$0xff] }
0x14c1   :  { %v10982_v62 = vadd.f32 0.5, %v10976_v13  ;;  %v9161_v13 = vrot.slane %v12357_v25, %v17225_v1 }
0x14c2   :  { %v16897_v61 = vadd.f32 %v10988_v30, %v10986_v23  ;;  %v9414_v30 = vadd.f32 %v17423_v10, %v9165_v5 }
0x14c4   :  { %13823 = vtanh.f32 %v16897_v61 }
0x14cd   :  { %v13822_v54 = vpop.eup %13821 }
0x14ce   :  { %v10993_v26 = vmul.f32 %v13822_v54, %v10979_v19  ;;  %v17424_v54 = vld [vmem:[#allocation21_spill] sm:$0xff] }
0x14cf   :  { %v9408_v19 = vadd.f32 %v17424_v54, %v9161_v13 }
0x14d1   :  { %v13824_v20 = vpop.eup %13823 }
0x14d2   :  { %v10994_v37 = vmul.f32 %v13824_v20, %v10982_v62  ;;  %v17425_v62 = vld [vmem:[#allocation46_spill] sm:$0xff] }
0x14d3   :  { %v9412_v20 = vadd.f32 %v17425_v62, %v9161_v13 }
0x14d4   :  { %v11003_v12 = vpack.c.bf16 %v10994_v37, %v10993_v26 }
0x14d6   :  { %11037 = vmatmul.mubr.bf16.vlgmr.msra.gmra.mxu0 %v11003_v12  ;;  %11080 = vmatmul.mubr.bf16.vlgmr.msra.gmra.mxu1 %v11003_v12 }
0x14d7   :  { %11144 = vmatpush1.bf16.msra.mxu0 %v16815_v58  ;;  %11187 = vmatpush1.bf16.msra.mxu1 %v16818_v18  ;;  %v13917_v58 = vld [vmem:[#allocation6 + $0x260] ss:$16 sps:$4 sm:$0xff]   ;;  %v13918_v18 = vld [vmem:[#allocation6 + $0x268] ss:$16 sps:$4 sm:$0xff]  }
0x14d8   :  { %11145 = vmatprep.subr.bf16.mxu0 %v16821_v14  ;;  %11188 = vmatprep.subr.bf16.mxu1 %v16824_v36  ;;  %v13919_v14 = vld [vmem:[#allocation6 + $0x244] ss:$16 sps:$4 sm:$0xff]   ;;  %v13920_v36 = vld [vmem:[#allocation6 + $0x24c] ss:$16 sps:$4 sm:$0xff]  }
0x14d9   :  { %11175 = vmatprep.mubr.bf16.mxu0 %v17111_v47  ;;  %11218 = vmatprep.mubr.bf16.mxu1 %v17111_v47  ;;  %v13915_v47 = vld [vmem:[#allocation6 + $0x264] ss:$16 sps:$4 sm:$0xff]  }
0x14db   :  { %11146 = vmatpush1.bf16.msra.mxu0 %v16829_v57  ;;  %11189 = vmatpush1.bf16.msra.mxu1 %v16832_v51  ;;  %v13921_v57 = vld [vmem:[#allocation6 + $0x240] ss:$16 sps:$4 sm:$0xff]   ;;  %v13922_v51 = vld [vmem:[#allocation6 + $0x248] ss:$16 sps:$4 sm:$0xff]  }
0x14dc   :  { %11147 = vmatprep.subr.bf16.mxu0 %v16835_v56  ;;  %11190 = vmatprep.subr.bf16.mxu1 %v16838_v35  ;;  %v13923_v56 = vld [vmem:[#allocation6 + $0x224] ss:$16 sps:$4 sm:$0xff]   ;;  %v13924_v35 = vld [vmem:[#allocation6 + $0x22c] ss:$16 sps:$4 sm:$0xff]  }
0x14df   :  { %11148 = vmatpush1.bf16.msra.mxu0 %v16841_v0  ;;  %11191 = vmatpush1.bf16.msra.mxu1 %v16844_v16  ;;  %v13925_v0 = vld [vmem:[#allocation6 + $0x220] ss:$16 sps:$4 sm:$0xff]   ;;  %v13926_v16 = vld [vmem:[#allocation6 + $0x228] ss:$16 sps:$4 sm:$0xff]  }
0x14e0   :  { %11149 = vmatprep.subr.bf16.mxu0 %v16847_v3  ;;  %11192 = vmatprep.subr.bf16.mxu1 %v16850_v8  ;;  %v13927_v3 = vld [vmem:[#allocation6 + $0x204] ss:$16 sps:$4 sm:$0xff]   ;;  %v13928_v8 = vld [vmem:[#allocation6 + $0x20c] ss:$16 sps:$4 sm:$0xff]  }
0x14e3   :  { %11150 = vmatpush1.bf16.msra.mxu0 %v16853_v41  ;;  %11193 = vmatpush1.bf16.msra.mxu1 %v16856_v4  ;;  %v13929_v41 = vld [vmem:[#allocation6 + $0x200] ss:$16 sps:$4 sm:$0xff]   ;;  %v13930_v4 = vld [vmem:[#allocation6 + $0x208] ss:$16 sps:$4 sm:$0xff]  }
0x14e4   :  { %11151 = vmatprep.subr.bf16.mxu0 %v13915_v47  ;;  %11194 = vmatprep.subr.bf16.mxu1 %v13916_v32 }
0x14e7   :  { %11152 = vmatpush1.bf16.msra.mxu0 %v13917_v58  ;;  %11195 = vmatpush1.bf16.msra.mxu1 %v13918_v18 }
0x14e8   :  { %11153 = vmatprep.subr.bf16.mxu0 %v13919_v14  ;;  %11196 = vmatprep.subr.bf16.mxu1 %v13920_v36 }
0x14eb   :  { %11154 = vmatpush1.bf16.msra.mxu0 %v13921_v57  ;;  %11197 = vmatpush1.bf16.msra.mxu1 %v13922_v51 }
0x14ec   :  { %11155 = vmatprep.subr.bf16.mxu0 %v13923_v56  ;;  %11198 = vmatprep.subr.bf16.mxu1 %v13924_v35 }
0x14ef   :  { %11156 = vmatpush1.bf16.msra.mxu0 %v13925_v0  ;;  %11199 = vmatpush1.bf16.msra.mxu1 %v13926_v16 }
0x14f0   :  { %11157 = vmatprep.subr.bf16.mxu0 %v13927_v3  ;;  %11200 = vmatprep.subr.bf16.mxu1 %v13928_v8 }
0x14f3   :  { %11158 = vmatpush1.bf16.msra.mxu0 %v13929_v41  ;;  %11201 = vmatpush1.bf16.msra.mxu1 %v13930_v4 }
0x14f4   :  { %12516 = vmatprep.subr.bf16.mxu0 %v13980_v50  ;;  %12536 = vmatprep.subr.bf16.mxu1 %v13980_v50 }
0x1596   :  { %v11038_v63 = vpop.f32.mrf.mxu0  ;;  %v11081_v40 = vpop.f32.mrf.mxu1 }
0x1597   :  { %v11090_v59 = vadd.f32 %v11038_v63, %v9365_v49  ;;  %v11092_v26 = vadd.f32 %v11081_v40, %v9408_v19  ;;  %v17428_v19 = vld [vmem:[#allocation60_spill] sm:$0xff] }
0x1598   :  { %v11040_v34 = vpop.f32.mrf.mxu0  ;;  %v11083_v11 = vpop.f32.mrf.mxu1 }
0x1599   :  { %v11098_v45 = vmul.f32 0.5, %v11090_v59  ;;  %v11091_v22 = vadd.f32 %v11040_v34, %v9367_v43  ;;  %v11093_v28 = vadd.f32 %v11083_v11, %v9410_v17  ;;  %v11100_v58 = vmul.f32 0.5, %v11092_v26 }
0x159a   :  { %v11042_v44 = vpop.f32.mrf.mxu0  ;;  %v11085_v15 = vpop.f32.mrf.mxu1 }
0x159b   :  { %13825 = vtanh.f32 %v11098_v45  ;;  %v11099_v7 = vmul.f32 0.5, %v11091_v22  ;;  %v11094_v52 = vadd.f32 %v11042_v44, %v9369_v21  ;;  %v11096_v37 = vadd.f32 %v11085_v15, %v9412_v20  ;;  %v13374_v21 = vld [vmem:[%s17023_s5 + $0x30] sm:$0xff]   ;;  %v13375_v45 = vld [vmem:[%s17023_s5 + $0x28] sm:$0xff]   ;;  %v13376_v22 = vld [vmem:[%s17023_s5 + $0x20] sm:$0xff]  }
0x159c   :  { %v11044_v31 = vpop.f32.mrf.mxu0  ;;  %v11087_v6 = vpop.f32.mrf.mxu1  ;;  %v13378_v44 = vld [vmem:[%s17023_s5 + $0x10] sm:$0xff]   ;;  %v13379_v15 = vld [vmem:[%s17023_s5 + $0x8] sm:$0xff]  }
0x159d   :  { %13827 = vtanh.f32 %v11099_v7  ;;  %v11101_v23 = vmul.f32 0.5, %v11094_v52  ;;  %v11095_v39 = vadd.f32 %v11044_v31, %v9371_v2  ;;  %v11097_v60 = vadd.f32 %v11087_v6, %v9414_v30  ;;  %v13381_v2 = vld [vmem:[%s17025_s7 + $0x18] sm:$0xff]   ;;  %v13382_v7 = vld [vmem:[%s17025_s7 + $0x10] sm:$0xff]   ;;  %v12422_v52 = vld [vmem:[%s17022_s4 + $0x8] sm:$0xf] }
0x159e   :  { %13829 = vtanh.f32 %v11093_v28  ;;  %v11103_v57 = vmul.f32 0.5, %v11096_v37  ;;  %v13377_v28 = vld [vmem:[%s17023_s5 + $0x18] sm:$0xff]   ;;  %v9792_v31 = vrot.slane %v12422_v52, %v17314_v53  ;;  %v9796_v6 = vrot.slane %v12422_v52, %v17392_v55  ;;  %v17426_v30 = vld [vmem:[#allocation63_spill] sm:$0xff]  ;;  %v17429_v37 = vld [vmem:[#allocation64_spill] sm:$0xff] }
0x159f   :  { %13831 = vtanh.f32 %v11101_v23  ;;  %v11102_v48 = vmul.f32 0.5, %v11095_v39  ;;  %v9804_v10 = vrot.slane %v12422_v52, %v17393_v38 }
0x15a0   :  { %v10004_v23 = vadd.f32 %v17426_v30, %v9792_v31 }
0x15a1   :  { %13833 = vtanh.f32 %v11102_v48  ;;  %v10049_v62 = vadd.f32 %v17428_v19, %v9804_v10 }
0x15a2   :  { %13835 = vtanh.f32 %v11097_v60  ;;  %v17427_v60 = vld [vmem:[#allocation14_spill] sm:$0xff] }
0x15a3   :  { %13837 = vtanh.f32 %v11100_v58  ;;  %v10006_v13 = vadd.f32 %v17427_v60, %v9796_v6 }
0x15a4   :  { %13839 = vtanh.f32 %v11103_v57  ;;  %v9800_v57 = vrot.slane %v12422_v52, %v17225_v1 }
0x15a8   :  { %v13826_v12 = vpop.eup %13825 }
0x15a9   :  { %v11110_v47 = vmul.f32 0.5, %v13826_v12  ;;  %v10008_v12 = vadd.f32 %v17429_v37, %v9792_v31 }
0x15aa   :  { %v13828_v32 = vpop.eup %13827 }
0x15ab   :  { %v13830_v18 = vpop.eup %13829  ;;  %v11116_v14 = vadd.f32 0.5, %v11110_v47  ;;  %v11111_v36 = vmul.f32 0.5, %v13828_v32 }
0x15ac   :  { %v13832_v51 = vpop.eup %13831 }
0x15ad   :  { %v11117_v56 = vadd.f32 0.5, %v11111_v36  ;;  %v11126_v35 = vmul.f32 %v13830_v18, %v11116_v14  ;;  %v11113_v0 = vmul.f32 0.5, %v13832_v51  ;;  %v17430_v18 = vld [vmem:[#allocation68_spill] sm:$0xff] }
0x15ae   :  { %v13834_v16 = vpop.eup %13833  ;;  %v10010_v38 = vadd.f32 %v17430_v18, %v9796_v6 }
0x15af   :  { %v11124_v3 = vmul.f32 %v11117_v56, %v16893_v33  ;;  %v11119_v8 = vadd.f32 0.5, %v11113_v0  ;;  %v11114_v41 = vmul.f32 0.5, %v13834_v16  ;;  %v13836_v4 = vpop.eup %13835 }
0x15b0   :  { %v13838_v49 = vpop.eup %13837 }
0x15b1   :  { %v16932_v25 = vadd.f32 %v11126_v35, %v11124_v3  ;;  %v11120_v24 = vadd.f32 0.5, %v11114_v41  ;;  %v11127_v42 = vmul.f32 %v13836_v4, %v11119_v8  ;;  %v13840_v63 = vpop.eup %13839  ;;  %v11112_v40 = vmul.f32 0.5, %v13838_v49  ;;  %v17431_v35 = vld [vmem:[#allocation69_spill] sm:$0xff] }
0x15b2   :  { %v11115_v33 = vmul.f32 0.5, %v13840_v63  ;;  %v10053_v0 = vadd.f32 %v17431_v35, %v9804_v10  ;;  %v17432_v4 = vld [vmem:[#allocation13_spill] sm:$0xff] }
0x15b3   :  { %v11125_v5 = vmul.f32 %v11120_v24, %v16897_v61  ;;  %13841 = vtanh.f32 %v16932_v25  ;;  %v11118_v43 = vadd.f32 0.5, %v11112_v40  ;;  %v13373_v61 = vld [vmem:[%s17023_s5 + $0x38] sm:$0xff]   ;;  %v10047_v24 = vadd.f32 %v17432_v4, %v9800_v57 }
0x15b4   :  { %v11121_v59 = vadd.f32 0.5, %v11115_v33 }
0x15b5   :  { %v16936_v29 = vadd.f32 %v11127_v42, %v11125_v5  ;;  %v17433_v5 = vld [vmem:[#allocation66_spill] sm:$0xff] }
0x15b6   :  { %v10051_v49 = vadd.f32 %v17433_v5, %v9800_v57 }
0x15b7   :  { %13843 = vtanh.f32 %v16936_v29 }
0x15c0   :  { %v13842_v46 = vpop.eup %13841 }
0x15c1   :  { %v11132_v17 = vmul.f32 %v13842_v46, %v11118_v43 }
0x15c4   :  { %v13844_v9 = vpop.eup %13843 }
0x15c5   :  { %v11133_v34 = vmul.f32 %v13844_v9, %v11121_v59 }
0x15c7   :  { %v11142_v11 = vpack.c.bf16 %v11133_v34, %v11132_v17 }
0x15c9   :  { %11176 = vmatmul.mubr.bf16.vlgmr.msra.gmra.mxu0 %v11142_v11  ;;  %11219 = vmatmul.mubr.bf16.vlgmr.msra.gmra.mxu1 %v11142_v11 }
0x15ca   :  { %12517 = vmatpush3.bf16.msra.mxu0 %v13373_v61  ;;  %12532 = vmatprep.mubr.msk.bf16.mxu0 %vm13981_vm0, %v13980_v50 }
0x15cb   :  { %12518 = vmatprep.subr.bf16.mxu0 %v13980_v50  ;;  %12544 = vmatprep.mubr.msk.bf16.mxu1 %vm13981_vm0, %v13980_v50 }
0x15cc   :  { %12537 = vmatpush3.bf16.msra.mxu1 %v13381_v2 }
0x15cd   :  { %12538 = vmatprep.subr.bf16.mxu1 %v13980_v50 }
0x15ce   :  { %12519 = vmatpush3.bf16.msra.mxu0 %v13374_v21 }
0x15cf   :  { %12520 = vmatprep.subr.bf16.mxu0 %v13980_v50 }
0x15d0   :  { %12539 = vmatpush3.bf16.msra.mxu1 %v13382_v7 }
0x15d1   :  { %12540 = vmatprep.subr.bf16.mxu1 %v13980_v50 }
0x15d2   :  { %12521 = vmatpush3.bf16.msra.mxu0 %v13375_v45 }
0x15d3   :  { %12522 = vmatprep.subr.bf16.mxu0 %v13980_v50 }
0x15d6   :  { %12523 = vmatpush3.bf16.msra.mxu0 %v13376_v22 }
0x15d7   :  { %12524 = vmatprep.subr.bf16.mxu0 %v13980_v50 }
0x15da   :  { %12525 = vmatpush3.bf16.msra.mxu0 %v13377_v28 }
0x15db   :  { %12526 = vmatprep.subr.bf16.mxu0 %v13980_v50 }
0x15de   :  { %12527 = vmatpush3.bf16.msra.mxu0 %v13378_v44 }
0x15df   :  { %12528 = vmatprep.subr.bf16.mxu0 %v13980_v50 }
0x15e2   :  { %12529 = vmatpush3.bf16.msra.mxu0 %v13379_v15 }
0x15e3   :  { %12530 = vmatprep.subr.bf16.mxu0 %v13980_v50 }
0x15e6   :  { %12531 = vmatpush3.bf16.msra.mxu0 %v13380_v27 }
0x1689   :  { %v11177_v39 = vpop.f32.mrf.mxu0  ;;  %v11220_v48 = vpop.f32.mrf.mxu1 }
0x168a   :  { %v11229_v54 = vadd.f32 %v11177_v39, %v10004_v23  ;;  %v11231_v42 = vadd.f32 %v11220_v48, %v10047_v24 }
0x168b   :  { %v11179_v20 = vpop.f32.mrf.mxu0  ;;  %v11222_v26 = vpop.f32.mrf.mxu1 }
0x168c   :  { %v11237_v47 = vmul.f32 0.5, %v11229_v54  ;;  %v11230_v32 = vadd.f32 %v11179_v20, %v10006_v13  ;;  %v11232_v53 = vadd.f32 %v11222_v26, %v10049_v62  ;;  %v11239_v63 = vmul.f32 0.5, %v11231_v42  ;;  %v13383_v62 = vld [vmem:[%s17025_s7 + $0x8] sm:$0xff]   ;;  %v12487_v26 = vld [vmem:[%s17024_s6] ss:$0 sm:$0xff] }
0x168d   :  { %v11181_v58 = vpop.f32.mrf.mxu0  ;;  %v11224_v55 = vpop.f32.mrf.mxu1  ;;  %12541 = vmatpush3.bf16.msra.mxu1 %v13383_v62 }
0x168e   :  { %13845 = vtanh.f32 %v11237_v47  ;;  %v11238_v14 = vmul.f32 0.5, %v11230_v32  ;;  %v11233_v36 = vadd.f32 %v11181_v58, %v10008_v12  ;;  %v11235_v1 = vadd.f32 %v11224_v55, %v10051_v49  ;;  %12542 = vmatprep.subr.bf16.mxu1 %v13980_v50  ;;  %v12496_v50 = vld [vmem:[%s17026_s8] ss:$0 sm:$0xff] }
0x168f   :  { %v11183_v51 = vpop.f32.mrf.mxu0  ;;  %v11226_v56 = vpop.f32.mrf.mxu1 }
0x1690   :  { %13847 = vtanh.f32 %v11238_v14  ;;  %v11240_v16 = vmul.f32 0.5, %v11233_v36  ;;  %v11234_v3 = vadd.f32 %v11183_v51, %v10010_v38  ;;  %v11236_v41 = vadd.f32 %v11226_v56, %v10053_v0 }
0x1691   :  { %13849 = vtanh.f32 %v11232_v53  ;;  %v11242_v17 = vmul.f32 0.5, %v11235_v1 }
0x1692   :  { %13851 = vtanh.f32 %v11240_v16  ;;  %v11241_v8 = vmul.f32 0.5, %v11234_v3 }
0x1694   :  { %13853 = vtanh.f32 %v11241_v8 }
0x1695   :  { %13855 = vtanh.f32 %v11236_v41 }
0x1696   :  { %13857 = vtanh.f32 %v11239_v63 }
0x1697   :  { %13859 = vtanh.f32 %v11242_v17 }
0x169b   :  { %v13846_v40 = vpop.eup %13845 }
0x169c   :  { %v11249_v33 = vmul.f32 0.5, %v13846_v40 }
0x169d   :  { %v13848_v46 = vpop.eup %13847 }
0x169e   :  { %v13850_v43 = vpop.eup %13849  ;;  %v11255_v59 = vadd.f32 0.5, %v11249_v33  ;;  %v11250_v9 = vmul.f32 0.5, %v13848_v46 }
0x169f   :  { %v13852_v34 = vpop.eup %13851 }
0x16a0   :  { %v11256_v11 = vadd.f32 0.5, %v11250_v9  ;;  %v11265_v61 = vmul.f32 %v13850_v43, %v11255_v59  ;;  %v11252_v21 = vmul.f32 0.5, %v13852_v34 }
0x16a1   :  { %v13854_v45 = vpop.eup %13853 }
0x16a2   :  { %v11263_v22 = vmul.f32 %v11256_v11, %v16932_v25  ;;  %v11258_v28 = vadd.f32 0.5, %v11252_v21  ;;  %v11253_v44 = vmul.f32 0.5, %v13854_v45  ;;  %v13856_v15 = vpop.eup %13855 }
0x16a3   :  { %v13858_v6 = vpop.eup %13857 }
0x16a4   :  { %v11267_v27 = vadd.f32 %v11265_v61, %v11263_v22  ;;  %v11259_v2 = vadd.f32 0.5, %v11253_v44  ;;  %v11266_v7 = vmul.f32 %v13856_v15, %v11258_v28  ;;  %v11251_v10 = vmul.f32 0.5, %v13858_v6  ;;  %v13860_v30 = vpop.eup %13859 }
0x16a5   :  { %v11254_v39 = vmul.f32 0.5, %v13860_v30 }
0x16a6   :  { %13861 = vtanh.f32 %v11267_v27  ;;  %v11264_v52 = vmul.f32 %v11259_v2, %v16936_v29  ;;  %v11257_v23 = vadd.f32 0.5, %v11251_v10  ;;  %v13384_v29 = vld [vmem:[%s17025_s7] sm:$0xff]  }
0x16a7   :  { %v11260_v25 = vadd.f32 0.5, %v11254_v39  ;;  %12543 = vmatpush3.bf16.msra.mxu1 %v13384_v29 }
0x16a8   :  { %v11268_v31 = vadd.f32 %v11266_v7, %v11264_v52 }
0x16aa   :  { %13863 = vtanh.f32 %v11268_v31 }
0x16b3   :  { %v13862_v48 = vpop.eup %13861 }
0x16b4   :  { %v11271_v60 = vmul.f32 %v13862_v48, %v11257_v23 }
0x16b7   :  { %v13864_v13 = vpop.eup %13863 }
0x16b8   :  { %v11272_v54 = vmul.f32 %v13864_v13, %v11260_v25 }
0x16ba   :  { %v11273_v19 = vpack.c.bf16 %v11272_v54, %v11271_v60 }
0x16bc   :  { %12533 = vmatmul.mubr.bf16.vlgmr.msra.gmra.mxu0 %v11273_v19 }
0x177c   :  { %v11379_v20 = vpop.f32.mrf.mxu0 }
0x177d   :  { %v11380_v47 = vadd.f32 %v12487_v26, %v11379_v20 }
0x177e   :  { %v12534_v37 = vpop.f32.mrf.mxu0 }
0x1780   :  { %v11382_v12 = vpop.f32.mrf.mxu0 }
0x1781   :  { %v11383_v32 = vadd.f32 %v12487_v26, %v11382_v12 }
0x1782   :  { %v12535_v53 = vpop.f32.mrf.mxu0 }
0x1783   :  { %v11386_v58 = vpack.c.bf16 %v11383_v32, %v11380_v47 }
0x1785   :  { %12545 = vmatmul.mubr.msk.bf16.vlgmr.msra.gmra.mxu1 %vm11426_vm1, %v11386_v58 }
0x1845   :  { %v11464_v55 = vpop.f32.mrf.mxu1 }
0x1846   :  { %v11465_v18 = vadd.f32 %v12496_v50, %v11464_v55 }
0x1847   :  { %v12546_v38 = vpop.f32.mrf.mxu1 }
0x1848   :  { %11471 = vst [vmem:[%s17027_s9] sm:$0xff] %v11465_v18 }
0x1849   :  { %v11467_v14 = vpop.f32.mrf.mxu1 }
0x184a   :  { %v11468_v36 = vadd.f32 %v12496_v50, %v11467_v14 }
0x184b   :  { %v12547_v57 = vpop.f32.mrf.mxu1 }
0x184c   :  { %11472 = vst [vmem:[%s17027_s9 + $0x8] sm:$0xff] %v11468_v36 }
0x184d   :  { %11477 = vsyncpa [#allocation5], 1 }
0x184e   :  { %11478 = vsyncpa [#allocation7], 1 }

</bundles_post_ra>
